<compile_context>
chip_gen: v5e
topology: v5e:2x2
jax: 0.10.0
libtpu: 0.0.40
codegen_flags: <defaults>
</compile_context>

<pallas_src>
import jax
import jax.numpy as jnp
from jax.experimental import pallas as pl
from jax.experimental.pallas import tpu as pltpu

D = 128      # lanes (TPU fast axis)
BR = 2048    # rows (sublanes) per grid step: (2048, 128) f32 block = 1 MiB
NC = 2       # leading "parallel" grid axis -> maps to the 2 TensorCores on v7x


def _build_stats_call(rows, n):
    """Build a pallas_call computing per-core partial [sum, sumsq, min, max]
    over an (rows, 128) row-major view holding `n` valid elements.

    `rows` and `n` are static Python ints (one compile per parameter shape,
    cached by jax.jit in the wrapper).  Assumes n < 2**31 (int32 index math).
    """
    br = BR if rows >= BR else rows   # block rows: multiple of 8, or full dim
    chunk = br * D                    # elements per grid step
    nb = pl.cdiv(rows, br)            # total row blocks
    nbc = pl.cdiv(nb, NC)             # row blocks per core split

    def kernel(x_ref, out_ref, sum_s, sq_s, min_s, max_s):
        c = pl.program_id(0)          # core split (parallel axis)
        j = pl.program_id(1)          # row-block index within the split

        @pl.when(j == 0)
        def _init():
            sum_s[...] = jnp.zeros_like(sum_s)
            sq_s[...] = jnp.zeros_like(sq_s)
            min_s[...] = jnp.full_like(min_s, jnp.inf)
            max_s[...] = jnp.full_like(max_s, -jnp.inf)

        blk = c * nbc + j             # global row-block index (unclamped)
        rem = n - blk * chunk         # valid elements remaining at this block

        x = x_ref[...].astype(jnp.float32)          # (br, D), cast in-kernel

        @pl.when(rem >= chunk)        # hot path: fully valid block, no masks
        def _full():
            sum_s[...] += jnp.sum(x, axis=0, keepdims=True)
            sq_s[...] += jnp.sum(x * x, axis=0, keepdims=True)
            min_s[...] = jnp.minimum(min_s[...],
                                     jnp.min(x, axis=0, keepdims=True))
            max_s[...] = jnp.maximum(max_s[...],
                                     jnp.max(x, axis=0, keepdims=True))

        @pl.when(jnp.logical_and(rem > 0, rem < chunk))   # ragged tail only
        def _tail():
            row = jax.lax.broadcasted_iota(jnp.int32, (br, D), 0)
            lane = jax.lax.broadcasted_iota(jnp.int32, (br, D), 1)
            valid = (row * D + lane) < rem
            xz = jnp.where(valid, x, 0.0)
            sum_s[...] += jnp.sum(xz, axis=0, keepdims=True)
            sq_s[...] += jnp.sum(xz * xz, axis=0, keepdims=True)
            min_s[...] = jnp.minimum(
                min_s[...],
                jnp.min(jnp.where(valid, x, jnp.inf), axis=0, keepdims=True))
            max_s[...] = jnp.maximum(
                max_s[...],
                jnp.max(jnp.where(valid, x, -jnp.inf), axis=0, keepdims=True))

        @pl.when(j == nbc - 1)
        def _finalize():
            lane3 = jax.lax.broadcasted_iota(jnp.int32, (1, 8, D), 2)
            stats = jnp.where(lane3 == 0, jnp.sum(sum_s[...]),
                    jnp.where(lane3 == 1, jnp.sum(sq_s[...]),
                    jnp.where(lane3 == 2, jnp.min(min_s[...]),
                    jnp.where(lane3 == 3, jnp.max(max_s[...]), 0.0))))
            out_ref[...] = stats

    def x_map(c, j):
        blk = c * nbc + j
        # Clamp the overshoot block of a ragged 2-way split; the kernel skips
        # it anyway via the remaining-count check (rem <= 0).
        return (jnp.minimum(blk, nb - 1), 0)

    return pl.pallas_call(
        kernel,
        out_shape=jax.ShapeDtypeStruct((NC, 8, D), jnp.float32),
        grid=(NC, nbc),
        in_specs=[pl.BlockSpec((br, D), x_map)],
        out_specs=pl.BlockSpec((1, 8, D), lambda c, j: (c, 0, 0)),
        scratch_shapes=[pltpu.VMEM((1, D), jnp.float32)] * 4,
        compiler_params=pltpu.CompilerParams(
            dimension_semantics=("parallel", "arbitrary"),
            vmem_limit_bytes=32 * 1024 * 1024,
        ),
    )


@jax.jit
def pallas_param_stats(param):
    """[mean, std, min, max] (f32 vector, shape (4,)) of an arbitrary-shaped
    parameter, computed by the Pallas reduction kernel (population std,
    matching np.std used by BaseModel.record_parameters)."""
    flat = jnp.reshape(param, (-1,))
    n = flat.size                        # static under jit
    if n == 0:
        return jnp.zeros((4,), jnp.float32)
    pad = (-n) % D                       # only the <128-element remainder
    if pad:
        flat = jnp.concatenate([flat, jnp.zeros((pad,), flat.dtype)])
    xp = jnp.reshape(flat, (-1, D))      # (rows, 128) view, native dtype

    out = _build_stats_call(xp.shape[0], n)(xp)     # (NC, 8, 128) partials

    total = jnp.sum(out[:, 0, 0])
    totsq = jnp.sum(out[:, 0, 1])
    mn = jnp.min(out[:, 0, 2])
    mx = jnp.max(out[:, 0, 3])
    mean = total / n
    # NOTE: E[x^2] - mean^2 in f32 can lose precision when |mean| >> spread;
    # fine for typical parameter distributions.
    var = jnp.maximum(totsq / n - mean * mean, 0.0)
    return jnp.stack([mean, jnp.sqrt(var), mn, mx])


class BaseModel:
    """JAX/Pallas port of the PyTorch BaseModel with parameter tracking."""

    def __init__(self):
        self.is_fitted = False
        self._parameters = {}
        self.param_history = []
        self.batch_losses = []

    def register_parameter(self, name, param):
        if param is not None:
            self._parameters[name] = param

    def named_parameters(self):
        return self._parameters.items()

    def forward(self, x, features=None):
        # TODO(synk): base-class forward is NotImplementedError in the
        # reference; there is no compute to translate.
        raise NotImplementedError("Forward method not implemented.")

    def fit(self, data, labels):
        raise NotImplementedError("Fit method not implemented.")

    def predict(self, data):
        raise NotImplementedError("Predict method not implemented.")

    # TODO(synk): save/load use torch state-dict serialization; no Pallas
    # equivalent (pure host-side I/O), intentionally omitted.

    def record_parameters(self, epoch: int):
        """Record model parameter statistics (Pallas reduction kernel).

        All device->host traffic for a snapshot happens in ONE device_get."""
        device_snapshot = {}
        for name, param in self.named_parameters():
            stats_vec = pallas_param_stats(param)          # (4,) device array
            values = jnp.reshape(param, (-1,))[:100]
            device_snapshot[name] = (stats_vec, values)
        host_snapshot = jax.device_get(device_snapshot)    # single sync

        snapshot = {}
        for name, (stats_vec, values) in host_snapshot.items():
            snapshot[name] = {
                "mean": float(stats_vec[0]),
                "std": float(stats_vec[1]),
                "min": float(stats_vec[2]),
                "max": float(stats_vec[3]),
                "values": values,
            }
        self.param_history.append(snapshot)

    def record_batch_loss(self, loss: float):
        self.batch_losses.append(float(loss))


if __name__ == "__main__":
    key = jax.random.PRNGKey(0)
    k_w, k_b, k_g, k_h = jax.random.split(key, 4)

    # Deterministic synthetic parameters exercising every kernel path:
    #   weight : 128 elems  (single full row, exact tile)
    #   bias   : 32 elems   (ragged lanes -> masked tail)
    #   gamma  : bf16 input (native-dtype cast inside the kernel)
    #   hidden : >1 row-block -> multi-block grid, 2-way core split, ragged tail
    weight = jax.random.normal(k_w, (4, 32), dtype=jnp.float32)
    bias = jax.random.normal(k_b, (32,), dtype=jnp.float32)
    gamma = jax.random.normal(k_g, (2, 128), dtype=jnp.bfloat16)
    hidden = jax.random.normal(k_h, (520, 520), dtype=jnp.float32)

    model = BaseModel()
    model.register_parameter("weight", weight)
    model.register_parameter("bias", bias)
    model.register_parameter("gamma", gamma)
    model.register_parameter("hidden_weight", hidden)

    # Run the kernel once and block on the result.
    warm = pallas_param_stats(hidden)
    jax.block_until_ready(warm)

    # Pallas-backed snapshot (single host sync inside).
    model.record_parameters(epoch=0)
    model.record_batch_loss(0.123)

    ok = True
    for name, param in model.named_parameters():
        got = model.param_history[0][name]
        flat = jnp.reshape(param, (-1,)).astype(jnp.float32)
        ref = {
            "mean": float(jnp.mean(flat)),
            "std": float(jnp.std(flat)),
            "min": float(jnp.min(flat)),
            "max": float(jnp.max(flat)),
        }
        for k in ("mean", "std", "min", "max"):
            if abs(got[k] - ref[k]) > 1e-4 * max(1.0, abs(ref[k])):
                ok = False

    if ok:
        print("KERNEL_OK")
    else:
        print("KERNEL_MISMATCH")
</pallas_src>

<mosaic_0001>
module attributes {stable_mosaic.version = 11 : i64} {
  func.func @kernel(%arg0: i32, %arg1: i32, %arg2: memref<2048x128xf32, #tpu.memory_space<vmem>>, %arg3: memref<1x8x128xf32, #tpu.memory_space<vmem>>, %arg4: memref<1x128xf32, #tpu.memory_space<vmem>>, %arg5: memref<1x128xf32, #tpu.memory_space<vmem>>, %arg6: memref<1x128xf32, #tpu.memory_space<vmem>>, %arg7: memref<1x128xf32, #tpu.memory_space<vmem>>) attributes {dimension_semantics = [#tpu.dimension_semantics<parallel>, #tpu.dimension_semantics<arbitrary>], iteration_bounds = array<i64: 2, 1>, scalar_prefetch = 0 : i64, scratch_operands = 4 : i64, tpu.core_type = #tpu.core_type<tc>, window_params = [{transform_indices = @transform_0, window_bounds = array<i64: 2048, 128>}, {transform_indices = @transform_1, window_bounds = array<i64: 1, 8, 128>}]} {
    %c0_i32 = arith.constant 0 : i32
    %0 = arith.cmpi eq, %arg1, %c0_i32 : i32
    %1 = arith.extui %0 : i1 to i32
    %c0_i32_0 = arith.constant 0 : i32
    %2 = arith.cmpi ne, %1, %c0_i32_0 : i32
    scf.if %2 {
      %cst = arith.constant 0.000000e+00 : f32
      %19 = vector.broadcast %cst : f32 to vector<1x128xf32>
      %c0_9 = arith.constant 0 : index
      %c0_10 = arith.constant 0 : index
      %20 = vector.load %arg4[%c0_9, %c0_10] : memref<1x128xf32, #tpu.memory_space<vmem>>, vector<1x128xf32>
      tpu.vector_store %arg4[%c0_9, %c0_10], %19 {strides = array<i32>} : memref<1x128xf32, #tpu.memory_space<vmem>>, vector<1x128xf32>,
      %cst_11 = arith.constant 0.000000e+00 : f32
      %21 = vector.broadcast %cst_11 : f32 to vector<1x128xf32>
      %c0_12 = arith.constant 0 : index
      %c0_13 = arith.constant 0 : index
      %22 = vector.load %arg5[%c0_12, %c0_13] : memref<1x128xf32, #tpu.memory_space<vmem>>, vector<1x128xf32>
      tpu.vector_store %arg5[%c0_12, %c0_13], %21 {strides = array<i32>} : memref<1x128xf32, #tpu.memory_space<vmem>>, vector<1x128xf32>,
      %cst_14 = arith.constant 0x7F800000 : f32
      %23 = vector.broadcast %cst_14 : f32 to vector<1x128xf32>
      %c0_15 = arith.constant 0 : index
      %c0_16 = arith.constant 0 : index
      %24 = vector.load %arg6[%c0_15, %c0_16] : memref<1x128xf32, #tpu.memory_space<vmem>>, vector<1x128xf32>
      tpu.vector_store %arg6[%c0_15, %c0_16], %23 {strides = array<i32>} : memref<1x128xf32, #tpu.memory_space<vmem>>, vector<1x128xf32>,
      %cst_17 = arith.constant 0xFF800000 : f32
      %25 = vector.broadcast %cst_17 : f32 to vector<1x128xf32>
      %c0_18 = arith.constant 0 : index
      %c0_19 = arith.constant 0 : index
      %26 = vector.load %arg7[%c0_18, %c0_19] : memref<1x128xf32, #tpu.memory_space<vmem>>, vector<1x128xf32>
      tpu.vector_store %arg7[%c0_18, %c0_19], %25 {strides = array<i32>} : memref<1x128xf32, #tpu.memory_space<vmem>>, vector<1x128xf32>,
    } else {
    }
    %c1_i32 = arith.constant 1 : i32
    %3 = arith.muli %arg0, %c1_i32 : i32
    %4 = arith.addi %3, %arg1 : i32
    %c262144_i32 = arith.constant 262144 : i32
    %5 = arith.muli %4, %c262144_i32 : i32
    %c270400_i32 = arith.constant 270400 : i32
    %6 = arith.subi %c270400_i32, %5 : i32
    %c0 = arith.constant 0 : index
    %c0_1 = arith.constant 0 : index
    %7 = vector.load %arg2[%c0, %c0_1] : memref<2048x128xf32, #tpu.memory_space<vmem>>, vector<2048x128xf32>
    %c262144_i32_2 = arith.constant 262144 : i32
    %8 = arith.cmpi sge, %6, %c262144_i32_2 : i32
    %9 = arith.extui %8 : i1 to i32
    %c0_i32_3 = arith.constant 0 : i32
    %10 = arith.cmpi ne, %9, %c0_i32_3 : i32
    scf.if %10 {
      %c0_9 = arith.constant 0 : index
      %c0_10 = arith.constant 0 : index
      %19 = vector.load %arg4[%c0_9, %c0_10] : memref<1x128xf32, #tpu.memory_space<vmem>>, vector<1x128xf32>
      %cst = arith.constant dense<0.000000e+00> : vector<128xf32>
      %20 = vector.multi_reduction <add>, %7, %cst [0] : vector<2048x128xf32> to vector<128xf32>
      %21 = vector.shape_cast %20 : vector<128xf32> to vector<1x128xf32>
      %22 = arith.addf %19, %21 : vector<1x128xf32>
      %c0_11 = arith.constant 0 : index
      %c0_12 = arith.constant 0 : index
      %23 = vector.load %arg4[%c0_11, %c0_12] : memref<1x128xf32, #tpu.memory_space<vmem>>, vector<1x128xf32>
      tpu.vector_store %arg4[%c0_11, %c0_12], %22 {strides = array<i32>} : memref<1x128xf32, #tpu.memory_space<vmem>>, vector<1x128xf32>,
      %c0_13 = arith.constant 0 : index
      %c0_14 = arith.constant 0 : index
      %24 = vector.load %arg5[%c0_13, %c0_14] : memref<1x128xf32, #tpu.memory_space<vmem>>, vector<1x128xf32>
      %25 = arith.mulf %7, %7 : vector<2048x128xf32>
      %cst_15 = arith.constant dense<0.000000e+00> : vector<128xf32>
      %26 = vector.multi_reduction <add>, %25, %cst_15 [0] : vector<2048x128xf32> to vector<128xf32>
      %27 = vector.shape_cast %26 : vector<128xf32> to vector<1x128xf32>
      %28 = arith.addf %24, %27 : vector<1x128xf32>
      %c0_16 = arith.constant 0 : index
      %c0_17 = arith.constant 0 : index
      %29 = vector.load %arg5[%c0_16, %c0_17] : memref<1x128xf32, #tpu.memory_space<vmem>>, vector<1x128xf32>
      tpu.vector_store %arg5[%c0_16, %c0_17], %28 {strides = array<i32>} : memref<1x128xf32, #tpu.memory_space<vmem>>, vector<1x128xf32>,
      %c0_18 = arith.constant 0 : index
      %c0_19 = arith.constant 0 : index
      %30 = vector.load %arg6[%c0_18, %c0_19] : memref<1x128xf32, #tpu.memory_space<vmem>>, vector<1x128xf32>
      %cst_20 = arith.constant dense<0x7F800000> : vector<128xf32>
      %31 = vector.multi_reduction <minimumf>, %7, %cst_20 [0] : vector<2048x128xf32> to vector<128xf32>
      %32 = vector.shape_cast %31 : vector<128xf32> to vector<1x128xf32>
      %33 = arith.minimumf %30, %32 : vector<1x128xf32>
      %c0_21 = arith.constant 0 : index
      %c0_22 = arith.constant 0 : index
      %34 = vector.load %arg6[%c0_21, %c0_22] : memref<1x128xf32, #tpu.memory_space<vmem>>, vector<1x128xf32>
      tpu.vector_store %arg6[%c0_21, %c0_22], %33 {strides = array<i32>} : memref<1x128xf32, #tpu.memory_space<vmem>>, vector<1x128xf32>,
      %c0_23 = arith.constant 0 : index
      %c0_24 = arith.constant 0 : index
      %35 = vector.load %arg7[%c0_23, %c0_24] : memref<1x128xf32, #tpu.memory_space<vmem>>, vector<1x128xf32>
      %cst_25 = arith.constant dense<0xFF800000> : vector<128xf32>
      %36 = vector.multi_reduction <maximumf>, %7, %cst_25 [0] : vector<2048x128xf32> to vector<128xf32>
      %37 = vector.shape_cast %36 : vector<128xf32> to vector<1x128xf32>
      %38 = arith.maximumf %35, %37 : vector<1x128xf32>
      %c0_26 = arith.constant 0 : index
      %c0_27 = arith.constant 0 : index
      %39 = vector.load %arg7[%c0_26, %c0_27] : memref<1x128xf32, #tpu.memory_space<vmem>>, vector<1x128xf32>
      tpu.vector_store %arg7[%c0_26, %c0_27], %38 {strides = array<i32>} : memref<1x128xf32, #tpu.memory_space<vmem>>, vector<1x128xf32>,
    } else {
    }
    %c0_i32_4 = arith.constant 0 : i32
    %11 = arith.cmpi sgt, %6, %c0_i32_4 : i32
    %c262144_i32_5 = arith.constant 262144 : i32
    %12 = arith.cmpi slt, %6, %c262144_i32_5 : i32
    %13 = arith.andi %11, %12 : i1
    %14 = arith.extui %13 : i1 to i32
    %c0_i32_6 = arith.constant 0 : i32
    %15 = arith.cmpi ne, %14, %c0_i32_6 : i32
    scf.if %15 {
      %19 = tpu.iota {dimensions = array<i32: 0>} : vector<2048x128xi32>
      %20 = tpu.iota {dimensions = array<i32: 1>} : vector<2048x128xi32>
      %c128_i32 = arith.constant 128 : i32
      %21 = vector.broadcast %c128_i32 : i32 to vector<2048x128xi32>
      %22 = arith.muli %19, %21 : vector<2048x128xi32>
      %23 = arith.addi %22, %20 : vector<2048x128xi32>
      %24 = vector.broadcast %6 : i32 to vector<2048x128xi32>
      %25 = arith.cmpi slt, %23, %24 : vector<2048x128xi32>
      %cst = arith.constant 0.000000e+00 : f32
      %26 = vector.broadcast %cst : f32 to vector<2048x128xf32>
      %27 = arith.select %25, %7, %26 : vector<2048x128xi1>, vector<2048x128xf32>
      %c0_9 = arith.constant 0 : index
      %c0_10 = arith.constant 0 : index
      %28 = vector.load %arg4[%c0_9, %c0_10] : memref<1x128xf32, #tpu.memory_space<vmem>>, vector<1x128xf32>
      %cst_11 = arith.constant dense<0.000000e+00> : vector<128xf32>
      %29 = vector.multi_reduction <add>, %27, %cst_11 [0] : vector<2048x128xf32> to vector<128xf32>
      %30 = vector.shape_cast %29 : vector<128xf32> to vector<1x128xf32>
      %31 = arith.addf %28, %30 : vector<1x128xf32>
      %c0_12 = arith.constant 0 : index
      %c0_13 = arith.constant 0 : index
      %32 = vector.load %arg4[%c0_12, %c0_13] : memref<1x128xf32, #tpu.memory_space<vmem>>, vector<1x128xf32>
      tpu.vector_store %arg4[%c0_12, %c0_13], %31 {strides = array<i32>} : memref<1x128xf32, #tpu.memory_space<vmem>>, vector<1x128xf32>,
      %c0_14 = arith.constant 0 : index
      %c0_15 = arith.constant 0 : index
      %33 = vector.load %arg5[%c0_14, %c0_15] : memref<1x128xf32, #tpu.memory_space<vmem>>, vector<1x128xf32>
      %34 = arith.mulf %27, %27 : vector<2048x128xf32>
      %cst_16 = arith.constant dense<0.000000e+00> : vector<128xf32>
      %35 = vector.multi_reduction <add>, %34, %cst_16 [0] : vector<2048x128xf32> to vector<128xf32>
      %36 = vector.shape_cast %35 : vector<128xf32> to vector<1x128xf32>
      %37 = arith.addf %33, %36 : vector<1x128xf32>
      %c0_17 = arith.constant 0 : index
      %c0_18 = arith.constant 0 : index
      %38 = vector.load %arg5[%c0_17, %c0_18] : memref<1x128xf32, #tpu.memory_space<vmem>>, vector<1x128xf32>
      tpu.vector_store %arg5[%c0_17, %c0_18], %37 {strides = array<i32>} : memref<1x128xf32, #tpu.memory_space<vmem>>, vector<1x128xf32>,
      %c0_19 = arith.constant 0 : index
      %c0_20 = arith.constant 0 : index
      %39 = vector.load %arg6[%c0_19, %c0_20] : memref<1x128xf32, #tpu.memory_space<vmem>>, vector<1x128xf32>
      %cst_21 = arith.constant 0x7F800000 : f32
      %40 = vector.broadcast %cst_21 : f32 to vector<2048x128xf32>
      %41 = arith.select %25, %7, %40 : vector<2048x128xi1>, vector<2048x128xf32>
      %cst_22 = arith.constant dense<0x7F800000> : vector<128xf32>
      %42 = vector.multi_reduction <minimumf>, %41, %cst_22 [0] : vector<2048x128xf32> to vector<128xf32>
      %43 = vector.shape_cast %42 : vector<128xf32> to vector<1x128xf32>
      %44 = arith.minimumf %39, %43 : vector<1x128xf32>
      %c0_23 = arith.constant 0 : index
      %c0_24 = arith.constant 0 : index
      %45 = vector.load %arg6[%c0_23, %c0_24] : memref<1x128xf32, #tpu.memory_space<vmem>>, vector<1x128xf32>
      tpu.vector_store %arg6[%c0_23, %c0_24], %44 {strides = array<i32>} : memref<1x128xf32, #tpu.memory_space<vmem>>, vector<1x128xf32>,
      %c0_25 = arith.constant 0 : index
      %c0_26 = arith.constant 0 : index
      %46 = vector.load %arg7[%c0_25, %c0_26] : memref<1x128xf32, #tpu.memory_space<vmem>>, vector<1x128xf32>
      %cst_27 = arith.constant 0xFF800000 : f32
      %47 = vector.broadcast %cst_27 : f32 to vector<2048x128xf32>
      %48 = arith.select %25, %7, %47 : vector<2048x128xi1>, vector<2048x128xf32>
      %cst_28 = arith.constant dense<0xFF800000> : vector<128xf32>
      %49 = vector.multi_reduction <maximumf>, %48, %cst_28 [0] : vector<2048x128xf32> to vector<128xf32>
      %50 = vector.shape_cast %49 : vector<128xf32> to vector<1x128xf32>
      %51 = arith.maximumf %46, %50 : vector<1x128xf32>
      %c0_29 = arith.constant 0 : index
      %c0_30 = arith.constant 0 : index
      %52 = vector.load %arg7[%c0_29, %c0_30] : memref<1x128xf32, #tpu.memory_space<vmem>>, vector<1x128xf32>
      tpu.vector_store %arg7[%c0_29, %c0_30], %51 {strides = array<i32>} : memref<1x128xf32, #tpu.memory_space<vmem>>, vector<1x128xf32>,
    } else {
    }
    %c0_i32_7 = arith.constant 0 : i32
    %16 = arith.cmpi eq, %arg1, %c0_i32_7 : i32
    %17 = arith.extui %16 : i1 to i32
    %c0_i32_8 = arith.constant 0 : i32
    %18 = arith.cmpi ne, %17, %c0_i32_8 : i32
    scf.if %18 {
      %19 = tpu.iota {dimensions = array<i32: 2>} : vector<1x8x128xi32>
      %c0_i32_9 = arith.constant 0 : i32
      %20 = vector.broadcast %c0_i32_9 : i32 to vector<1x8x128xi32>
      %21 = arith.cmpi eq, %19, %20 : vector<1x8x128xi32>
      %c0_10 = arith.constant 0 : index
      %c0_11 = arith.constant 0 : index
      %22 = vector.load %arg4[%c0_10, %c0_11] : memref<1x128xf32, #tpu.memory_space<vmem>>, vector<1x128xf32>
      %23 = vector.shape_cast %22 : vector<1x128xf32> to vector<1x1x128xf32>
      %cst = arith.constant dense<0.000000e+00> : vector<1xf32>
      %24 = vector.multi_reduction <add>, %23, %cst [1, 2] : vector<1x1x128xf32> to vector<1xf32>
      %25 = vector.shape_cast %24 : vector<1xf32> to vector<1x1x1xf32>
      %26 = vector.extract %25[0, 0, 0] : f32 from vector<1x1x1xf32>
      %c1_i32_12 = arith.constant 1 : i32
      %27 = vector.broadcast %c1_i32_12 : i32 to vector<1x8x128xi32>
      %28 = arith.cmpi eq, %19, %27 : vector<1x8x128xi32>
      %c0_13 = arith.constant 0 : index
      %c0_14 = arith.constant 0 : index
      %29 = vector.load %arg5[%c0_13, %c0_14] : memref<1x128xf32, #tpu.memory_space<vmem>>, vector<1x128xf32>
      %30 = vector.shape_cast %29 : vector<1x128xf32> to vector<1x1x128xf32>
      %cst_15 = arith.constant dense<0.000000e+00> : vector<1xf32>
      %31 = vector.multi_reduction <add>, %30, %cst_15 [1, 2] : vector<1x1x128xf32> to vector<1xf32>
      %32 = vector.shape_cast %31 : vector<1xf32> to vector<1x1x1xf32>
      %33 = vector.extract %32[0, 0, 0] : f32 from vector<1x1x1xf32>
      %c2_i32 = arith.constant 2 : i32
      %34 = vector.broadcast %c2_i32 : i32 to vector<1x8x128xi32>
      %35 = arith.cmpi eq, %19, %34 : vector<1x8x128xi32>
      %c0_16 = arith.constant 0 : index
      %c0_17 = arith.constant 0 : index
      %36 = vector.load %arg6[%c0_16, %c0_17] : memref<1x128xf32, #tpu.memory_space<vmem>>, vector<1x128xf32>
      %37 = vector.shape_cast %36 : vector<1x128xf32> to vector<1x1x128xf32>
      %cst_18 = arith.constant dense<0x7F800000> : vector<1xf32>
      %38 = vector.multi_reduction <minimumf>, %37, %cst_18 [1, 2] : vector<1x1x128xf32> to vector<1xf32>
      %39 = vector.shape_cast %38 : vector<1xf32> to vector<1x1x1xf32>
      %40 = vector.extract %39[0, 0, 0] : f32 from vector<1x1x1xf32>
      %c3_i32 = arith.constant 3 : i32
      %41 = vector.broadcast %c3_i32 : i32 to vector<1x8x128xi32>
      %42 = arith.cmpi eq, %19, %41 : vector<1x8x128xi32>
      %c0_19 = arith.constant 0 : index
      %c0_20 = arith.constant 0 : index
      %43 = vector.load %arg7[%c0_19, %c0_20] : memref<1x128xf32, #tpu.memory_space<vmem>>, vector<1x128xf32>
      %44 = vector.shape_cast %43 : vector<1x128xf32> to vector<1x1x128xf32>
      %cst_21 = arith.constant dense<0xFF800000> : vector<1xf32>
      %45 = vector.multi_reduction <maximumf>, %44, %cst_21 [1, 2] : vector<1x1x128xf32> to vector<1xf32>
      %46 = vector.shape_cast %45 : vector<1xf32> to vector<1x1x1xf32>
      %47 = vector.extract %46[0, 0, 0] : f32 from vector<1x1x1xf32>
      %cst_22 = arith.constant 0.000000e+00 : f32
      %48 = vector.broadcast %47 : f32 to vector<1x8x128xf32>
      %49 = vector.broadcast %cst_22 : f32 to vector<1x8x128xf32>
      %50 = arith.select %42, %48, %49 : vector<1x8x128xi1>, vector<1x8x128xf32>
      %51 = vector.broadcast %40 : f32 to vector<1x8x128xf32>
      %52 = arith.select %35, %51, %50 : vector<1x8x128xi1>, vector<1x8x128xf32>
      %53 = vector.broadcast %33 : f32 to vector<1x8x128xf32>
      %54 = arith.select %28, %53, %52 : vector<1x8x128xi1>, vector<1x8x128xf32>
      %55 = vector.broadcast %26 : f32 to vector<1x8x128xf32>
      %56 = arith.select %21, %55, %54 : vector<1x8x128xi1>, vector<1x8x128xf32>
      %c0_23 = arith.constant 0 : index
      %c0_24 = arith.constant 0 : index
      %c0_25 = arith.constant 0 : index
      %57 = vector.load %arg3[%c0_23, %c0_24, %c0_25] : memref<1x8x128xf32, #tpu.memory_space<vmem>>, vector<1x8x128xf32>
      tpu.vector_store %arg3[%c0_23, %c0_24, %c0_25], %56 {strides = array<i32>} : memref<1x8x128xf32, #tpu.memory_space<vmem>>, vector<1x8x128xf32>,
    } else {
    }
    return
  }
  func.func @transform_0(%arg0: i32, %arg1: i32) -> (i32, i32) {
    %c1_i32 = arith.constant 1 : i32
    %0 = arith.muli %arg0, %c1_i32 : i32
    %1 = arith.addi %0, %arg1 : i32
    %c1_i32_0 = arith.constant 1 : i32
    %2 = arith.minsi %1, %c1_i32_0 : i32
    %c0_i32 = arith.constant 0 : i32
    %c0_i32_1 = arith.constant 0 : i32
    return %2, %c0_i32 : i32, i32
  }
  func.func @transform_1(%arg0: i32, %arg1: i32) -> (i32, i32, i32) {
    %c0_i32 = arith.constant 0 : i32
    %c0_i32_0 = arith.constant 0 : i32
    %c0_i32_1 = arith.constant 0 : i32
    return %arg0, %c0_i32, %c0_i32_0 : i32, i32, i32
  }
}

</mosaic_0001>

<bundles_post_ra>
// kernel: pallas_param_stats.1
= control target key start
LH: loop header
LB: loop body
LE: loop exit
PB: predicated region body
PF: predicated region fallthrough
CT: control target
= control target key end

     0   :  { %s5075_s6 = smov 0   ;;  %s5077_s7 = smov 0   ;;  %s13227_s0 = inlined_call_operand.vmem [shape: f32[2113,128], index: 0, kind: input, shape index: {}]   ;;  %s13228_s1 = inlined_call_operand.vmem [shape: f32[2,8,128], index: 1, kind: output, shape index: {}]  }
   0x1   :  { %s5079_s8 = smov 0  }
   0x2 LB: > { %s23_s9 = sadd.s32 1, %s5056_s7  ;;  %p4995_p0 = scmp.ge.s32.totalorder %s5060_s8, 1  ;;  %s5060_s8 = sphi %s5079_s8, %s11_s8   ;;  %s5056_s7 = sphi %s5077_s7, %s17389_s7   ;;  %s5052_s6 = sphi %s5075_s6, %s17388_s6  }
   0x3   : > { %p25_p1 = scmp.ge.s32.totalorder %s23_s9, 2  ;;  %p120_p2 = scmp.lt.s32.totalorder %s5060_s8, 3 }
   0x5   : > { %s17391_s9 = smov (%p25_p1, %s23_s9), 0  ;;  %p121_p3 = pnand %p4995_p0, %p120_p2 }
   0x7   : > { %124 = sbr.rel (%p121_p3) target bundleno = 2108 (0x83c), region = 24 }
   0xc   : > { %p147_p4 = scmp.lt.s32.totalorder %s5052_s6, 1  ;;  %s4999_s10 = sshll.u32 %s5052_s6, 18  ;;  %v5062_v0 = vmov 0.0   ;;  %v5063_v1 = vmov inf   ;;  %v5064_v2 = vmov -inf  }
   0xd   : > { %174 = vst [vmem:[#allocation2] sm:$0x1] %v5062_v0  ;;  %s5093_s11 = ssub.s32 270400, %s4999_s10 }
   0xe   : > { %s17393_s6 = smov (!%p147_p4, %s5052_s6), 1  ;;  %175 = vst [vmem:[#allocation3] sm:$0x1] %v5062_v0  ;;  %p5000_p6 = scmp.lt.s32.totalorder %s5093_s11, 262144 }
   0xf   : > { %176 = vst [vmem:[#allocation4] sm:$0x1] %v5063_v1  ;;  %s4996_s12 = sshll.u32 %s17393_s6, 8  ;;  %s4998_s13 = sshll.u32 %s17393_s6, 3 }
  0x10   : > { %177 = vst [vmem:[#allocation5] sm:$0x1] %v5064_v2  ;;  %p154_p5 = scmp.lt.s32.totalorder %s4996_s12, 264  ;;  %s5098_s16 = scalar_lea.vmem %s13228_s1, %s4998_s13 }
  0x12   : > { %s17395_s12 = smov (!%p154_p5, %s4996_s12), 264 }
  0x13   : > { %s4997_s17 = sshll.u32 %s17395_s12, 3 }
  0x14   : > { %s5103_s20 = scalar_lea.vmem %s13227_s0, %s4997_s17 }
  0x15   : > { %v5106_v3 = vld [vmem:[%s5103_s20] sm:$0xff]  ;;  %v5109_v4 = vld [vmem:[%s5103_s20 + $0x8] sm:$0xff]  ;;  %v5112_v5 = vld [vmem:[%s5103_s20 + $0x10] sm:$0xff] }
  0x16   : > { %14392 = vst [vmem:[#allocation6_spill] sm:$0xff] %v5106_v3  ;;  %v5115_v6 = vld [vmem:[%s5103_s20 + $0x18] sm:$0xff]  ;;  %v5118_v7 = vld [vmem:[%s5103_s20 + $0x20] sm:$0xff]  ;;  %v5121_v8 = vld [vmem:[%s5103_s20 + $0x28] sm:$0xff] }
  0x17   : > { %14393 = vst [vmem:[#allocation7_spill] sm:$0xff] %v5109_v4  ;;  %v5124_v9 = vld [vmem:[%s5103_s20 + $0x30] sm:$0xff]  ;;  %v5127_v10 = vld [vmem:[%s5103_s20 + $0x38] sm:$0xff]  ;;  %v5130_v11 = vld [vmem:[%s5103_s20 + $0x40] sm:$0xff] }
  0x18   : > { %14394 = vst [vmem:[#allocation8_spill] sm:$0xff] %v5112_v5  ;;  %v5133_v12 = vld [vmem:[%s5103_s20 + $0x48] sm:$0xff]  ;;  %v5136_v13 = vld [vmem:[%s5103_s20 + $0x50] sm:$0xff]  ;;  %v5139_v14 = vld [vmem:[%s5103_s20 + $0x58] sm:$0xff] }
  0x19   : > { %14395 = vst [vmem:[#allocation9_spill] sm:$0xff] %v5115_v6  ;;  %v5142_v15 = vld [vmem:[%s5103_s20 + $0x60] sm:$0xff]  ;;  %v5145_v16 = vld [vmem:[%s5103_s20 + $0x68] sm:$0xff]  ;;  %v5148_v17 = vld [vmem:[%s5103_s20 + $0x70] sm:$0xff] }
  0x1a   : > { %14396 = vst [vmem:[#allocation10_spill] sm:$0xff] %v5118_v7  ;;  %v5151_v18 = vld [vmem:[%s5103_s20 + $0x78] sm:$0xff]  ;;  %v5154_v19 = vld [vmem:[%s5103_s20 + $0x80] sm:$0xff]  ;;  %v5157_v20 = vld [vmem:[%s5103_s20 + $0x88] sm:$0xff] }
  0x1b   : > { %14397 = vst [vmem:[#allocation11_spill] sm:$0xff] %v5121_v8  ;;  %v5160_v21 = vld [vmem:[%s5103_s20 + $0x90] sm:$0xff]  ;;  %v5163_v22 = vld [vmem:[%s5103_s20 + $0x98] sm:$0xff]  ;;  %v5166_v23 = vld [vmem:[%s5103_s20 + $0xa0] sm:$0xff] }
  0x1c   : > { %14398 = vst [vmem:[#allocation12_spill] sm:$0xff] %v5124_v9  ;;  %v5169_v24 = vld [vmem:[%s5103_s20 + $0xa8] sm:$0xff]  ;;  %v5172_v25 = vld [vmem:[%s5103_s20 + $0xb0] sm:$0xff]  ;;  %v5175_v26 = vld [vmem:[%s5103_s20 + $0xb8] sm:$0xff] }
  0x1d   : > { %14399 = vst [vmem:[#allocation13_spill] sm:$0xff] %v5127_v10  ;;  %v5178_v27 = vld [vmem:[%s5103_s20 + $0xc0] sm:$0xff]  ;;  %v5181_v28 = vld [vmem:[%s5103_s20 + $0xc8] sm:$0xff]  ;;  %v5184_v29 = vld [vmem:[%s5103_s20 + $0xd0] sm:$0xff] }
  0x1e   : > { %14400 = vst [vmem:[#allocation14_spill] sm:$0xff] %v5130_v11  ;;  %v5187_v30 = vld [vmem:[%s5103_s20 + $0xd8] sm:$0xff]  ;;  %v5190_v31 = vld [vmem:[%s5103_s20 + $0xe0] sm:$0xff]  ;;  %v5193_v32 = vld [vmem:[%s5103_s20 + $0xe8] sm:$0xff] }
  0x1f   : > { %14401 = vst [vmem:[#allocation15_spill] sm:$0xff] %v5133_v12  ;;  %v5196_v33 = vld [vmem:[%s5103_s20 + $0xf0] sm:$0xff]  ;;  %v5199_v34 = vld [vmem:[%s5103_s20 + $0xf8] sm:$0xff]  ;;  %v5202_v35 = vld [vmem:[%s5103_s20 + $0x100] sm:$0xff] }
  0x20   : > { %14402 = vst [vmem:[#allocation16_spill] sm:$0xff] %v5136_v13  ;;  %v5205_v36 = vld [vmem:[%s5103_s20 + $0x108] sm:$0xff]  ;;  %v5208_v37 = vld [vmem:[%s5103_s20 + $0x110] sm:$0xff]  ;;  %v5211_v38 = vld [vmem:[%s5103_s20 + $0x118] sm:$0xff] }
  0x21   : > { %14403 = vst [vmem:[#allocation17_spill] sm:$0xff] %v5139_v14  ;;  %v5214_v39 = vld [vmem:[%s5103_s20 + $0x120] sm:$0xff]  ;;  %v5217_v40 = vld [vmem:[%s5103_s20 + $0x128] sm:$0xff]  ;;  %v5220_v41 = vld [vmem:[%s5103_s20 + $0x130] sm:$0xff] }
  0x22   : > { %14404 = vst [vmem:[#allocation18_spill] sm:$0xff] %v5142_v15  ;;  %v5223_v42 = vld [vmem:[%s5103_s20 + $0x138] sm:$0xff]  ;;  %v5226_v43 = vld [vmem:[%s5103_s20 + $0x140] sm:$0xff]  ;;  %v5229_v44 = vld [vmem:[%s5103_s20 + $0x148] sm:$0xff] }
  0x23   : > { %14405 = vst [vmem:[#allocation19_spill] sm:$0xff] %v5145_v16  ;;  %v5232_v45 = vld [vmem:[%s5103_s20 + $0x150] sm:$0xff]  ;;  %v5235_v46 = vld [vmem:[%s5103_s20 + $0x158] sm:$0xff]  ;;  %v5238_v47 = vld [vmem:[%s5103_s20 + $0x160] sm:$0xff] }
  0x24   : > { %14406 = vst [vmem:[#allocation20_spill] sm:$0xff] %v5148_v17  ;;  %v5241_v48 = vld [vmem:[%s5103_s20 + $0x168] sm:$0xff]  ;;  %v5244_v49 = vld [vmem:[%s5103_s20 + $0x170] sm:$0xff]  ;;  %v5247_v50 = vld [vmem:[%s5103_s20 + $0x178] sm:$0xff] }
  0x25   : > { %14407 = vst [vmem:[#allocation21_spill] sm:$0xff] %v5151_v18  ;;  %v5250_v51 = vld [vmem:[%s5103_s20 + $0x180] sm:$0xff]  ;;  %v5253_v52 = vld [vmem:[%s5103_s20 + $0x188] sm:$0xff]  ;;  %v5256_v53 = vld [vmem:[%s5103_s20 + $0x190] sm:$0xff] }
  0x26   : > { %14408 = vst [vmem:[#allocation22_spill] sm:$0xff] %v5154_v19  ;;  %v5259_v54 = vld [vmem:[%s5103_s20 + $0x198] sm:$0xff]  ;;  %v5262_v55 = vld [vmem:[%s5103_s20 + $0x1a0] sm:$0xff]  ;;  %v5265_v56 = vld [vmem:[%s5103_s20 + $0x1a8] sm:$0xff] }
  0x27   : > { %14409 = vst [vmem:[#allocation23_spill] sm:$0xff] %v5157_v20  ;;  %v5268_v57 = vld [vmem:[%s5103_s20 + $0x1b0] sm:$0xff]  ;;  %v5271_v58 = vld [vmem:[%s5103_s20 + $0x1b8] sm:$0xff]  ;;  %v5274_v59 = vld [vmem:[%s5103_s20 + $0x1c0] sm:$0xff] }
  0x28   : > { %14410 = vst [vmem:[#allocation24_spill] sm:$0xff] %v5160_v21  ;;  %v5277_v60 = vld [vmem:[%s5103_s20 + $0x1c8] sm:$0xff]  ;;  %v5280_v61 = vld [vmem:[%s5103_s20 + $0x1d0] sm:$0xff]  ;;  %v5283_v62 = vld [vmem:[%s5103_s20 + $0x1d8] sm:$0xff] }
  0x29   : > { %14411 = vst [vmem:[#allocation25_spill] sm:$0xff] %v5163_v22  ;;  %v5286_v63 = vld [vmem:[%s5103_s20 + $0x1e0] sm:$0xff]  ;;  %v5289_v0 = vld [vmem:[%s5103_s20 + $0x1e8] sm:$0xff]  ;;  %v5292_v1 = vld [vmem:[%s5103_s20 + $0x1f0] sm:$0xff] }
  0x2a   : > { %14412 = vst [vmem:[#allocation26_spill] sm:$0xff] %v5166_v23  ;;  %v5295_v2 = vld [vmem:[%s5103_s20 + $0x1f8] sm:$0xff] }
  0x2b   : > { %14413 = vst [vmem:[#allocation27_spill] sm:$0xff] %v5169_v24 }
  0x2c   : > { %14414 = vst [vmem:[#allocation28_spill] sm:$0xff] %v5172_v25 }
  0x2d   : > { %14415 = vst [vmem:[#allocation29_spill] sm:$0xff] %v5175_v26 }
  0x2e   : > { %14416 = vst [vmem:[#allocation30_spill] sm:$0xff] %v5178_v27 }
  0x2f   : > { %14417 = vst [vmem:[#allocation31_spill] sm:$0xff] %v5181_v28 }
  0x30   : > { %14418 = vst [vmem:[#allocation32_spill] sm:$0xff] %v5184_v29 }
  0x31   : > { %14419 = vst [vmem:[#allocation33_spill] sm:$0xff] %v5187_v30 }
  0x32   : > { %14420 = vst [vmem:[#allocation34_spill] sm:$0xff] %v5190_v31 }
  0x33   : > { %14421 = vst [vmem:[#allocation35_spill] sm:$0xff] %v5193_v32 }
  0x34   : > { %14422 = vst [vmem:[#allocation36_spill] sm:$0xff] %v5196_v33 }
  0x35   : > { %14423 = vst [vmem:[#allocation37_spill] sm:$0xff] %v5199_v34 }
  0x36   : > { %14424 = vst [vmem:[#allocation38_spill] sm:$0xff] %v5202_v35 }
  0x37   : > { %14425 = vst [vmem:[#allocation39_spill] sm:$0xff] %v5205_v36 }
  0x38   : > { %14426 = vst [vmem:[#allocation40_spill] sm:$0xff] %v5208_v37 }
  0x39   : > { %14427 = vst [vmem:[#allocation41_spill] sm:$0xff] %v5211_v38 }
  0x3a   : > { %14428 = vst [vmem:[#allocation42_spill] sm:$0xff] %v5214_v39 }
  0x3b   : > { %14429 = vst [vmem:[#allocation43_spill] sm:$0xff] %v5217_v40 }
  0x3c   : > { %14430 = vst [vmem:[#allocation44_spill] sm:$0xff] %v5220_v41 }
  0x3d   : > { %14431 = vst [vmem:[#allocation45_spill] sm:$0xff] %v5223_v42 }
  0x3e   : > { %14432 = vst [vmem:[#allocation46_spill] sm:$0xff] %v5226_v43 }
  0x3f   : > { %14433 = vst [vmem:[#allocation47_spill] sm:$0xff] %v5229_v44 }
  0x40   : > { %14434 = vst [vmem:[#allocation48_spill] sm:$0xff] %v5232_v45 }
  0x41   : > { %14435 = vst [vmem:[#allocation49_spill] sm:$0xff] %v5235_v46 }
  0x42   : > { %14436 = vst [vmem:[#allocation50_spill] sm:$0xff] %v5238_v47 }
  0x43   : > { %14437 = vst [vmem:[#allocation51_spill] sm:$0xff] %v5241_v48 }
  0x44   : > { %14438 = vst [vmem:[#allocation52_spill] sm:$0xff] %v5244_v49 }
  0x45   : > { %14439 = vst [vmem:[#allocation53_spill] sm:$0xff] %v5247_v50 }
  0x46   : > { %14440 = vst [vmem:[#allocation54_spill] sm:$0xff] %v5250_v51 }
  0x47   : > { %14441 = vst [vmem:[#allocation55_spill] sm:$0xff] %v5253_v52 }
  0x48   : > { %14442 = vst [vmem:[#allocation56_spill] sm:$0xff] %v5256_v53 }
  0x49   : > { %14443 = vst [vmem:[#allocation57_spill] sm:$0xff] %v5259_v54 }
  0x4a   : > { %14444 = vst [vmem:[#allocation58_spill] sm:$0xff] %v5262_v55 }
  0x4b   : > { %14445 = vst [vmem:[#allocation59_spill] sm:$0xff] %v5265_v56  ;;  %v5856_v56 = vld [vmem:[%s5103_s20 + $0x7d0] sm:$0xff] }
  0x4c   : > { %14446 = vst [vmem:[#allocation60_spill] sm:$0xff] %v5268_v57  ;;  %v5847_v57 = vld [vmem:[%s5103_s20 + $0x7b8] sm:$0xff] }
  0x4d   : > { %14447 = vst [vmem:[#allocation61_spill] sm:$0xff] %v5271_v58  ;;  %v5838_v58 = vld [vmem:[%s5103_s20 + $0x7a0] sm:$0xff] }
  0x4e   : > { %14448 = vst [vmem:[#allocation62_spill] sm:$0xff] %v5274_v59  ;;  %v5829_v59 = vld [vmem:[%s5103_s20 + $0x788] sm:$0xff] }
  0x4f   : > { %14449 = vst [vmem:[#allocation63_spill] sm:$0xff] %v5277_v60  ;;  %v5298_v60 = vld [vmem:[%s5103_s20 + $0x200] sm:$0xff] }
  0x50   : > { %14450 = vst [vmem:[#allocation64_spill] sm:$0xff] %v5280_v61  ;;  %v5301_v61 = vld [vmem:[%s5103_s20 + $0x208] sm:$0xff] }
  0x51   : > { %14451 = vst [vmem:[#allocation65_spill] sm:$0xff] %v5283_v62  ;;  %v5304_v62 = vld [vmem:[%s5103_s20 + $0x210] sm:$0xff] }
  0x52   : > { %14452 = vst [vmem:[#allocation66_spill] sm:$0xff] %v5286_v63  ;;  %v5307_v63 = vld [vmem:[%s5103_s20 + $0x218] sm:$0xff] }
  0x53   : > { %14453 = vst [vmem:[#allocation67_spill] sm:$0xff] %v5289_v0  ;;  %v5310_v0 = vld [vmem:[%s5103_s20 + $0x220] sm:$0xff] }
  0x54   : > { %14454 = vst [vmem:[#allocation68_spill] sm:$0xff] %v5292_v1  ;;  %v5313_v1 = vld [vmem:[%s5103_s20 + $0x228] sm:$0xff] }
  0x55   : > { %14455 = vst [vmem:[#allocation69_spill] sm:$0xff] %v5295_v2  ;;  %v5316_v2 = vld [vmem:[%s5103_s20 + $0x230] sm:$0xff] }
  0x56   : > { %14456 = vst [vmem:[#allocation70_spill] sm:$0xff] %v5298_v60  ;;  %v5319_v60 = vld [vmem:[%s5103_s20 + $0x238] sm:$0xff] }
  0x57   : > { %14457 = vst [vmem:[#allocation71_spill] sm:$0xff] %v5301_v61  ;;  %v5322_v61 = vld [vmem:[%s5103_s20 + $0x240] sm:$0xff] }
  0x58   : > { %14458 = vst [vmem:[#allocation72_spill] sm:$0xff] %v5304_v62  ;;  %v5325_v62 = vld [vmem:[%s5103_s20 + $0x248] sm:$0xff] }
  0x59   : > { %14459 = vst [vmem:[#allocation73_spill] sm:$0xff] %v5307_v63  ;;  %v5328_v63 = vld [vmem:[%s5103_s20 + $0x250] sm:$0xff] }
  0x5a   : > { %14460 = vst [vmem:[#allocation74_spill] sm:$0xff] %v5310_v0  ;;  %v5331_v0 = vld [vmem:[%s5103_s20 + $0x258] sm:$0xff] }
  0x5b   : > { %14461 = vst [vmem:[#allocation75_spill] sm:$0xff] %v5313_v1  ;;  %v5334_v1 = vld [vmem:[%s5103_s20 + $0x260] sm:$0xff] }
  0x5c   : > { %14462 = vst [vmem:[#allocation76_spill] sm:$0xff] %v5316_v2  ;;  %v5337_v2 = vld [vmem:[%s5103_s20 + $0x268] sm:$0xff] }
  0x5d   : > { %14463 = vst [vmem:[#allocation77_spill] sm:$0xff] %v5319_v60  ;;  %v5340_v60 = vld [vmem:[%s5103_s20 + $0x270] sm:$0xff] }
  0x5e   : > { %14464 = vst [vmem:[#allocation78_spill] sm:$0xff] %v5322_v61  ;;  %v5343_v61 = vld [vmem:[%s5103_s20 + $0x278] sm:$0xff] }
  0x5f   : > { %14465 = vst [vmem:[#allocation79_spill] sm:$0xff] %v5325_v62  ;;  %v5346_v62 = vld [vmem:[%s5103_s20 + $0x280] sm:$0xff] }
  0x60   : > { %14466 = vst [vmem:[#allocation80_spill] sm:$0xff] %v5328_v63  ;;  %v5349_v63 = vld [vmem:[%s5103_s20 + $0x288] sm:$0xff] }
  0x61   : > { %14467 = vst [vmem:[#allocation81_spill] sm:$0xff] %v5331_v0  ;;  %v5352_v0 = vld [vmem:[%s5103_s20 + $0x290] sm:$0xff] }
  0x62   : > { %14468 = vst [vmem:[#allocation82_spill] sm:$0xff] %v5334_v1  ;;  %v5355_v1 = vld [vmem:[%s5103_s20 + $0x298] sm:$0xff] }
  0x63   : > { %14469 = vst [vmem:[#allocation83_spill] sm:$0xff] %v5337_v2  ;;  %v5358_v2 = vld [vmem:[%s5103_s20 + $0x2a0] sm:$0xff] }
  0x64   : > { %14470 = vst [vmem:[#allocation84_spill] sm:$0xff] %v5340_v60  ;;  %v5361_v60 = vld [vmem:[%s5103_s20 + $0x2a8] sm:$0xff] }
  0x65   : > { %14471 = vst [vmem:[#allocation85_spill] sm:$0xff] %v5343_v61  ;;  %v5364_v61 = vld [vmem:[%s5103_s20 + $0x2b0] sm:$0xff] }
  0x66   : > { %14472 = vst [vmem:[#allocation86_spill] sm:$0xff] %v5346_v62  ;;  %v5367_v62 = vld [vmem:[%s5103_s20 + $0x2b8] sm:$0xff] }
  0x67   : > { %14473 = vst [vmem:[#allocation87_spill] sm:$0xff] %v5349_v63  ;;  %v5370_v63 = vld [vmem:[%s5103_s20 + $0x2c0] sm:$0xff] }
  0x68   : > { %14474 = vst [vmem:[#allocation88_spill] sm:$0xff] %v5352_v0  ;;  %v5373_v0 = vld [vmem:[%s5103_s20 + $0x2c8] sm:$0xff] }
  0x69   : > { %14475 = vst [vmem:[#allocation89_spill] sm:$0xff] %v5355_v1  ;;  %v5376_v1 = vld [vmem:[%s5103_s20 + $0x2d0] sm:$0xff] }
  0x6a   : > { %14476 = vst [vmem:[#allocation90_spill] sm:$0xff] %v5358_v2  ;;  %v5379_v2 = vld [vmem:[%s5103_s20 + $0x2d8] sm:$0xff] }
  0x6b   : > { %14477 = vst [vmem:[#allocation91_spill] sm:$0xff] %v5361_v60  ;;  %v5382_v60 = vld [vmem:[%s5103_s20 + $0x2e0] sm:$0xff] }
  0x6c   : > { %14478 = vst [vmem:[#allocation92_spill] sm:$0xff] %v5364_v61  ;;  %v5385_v61 = vld [vmem:[%s5103_s20 + $0x2e8] sm:$0xff] }
  0x6d   : > { %14479 = vst [vmem:[#allocation93_spill] sm:$0xff] %v5367_v62  ;;  %v5388_v62 = vld [vmem:[%s5103_s20 + $0x2f0] sm:$0xff] }
  0x6e   : > { %14480 = vst [vmem:[#allocation94_spill] sm:$0xff] %v5370_v63  ;;  %v5391_v63 = vld [vmem:[%s5103_s20 + $0x2f8] sm:$0xff] }
  0x6f   : > { %14481 = vst [vmem:[#allocation95_spill] sm:$0xff] %v5373_v0  ;;  %v5394_v0 = vld [vmem:[%s5103_s20 + $0x300] sm:$0xff] }
  0x70   : > { %14482 = vst [vmem:[#allocation96_spill] sm:$0xff] %v5376_v1  ;;  %v5397_v1 = vld [vmem:[%s5103_s20 + $0x308] sm:$0xff] }
  0x71   : > { %14483 = vst [vmem:[#allocation97_spill] sm:$0xff] %v5379_v2  ;;  %v5400_v2 = vld [vmem:[%s5103_s20 + $0x310] sm:$0xff] }
  0x72   : > { %14484 = vst [vmem:[#allocation98_spill] sm:$0xff] %v5382_v60  ;;  %v5403_v60 = vld [vmem:[%s5103_s20 + $0x318] sm:$0xff] }
  0x73   : > { %14485 = vst [vmem:[#allocation99_spill] sm:$0xff] %v5385_v61  ;;  %v5406_v61 = vld [vmem:[%s5103_s20 + $0x320] sm:$0xff] }
  0x74   : > { %14486 = vst [vmem:[#allocation100_spill] sm:$0xff] %v5388_v62  ;;  %v5409_v62 = vld [vmem:[%s5103_s20 + $0x328] sm:$0xff] }
  0x75   : > { %14487 = vst [vmem:[#allocation101_spill] sm:$0xff] %v5391_v63  ;;  %v5412_v63 = vld [vmem:[%s5103_s20 + $0x330] sm:$0xff] }
  0x76   : > { %14488 = vst [vmem:[#allocation102_spill] sm:$0xff] %v5394_v0  ;;  %v5415_v0 = vld [vmem:[%s5103_s20 + $0x338] sm:$0xff] }
  0x77   : > { %14489 = vst [vmem:[#allocation103_spill] sm:$0xff] %v5397_v1  ;;  %v5418_v1 = vld [vmem:[%s5103_s20 + $0x340] sm:$0xff] }
  0x78   : > { %14490 = vst [vmem:[#allocation104_spill] sm:$0xff] %v5400_v2  ;;  %v5421_v2 = vld [vmem:[%s5103_s20 + $0x348] sm:$0xff] }
  0x79   : > { %14491 = vst [vmem:[#allocation105_spill] sm:$0xff] %v5403_v60  ;;  %v5424_v60 = vld [vmem:[%s5103_s20 + $0x350] sm:$0xff] }
  0x7a   : > { %14492 = vst [vmem:[#allocation106_spill] sm:$0xff] %v5406_v61  ;;  %v5427_v61 = vld [vmem:[%s5103_s20 + $0x358] sm:$0xff] }
  0x7b   : > { %14493 = vst [vmem:[#allocation107_spill] sm:$0xff] %v5409_v62  ;;  %v5430_v62 = vld [vmem:[%s5103_s20 + $0x360] sm:$0xff] }
  0x7c   : > { %14494 = vst [vmem:[#allocation108_spill] sm:$0xff] %v5412_v63  ;;  %v5433_v63 = vld [vmem:[%s5103_s20 + $0x368] sm:$0xff] }
  0x7d   : > { %14495 = vst [vmem:[#allocation109_spill] sm:$0xff] %v5415_v0  ;;  %v5436_v0 = vld [vmem:[%s5103_s20 + $0x370] sm:$0xff] }
  0x7e   : > { %14496 = vst [vmem:[#allocation110_spill] sm:$0xff] %v5418_v1  ;;  %v5439_v1 = vld [vmem:[%s5103_s20 + $0x378] sm:$0xff] }
  0x7f   : > { %14497 = vst [vmem:[#allocation111_spill] sm:$0xff] %v5421_v2  ;;  %v5442_v2 = vld [vmem:[%s5103_s20 + $0x380] sm:$0xff] }
  0x80   : > { %14498 = vst [vmem:[#allocation112_spill] sm:$0xff] %v5424_v60  ;;  %v5445_v60 = vld [vmem:[%s5103_s20 + $0x388] sm:$0xff] }
  0x81   : > { %14499 = vst [vmem:[#allocation113_spill] sm:$0xff] %v5427_v61  ;;  %v5448_v61 = vld [vmem:[%s5103_s20 + $0x390] sm:$0xff] }
  0x82   : > { %14500 = vst [vmem:[#allocation114_spill] sm:$0xff] %v5430_v62  ;;  %v5451_v62 = vld [vmem:[%s5103_s20 + $0x398] sm:$0xff] }
  0x83   : > { %14501 = vst [vmem:[#allocation115_spill] sm:$0xff] %v5433_v63  ;;  %v5454_v63 = vld [vmem:[%s5103_s20 + $0x3a0] sm:$0xff] }
  0x84   : > { %14502 = vst [vmem:[#allocation116_spill] sm:$0xff] %v5436_v0  ;;  %v5457_v0 = vld [vmem:[%s5103_s20 + $0x3a8] sm:$0xff] }
  0x85   : > { %14503 = vst [vmem:[#allocation117_spill] sm:$0xff] %v5439_v1  ;;  %v5460_v1 = vld [vmem:[%s5103_s20 + $0x3b0] sm:$0xff] }
  0x86   : > { %14504 = vst [vmem:[#allocation118_spill] sm:$0xff] %v5442_v2  ;;  %v5463_v2 = vld [vmem:[%s5103_s20 + $0x3b8] sm:$0xff] }
  0x87   : > { %14505 = vst [vmem:[#allocation119_spill] sm:$0xff] %v5445_v60  ;;  %v5466_v60 = vld [vmem:[%s5103_s20 + $0x3c0] sm:$0xff] }
  0x88   : > { %14506 = vst [vmem:[#allocation120_spill] sm:$0xff] %v5448_v61  ;;  %v5469_v61 = vld [vmem:[%s5103_s20 + $0x3c8] sm:$0xff] }
  0x89   : > { %14507 = vst [vmem:[#allocation121_spill] sm:$0xff] %v5451_v62  ;;  %v5472_v62 = vld [vmem:[%s5103_s20 + $0x3d0] sm:$0xff] }
  0x8a   : > { %14508 = vst [vmem:[#allocation122_spill] sm:$0xff] %v5454_v63  ;;  %v5475_v63 = vld [vmem:[%s5103_s20 + $0x3d8] sm:$0xff] }
  0x8b   : > { %14509 = vst [vmem:[#allocation123_spill] sm:$0xff] %v5457_v0  ;;  %v5478_v0 = vld [vmem:[%s5103_s20 + $0x3e0] sm:$0xff] }
  0x8c   : > { %14510 = vst [vmem:[#allocation124_spill] sm:$0xff] %v5460_v1  ;;  %v5481_v1 = vld [vmem:[%s5103_s20 + $0x3e8] sm:$0xff] }
  0x8d   : > { %14511 = vst [vmem:[#allocation125_spill] sm:$0xff] %v5463_v2  ;;  %v5484_v2 = vld [vmem:[%s5103_s20 + $0x3f0] sm:$0xff] }
  0x8e   : > { %14512 = vst [vmem:[#allocation126_spill] sm:$0xff] %v5466_v60  ;;  %v5487_v60 = vld [vmem:[%s5103_s20 + $0x3f8] sm:$0xff] }
  0x8f   : > { %14513 = vst [vmem:[#allocation127_spill] sm:$0xff] %v5469_v61  ;;  %v5490_v61 = vld [vmem:[%s5103_s20 + $0x400] sm:$0xff] }
  0x90   : > { %14514 = vst [vmem:[#allocation128_spill] sm:$0xff] %v5472_v62  ;;  %v5493_v62 = vld [vmem:[%s5103_s20 + $0x408] sm:$0xff] }
  0x91   : > { %14515 = vst [vmem:[#allocation129_spill] sm:$0xff] %v5475_v63  ;;  %v5496_v63 = vld [vmem:[%s5103_s20 + $0x410] sm:$0xff] }
  0x92   : > { %14516 = vst [vmem:[#allocation130_spill] sm:$0xff] %v5478_v0  ;;  %v5499_v0 = vld [vmem:[%s5103_s20 + $0x418] sm:$0xff] }
  0x93   : > { %14517 = vst [vmem:[#allocation131_spill] sm:$0xff] %v5481_v1  ;;  %v5502_v1 = vld [vmem:[%s5103_s20 + $0x420] sm:$0xff] }
  0x94   : > { %14518 = vst [vmem:[#allocation132_spill] sm:$0xff] %v5484_v2  ;;  %v5505_v2 = vld [vmem:[%s5103_s20 + $0x428] sm:$0xff] }
  0x95   : > { %14519 = vst [vmem:[#allocation133_spill] sm:$0xff] %v5487_v60  ;;  %v5508_v60 = vld [vmem:[%s5103_s20 + $0x430] sm:$0xff] }
  0x96   : > { %14520 = vst [vmem:[#allocation134_spill] sm:$0xff] %v5490_v61  ;;  %v5511_v61 = vld [vmem:[%s5103_s20 + $0x438] sm:$0xff] }
  0x97   : > { %14521 = vst [vmem:[#allocation135_spill] sm:$0xff] %v5493_v62  ;;  %v5514_v62 = vld [vmem:[%s5103_s20 + $0x440] sm:$0xff] }
  0x98   : > { %14522 = vst [vmem:[#allocation136_spill] sm:$0xff] %v5496_v63  ;;  %v5517_v63 = vld [vmem:[%s5103_s20 + $0x448] sm:$0xff] }
  0x99   : > { %14523 = vst [vmem:[#allocation137_spill] sm:$0xff] %v5499_v0  ;;  %v5520_v0 = vld [vmem:[%s5103_s20 + $0x450] sm:$0xff] }
  0x9a   : > { %14524 = vst [vmem:[#allocation138_spill] sm:$0xff] %v5502_v1  ;;  %v5523_v1 = vld [vmem:[%s5103_s20 + $0x458] sm:$0xff] }
  0x9b   : > { %14525 = vst [vmem:[#allocation139_spill] sm:$0xff] %v5505_v2  ;;  %v5526_v2 = vld [vmem:[%s5103_s20 + $0x460] sm:$0xff] }
  0x9c   : > { %14526 = vst [vmem:[#allocation140_spill] sm:$0xff] %v5508_v60  ;;  %v5529_v60 = vld [vmem:[%s5103_s20 + $0x468] sm:$0xff] }
  0x9d   : > { %14527 = vst [vmem:[#allocation141_spill] sm:$0xff] %v5511_v61  ;;  %v5532_v61 = vld [vmem:[%s5103_s20 + $0x470] sm:$0xff] }
  0x9e   : > { %14528 = vst [vmem:[#allocation142_spill] sm:$0xff] %v5514_v62  ;;  %v5535_v62 = vld [vmem:[%s5103_s20 + $0x478] sm:$0xff] }
  0x9f   : > { %14529 = vst [vmem:[#allocation143_spill] sm:$0xff] %v5517_v63  ;;  %v5538_v63 = vld [vmem:[%s5103_s20 + $0x480] sm:$0xff] }
  0xa0   : > { %14530 = vst [vmem:[#allocation144_spill] sm:$0xff] %v5520_v0  ;;  %v5541_v0 = vld [vmem:[%s5103_s20 + $0x488] sm:$0xff] }
  0xa1   : > { %14531 = vst [vmem:[#allocation145_spill] sm:$0xff] %v5523_v1  ;;  %v5544_v1 = vld [vmem:[%s5103_s20 + $0x490] sm:$0xff] }
  0xa2   : > { %14532 = vst [vmem:[#allocation146_spill] sm:$0xff] %v5526_v2  ;;  %v5547_v2 = vld [vmem:[%s5103_s20 + $0x498] sm:$0xff] }
  0xa3   : > { %14533 = vst [vmem:[#allocation147_spill] sm:$0xff] %v5529_v60  ;;  %v5550_v60 = vld [vmem:[%s5103_s20 + $0x4a0] sm:$0xff] }
  0xa4   : > { %14534 = vst [vmem:[#allocation148_spill] sm:$0xff] %v5532_v61  ;;  %v5553_v61 = vld [vmem:[%s5103_s20 + $0x4a8] sm:$0xff] }
  0xa5   : > { %14535 = vst [vmem:[#allocation149_spill] sm:$0xff] %v5535_v62  ;;  %v5556_v62 = vld [vmem:[%s5103_s20 + $0x4b0] sm:$0xff] }
  0xa6   : > { %14536 = vst [vmem:[#allocation150_spill] sm:$0xff] %v5538_v63  ;;  %v5559_v63 = vld [vmem:[%s5103_s20 + $0x4b8] sm:$0xff] }
  0xa7   : > { %14537 = vst [vmem:[#allocation151_spill] sm:$0xff] %v5541_v0  ;;  %v5562_v0 = vld [vmem:[%s5103_s20 + $0x4c0] sm:$0xff] }
  0xa8   : > { %14538 = vst [vmem:[#allocation152_spill] sm:$0xff] %v5544_v1  ;;  %v5565_v1 = vld [vmem:[%s5103_s20 + $0x4c8] sm:$0xff] }
  0xa9   : > { %14539 = vst [vmem:[#allocation153_spill] sm:$0xff] %v5547_v2  ;;  %v5568_v2 = vld [vmem:[%s5103_s20 + $0x4d0] sm:$0xff] }
  0xaa   : > { %14540 = vst [vmem:[#allocation154_spill] sm:$0xff] %v5550_v60  ;;  %v5571_v60 = vld [vmem:[%s5103_s20 + $0x4d8] sm:$0xff] }
  0xab   : > { %14541 = vst [vmem:[#allocation155_spill] sm:$0xff] %v5553_v61  ;;  %v5574_v61 = vld [vmem:[%s5103_s20 + $0x4e0] sm:$0xff] }
  0xac   : > { %14542 = vst [vmem:[#allocation156_spill] sm:$0xff] %v5556_v62  ;;  %v5577_v62 = vld [vmem:[%s5103_s20 + $0x4e8] sm:$0xff] }
  0xad   : > { %14543 = vst [vmem:[#allocation157_spill] sm:$0xff] %v5559_v63  ;;  %v5580_v63 = vld [vmem:[%s5103_s20 + $0x4f0] sm:$0xff] }
  0xae   : > { %14544 = vst [vmem:[#allocation158_spill] sm:$0xff] %v5562_v0  ;;  %v5583_v0 = vld [vmem:[%s5103_s20 + $0x4f8] sm:$0xff] }
  0xaf   : > { %14545 = vst [vmem:[#allocation159_spill] sm:$0xff] %v5565_v1  ;;  %v5586_v1 = vld [vmem:[%s5103_s20 + $0x500] sm:$0xff] }
  0xb0   : > { %14546 = vst [vmem:[#allocation160_spill] sm:$0xff] %v5568_v2  ;;  %v5589_v2 = vld [vmem:[%s5103_s20 + $0x508] sm:$0xff] }
  0xb1   : > { %14547 = vst [vmem:[#allocation161_spill] sm:$0xff] %v5571_v60  ;;  %v5592_v60 = vld [vmem:[%s5103_s20 + $0x510] sm:$0xff] }
  0xb2   : > { %14548 = vst [vmem:[#allocation162_spill] sm:$0xff] %v5574_v61  ;;  %v5595_v61 = vld [vmem:[%s5103_s20 + $0x518] sm:$0xff] }
  0xb3   : > { %14549 = vst [vmem:[#allocation163_spill] sm:$0xff] %v5577_v62  ;;  %v5598_v62 = vld [vmem:[%s5103_s20 + $0x520] sm:$0xff] }
  0xb4   : > { %14550 = vst [vmem:[#allocation164_spill] sm:$0xff] %v5580_v63  ;;  %v5601_v63 = vld [vmem:[%s5103_s20 + $0x528] sm:$0xff] }
  0xb5   : > { %14551 = vst [vmem:[#allocation165_spill] sm:$0xff] %v5583_v0  ;;  %v5604_v0 = vld [vmem:[%s5103_s20 + $0x530] sm:$0xff] }
  0xb6   : > { %14552 = vst [vmem:[#allocation166_spill] sm:$0xff] %v5586_v1  ;;  %v5607_v1 = vld [vmem:[%s5103_s20 + $0x538] sm:$0xff] }
  0xb7   : > { %14553 = vst [vmem:[#allocation167_spill] sm:$0xff] %v5589_v2  ;;  %v5610_v2 = vld [vmem:[%s5103_s20 + $0x540] sm:$0xff] }
  0xb8   : > { %14554 = vst [vmem:[#allocation168_spill] sm:$0xff] %v5592_v60  ;;  %v5613_v60 = vld [vmem:[%s5103_s20 + $0x548] sm:$0xff] }
  0xb9   : > { %14555 = vst [vmem:[#allocation169_spill] sm:$0xff] %v5595_v61  ;;  %v5616_v61 = vld [vmem:[%s5103_s20 + $0x550] sm:$0xff] }
  0xba   : > { %14556 = vst [vmem:[#allocation170_spill] sm:$0xff] %v5598_v62  ;;  %v5619_v62 = vld [vmem:[%s5103_s20 + $0x558] sm:$0xff] }
  0xbb   : > { %14557 = vst [vmem:[#allocation171_spill] sm:$0xff] %v5601_v63  ;;  %v5622_v63 = vld [vmem:[%s5103_s20 + $0x560] sm:$0xff] }
  0xbc   : > { %14558 = vst [vmem:[#allocation172_spill] sm:$0xff] %v5604_v0  ;;  %v5625_v0 = vld [vmem:[%s5103_s20 + $0x568] sm:$0xff] }
  0xbd   : > { %14559 = vst [vmem:[#allocation173_spill] sm:$0xff] %v5607_v1  ;;  %v5628_v1 = vld [vmem:[%s5103_s20 + $0x570] sm:$0xff] }
  0xbe   : > { %14560 = vst [vmem:[#allocation174_spill] sm:$0xff] %v5610_v2  ;;  %v5631_v2 = vld [vmem:[%s5103_s20 + $0x578] sm:$0xff] }
  0xbf   : > { %14561 = vst [vmem:[#allocation175_spill] sm:$0xff] %v5613_v60  ;;  %v5634_v60 = vld [vmem:[%s5103_s20 + $0x580] sm:$0xff] }
  0xc0   : > { %14562 = vst [vmem:[#allocation176_spill] sm:$0xff] %v5616_v61  ;;  %v5637_v61 = vld [vmem:[%s5103_s20 + $0x588] sm:$0xff] }
  0xc1   : > { %14563 = vst [vmem:[#allocation177_spill] sm:$0xff] %v5619_v62  ;;  %v5640_v62 = vld [vmem:[%s5103_s20 + $0x590] sm:$0xff] }
  0xc2   : > { %14564 = vst [vmem:[#allocation178_spill] sm:$0xff] %v5622_v63  ;;  %v5643_v63 = vld [vmem:[%s5103_s20 + $0x598] sm:$0xff] }
  0xc3   : > { %14565 = vst [vmem:[#allocation179_spill] sm:$0xff] %v5625_v0  ;;  %v5646_v0 = vld [vmem:[%s5103_s20 + $0x5a0] sm:$0xff] }
  0xc4   : > { %14566 = vst [vmem:[#allocation180_spill] sm:$0xff] %v5628_v1  ;;  %v5649_v1 = vld [vmem:[%s5103_s20 + $0x5a8] sm:$0xff] }
  0xc5   : > { %14567 = vst [vmem:[#allocation181_spill] sm:$0xff] %v5631_v2  ;;  %v5652_v2 = vld [vmem:[%s5103_s20 + $0x5b0] sm:$0xff] }
  0xc6   : > { %14568 = vst [vmem:[#allocation182_spill] sm:$0xff] %v5634_v60  ;;  %v5655_v60 = vld [vmem:[%s5103_s20 + $0x5b8] sm:$0xff] }
  0xc7   : > { %14569 = vst [vmem:[#allocation183_spill] sm:$0xff] %v5637_v61  ;;  %v5658_v61 = vld [vmem:[%s5103_s20 + $0x5c0] sm:$0xff] }
  0xc8   : > { %14570 = vst [vmem:[#allocation184_spill] sm:$0xff] %v5640_v62  ;;  %v5661_v62 = vld [vmem:[%s5103_s20 + $0x5c8] sm:$0xff] }
  0xc9   : > { %14571 = vst [vmem:[#allocation185_spill] sm:$0xff] %v5643_v63  ;;  %v5664_v63 = vld [vmem:[%s5103_s20 + $0x5d0] sm:$0xff] }
  0xca   : > { %14572 = vst [vmem:[#allocation186_spill] sm:$0xff] %v5646_v0  ;;  %v5667_v0 = vld [vmem:[%s5103_s20 + $0x5d8] sm:$0xff] }
  0xcb   : > { %14573 = vst [vmem:[#allocation187_spill] sm:$0xff] %v5649_v1  ;;  %v5670_v1 = vld [vmem:[%s5103_s20 + $0x5e0] sm:$0xff] }
  0xcc   : > { %14574 = vst [vmem:[#allocation188_spill] sm:$0xff] %v5652_v2  ;;  %v5673_v2 = vld [vmem:[%s5103_s20 + $0x5e8] sm:$0xff] }
  0xcd   : > { %14575 = vst [vmem:[#allocation189_spill] sm:$0xff] %v5655_v60  ;;  %v5676_v60 = vld [vmem:[%s5103_s20 + $0x5f0] sm:$0xff] }
  0xce   : > { %14576 = vst [vmem:[#allocation190_spill] sm:$0xff] %v5658_v61  ;;  %v5679_v61 = vld [vmem:[%s5103_s20 + $0x5f8] sm:$0xff] }
  0xcf   : > { %14577 = vst [vmem:[#allocation191_spill] sm:$0xff] %v5661_v62  ;;  %v5682_v62 = vld [vmem:[%s5103_s20 + $0x600] sm:$0xff] }
  0xd0   : > { %14578 = vst [vmem:[#allocation192_spill] sm:$0xff] %v5664_v63  ;;  %v5685_v63 = vld [vmem:[%s5103_s20 + $0x608] sm:$0xff] }
  0xd1   : > { %14579 = vst [vmem:[#allocation193_spill] sm:$0xff] %v5667_v0  ;;  %v5688_v0 = vld [vmem:[%s5103_s20 + $0x610] sm:$0xff] }
  0xd2   : > { %14580 = vst [vmem:[#allocation194_spill] sm:$0xff] %v5670_v1  ;;  %v5691_v1 = vld [vmem:[%s5103_s20 + $0x618] sm:$0xff] }
  0xd3   : > { %14581 = vst [vmem:[#allocation195_spill] sm:$0xff] %v5673_v2  ;;  %v5694_v2 = vld [vmem:[%s5103_s20 + $0x620] sm:$0xff] }
  0xd4   : > { %14582 = vst [vmem:[#allocation196_spill] sm:$0xff] %v5676_v60  ;;  %v5697_v60 = vld [vmem:[%s5103_s20 + $0x628] sm:$0xff] }
  0xd5   : > { %14583 = vst [vmem:[#allocation197_spill] sm:$0xff] %v5679_v61  ;;  %v5700_v61 = vld [vmem:[%s5103_s20 + $0x630] sm:$0xff] }
  0xd6   : > { %14584 = vst [vmem:[#allocation198_spill] sm:$0xff] %v5682_v62  ;;  %v5703_v62 = vld [vmem:[%s5103_s20 + $0x638] sm:$0xff] }
  0xd7   : > { %14585 = vst [vmem:[#allocation199_spill] sm:$0xff] %v5685_v63  ;;  %v5706_v63 = vld [vmem:[%s5103_s20 + $0x640] sm:$0xff] }
  0xd8   : > { %14586 = vst [vmem:[#allocation200_spill] sm:$0xff] %v5688_v0  ;;  %v5709_v0 = vld [vmem:[%s5103_s20 + $0x648] sm:$0xff] }
  0xd9   : > { %14587 = vst [vmem:[#allocation201_spill] sm:$0xff] %v5691_v1  ;;  %v5712_v1 = vld [vmem:[%s5103_s20 + $0x650] sm:$0xff] }
  0xda   : > { %14588 = vst [vmem:[#allocation202_spill] sm:$0xff] %v5694_v2  ;;  %v5715_v2 = vld [vmem:[%s5103_s20 + $0x658] sm:$0xff] }
  0xdb   : > { %14589 = vst [vmem:[#allocation203_spill] sm:$0xff] %v5697_v60  ;;  %v5718_v60 = vld [vmem:[%s5103_s20 + $0x660] sm:$0xff] }
  0xdc   : > { %14590 = vst [vmem:[#allocation204_spill] sm:$0xff] %v5700_v61  ;;  %v5721_v61 = vld [vmem:[%s5103_s20 + $0x668] sm:$0xff] }
  0xdd   : > { %14591 = vst [vmem:[#allocation205_spill] sm:$0xff] %v5703_v62  ;;  %v5724_v62 = vld [vmem:[%s5103_s20 + $0x670] sm:$0xff] }
  0xde   : > { %14592 = vst [vmem:[#allocation206_spill] sm:$0xff] %v5706_v63  ;;  %v5727_v63 = vld [vmem:[%s5103_s20 + $0x678] sm:$0xff] }
  0xdf   : > { %14593 = vst [vmem:[#allocation207_spill] sm:$0xff] %v5709_v0  ;;  %v5730_v0 = vld [vmem:[%s5103_s20 + $0x680] sm:$0xff] }
  0xe0   : > { %14594 = vst [vmem:[#allocation208_spill] sm:$0xff] %v5712_v1  ;;  %v5733_v1 = vld [vmem:[%s5103_s20 + $0x688] sm:$0xff] }
  0xe1   : > { %14595 = vst [vmem:[#allocation209_spill] sm:$0xff] %v5715_v2  ;;  %v5736_v2 = vld [vmem:[%s5103_s20 + $0x690] sm:$0xff] }
  0xe2   : > { %14596 = vst [vmem:[#allocation210_spill] sm:$0xff] %v5718_v60  ;;  %v5739_v60 = vld [vmem:[%s5103_s20 + $0x698] sm:$0xff] }
  0xe3   : > { %14597 = vst [vmem:[#allocation211_spill] sm:$0xff] %v5721_v61  ;;  %v5742_v61 = vld [vmem:[%s5103_s20 + $0x6a0] sm:$0xff] }
  0xe4   : > { %14598 = vst [vmem:[#allocation212_spill] sm:$0xff] %v5724_v62  ;;  %v5745_v62 = vld [vmem:[%s5103_s20 + $0x6a8] sm:$0xff] }
  0xe5   : > { %14599 = vst [vmem:[#allocation213_spill] sm:$0xff] %v5727_v63  ;;  %v5748_v63 = vld [vmem:[%s5103_s20 + $0x6b0] sm:$0xff] }
  0xe6   : > { %14600 = vst [vmem:[#allocation214_spill] sm:$0xff] %v5730_v0  ;;  %v5751_v0 = vld [vmem:[%s5103_s20 + $0x6b8] sm:$0xff] }
  0xe7   : > { %14601 = vst [vmem:[#allocation215_spill] sm:$0xff] %v5733_v1  ;;  %v5754_v1 = vld [vmem:[%s5103_s20 + $0x6c0] sm:$0xff] }
  0xe8   : > { %14602 = vst [vmem:[#allocation216_spill] sm:$0xff] %v5736_v2  ;;  %v5757_v2 = vld [vmem:[%s5103_s20 + $0x6c8] sm:$0xff] }
  0xe9   : > { %14603 = vst [vmem:[#allocation217_spill] sm:$0xff] %v5739_v60  ;;  %v5760_v60 = vld [vmem:[%s5103_s20 + $0x6d0] sm:$0xff] }
  0xea   : > { %14604 = vst [vmem:[#allocation218_spill] sm:$0xff] %v5742_v61  ;;  %v5763_v61 = vld [vmem:[%s5103_s20 + $0x6d8] sm:$0xff] }
  0xeb   : > { %14605 = vst [vmem:[#allocation219_spill] sm:$0xff] %v5745_v62  ;;  %v5766_v62 = vld [vmem:[%s5103_s20 + $0x6e0] sm:$0xff] }
  0xec   : > { %14606 = vst [vmem:[#allocation220_spill] sm:$0xff] %v5748_v63  ;;  %v5769_v63 = vld [vmem:[%s5103_s20 + $0x6e8] sm:$0xff] }
  0xed   : > { %14607 = vst [vmem:[#allocation221_spill] sm:$0xff] %v5751_v0  ;;  %v5772_v0 = vld [vmem:[%s5103_s20 + $0x6f0] sm:$0xff] }
  0xee   : > { %14608 = vst [vmem:[#allocation222_spill] sm:$0xff] %v5754_v1  ;;  %v5775_v1 = vld [vmem:[%s5103_s20 + $0x6f8] sm:$0xff] }
  0xef   : > { %14609 = vst [vmem:[#allocation223_spill] sm:$0xff] %v5757_v2  ;;  %v5778_v2 = vld [vmem:[%s5103_s20 + $0x700] sm:$0xff] }
  0xf0   : > { %14610 = vst [vmem:[#allocation224_spill] sm:$0xff] %v5760_v60  ;;  %v5781_v60 = vld [vmem:[%s5103_s20 + $0x708] sm:$0xff] }
  0xf1   : > { %14611 = vst [vmem:[#allocation225_spill] sm:$0xff] %v5763_v61  ;;  %v5784_v61 = vld [vmem:[%s5103_s20 + $0x710] sm:$0xff] }
  0xf2   : > { %14612 = vst [vmem:[#allocation226_spill] sm:$0xff] %v5766_v62  ;;  %v5787_v62 = vld [vmem:[%s5103_s20 + $0x718] sm:$0xff] }
  0xf3   : > { %14613 = vst [vmem:[#allocation227_spill] sm:$0xff] %v5769_v63  ;;  %v5790_v63 = vld [vmem:[%s5103_s20 + $0x720] sm:$0xff] }
  0xf4   : > { %14614 = vst [vmem:[#allocation228_spill] sm:$0xff] %v5772_v0  ;;  %v5793_v0 = vld [vmem:[%s5103_s20 + $0x728] sm:$0xff] }
  0xf5   : > { %14615 = vst [vmem:[#allocation229_spill] sm:$0xff] %v5775_v1  ;;  %v5796_v1 = vld [vmem:[%s5103_s20 + $0x730] sm:$0xff] }
  0xf6   : > { %14616 = vst [vmem:[#allocation230_spill] sm:$0xff] %v5778_v2  ;;  %v5799_v2 = vld [vmem:[%s5103_s20 + $0x738] sm:$0xff] }
  0xf7   : > { %14617 = vst [vmem:[#allocation231_spill] sm:$0xff] %v5781_v60  ;;  %v5802_v60 = vld [vmem:[%s5103_s20 + $0x740] sm:$0xff] }
  0xf8   : > { %14618 = vst [vmem:[#allocation232_spill] sm:$0xff] %v5784_v61  ;;  %v5805_v61 = vld [vmem:[%s5103_s20 + $0x748] sm:$0xff] }
  0xf9   : > { %14619 = vst [vmem:[#allocation233_spill] sm:$0xff] %v5787_v62  ;;  %v5808_v62 = vld [vmem:[%s5103_s20 + $0x750] sm:$0xff] }
  0xfa   : > { %14620 = vst [vmem:[#allocation234_spill] sm:$0xff] %v5790_v63  ;;  %v5811_v63 = vld [vmem:[%s5103_s20 + $0x758] sm:$0xff] }
  0xfb   : > { %14621 = vst [vmem:[#allocation235_spill] sm:$0xff] %v5793_v0  ;;  %v5814_v0 = vld [vmem:[%s5103_s20 + $0x760] sm:$0xff] }
  0xfc   : > { %14622 = vst [vmem:[#allocation236_spill] sm:$0xff] %v5796_v1  ;;  %v5817_v1 = vld [vmem:[%s5103_s20 + $0x768] sm:$0xff] }
  0xfd   : > { %14623 = vst [vmem:[#allocation237_spill] sm:$0xff] %v5799_v2  ;;  %v5820_v2 = vld [vmem:[%s5103_s20 + $0x770] sm:$0xff] }
  0xfe   : > { %14624 = vst [vmem:[#allocation238_spill] sm:$0xff] %v5802_v60  ;;  %v5823_v60 = vld [vmem:[%s5103_s20 + $0x778] sm:$0xff] }
  0xff   : > { %14625 = vst [vmem:[#allocation239_spill] sm:$0xff] %v5805_v61  ;;  %v5826_v61 = vld [vmem:[%s5103_s20 + $0x780] sm:$0xff] }
 0x100   : > { %14626 = vst [vmem:[#allocation240_spill] sm:$0xff] %v5808_v62  ;;  %v5832_v62 = vld [vmem:[%s5103_s20 + $0x790] sm:$0xff] }
 0x101   : > { %14627 = vst [vmem:[#allocation241_spill] sm:$0xff] %v5811_v63  ;;  %v5835_v63 = vld [vmem:[%s5103_s20 + $0x798] sm:$0xff] }
 0x102   : > { %14628 = vst [vmem:[#allocation242_spill] sm:$0xff] %v5814_v0  ;;  %v5841_v0 = vld [vmem:[%s5103_s20 + $0x7a8] sm:$0xff] }
 0x103   : > { %14629 = vst [vmem:[#allocation243_spill] sm:$0xff] %v5817_v1  ;;  %v5844_v1 = vld [vmem:[%s5103_s20 + $0x7b0] sm:$0xff] }
 0x104   : > { %14630 = vst [vmem:[#allocation244_spill] sm:$0xff] %v5820_v2  ;;  %v5850_v2 = vld [vmem:[%s5103_s20 + $0x7c0] sm:$0xff] }
 0x105   : > { %14631 = vst [vmem:[#allocation245_spill] sm:$0xff] %v5823_v60  ;;  %v5853_v60 = vld [vmem:[%s5103_s20 + $0x7c8] sm:$0xff] }
 0x106   : > { %14632 = vst [vmem:[#allocation246_spill] sm:$0xff] %v5826_v61  ;;  %v5859_v61 = vld [vmem:[%s5103_s20 + $0x7d8] sm:$0xff] }
 0x107   : > { %14633 = vst [vmem:[#allocation247_spill] sm:$0xff] %v5829_v59  ;;  %v5862_v59 = vld [vmem:[%s5103_s20 + $0x7e0] sm:$0xff] }
 0x108   : > { %14634 = vst [vmem:[#allocation248_spill] sm:$0xff] %v5832_v62  ;;  %v5865_v62 = vld [vmem:[%s5103_s20 + $0x7e8] sm:$0xff] }
 0x109   : > { %14635 = vst [vmem:[#allocation249_spill] sm:$0xff] %v5835_v63  ;;  %v5868_v63 = vld [vmem:[%s5103_s20 + $0x7f0] sm:$0xff] }
 0x10a   : > { %14636 = vst [vmem:[#allocation250_spill] sm:$0xff] %v5838_v58  ;;  %v5871_v58 = vld [vmem:[%s5103_s20 + $0x7f8] sm:$0xff] }
 0x10b   : > { %14637 = vst [vmem:[#allocation251_spill] sm:$0xff] %v5841_v0 }
 0x10c   : > { %14638 = vst [vmem:[#allocation252_spill] sm:$0xff] %v5844_v1 }
 0x10d   : > { %14639 = vst [vmem:[#allocation253_spill] sm:$0xff] %v5847_v57 }
 0x10e   : > { %14640 = vst [vmem:[#allocation254_spill] sm:$0xff] %v5850_v2 }
 0x10f   : > { %14641 = vst [vmem:[#allocation255_spill] sm:$0xff] %v5853_v60 }
 0x110   : > { %14642 = vst [vmem:[#allocation256_spill] sm:$0xff] %v5856_v56 }
 0x111   : > { %14643 = vst [vmem:[#allocation257_spill] sm:$0xff] %v5859_v61  ;;  %440 = sbr.rel (%p5000_p6) target bundleno = 870 (0x366), region = 32 }
 0x112   : > { %14644 = vst [vmem:[#allocation258_spill] sm:$0xff] %v5862_v59 }
 0x113   : > { %14645 = vst [vmem:[#allocation259_spill] sm:$0xff] %v5865_v62 }
 0x114   : > { %14646 = vst [vmem:[#allocation260_spill] sm:$0xff] %v5868_v63 }
 0x115   : > { %14647 = vst [vmem:[#allocation261_spill] sm:$0xff] %v5871_v58 }
 0x116   : > { %v442_v60 = vadd.f32 %v5109_v4, %v5106_v3  ;;  %v706_v56 = vmul.f32 %v5106_v3, %v5106_v3  ;;  %v707_v59 = vmul.f32 %v5109_v4, %v5109_v4  ;;  %v708_v63 = vmul.f32 %v5112_v5, %v5112_v5 }
 0x117   : > { %v709_v61 = vmul.f32 %v5115_v6, %v5115_v6  ;;  %v710_v1 = vmul.f32 %v5118_v7, %v5118_v7 }
 0x118   : > { %v443_v62 = vadd.f32 %v442_v60, %v5112_v5  ;;  %v962_v2 = vadd.f32 %v707_v59, %v706_v56  ;;  %v711_v60 = vmul.f32 %v5121_v8, %v5121_v8 }
 0x11a   : > { %v444_v58 = vadd.f32 %v443_v62, %v5115_v6  ;;  %v963_v0 = vadd.f32 %v962_v2, %v708_v63  ;;  %v712_v62 = vmul.f32 %v5124_v9, %v5124_v9 }
 0x11c   : > { %v445_v57 = vadd.f32 %v444_v58, %v5118_v7  ;;  %v964_v4 = vadd.f32 %v963_v0, %v709_v61  ;;  %v713_v58 = vmul.f32 %v5127_v10, %v5127_v10 }
 0x11e   : > { %v446_v3 = vadd.f32 %v445_v57, %v5121_v8  ;;  %v965_v55 = vadd.f32 %v964_v4, %v710_v1  ;;  %v714_v57 = vmul.f32 %v5130_v11, %v5130_v11 }
 0x120   : > { %v447_v5 = vadd.f32 %v446_v3, %v5124_v9  ;;  %v966_v59 = vadd.f32 %v965_v55, %v711_v60  ;;  %v715_v3 = vmul.f32 %v5133_v12, %v5133_v12  ;;  %v717_v60 = vmul.f32 %v5139_v14, %v5139_v14 }
 0x122   : > { %v448_v56 = vadd.f32 %v447_v5, %v5127_v10  ;;  %v967_v2 = vadd.f32 %v966_v59, %v712_v62  ;;  %v716_v5 = vmul.f32 %v5136_v13, %v5136_v13  ;;  %v718_v59 = vmul.f32 %v5142_v15, %v5142_v15 }
 0x124   : > { %v449_v63 = vadd.f32 %v448_v56, %v5130_v11  ;;  %v968_v0 = vadd.f32 %v967_v2, %v713_v58  ;;  %v719_v2 = vmul.f32 %v5145_v16, %v5145_v16 }
 0x126   : > { %v450_v61 = vadd.f32 %v449_v63, %v5133_v12  ;;  %v969_v1 = vadd.f32 %v968_v0, %v714_v57  ;;  %v720_v0 = vmul.f32 %v5148_v17, %v5148_v17 }
 0x128   : > { %v451_v4 = vadd.f32 %v450_v61, %v5136_v13  ;;  %v970_v56 = vadd.f32 %v969_v1, %v715_v3  ;;  %v721_v1 = vmul.f32 %v5151_v18, %v5151_v18 }
 0x12a   : > { %v452_v55 = vadd.f32 %v451_v4, %v5139_v14  ;;  %v971_v63 = vadd.f32 %v970_v56, %v716_v5  ;;  %v722_v56 = vmul.f32 %v5154_v19, %v5154_v19 }
 0x12c   : > { %v453_v62 = vadd.f32 %v452_v55, %v5142_v15  ;;  %v972_v61 = vadd.f32 %v971_v63, %v717_v60  ;;  %v723_v63 = vmul.f32 %v5157_v20, %v5157_v20 }
 0x12e   : > { %v454_v58 = vadd.f32 %v453_v62, %v5145_v16  ;;  %v973_v4 = vadd.f32 %v972_v61, %v718_v59  ;;  %v724_v61 = vmul.f32 %v5160_v21, %v5160_v21 }
 0x130   : > { %v455_v57 = vadd.f32 %v454_v58, %v5148_v17  ;;  %v974_v55 = vadd.f32 %v973_v4, %v719_v2  ;;  %v725_v4 = vmul.f32 %v5163_v22, %v5163_v22 }
 0x132   : > { %v456_v3 = vadd.f32 %v455_v57, %v5151_v18  ;;  %v975_v62 = vadd.f32 %v974_v55, %v720_v0  ;;  %v726_v55 = vmul.f32 %v5166_v23, %v5166_v23 }
 0x134   : > { %v457_v5 = vadd.f32 %v456_v3, %v5154_v19  ;;  %v976_v58 = vadd.f32 %v975_v62, %v721_v1  ;;  %v727_v62 = vmul.f32 %v5169_v24, %v5169_v24 }
 0x136   : > { %v458_v60 = vadd.f32 %v457_v5, %v5157_v20  ;;  %v977_v57 = vadd.f32 %v976_v58, %v722_v56  ;;  %v728_v58 = vmul.f32 %v5172_v25, %v5172_v25 }
 0x138   : > { %v459_v59 = vadd.f32 %v458_v60, %v5160_v21  ;;  %v978_v3 = vadd.f32 %v977_v57, %v723_v63  ;;  %v729_v57 = vmul.f32 %v5175_v26, %v5175_v26 }
 0x13a   : > { %v460_v2 = vadd.f32 %v459_v59, %v5163_v22  ;;  %v979_v5 = vadd.f32 %v978_v3, %v724_v61  ;;  %v730_v3 = vmul.f32 %v5178_v27, %v5178_v27 }
 0x13c   : > { %v461_v0 = vadd.f32 %v460_v2, %v5166_v23  ;;  %v980_v60 = vadd.f32 %v979_v5, %v725_v4  ;;  %v731_v5 = vmul.f32 %v5181_v28, %v5181_v28 }
 0x13e   : > { %v462_v1 = vadd.f32 %v461_v0, %v5169_v24  ;;  %v981_v59 = vadd.f32 %v980_v60, %v726_v55  ;;  %v732_v60 = vmul.f32 %v5184_v29, %v5184_v29 }
 0x140   : > { %v463_v56 = vadd.f32 %v462_v1, %v5172_v25  ;;  %v982_v2 = vadd.f32 %v981_v59, %v727_v62  ;;  %v733_v59 = vmul.f32 %v5187_v30, %v5187_v30 }
 0x142   : > { %v464_v63 = vadd.f32 %v463_v56, %v5175_v26  ;;  %v983_v0 = vadd.f32 %v982_v2, %v728_v58  ;;  %v734_v2 = vmul.f32 %v5190_v31, %v5190_v31 }
 0x144   : > { %v465_v61 = vadd.f32 %v464_v63, %v5178_v27  ;;  %v984_v1 = vadd.f32 %v983_v0, %v729_v57  ;;  %v735_v0 = vmul.f32 %v5193_v32, %v5193_v32 }
 0x146   : > { %v466_v4 = vadd.f32 %v465_v61, %v5181_v28  ;;  %v985_v56 = vadd.f32 %v984_v1, %v730_v3  ;;  %v736_v1 = vmul.f32 %v5196_v33, %v5196_v33 }
 0x148   : > { %v467_v55 = vadd.f32 %v466_v4, %v5184_v29  ;;  %v986_v63 = vadd.f32 %v985_v56, %v731_v5  ;;  %v737_v56 = vmul.f32 %v5199_v34, %v5199_v34 }
 0x14a   : > { %v468_v62 = vadd.f32 %v467_v55, %v5187_v30  ;;  %v987_v61 = vadd.f32 %v986_v63, %v732_v60  ;;  %v738_v63 = vmul.f32 %v5202_v35, %v5202_v35 }
 0x14c   : > { %v469_v58 = vadd.f32 %v468_v62, %v5190_v31  ;;  %v988_v4 = vadd.f32 %v987_v61, %v733_v59  ;;  %v739_v61 = vmul.f32 %v5205_v36, %v5205_v36 }
 0x14e   : > { %v470_v57 = vadd.f32 %v469_v58, %v5193_v32  ;;  %v989_v55 = vadd.f32 %v988_v4, %v734_v2  ;;  %v740_v4 = vmul.f32 %v5208_v37, %v5208_v37 }
 0x150   : > { %v471_v3 = vadd.f32 %v470_v57, %v5196_v33  ;;  %v990_v62 = vadd.f32 %v989_v55, %v735_v0  ;;  %v741_v55 = vmul.f32 %v5211_v38, %v5211_v38 }
 0x152   : > { %v472_v5 = vadd.f32 %v471_v3, %v5199_v34  ;;  %v991_v58 = vadd.f32 %v990_v62, %v736_v1  ;;  %v742_v62 = vmul.f32 %v5214_v39, %v5214_v39 }
 0x154   : > { %v473_v60 = vadd.f32 %v472_v5, %v5202_v35  ;;  %v992_v57 = vadd.f32 %v991_v58, %v737_v56  ;;  %v743_v58 = vmul.f32 %v5217_v40, %v5217_v40 }
 0x156   : > { %v474_v59 = vadd.f32 %v473_v60, %v5205_v36  ;;  %v993_v3 = vadd.f32 %v992_v57, %v738_v63  ;;  %v744_v57 = vmul.f32 %v5220_v41, %v5220_v41 }
 0x158   : > { %v475_v2 = vadd.f32 %v474_v59, %v5208_v37  ;;  %v994_v5 = vadd.f32 %v993_v3, %v739_v61  ;;  %v745_v3 = vmul.f32 %v5223_v42, %v5223_v42 }
 0x15a   : > { %v476_v0 = vadd.f32 %v475_v2, %v5211_v38  ;;  %v995_v60 = vadd.f32 %v994_v5, %v740_v4  ;;  %v746_v5 = vmul.f32 %v5226_v43, %v5226_v43 }
 0x15c   : > { %v477_v1 = vadd.f32 %v476_v0, %v5214_v39  ;;  %v996_v59 = vadd.f32 %v995_v60, %v741_v55  ;;  %v747_v60 = vmul.f32 %v5229_v44, %v5229_v44 }
 0x15e   : > { %v478_v56 = vadd.f32 %v477_v1, %v5217_v40  ;;  %v997_v2 = vadd.f32 %v996_v59, %v742_v62  ;;  %v748_v59 = vmul.f32 %v5232_v45, %v5232_v45 }
 0x160   : > { %v479_v63 = vadd.f32 %v478_v56, %v5220_v41  ;;  %v998_v0 = vadd.f32 %v997_v2, %v743_v58  ;;  %v749_v2 = vmul.f32 %v5235_v46, %v5235_v46 }
 0x162   : > { %v480_v61 = vadd.f32 %v479_v63, %v5223_v42  ;;  %v999_v1 = vadd.f32 %v998_v0, %v744_v57  ;;  %v750_v0 = vmul.f32 %v5238_v47, %v5238_v47 }
 0x164   : > { %v481_v4 = vadd.f32 %v480_v61, %v5226_v43  ;;  %v1000_v56 = vadd.f32 %v999_v1, %v745_v3  ;;  %v751_v1 = vmul.f32 %v5241_v48, %v5241_v48 }
 0x166   : > { %v482_v55 = vadd.f32 %v481_v4, %v5229_v44  ;;  %v1001_v63 = vadd.f32 %v1000_v56, %v746_v5  ;;  %v752_v56 = vmul.f32 %v5244_v49, %v5244_v49 }
 0x168   : > { %v483_v62 = vadd.f32 %v482_v55, %v5232_v45  ;;  %v1002_v61 = vadd.f32 %v1001_v63, %v747_v60  ;;  %v753_v63 = vmul.f32 %v5247_v50, %v5247_v50 }
 0x16a   : > { %v484_v58 = vadd.f32 %v483_v62, %v5235_v46  ;;  %v1003_v4 = vadd.f32 %v1002_v61, %v748_v59  ;;  %v754_v61 = vmul.f32 %v5250_v51, %v5250_v51 }
 0x16c   : > { %v485_v57 = vadd.f32 %v484_v58, %v5238_v47  ;;  %v1004_v55 = vadd.f32 %v1003_v4, %v749_v2  ;;  %v755_v4 = vmul.f32 %v5253_v52, %v5253_v52 }
 0x16e   : > { %v486_v3 = vadd.f32 %v485_v57, %v5241_v48  ;;  %v1005_v62 = vadd.f32 %v1004_v55, %v750_v0  ;;  %v756_v55 = vmul.f32 %v5256_v53, %v5256_v53 }
 0x170   : > { %v487_v5 = vadd.f32 %v486_v3, %v5244_v49  ;;  %v1006_v58 = vadd.f32 %v1005_v62, %v751_v1  ;;  %v757_v62 = vmul.f32 %v5259_v54, %v5259_v54 }
 0x172   : > { %v488_v60 = vadd.f32 %v487_v5, %v5247_v50  ;;  %v1007_v57 = vadd.f32 %v1006_v58, %v752_v56 }
 0x174   : > { %v489_v59 = vadd.f32 %v488_v60, %v5250_v51  ;;  %v1008_v3 = vadd.f32 %v1007_v57, %v753_v63  ;;  %v14648_v51 = vld [vmem:[#allocation58_spill] sm:$0xff] }
 0x175   : > { %v758_v58 = vmul.f32 %v14648_v51, %v14648_v51 }
 0x176   : > { %v490_v2 = vadd.f32 %v489_v59, %v5253_v52  ;;  %v1009_v5 = vadd.f32 %v1008_v3, %v754_v61  ;;  %v14649_v52 = vld [vmem:[#allocation59_spill] sm:$0xff] }
 0x177   : > { %v759_v57 = vmul.f32 %v14649_v52, %v14649_v52 }
 0x178   : > { %v491_v0 = vadd.f32 %v490_v2, %v5256_v53  ;;  %v1010_v60 = vadd.f32 %v1009_v5, %v755_v4  ;;  %v14650_v53 = vld [vmem:[#allocation60_spill] sm:$0xff] }
 0x179   : > { %v760_v3 = vmul.f32 %v14650_v53, %v14650_v53 }
 0x17a   : > { %v492_v1 = vadd.f32 %v491_v0, %v5259_v54  ;;  %v1011_v59 = vadd.f32 %v1010_v60, %v756_v55  ;;  %v14651_v54 = vld [vmem:[#allocation61_spill] sm:$0xff] }
 0x17b   : > { %v761_v5 = vmul.f32 %v14651_v54, %v14651_v54 }
 0x17c   : > { %v493_v56 = vadd.f32 %v492_v1, %v14648_v51  ;;  %v1012_v2 = vadd.f32 %v1011_v59, %v757_v62  ;;  %v14652_v51 = vld [vmem:[#allocation62_spill] sm:$0xff] }
 0x17d   : > { %v762_v60 = vmul.f32 %v14652_v51, %v14652_v51 }
 0x17e   : > { %v494_v63 = vadd.f32 %v493_v56, %v14649_v52  ;;  %v1013_v0 = vadd.f32 %v1012_v2, %v758_v58  ;;  %v14653_v52 = vld [vmem:[#allocation63_spill] sm:$0xff] }
 0x17f   : > { %v763_v59 = vmul.f32 %v14653_v52, %v14653_v52 }
 0x180   : > { %v495_v61 = vadd.f32 %v494_v63, %v14650_v53  ;;  %v1014_v1 = vadd.f32 %v1013_v0, %v759_v57  ;;  %v14654_v53 = vld [vmem:[#allocation64_spill] sm:$0xff] }
 0x181   : > { %v764_v2 = vmul.f32 %v14654_v53, %v14654_v53 }
 0x182   : > { %v496_v4 = vadd.f32 %v495_v61, %v14651_v54  ;;  %v1015_v56 = vadd.f32 %v1014_v1, %v760_v3  ;;  %v14655_v54 = vld [vmem:[#allocation65_spill] sm:$0xff] }
 0x183   : > { %v765_v0 = vmul.f32 %v14655_v54, %v14655_v54 }
 0x184   : > { %v497_v55 = vadd.f32 %v496_v4, %v14652_v51  ;;  %v1016_v63 = vadd.f32 %v1015_v56, %v761_v5  ;;  %v14656_v51 = vld [vmem:[#allocation66_spill] sm:$0xff] }
 0x185   : > { %v766_v1 = vmul.f32 %v14656_v51, %v14656_v51 }
 0x186   : > { %v498_v62 = vadd.f32 %v497_v55, %v14653_v52  ;;  %v1017_v61 = vadd.f32 %v1016_v63, %v762_v60  ;;  %v14657_v52 = vld [vmem:[#allocation67_spill] sm:$0xff] }
 0x187   : > { %v767_v56 = vmul.f32 %v14657_v52, %v14657_v52 }
 0x188   : > { %v499_v58 = vadd.f32 %v498_v62, %v14654_v53  ;;  %v1018_v4 = vadd.f32 %v1017_v61, %v763_v59  ;;  %v14658_v53 = vld [vmem:[#allocation68_spill] sm:$0xff] }
 0x189   : > { %v768_v63 = vmul.f32 %v14658_v53, %v14658_v53 }
 0x18a   : > { %v500_v57 = vadd.f32 %v499_v58, %v14655_v54  ;;  %v1019_v55 = vadd.f32 %v1018_v4, %v764_v2  ;;  %v14659_v54 = vld [vmem:[#allocation69_spill] sm:$0xff] }
 0x18b   : > { %v769_v61 = vmul.f32 %v14659_v54, %v14659_v54 }
 0x18c   : > { %v501_v3 = vadd.f32 %v500_v57, %v14656_v51  ;;  %v1020_v62 = vadd.f32 %v1019_v55, %v765_v0  ;;  %v14660_v51 = vld [vmem:[#allocation70_spill] sm:$0xff] }
 0x18d   : > { %v770_v4 = vmul.f32 %v14660_v51, %v14660_v51 }
 0x18e   : > { %v502_v5 = vadd.f32 %v501_v3, %v14657_v52  ;;  %v1021_v58 = vadd.f32 %v1020_v62, %v766_v1  ;;  %v14661_v52 = vld [vmem:[#allocation71_spill] sm:$0xff] }
 0x18f   : > { %v771_v55 = vmul.f32 %v14661_v52, %v14661_v52 }
 0x190   : > { %v503_v60 = vadd.f32 %v502_v5, %v14658_v53  ;;  %v1022_v57 = vadd.f32 %v1021_v58, %v767_v56  ;;  %v14662_v53 = vld [vmem:[#allocation72_spill] sm:$0xff] }
 0x191   : > { %v772_v62 = vmul.f32 %v14662_v53, %v14662_v53 }
 0x192   : > { %v504_v59 = vadd.f32 %v503_v60, %v14659_v54  ;;  %v1023_v3 = vadd.f32 %v1022_v57, %v768_v63  ;;  %v14663_v54 = vld [vmem:[#allocation73_spill] sm:$0xff] }
 0x193   : > { %v773_v58 = vmul.f32 %v14663_v54, %v14663_v54 }
 0x194   : > { %v505_v2 = vadd.f32 %v504_v59, %v14660_v51  ;;  %v1024_v5 = vadd.f32 %v1023_v3, %v769_v61  ;;  %v14664_v51 = vld [vmem:[#allocation74_spill] sm:$0xff] }
 0x195   : > { %v774_v57 = vmul.f32 %v14664_v51, %v14664_v51 }
 0x196   : > { %v506_v0 = vadd.f32 %v505_v2, %v14661_v52  ;;  %v1025_v60 = vadd.f32 %v1024_v5, %v770_v4  ;;  %v14665_v52 = vld [vmem:[#allocation75_spill] sm:$0xff] }
 0x197   : > { %v775_v3 = vmul.f32 %v14665_v52, %v14665_v52 }
 0x198   : > { %v507_v1 = vadd.f32 %v506_v0, %v14662_v53  ;;  %v1026_v59 = vadd.f32 %v1025_v60, %v771_v55  ;;  %v14666_v53 = vld [vmem:[#allocation76_spill] sm:$0xff] }
 0x199   : > { %v776_v5 = vmul.f32 %v14666_v53, %v14666_v53 }
 0x19a   : > { %v508_v56 = vadd.f32 %v507_v1, %v14663_v54  ;;  %v1027_v2 = vadd.f32 %v1026_v59, %v772_v62  ;;  %v14667_v54 = vld [vmem:[#allocation77_spill] sm:$0xff] }
 0x19b   : > { %v777_v60 = vmul.f32 %v14667_v54, %v14667_v54 }
 0x19c   : > { %v509_v63 = vadd.f32 %v508_v56, %v14664_v51  ;;  %v1028_v0 = vadd.f32 %v1027_v2, %v773_v58  ;;  %v14668_v51 = vld [vmem:[#allocation78_spill] sm:$0xff] }
 0x19d   : > { %v778_v59 = vmul.f32 %v14668_v51, %v14668_v51 }
 0x19e   : > { %v510_v61 = vadd.f32 %v509_v63, %v14665_v52  ;;  %v1029_v1 = vadd.f32 %v1028_v0, %v774_v57  ;;  %v14669_v52 = vld [vmem:[#allocation79_spill] sm:$0xff] }
 0x19f   : > { %v779_v2 = vmul.f32 %v14669_v52, %v14669_v52 }
 0x1a0   : > { %v511_v4 = vadd.f32 %v510_v61, %v14666_v53  ;;  %v1030_v56 = vadd.f32 %v1029_v1, %v775_v3  ;;  %v14670_v53 = vld [vmem:[#allocation80_spill] sm:$0xff] }
 0x1a1   : > { %v780_v0 = vmul.f32 %v14670_v53, %v14670_v53 }
 0x1a2   : > { %v512_v55 = vadd.f32 %v511_v4, %v14667_v54  ;;  %v1031_v63 = vadd.f32 %v1030_v56, %v776_v5  ;;  %v14671_v54 = vld [vmem:[#allocation81_spill] sm:$0xff] }
 0x1a3   : > { %v781_v1 = vmul.f32 %v14671_v54, %v14671_v54 }
 0x1a4   : > { %v513_v62 = vadd.f32 %v512_v55, %v14668_v51  ;;  %v1032_v61 = vadd.f32 %v1031_v63, %v777_v60  ;;  %v14672_v51 = vld [vmem:[#allocation82_spill] sm:$0xff] }
 0x1a5   : > { %v782_v56 = vmul.f32 %v14672_v51, %v14672_v51 }
 0x1a6   : > { %v514_v58 = vadd.f32 %v513_v62, %v14669_v52  ;;  %v1033_v4 = vadd.f32 %v1032_v61, %v778_v59  ;;  %v14673_v52 = vld [vmem:[#allocation83_spill] sm:$0xff] }
 0x1a7   : > { %v783_v63 = vmul.f32 %v14673_v52, %v14673_v52 }
 0x1a8   : > { %v515_v57 = vadd.f32 %v514_v58, %v14670_v53  ;;  %v1034_v55 = vadd.f32 %v1033_v4, %v779_v2  ;;  %v14674_v53 = vld [vmem:[#allocation84_spill] sm:$0xff] }
 0x1a9   : > { %v784_v61 = vmul.f32 %v14674_v53, %v14674_v53 }
 0x1aa   : > { %v516_v3 = vadd.f32 %v515_v57, %v14671_v54  ;;  %v1035_v62 = vadd.f32 %v1034_v55, %v780_v0  ;;  %v14675_v54 = vld [vmem:[#allocation85_spill] sm:$0xff] }
 0x1ab   : > { %v785_v4 = vmul.f32 %v14675_v54, %v14675_v54 }
 0x1ac   : > { %v517_v5 = vadd.f32 %v516_v3, %v14672_v51  ;;  %v1036_v58 = vadd.f32 %v1035_v62, %v781_v1  ;;  %v14676_v51 = vld [vmem:[#allocation86_spill] sm:$0xff] }
 0x1ad   : > { %v786_v55 = vmul.f32 %v14676_v51, %v14676_v51 }
 0x1ae   : > { %v518_v60 = vadd.f32 %v517_v5, %v14673_v52  ;;  %v1037_v57 = vadd.f32 %v1036_v58, %v782_v56  ;;  %v14677_v52 = vld [vmem:[#allocation87_spill] sm:$0xff] }
 0x1af   : > { %v787_v62 = vmul.f32 %v14677_v52, %v14677_v52 }
 0x1b0   : > { %v519_v59 = vadd.f32 %v518_v60, %v14674_v53  ;;  %v1038_v3 = vadd.f32 %v1037_v57, %v783_v63  ;;  %v14678_v53 = vld [vmem:[#allocation88_spill] sm:$0xff] }
 0x1b1   : > { %v788_v58 = vmul.f32 %v14678_v53, %v14678_v53 }
 0x1b2   : > { %v520_v2 = vadd.f32 %v519_v59, %v14675_v54  ;;  %v1039_v5 = vadd.f32 %v1038_v3, %v784_v61  ;;  %v14679_v54 = vld [vmem:[#allocation89_spill] sm:$0xff] }
 0x1b3   : > { %v789_v57 = vmul.f32 %v14679_v54, %v14679_v54 }
 0x1b4   : > { %v521_v0 = vadd.f32 %v520_v2, %v14676_v51  ;;  %v1040_v60 = vadd.f32 %v1039_v5, %v785_v4  ;;  %v14680_v51 = vld [vmem:[#allocation90_spill] sm:$0xff] }
 0x1b5   : > { %v790_v3 = vmul.f32 %v14680_v51, %v14680_v51 }
 0x1b6   : > { %v522_v1 = vadd.f32 %v521_v0, %v14677_v52  ;;  %v1041_v59 = vadd.f32 %v1040_v60, %v786_v55  ;;  %v14681_v52 = vld [vmem:[#allocation91_spill] sm:$0xff] }
 0x1b7   : > { %v791_v5 = vmul.f32 %v14681_v52, %v14681_v52 }
 0x1b8   : > { %v523_v56 = vadd.f32 %v522_v1, %v14678_v53  ;;  %v1042_v2 = vadd.f32 %v1041_v59, %v787_v62  ;;  %v14682_v53 = vld [vmem:[#allocation92_spill] sm:$0xff] }
 0x1b9   : > { %v792_v60 = vmul.f32 %v14682_v53, %v14682_v53 }
 0x1ba   : > { %v524_v63 = vadd.f32 %v523_v56, %v14679_v54  ;;  %v1043_v0 = vadd.f32 %v1042_v2, %v788_v58  ;;  %v14683_v54 = vld [vmem:[#allocation93_spill] sm:$0xff] }
 0x1bb   : > { %v793_v59 = vmul.f32 %v14683_v54, %v14683_v54 }
 0x1bc   : > { %v525_v61 = vadd.f32 %v524_v63, %v14680_v51  ;;  %v1044_v1 = vadd.f32 %v1043_v0, %v789_v57  ;;  %v14684_v51 = vld [vmem:[#allocation94_spill] sm:$0xff] }
 0x1bd   : > { %v794_v2 = vmul.f32 %v14684_v51, %v14684_v51 }
 0x1be   : > { %v526_v4 = vadd.f32 %v525_v61, %v14681_v52  ;;  %v1045_v56 = vadd.f32 %v1044_v1, %v790_v3  ;;  %v14685_v52 = vld [vmem:[#allocation95_spill] sm:$0xff] }
 0x1bf   : > { %v795_v0 = vmul.f32 %v14685_v52, %v14685_v52 }
 0x1c0   : > { %v527_v55 = vadd.f32 %v526_v4, %v14682_v53  ;;  %v1046_v63 = vadd.f32 %v1045_v56, %v791_v5  ;;  %v14686_v53 = vld [vmem:[#allocation96_spill] sm:$0xff] }
 0x1c1   : > { %v796_v1 = vmul.f32 %v14686_v53, %v14686_v53 }
 0x1c2   : > { %v528_v62 = vadd.f32 %v527_v55, %v14683_v54  ;;  %v1047_v61 = vadd.f32 %v1046_v63, %v792_v60  ;;  %v14687_v54 = vld [vmem:[#allocation97_spill] sm:$0xff] }
 0x1c3   : > { %v797_v56 = vmul.f32 %v14687_v54, %v14687_v54 }
 0x1c4   : > { %v529_v58 = vadd.f32 %v528_v62, %v14684_v51  ;;  %v1048_v4 = vadd.f32 %v1047_v61, %v793_v59  ;;  %v14688_v51 = vld [vmem:[#allocation98_spill] sm:$0xff] }
 0x1c5   : > { %v798_v63 = vmul.f32 %v14688_v51, %v14688_v51 }
 0x1c6   : > { %v530_v57 = vadd.f32 %v529_v58, %v14685_v52  ;;  %v1049_v55 = vadd.f32 %v1048_v4, %v794_v2  ;;  %v14689_v52 = vld [vmem:[#allocation99_spill] sm:$0xff] }
 0x1c7   : > { %v799_v61 = vmul.f32 %v14689_v52, %v14689_v52 }
 0x1c8   : > { %v531_v3 = vadd.f32 %v530_v57, %v14686_v53  ;;  %v1050_v62 = vadd.f32 %v1049_v55, %v795_v0  ;;  %v14690_v53 = vld [vmem:[#allocation100_spill] sm:$0xff] }
 0x1c9   : > { %v800_v4 = vmul.f32 %v14690_v53, %v14690_v53 }
 0x1ca   : > { %v532_v5 = vadd.f32 %v531_v3, %v14687_v54  ;;  %v1051_v58 = vadd.f32 %v1050_v62, %v796_v1  ;;  %v14691_v54 = vld [vmem:[#allocation101_spill] sm:$0xff] }
 0x1cb   : > { %v801_v55 = vmul.f32 %v14691_v54, %v14691_v54 }
 0x1cc   : > { %v533_v60 = vadd.f32 %v532_v5, %v14688_v51  ;;  %v1052_v57 = vadd.f32 %v1051_v58, %v797_v56  ;;  %v14692_v51 = vld [vmem:[#allocation102_spill] sm:$0xff] }
 0x1cd   : > { %v802_v62 = vmul.f32 %v14692_v51, %v14692_v51 }
 0x1ce   : > { %v534_v59 = vadd.f32 %v533_v60, %v14689_v52  ;;  %v1053_v3 = vadd.f32 %v1052_v57, %v798_v63  ;;  %v14693_v52 = vld [vmem:[#allocation103_spill] sm:$0xff] }
 0x1cf   : > { %v803_v58 = vmul.f32 %v14693_v52, %v14693_v52 }
 0x1d0   : > { %v535_v2 = vadd.f32 %v534_v59, %v14690_v53  ;;  %v1054_v5 = vadd.f32 %v1053_v3, %v799_v61  ;;  %v14694_v53 = vld [vmem:[#allocation104_spill] sm:$0xff] }
 0x1d1   : > { %v804_v57 = vmul.f32 %v14694_v53, %v14694_v53 }
 0x1d2   : > { %v536_v0 = vadd.f32 %v535_v2, %v14691_v54  ;;  %v1055_v60 = vadd.f32 %v1054_v5, %v800_v4  ;;  %v14695_v54 = vld [vmem:[#allocation105_spill] sm:$0xff] }
 0x1d3   : > { %v805_v3 = vmul.f32 %v14695_v54, %v14695_v54 }
 0x1d4   : > { %v537_v1 = vadd.f32 %v536_v0, %v14692_v51  ;;  %v1056_v59 = vadd.f32 %v1055_v60, %v801_v55  ;;  %v14696_v51 = vld [vmem:[#allocation106_spill] sm:$0xff] }
 0x1d5   : > { %v806_v5 = vmul.f32 %v14696_v51, %v14696_v51 }
 0x1d6   : > { %v538_v56 = vadd.f32 %v537_v1, %v14693_v52  ;;  %v1057_v2 = vadd.f32 %v1056_v59, %v802_v62  ;;  %v14697_v52 = vld [vmem:[#allocation107_spill] sm:$0xff] }
 0x1d7   : > { %v807_v60 = vmul.f32 %v14697_v52, %v14697_v52 }
 0x1d8   : > { %v539_v63 = vadd.f32 %v538_v56, %v14694_v53  ;;  %v1058_v0 = vadd.f32 %v1057_v2, %v803_v58  ;;  %v14698_v53 = vld [vmem:[#allocation108_spill] sm:$0xff] }
 0x1d9   : > { %v808_v59 = vmul.f32 %v14698_v53, %v14698_v53 }
 0x1da   : > { %v540_v61 = vadd.f32 %v539_v63, %v14695_v54  ;;  %v1059_v1 = vadd.f32 %v1058_v0, %v804_v57  ;;  %v14699_v54 = vld [vmem:[#allocation109_spill] sm:$0xff] }
 0x1db   : > { %v809_v2 = vmul.f32 %v14699_v54, %v14699_v54 }
 0x1dc   : > { %v541_v4 = vadd.f32 %v540_v61, %v14696_v51  ;;  %v1060_v56 = vadd.f32 %v1059_v1, %v805_v3  ;;  %v14700_v51 = vld [vmem:[#allocation110_spill] sm:$0xff] }
 0x1dd   : > { %v810_v0 = vmul.f32 %v14700_v51, %v14700_v51 }
 0x1de   : > { %v542_v55 = vadd.f32 %v541_v4, %v14697_v52  ;;  %v1061_v63 = vadd.f32 %v1060_v56, %v806_v5  ;;  %v14701_v52 = vld [vmem:[#allocation111_spill] sm:$0xff] }
 0x1df   : > { %v811_v1 = vmul.f32 %v14701_v52, %v14701_v52 }
 0x1e0   : > { %v543_v62 = vadd.f32 %v542_v55, %v14698_v53  ;;  %v1062_v61 = vadd.f32 %v1061_v63, %v807_v60  ;;  %v14702_v53 = vld [vmem:[#allocation112_spill] sm:$0xff] }
 0x1e1   : > { %v812_v56 = vmul.f32 %v14702_v53, %v14702_v53 }
 0x1e2   : > { %v544_v58 = vadd.f32 %v543_v62, %v14699_v54  ;;  %v1063_v4 = vadd.f32 %v1062_v61, %v808_v59  ;;  %v14703_v54 = vld [vmem:[#allocation113_spill] sm:$0xff] }
 0x1e3   : > { %v813_v63 = vmul.f32 %v14703_v54, %v14703_v54 }
 0x1e4   : > { %v545_v57 = vadd.f32 %v544_v58, %v14700_v51  ;;  %v1064_v55 = vadd.f32 %v1063_v4, %v809_v2  ;;  %v14704_v51 = vld [vmem:[#allocation114_spill] sm:$0xff] }
 0x1e5   : > { %v814_v61 = vmul.f32 %v14704_v51, %v14704_v51 }
 0x1e6   : > { %v546_v3 = vadd.f32 %v545_v57, %v14701_v52  ;;  %v1065_v62 = vadd.f32 %v1064_v55, %v810_v0  ;;  %v14705_v52 = vld [vmem:[#allocation115_spill] sm:$0xff] }
 0x1e7   : > { %v815_v4 = vmul.f32 %v14705_v52, %v14705_v52 }
 0x1e8   : > { %v547_v5 = vadd.f32 %v546_v3, %v14702_v53  ;;  %v1066_v58 = vadd.f32 %v1065_v62, %v811_v1  ;;  %v14706_v53 = vld [vmem:[#allocation116_spill] sm:$0xff] }
 0x1e9   : > { %v816_v55 = vmul.f32 %v14706_v53, %v14706_v53 }
 0x1ea   : > { %v548_v60 = vadd.f32 %v547_v5, %v14703_v54  ;;  %v1067_v57 = vadd.f32 %v1066_v58, %v812_v56  ;;  %v14707_v54 = vld [vmem:[#allocation117_spill] sm:$0xff] }
 0x1eb   : > { %v817_v62 = vmul.f32 %v14707_v54, %v14707_v54 }
 0x1ec   : > { %v549_v59 = vadd.f32 %v548_v60, %v14704_v51  ;;  %v1068_v3 = vadd.f32 %v1067_v57, %v813_v63  ;;  %v14708_v51 = vld [vmem:[#allocation118_spill] sm:$0xff] }
 0x1ed   : > { %v818_v58 = vmul.f32 %v14708_v51, %v14708_v51 }
 0x1ee   : > { %v550_v2 = vadd.f32 %v549_v59, %v14705_v52  ;;  %v1069_v5 = vadd.f32 %v1068_v3, %v814_v61  ;;  %v14709_v52 = vld [vmem:[#allocation119_spill] sm:$0xff] }
 0x1ef   : > { %v819_v57 = vmul.f32 %v14709_v52, %v14709_v52 }
 0x1f0   : > { %v551_v0 = vadd.f32 %v550_v2, %v14706_v53  ;;  %v1070_v60 = vadd.f32 %v1069_v5, %v815_v4  ;;  %v14710_v53 = vld [vmem:[#allocation120_spill] sm:$0xff] }
 0x1f1   : > { %v820_v3 = vmul.f32 %v14710_v53, %v14710_v53 }
 0x1f2   : > { %v552_v1 = vadd.f32 %v551_v0, %v14707_v54  ;;  %v1071_v59 = vadd.f32 %v1070_v60, %v816_v55  ;;  %v14711_v54 = vld [vmem:[#allocation121_spill] sm:$0xff] }
 0x1f3   : > { %v821_v5 = vmul.f32 %v14711_v54, %v14711_v54 }
 0x1f4   : > { %v553_v56 = vadd.f32 %v552_v1, %v14708_v51  ;;  %v1072_v2 = vadd.f32 %v1071_v59, %v817_v62  ;;  %v14712_v51 = vld [vmem:[#allocation122_spill] sm:$0xff] }
 0x1f5   : > { %v822_v60 = vmul.f32 %v14712_v51, %v14712_v51 }
 0x1f6   : > { %v554_v63 = vadd.f32 %v553_v56, %v14709_v52  ;;  %v1073_v0 = vadd.f32 %v1072_v2, %v818_v58  ;;  %v14713_v52 = vld [vmem:[#allocation123_spill] sm:$0xff] }
 0x1f7   : > { %v823_v59 = vmul.f32 %v14713_v52, %v14713_v52 }
 0x1f8   : > { %v555_v61 = vadd.f32 %v554_v63, %v14710_v53  ;;  %v1074_v1 = vadd.f32 %v1073_v0, %v819_v57  ;;  %v14714_v53 = vld [vmem:[#allocation124_spill] sm:$0xff] }
 0x1f9   : > { %v824_v2 = vmul.f32 %v14714_v53, %v14714_v53 }
 0x1fa   : > { %v556_v4 = vadd.f32 %v555_v61, %v14711_v54  ;;  %v1075_v56 = vadd.f32 %v1074_v1, %v820_v3  ;;  %v14715_v54 = vld [vmem:[#allocation125_spill] sm:$0xff] }
 0x1fb   : > { %v825_v0 = vmul.f32 %v14715_v54, %v14715_v54 }
 0x1fc   : > { %v557_v55 = vadd.f32 %v556_v4, %v14712_v51  ;;  %v1076_v63 = vadd.f32 %v1075_v56, %v821_v5  ;;  %v14716_v51 = vld [vmem:[#allocation126_spill] sm:$0xff] }
 0x1fd   : > { %v826_v1 = vmul.f32 %v14716_v51, %v14716_v51 }
 0x1fe   : > { %v558_v62 = vadd.f32 %v557_v55, %v14713_v52  ;;  %v1077_v61 = vadd.f32 %v1076_v63, %v822_v60  ;;  %v14717_v52 = vld [vmem:[#allocation127_spill] sm:$0xff] }
 0x1ff   : > { %v827_v56 = vmul.f32 %v14717_v52, %v14717_v52 }
 0x200   : > { %v559_v58 = vadd.f32 %v558_v62, %v14714_v53  ;;  %v1078_v4 = vadd.f32 %v1077_v61, %v823_v59  ;;  %v14718_v53 = vld [vmem:[#allocation128_spill] sm:$0xff] }
 0x201   : > { %v828_v63 = vmul.f32 %v14718_v53, %v14718_v53 }
 0x202   : > { %v560_v57 = vadd.f32 %v559_v58, %v14715_v54  ;;  %v1079_v55 = vadd.f32 %v1078_v4, %v824_v2  ;;  %v14719_v54 = vld [vmem:[#allocation129_spill] sm:$0xff] }
 0x203   : > { %v829_v61 = vmul.f32 %v14719_v54, %v14719_v54 }
 0x204   : > { %v561_v3 = vadd.f32 %v560_v57, %v14716_v51  ;;  %v1080_v62 = vadd.f32 %v1079_v55, %v825_v0  ;;  %v14720_v51 = vld [vmem:[#allocation130_spill] sm:$0xff] }
 0x205   : > { %v830_v4 = vmul.f32 %v14720_v51, %v14720_v51 }
 0x206   : > { %v562_v5 = vadd.f32 %v561_v3, %v14717_v52  ;;  %v1081_v58 = vadd.f32 %v1080_v62, %v826_v1  ;;  %v14721_v52 = vld [vmem:[#allocation131_spill] sm:$0xff] }
 0x207   : > { %v831_v55 = vmul.f32 %v14721_v52, %v14721_v52 }
 0x208   : > { %v563_v60 = vadd.f32 %v562_v5, %v14718_v53  ;;  %v1082_v57 = vadd.f32 %v1081_v58, %v827_v56  ;;  %v14722_v53 = vld [vmem:[#allocation132_spill] sm:$0xff] }
 0x209   : > { %v832_v62 = vmul.f32 %v14722_v53, %v14722_v53 }
 0x20a   : > { %v564_v59 = vadd.f32 %v563_v60, %v14719_v54  ;;  %v1083_v3 = vadd.f32 %v1082_v57, %v828_v63  ;;  %v14723_v54 = vld [vmem:[#allocation133_spill] sm:$0xff] }
 0x20b   : > { %v833_v58 = vmul.f32 %v14723_v54, %v14723_v54 }
 0x20c   : > { %v565_v2 = vadd.f32 %v564_v59, %v14720_v51  ;;  %v1084_v5 = vadd.f32 %v1083_v3, %v829_v61  ;;  %v14724_v51 = vld [vmem:[#allocation134_spill] sm:$0xff] }
 0x20d   : > { %v834_v57 = vmul.f32 %v14724_v51, %v14724_v51 }
 0x20e   : > { %v566_v0 = vadd.f32 %v565_v2, %v14721_v52  ;;  %v1085_v60 = vadd.f32 %v1084_v5, %v830_v4  ;;  %v14725_v52 = vld [vmem:[#allocation135_spill] sm:$0xff] }
 0x20f   : > { %v835_v3 = vmul.f32 %v14725_v52, %v14725_v52 }
 0x210   : > { %v567_v1 = vadd.f32 %v566_v0, %v14722_v53  ;;  %v1086_v59 = vadd.f32 %v1085_v60, %v831_v55  ;;  %v14726_v53 = vld [vmem:[#allocation136_spill] sm:$0xff] }
 0x211   : > { %v836_v5 = vmul.f32 %v14726_v53, %v14726_v53 }
 0x212   : > { %v568_v56 = vadd.f32 %v567_v1, %v14723_v54  ;;  %v1087_v2 = vadd.f32 %v1086_v59, %v832_v62  ;;  %v14727_v54 = vld [vmem:[#allocation137_spill] sm:$0xff] }
 0x213   : > { %v837_v60 = vmul.f32 %v14727_v54, %v14727_v54 }
 0x214   : > { %v569_v63 = vadd.f32 %v568_v56, %v14724_v51  ;;  %v1088_v0 = vadd.f32 %v1087_v2, %v833_v58  ;;  %v14728_v51 = vld [vmem:[#allocation138_spill] sm:$0xff] }
 0x215   : > { %v838_v59 = vmul.f32 %v14728_v51, %v14728_v51 }
 0x216   : > { %v570_v61 = vadd.f32 %v569_v63, %v14725_v52  ;;  %v1089_v1 = vadd.f32 %v1088_v0, %v834_v57  ;;  %v14729_v52 = vld [vmem:[#allocation139_spill] sm:$0xff] }
 0x217   : > { %v839_v2 = vmul.f32 %v14729_v52, %v14729_v52 }
 0x218   : > { %v571_v4 = vadd.f32 %v570_v61, %v14726_v53  ;;  %v1090_v56 = vadd.f32 %v1089_v1, %v835_v3  ;;  %v14730_v53 = vld [vmem:[#allocation140_spill] sm:$0xff] }
 0x219   : > { %v840_v0 = vmul.f32 %v14730_v53, %v14730_v53 }
 0x21a   : > { %v572_v55 = vadd.f32 %v571_v4, %v14727_v54  ;;  %v1091_v63 = vadd.f32 %v1090_v56, %v836_v5  ;;  %v14731_v54 = vld [vmem:[#allocation141_spill] sm:$0xff] }
 0x21b   : > { %v841_v1 = vmul.f32 %v14731_v54, %v14731_v54 }
 0x21c   : > { %v573_v62 = vadd.f32 %v572_v55, %v14728_v51  ;;  %v1092_v61 = vadd.f32 %v1091_v63, %v837_v60  ;;  %v14732_v51 = vld [vmem:[#allocation142_spill] sm:$0xff] }
 0x21d   : > { %v842_v56 = vmul.f32 %v14732_v51, %v14732_v51 }
 0x21e   : > { %v574_v58 = vadd.f32 %v573_v62, %v14729_v52  ;;  %v1093_v4 = vadd.f32 %v1092_v61, %v838_v59  ;;  %v14733_v52 = vld [vmem:[#allocation143_spill] sm:$0xff] }
 0x21f   : > { %v843_v63 = vmul.f32 %v14733_v52, %v14733_v52 }
 0x220   : > { %v575_v57 = vadd.f32 %v574_v58, %v14730_v53  ;;  %v1094_v55 = vadd.f32 %v1093_v4, %v839_v2  ;;  %v14734_v53 = vld [vmem:[#allocation144_spill] sm:$0xff] }
 0x221   : > { %v844_v61 = vmul.f32 %v14734_v53, %v14734_v53 }
 0x222   : > { %v576_v3 = vadd.f32 %v575_v57, %v14731_v54  ;;  %v1095_v62 = vadd.f32 %v1094_v55, %v840_v0  ;;  %v14735_v54 = vld [vmem:[#allocation145_spill] sm:$0xff] }
 0x223   : > { %v845_v4 = vmul.f32 %v14735_v54, %v14735_v54 }
 0x224   : > { %v577_v5 = vadd.f32 %v576_v3, %v14732_v51  ;;  %v1096_v58 = vadd.f32 %v1095_v62, %v841_v1  ;;  %v14736_v51 = vld [vmem:[#allocation146_spill] sm:$0xff] }
 0x225   : > { %v846_v55 = vmul.f32 %v14736_v51, %v14736_v51 }
 0x226   : > { %v578_v60 = vadd.f32 %v577_v5, %v14733_v52  ;;  %v1097_v57 = vadd.f32 %v1096_v58, %v842_v56  ;;  %v14737_v52 = vld [vmem:[#allocation147_spill] sm:$0xff] }
 0x227   : > { %v847_v62 = vmul.f32 %v14737_v52, %v14737_v52 }
 0x228   : > { %v579_v59 = vadd.f32 %v578_v60, %v14734_v53  ;;  %v1098_v3 = vadd.f32 %v1097_v57, %v843_v63  ;;  %v14738_v53 = vld [vmem:[#allocation148_spill] sm:$0xff] }
 0x229   : > { %v848_v58 = vmul.f32 %v14738_v53, %v14738_v53 }
 0x22a   : > { %v580_v2 = vadd.f32 %v579_v59, %v14735_v54  ;;  %v1099_v5 = vadd.f32 %v1098_v3, %v844_v61  ;;  %v14739_v54 = vld [vmem:[#allocation149_spill] sm:$0xff] }
 0x22b   : > { %v849_v57 = vmul.f32 %v14739_v54, %v14739_v54 }
 0x22c   : > { %v581_v0 = vadd.f32 %v580_v2, %v14736_v51  ;;  %v1100_v60 = vadd.f32 %v1099_v5, %v845_v4  ;;  %v14740_v51 = vld [vmem:[#allocation150_spill] sm:$0xff] }
 0x22d   : > { %v850_v3 = vmul.f32 %v14740_v51, %v14740_v51 }
 0x22e   : > { %v582_v1 = vadd.f32 %v581_v0, %v14737_v52  ;;  %v1101_v59 = vadd.f32 %v1100_v60, %v846_v55  ;;  %v14741_v52 = vld [vmem:[#allocation151_spill] sm:$0xff] }
 0x22f   : > { %v851_v5 = vmul.f32 %v14741_v52, %v14741_v52 }
 0x230   : > { %v583_v56 = vadd.f32 %v582_v1, %v14738_v53  ;;  %v1102_v2 = vadd.f32 %v1101_v59, %v847_v62  ;;  %v14742_v53 = vld [vmem:[#allocation152_spill] sm:$0xff] }
 0x231   : > { %v852_v60 = vmul.f32 %v14742_v53, %v14742_v53 }
 0x232   : > { %v584_v63 = vadd.f32 %v583_v56, %v14739_v54  ;;  %v1103_v0 = vadd.f32 %v1102_v2, %v848_v58  ;;  %v14743_v54 = vld [vmem:[#allocation153_spill] sm:$0xff] }
 0x233   : > { %v853_v59 = vmul.f32 %v14743_v54, %v14743_v54 }
 0x234   : > { %v585_v61 = vadd.f32 %v584_v63, %v14740_v51  ;;  %v1104_v1 = vadd.f32 %v1103_v0, %v849_v57  ;;  %v14744_v51 = vld [vmem:[#allocation154_spill] sm:$0xff] }
 0x235   : > { %v854_v2 = vmul.f32 %v14744_v51, %v14744_v51 }
 0x236   : > { %v586_v4 = vadd.f32 %v585_v61, %v14741_v52  ;;  %v1105_v56 = vadd.f32 %v1104_v1, %v850_v3  ;;  %v14745_v52 = vld [vmem:[#allocation155_spill] sm:$0xff] }
 0x237   : > { %v855_v0 = vmul.f32 %v14745_v52, %v14745_v52 }
 0x238   : > { %v587_v55 = vadd.f32 %v586_v4, %v14742_v53  ;;  %v1106_v63 = vadd.f32 %v1105_v56, %v851_v5  ;;  %v14746_v53 = vld [vmem:[#allocation156_spill] sm:$0xff] }
 0x239   : > { %v856_v1 = vmul.f32 %v14746_v53, %v14746_v53 }
 0x23a   : > { %v588_v62 = vadd.f32 %v587_v55, %v14743_v54  ;;  %v1107_v61 = vadd.f32 %v1106_v63, %v852_v60  ;;  %v14747_v54 = vld [vmem:[#allocation157_spill] sm:$0xff] }
 0x23b   : > { %v857_v56 = vmul.f32 %v14747_v54, %v14747_v54 }
 0x23c   : > { %v589_v58 = vadd.f32 %v588_v62, %v14744_v51  ;;  %v1108_v4 = vadd.f32 %v1107_v61, %v853_v59  ;;  %v14748_v51 = vld [vmem:[#allocation158_spill] sm:$0xff] }
 0x23d   : > { %v858_v63 = vmul.f32 %v14748_v51, %v14748_v51 }
 0x23e   : > { %v590_v57 = vadd.f32 %v589_v58, %v14745_v52  ;;  %v1109_v55 = vadd.f32 %v1108_v4, %v854_v2  ;;  %v14749_v52 = vld [vmem:[#allocation159_spill] sm:$0xff] }
 0x23f   : > { %v859_v61 = vmul.f32 %v14749_v52, %v14749_v52 }
 0x240   : > { %v591_v3 = vadd.f32 %v590_v57, %v14746_v53  ;;  %v1110_v62 = vadd.f32 %v1109_v55, %v855_v0  ;;  %v14750_v53 = vld [vmem:[#allocation160_spill] sm:$0xff] }
 0x241   : > { %v860_v4 = vmul.f32 %v14750_v53, %v14750_v53 }
 0x242   : > { %v592_v5 = vadd.f32 %v591_v3, %v14747_v54  ;;  %v1111_v58 = vadd.f32 %v1110_v62, %v856_v1  ;;  %v14751_v54 = vld [vmem:[#allocation161_spill] sm:$0xff] }
 0x243   : > { %v861_v55 = vmul.f32 %v14751_v54, %v14751_v54 }
 0x244   : > { %v593_v60 = vadd.f32 %v592_v5, %v14748_v51  ;;  %v1112_v57 = vadd.f32 %v1111_v58, %v857_v56  ;;  %v14752_v51 = vld [vmem:[#allocation162_spill] sm:$0xff] }
 0x245   : > { %v862_v62 = vmul.f32 %v14752_v51, %v14752_v51 }
 0x246   : > { %v594_v59 = vadd.f32 %v593_v60, %v14749_v52  ;;  %v1113_v3 = vadd.f32 %v1112_v57, %v858_v63  ;;  %v14753_v52 = vld [vmem:[#allocation163_spill] sm:$0xff] }
 0x247   : > { %v863_v58 = vmul.f32 %v14753_v52, %v14753_v52 }
 0x248   : > { %v595_v2 = vadd.f32 %v594_v59, %v14750_v53  ;;  %v1114_v5 = vadd.f32 %v1113_v3, %v859_v61  ;;  %v14754_v53 = vld [vmem:[#allocation164_spill] sm:$0xff] }
 0x249   : > { %v864_v57 = vmul.f32 %v14754_v53, %v14754_v53 }
 0x24a   : > { %v596_v0 = vadd.f32 %v595_v2, %v14751_v54  ;;  %v1115_v60 = vadd.f32 %v1114_v5, %v860_v4  ;;  %v14755_v54 = vld [vmem:[#allocation165_spill] sm:$0xff] }
 0x24b   : > { %v865_v3 = vmul.f32 %v14755_v54, %v14755_v54 }
 0x24c   : > { %v597_v1 = vadd.f32 %v596_v0, %v14752_v51  ;;  %v1116_v59 = vadd.f32 %v1115_v60, %v861_v55  ;;  %v14756_v51 = vld [vmem:[#allocation166_spill] sm:$0xff] }
 0x24d   : > { %v866_v5 = vmul.f32 %v14756_v51, %v14756_v51 }
 0x24e   : > { %v598_v56 = vadd.f32 %v597_v1, %v14753_v52  ;;  %v1117_v2 = vadd.f32 %v1116_v59, %v862_v62  ;;  %v14757_v52 = vld [vmem:[#allocation167_spill] sm:$0xff] }
 0x24f   : > { %v867_v60 = vmul.f32 %v14757_v52, %v14757_v52 }
 0x250   : > { %v599_v63 = vadd.f32 %v598_v56, %v14754_v53  ;;  %v1118_v0 = vadd.f32 %v1117_v2, %v863_v58  ;;  %v14758_v53 = vld [vmem:[#allocation168_spill] sm:$0xff] }
 0x251   : > { %v868_v59 = vmul.f32 %v14758_v53, %v14758_v53 }
 0x252   : > { %v600_v61 = vadd.f32 %v599_v63, %v14755_v54  ;;  %v1119_v1 = vadd.f32 %v1118_v0, %v864_v57  ;;  %v14759_v54 = vld [vmem:[#allocation169_spill] sm:$0xff] }
 0x253   : > { %v869_v2 = vmul.f32 %v14759_v54, %v14759_v54 }
 0x254   : > { %v601_v4 = vadd.f32 %v600_v61, %v14756_v51  ;;  %v1120_v56 = vadd.f32 %v1119_v1, %v865_v3  ;;  %v14760_v51 = vld [vmem:[#allocation170_spill] sm:$0xff] }
 0x255   : > { %v870_v0 = vmul.f32 %v14760_v51, %v14760_v51 }
 0x256   : > { %v602_v55 = vadd.f32 %v601_v4, %v14757_v52  ;;  %v1121_v63 = vadd.f32 %v1120_v56, %v866_v5  ;;  %v14761_v52 = vld [vmem:[#allocation171_spill] sm:$0xff] }
 0x257   : > { %v871_v1 = vmul.f32 %v14761_v52, %v14761_v52 }
 0x258   : > { %v603_v62 = vadd.f32 %v602_v55, %v14758_v53  ;;  %v1122_v61 = vadd.f32 %v1121_v63, %v867_v60  ;;  %v14762_v53 = vld [vmem:[#allocation172_spill] sm:$0xff] }
 0x259   : > { %v872_v56 = vmul.f32 %v14762_v53, %v14762_v53 }
 0x25a   : > { %v604_v58 = vadd.f32 %v603_v62, %v14759_v54  ;;  %v1123_v4 = vadd.f32 %v1122_v61, %v868_v59  ;;  %v14763_v54 = vld [vmem:[#allocation173_spill] sm:$0xff] }
 0x25b   : > { %v873_v63 = vmul.f32 %v14763_v54, %v14763_v54 }
 0x25c   : > { %v605_v57 = vadd.f32 %v604_v58, %v14760_v51  ;;  %v1124_v55 = vadd.f32 %v1123_v4, %v869_v2  ;;  %v14764_v51 = vld [vmem:[#allocation174_spill] sm:$0xff] }
 0x25d   : > { %v874_v61 = vmul.f32 %v14764_v51, %v14764_v51 }
 0x25e   : > { %v606_v3 = vadd.f32 %v605_v57, %v14761_v52  ;;  %v1125_v62 = vadd.f32 %v1124_v55, %v870_v0  ;;  %v14765_v52 = vld [vmem:[#allocation175_spill] sm:$0xff] }
 0x25f   : > { %v875_v4 = vmul.f32 %v14765_v52, %v14765_v52 }
 0x260   : > { %v607_v5 = vadd.f32 %v606_v3, %v14762_v53  ;;  %v1126_v58 = vadd.f32 %v1125_v62, %v871_v1  ;;  %v14766_v53 = vld [vmem:[#allocation176_spill] sm:$0xff] }
 0x261   : > { %v876_v55 = vmul.f32 %v14766_v53, %v14766_v53 }
 0x262   : > { %v608_v60 = vadd.f32 %v607_v5, %v14763_v54  ;;  %v1127_v57 = vadd.f32 %v1126_v58, %v872_v56  ;;  %v14767_v54 = vld [vmem:[#allocation177_spill] sm:$0xff] }
 0x263   : > { %v877_v62 = vmul.f32 %v14767_v54, %v14767_v54 }
 0x264   : > { %v609_v59 = vadd.f32 %v608_v60, %v14764_v51  ;;  %v1128_v3 = vadd.f32 %v1127_v57, %v873_v63  ;;  %v14768_v51 = vld [vmem:[#allocation178_spill] sm:$0xff] }
 0x265   : > { %v878_v58 = vmul.f32 %v14768_v51, %v14768_v51 }
 0x266   : > { %v610_v2 = vadd.f32 %v609_v59, %v14765_v52  ;;  %v1129_v5 = vadd.f32 %v1128_v3, %v874_v61  ;;  %v14769_v52 = vld [vmem:[#allocation179_spill] sm:$0xff] }
 0x267   : > { %v879_v57 = vmul.f32 %v14769_v52, %v14769_v52 }
 0x268   : > { %v611_v0 = vadd.f32 %v610_v2, %v14766_v53  ;;  %v1130_v60 = vadd.f32 %v1129_v5, %v875_v4  ;;  %v14770_v53 = vld [vmem:[#allocation180_spill] sm:$0xff] }
 0x269   : > { %v880_v3 = vmul.f32 %v14770_v53, %v14770_v53 }
 0x26a   : > { %v612_v1 = vadd.f32 %v611_v0, %v14767_v54  ;;  %v1131_v59 = vadd.f32 %v1130_v60, %v876_v55  ;;  %v14771_v54 = vld [vmem:[#allocation181_spill] sm:$0xff] }
 0x26b   : > { %v881_v5 = vmul.f32 %v14771_v54, %v14771_v54 }
 0x26c   : > { %v613_v56 = vadd.f32 %v612_v1, %v14768_v51  ;;  %v1132_v2 = vadd.f32 %v1131_v59, %v877_v62  ;;  %v14772_v51 = vld [vmem:[#allocation182_spill] sm:$0xff] }
 0x26d   : > { %v882_v60 = vmul.f32 %v14772_v51, %v14772_v51 }
 0x26e   : > { %v614_v63 = vadd.f32 %v613_v56, %v14769_v52  ;;  %v1133_v0 = vadd.f32 %v1132_v2, %v878_v58  ;;  %v14773_v52 = vld [vmem:[#allocation183_spill] sm:$0xff] }
 0x26f   : > { %v883_v59 = vmul.f32 %v14773_v52, %v14773_v52 }
 0x270   : > { %v615_v61 = vadd.f32 %v614_v63, %v14770_v53  ;;  %v1134_v1 = vadd.f32 %v1133_v0, %v879_v57  ;;  %v14774_v63 = vld [vmem:[#allocation184_spill] sm:$0xff]  ;;  %v14776_v57 = vld [vmem:[#allocation7_spill] sm:$0xff] }
 0x271   : > { %v884_v58 = vmul.f32 %v14774_v63, %v14774_v63  ;;  %v1227_v0 = vmin.f32 %v14776_v57, %v5121_v8 }
 0x272   : > { %v616_v4 = vadd.f32 %v615_v61, %v14771_v54  ;;  %v1135_v56 = vadd.f32 %v1134_v1, %v880_v3  ;;  %v14775_v61 = vld [vmem:[#allocation6_spill] sm:$0xff]  ;;  %v14778_v1 = vld [vmem:[#allocation185_spill] sm:$0xff] }
 0x273   : > { %v1226_v53 = vmin.f32 %v14775_v61, %v5118_v7  ;;  %v1231_v49 = vmin.f32 %v1227_v0, %v5133_v12 }
 0x274   : > { %v617_v55 = vadd.f32 %v616_v4, %v14772_v51  ;;  %v1136_v2 = vadd.f32 %v1135_v56, %v881_v5  ;;  %v14777_v4 = vld [vmem:[#allocation8_spill] sm:$0xff]  ;;  %v14779_v51 = vld [vmem:[#allocation186_spill] sm:$0xff]  ;;  %v1229_v5 = vmin.f32 %v5115_v6, %v5127_v10 }
 0x275   : > { %v1228_v54 = vmin.f32 %v14777_v4, %v5124_v9  ;;  %v1230_v50 = vmin.f32 %v1226_v53, %v5130_v11  ;;  %v14780_v9 = vld [vmem:[#allocation187_spill] sm:$0xff] }
 0x276   : > { %v618_v62 = vadd.f32 %v617_v55, %v14773_v52  ;;  %v885_v55 = vmul.f32 %v14778_v1, %v14778_v1  ;;  %v886_v52 = vmul.f32 %v14779_v51, %v14779_v51  ;;  %v1137_v56 = vadd.f32 %v1136_v2, %v882_v60 }
 0x277   : > { %v1232_v48 = vmin.f32 %v1228_v54, %v5136_v13  ;;  %v1233_v57 = vmin.f32 %v1229_v5, %v5139_v14  ;;  %v1234_v6 = vmin.f32 %v1230_v50, %v5142_v15  ;;  %v1235_v60 = vmin.f32 %v1231_v49, %v5145_v16  ;;  %v14782_v54 = vld [vmem:[#allocation189_spill] sm:$0xff] }
 0x278   : > { %v619_v3 = vadd.f32 %v618_v62, %v14774_v63  ;;  %v887_v62 = vmul.f32 %v14780_v9, %v14780_v9  ;;  %v14781_v63 = vld [vmem:[#allocation188_spill] sm:$0xff]  ;;  %v1138_v8 = vadd.f32 %v1137_v56, %v883_v59  ;;  %v889_v0 = vmul.f32 %v14782_v54, %v14782_v54 }
 0x279   : > { %v888_v47 = vmul.f32 %v14781_v63, %v14781_v63  ;;  %v1236_v53 = vmin.f32 %v1232_v48, %v5148_v17  ;;  %v1237_v13 = vmin.f32 %v1233_v57, %v5151_v18  ;;  %v1238_v5 = vmin.f32 %v1234_v6, %v5154_v19  ;;  %v14784_v48 = vld [vmem:[#allocation191_spill] sm:$0xff]  ;;  %v14785_v56 = vld [vmem:[#allocation192_spill] sm:$0xff] }
 0x27a   : > { %v620_v4 = vadd.f32 %v619_v3, %v14778_v1  ;;  %v14783_v3 = vld [vmem:[#allocation190_spill] sm:$0xff]  ;;  %v1139_v12 = vadd.f32 %v1138_v8, %v884_v58  ;;  %v1239_v59 = vmin.f32 %v1235_v60, %v5157_v20  ;;  %v14786_v60 = vld [vmem:[#allocation193_spill] sm:$0xff] }
 0x27b   : > { %v890_v1 = vmul.f32 %v14783_v3, %v14783_v3  ;;  %v1240_v50 = vmin.f32 %v1236_v53, %v5160_v21  ;;  %v1241_v17 = vmin.f32 %v1237_v13, %v5163_v22  ;;  %v1242_v57 = vmin.f32 %v1238_v5, %v5166_v23 }
 0x27c   : > { %v621_v2 = vadd.f32 %v620_v4, %v14779_v51  ;;  %v891_v4 = vmul.f32 %v14784_v48, %v14784_v48  ;;  %v892_v51 = vmul.f32 %v14785_v56, %v14785_v56  ;;  %v1140_v16 = vadd.f32 %v1139_v12, %v885_v55 }
 0x27d   : > { %v1243_v8 = vmin.f32 %v1239_v59, %v5169_v24  ;;  %v1244_v6 = vmin.f32 %v1240_v50, %v5172_v25  ;;  %v893_v53 = vmul.f32 %v14786_v60, %v14786_v60  ;;  %v1245_v21 = vmin.f32 %v1241_v17, %v5175_v26  ;;  %v14788_v59 = vld [vmem:[#allocation195_spill] sm:$0xff] }
 0x27e   : > { %v622_v49 = vadd.f32 %v621_v2, %v14780_v9  ;;  %v14787_v2 = vld [vmem:[#allocation194_spill] sm:$0xff]  ;;  %v1141_v20 = vadd.f32 %v1140_v16, %v886_v52  ;;  %v1246_v12 = vmin.f32 %v1242_v57, %v5178_v27  ;;  %v6469_v50 = vmul.f32 %v14788_v59, %v14788_v59 }
 0x27f   : > { %v6460_v9 = vmul.f32 %v14787_v2, %v14787_v2  ;;  %v1247_v13 = vmin.f32 %v1243_v8, %v5181_v28  ;;  %v1248_v55 = vmin.f32 %v1244_v6, %v5184_v29  ;;  %v1249_v25 = vmin.f32 %v1245_v21, %v5187_v30  ;;  %v14790_v6 = vld [vmem:[#allocation197_spill] sm:$0xff] }
 0x280   : > { %v623_v58 = vadd.f32 %v622_v49, %v14781_v63  ;;  %v14789_v49 = vld [vmem:[#allocation196_spill] sm:$0xff]  ;;  %v1142_v17 = vadd.f32 %v1141_v20, %v887_v62  ;;  %v1250_v16 = vmin.f32 %v1246_v12, %v5190_v31 }
 0x281   : > { %v6473_v63 = vmul.f32 %v14789_v49, %v14789_v49  ;;  %v1251_v52 = vmin.f32 %v1247_v13, %v5193_v32  ;;  %v1252_v57 = vmin.f32 %v1248_v55, %v5196_v33  ;;  %v1253_v28 = vmin.f32 %v1249_v25, %v5199_v34  ;;  %v14792_v55 = vld [vmem:[#allocation199_spill] sm:$0xff] }
 0x282   : > { %v624_v5 = vadd.f32 %v623_v58, %v14782_v54  ;;  %v6482_v58 = vmul.f32 %v14790_v6, %v14790_v6  ;;  %v14791_v54 = vld [vmem:[#allocation198_spill] sm:$0xff]  ;;  %v1143_v21 = vadd.f32 %v1142_v17, %v888_v47  ;;  %v1254_v20 = vmin.f32 %v1250_v16, %v5202_v35 }
 0x283   : > { %v6486_v29 = vmul.f32 %v14791_v54, %v14791_v54  ;;  %v1255_v62 = vmin.f32 %v1251_v52, %v5205_v36  ;;  %v1256_v12 = vmin.f32 %v1252_v57, %v5208_v37  ;;  %v1257_v32 = vmin.f32 %v1253_v28, %v5211_v38  ;;  %v14794_v57 = vld [vmem:[#allocation201_spill] sm:$0xff] }
 0x284   : > { %v625_v8 = vadd.f32 %v624_v5, %v14783_v3  ;;  %v6495_v5 = vmul.f32 %v14792_v55, %v14792_v55  ;;  %v14793_v3 = vld [vmem:[#allocation200_spill] sm:$0xff]  ;;  %v1144_v25 = vadd.f32 %v1143_v21, %v889_v0  ;;  %v1258_v47 = vmin.f32 %v1254_v20, %v5214_v39 }
 0x285   : > { %v6499_v33 = vmul.f32 %v14793_v3, %v14793_v3  ;;  %v1259_v17 = vmin.f32 %v1255_v62, %v5217_v40  ;;  %v1260_v16 = vmin.f32 %v1256_v12, %v5220_v41  ;;  %v1490_v37 = vmax.f32 %v14775_v61, %v5118_v7  ;;  %v14795_v62 = vld [vmem:[#allocation202_spill] sm:$0xff]  ;;  %v14800_v7 = vld [vmem:[#allocation52_spill] sm:$0xff] }
 0x286   : > { %v626_v13 = vadd.f32 %v625_v8, %v14784_v48  ;;  %v6508_v8 = vmul.f32 %v14794_v57, %v14794_v57  ;;  %v1261_v48 = vmin.f32 %v1257_v32, %v5223_v42  ;;  %v1145_v36 = vadd.f32 %v1144_v25, %v890_v1  ;;  %v14797_v32 = vld [vmem:[#allocation7_spill] sm:$0xff]  ;;  %v14798_v61 = vld [vmem:[#allocation50_spill] sm:$0xff] }
 0x287   : > { %v1262_v28 = vmin.f32 %v1258_v47, %v5226_v43  ;;  %v1263_v0 = vmin.f32 %v1259_v17, %v5229_v44  ;;  %v1264_v21 = vmin.f32 %v1260_v16, %v5232_v45  ;;  %v6519_v12 = vmul.f32 %v14795_v62, %v14795_v62  ;;  %v14799_v25 = vld [vmem:[#allocation51_spill] sm:$0xff]  ;;  %v14802_v44 = vld [vmem:[#allocation53_spill] sm:$0xff]  ;;  %v14803_v43 = vld [vmem:[#allocation12_spill] sm:$0xff] }
 0x288   : > { %v627_v52 = vadd.f32 %v626_v13, %v14785_v56  ;;  %v1265_v13 = vmin.f32 %v1261_v48, %v5235_v46  ;;  %v14796_v56 = vld [vmem:[#allocation11_spill] sm:$0xff]  ;;  %v1146_v41 = vadd.f32 %v1145_v36, %v891_v4  ;;  %v14804_v48 = vld [vmem:[#allocation8_spill] sm:$0xff] }
 0x289   : > { %v1491_v42 = vmax.f32 %v14797_v32, %v14796_v56  ;;  %v1266_v1 = vmin.f32 %v1262_v28, %v14798_v61  ;;  %v1267_v47 = vmin.f32 %v1263_v0, %v14799_v25  ;;  %v1268_v17 = vmin.f32 %v1264_v21, %v14800_v7  ;;  %v14801_v45 = vld [vmem:[#allocation203_spill] sm:$0xff]  ;;  %v14805_v56 = vld [vmem:[#allocation54_spill] sm:$0xff]  ;;  %v14807_v32 = vld [vmem:[#allocation56_spill] sm:$0xff] }
 0x28a   : > { %v628_v20 = vadd.f32 %v627_v52, %v14786_v60  ;;  %v6530_v52 = vmul.f32 %v14801_v45, %v14801_v45  ;;  %v1269_v60 = vmin.f32 %v1265_v13, %v14802_v44  ;;  %v1492_v46 = vmax.f32 %v14804_v48, %v14803_v43  ;;  %v14806_v4 = vld [vmem:[#allocation55_spill] sm:$0xff]  ;;  %v14808_v7 = vld [vmem:[#allocation204_spill] sm:$0xff]  ;;  %v14809_v25 = vld [vmem:[#allocation57_spill] sm:$0xff] }
 0x28b   : > { %v1147_v40 = vadd.f32 %v1146_v41, %v892_v51  ;;  %v1270_v36 = vmin.f32 %v1266_v1, %v14805_v56  ;;  %v1271_v28 = vmin.f32 %v1267_v47, %v14806_v4  ;;  %v1272_v0 = vmin.f32 %v1268_v17, %v14807_v32  ;;  %v14810_v13 = vld [vmem:[#allocation9_spill] sm:$0xff]  ;;  %v14811_v43 = vld [vmem:[#allocation58_spill] sm:$0xff]  ;;  %v14812_v51 = vld [vmem:[#allocation59_spill] sm:$0xff] }
 0x28c   : > { %v629_v16 = vadd.f32 %v628_v20, %v14787_v2  ;;  %v6541_v20 = vmul.f32 %v14808_v7, %v14808_v7  ;;  %v1273_v61 = vmin.f32 %v1269_v60, %v14809_v25  ;;  %v1493_v44 = vmax.f32 %v14810_v13, %v5127_v10  ;;  %v14813_v48 = vld [vmem:[#allocation60_spill] sm:$0xff]  ;;  %v14814_v32 = vld [vmem:[#allocation205_spill] sm:$0xff] }
 0x28d   : > { %v1148_v2 = vadd.f32 %v1147_v40, %v893_v53  ;;  %v1274_v41 = vmin.f32 %v1270_v36, %v14811_v43  ;;  %v1275_v1 = vmin.f32 %v1271_v28, %v14812_v51  ;;  %v1276_v47 = vmin.f32 %v1272_v0, %v14813_v48  ;;  %v14815_v4 = vld [vmem:[#allocation61_spill] sm:$0xff]  ;;  %v14816_v40 = vld [vmem:[#allocation62_spill] sm:$0xff]  ;;  %v14817_v36 = vld [vmem:[#allocation63_spill] sm:$0xff] }
 0x28e   : > { %v630_v21 = vadd.f32 %v629_v16, %v14788_v59  ;;  %v6552_v16 = vmul.f32 %v14814_v32, %v14814_v32  ;;  %v1277_v56 = vmin.f32 %v1273_v61, %v14815_v4  ;;  %v6556_v60 = vmax.f32 %v1490_v37, %v5130_v11  ;;  %v14818_v28 = vld [vmem:[#allocation64_spill] sm:$0xff]  ;;  %v14820_v43 = vld [vmem:[#allocation65_spill] sm:$0xff]  ;;  %v14821_v61 = vld [vmem:[#allocation15_spill] sm:$0xff] }
 0x28f   : > { %v1149_v13 = vadd.f32 %v1148_v2, %v6460_v9  ;;  %v1278_v53 = vmin.f32 %v1274_v41, %v14816_v40  ;;  %v1279_v10 = vmin.f32 %v1275_v1, %v14817_v36  ;;  %v1280_v51 = vmin.f32 %v1276_v47, %v14818_v28  ;;  %v14822_v9 = vld [vmem:[#allocation66_spill] sm:$0xff]  ;;  %v14823_v41 = vld [vmem:[#allocation67_spill] sm:$0xff]  ;;  %v14824_v1 = vld [vmem:[#allocation68_spill] sm:$0xff] }
 0x290   : > { %v631_v17 = vadd.f32 %v630_v21, %v14789_v49  ;;  %v14819_v21 = vld [vmem:[#allocation206_spill] sm:$0xff]  ;;  %v1281_v25 = vmin.f32 %v1277_v56, %v14820_v43  ;;  %v6569_v4 = vmax.f32 %v1491_v42, %v14821_v61  ;;  %v14826_v40 = vld [vmem:[#allocation69_spill] sm:$0xff]  ;;  %v14827_v56 = vld [vmem:[#allocation16_spill] sm:$0xff] }
 0x291   : > { %v6565_v48 = vmul.f32 %v14819_v21, %v14819_v21  ;;  %v1150_v37 = vadd.f32 %v1149_v13, %v6469_v50  ;;  %v1282_v2 = vmin.f32 %v1278_v53, %v14822_v9  ;;  %v1283_v11 = vmin.f32 %v1279_v10, %v14823_v41  ;;  %v14828_v50 = vld [vmem:[#allocation70_spill] sm:$0xff]  ;;  %v14829_v53 = vld [vmem:[#allocation71_spill] sm:$0xff]  ;;  %v14830_v10 = vld [vmem:[#allocation72_spill] sm:$0xff] }
 0x292   : > { %v632_v0 = vadd.f32 %v631_v17, %v14790_v6  ;;  %v1284_v36 = vmin.f32 %v1280_v51, %v14824_v1  ;;  %v14825_v17 = vld [vmem:[#allocation207_spill] sm:$0xff]  ;;  %v1285_v6 = vmin.f32 %v1281_v25, %v14826_v40  ;;  %v6582_v43 = vmax.f32 %v1492_v46, %v14827_v56  ;;  %v14832_v9 = vld [vmem:[#allocation73_spill] sm:$0xff] }
 0x293   : > { %v6578_v28 = vmul.f32 %v14825_v17, %v14825_v17  ;;  %v1151_v42 = vadd.f32 %v1150_v37, %v6473_v63  ;;  %v1286_v13 = vmin.f32 %v1282_v2, %v14828_v50  ;;  %v1287_v61 = vmin.f32 %v1283_v11, %v14829_v53  ;;  %v14833_v63 = vld [vmem:[#allocation74_spill] sm:$0xff]  ;;  %v14834_v2 = vld [vmem:[#allocation75_spill] sm:$0xff]  ;;  %v14835_v11 = vld [vmem:[#allocation76_spill] sm:$0xff] }
 0x294   : > { %v633_v47 = vadd.f32 %v632_v0, %v14791_v54  ;;  %v1288_v41 = vmin.f32 %v1284_v36, %v14830_v10  ;;  %v14831_v0 = vld [vmem:[#allocation208_spill] sm:$0xff]  ;;  %v1289_v54 = vmin.f32 %v1285_v6, %v14832_v9  ;;  %v6595_v25 = vmax.f32 %v1493_v44, %v5139_v14  ;;  %v14837_v50 = vld [vmem:[#allocation77_spill] sm:$0xff] }
 0x295   : > { %v6591_v1 = vmul.f32 %v14831_v0, %v14831_v0  ;;  %v1152_v46 = vadd.f32 %v1151_v42, %v6482_v58  ;;  %v1290_v37 = vmin.f32 %v1286_v13, %v14833_v63  ;;  %v1291_v56 = vmin.f32 %v1287_v61, %v14834_v2  ;;  %v14838_v58 = vld [vmem:[#allocation78_spill] sm:$0xff]  ;;  %v14839_v13 = vld [vmem:[#allocation79_spill] sm:$0xff]  ;;  %v14840_v61 = vld [vmem:[#allocation80_spill] sm:$0xff] }
 0x296   : > { %v634_v51 = vadd.f32 %v633_v47, %v14792_v55  ;;  %v1292_v53 = vmin.f32 %v1288_v41, %v14835_v11  ;;  %v14836_v47 = vld [vmem:[#allocation209_spill] sm:$0xff]  ;;  %v1293_v40 = vmin.f32 %v1289_v54, %v14837_v50  ;;  %v1498_v44 = vmax.f32 %v6556_v60, %v5142_v15  ;;  %v14843_v54 = vld [vmem:[#allocation19_spill] sm:$0xff] }
 0x297   : > { %v6604_v10 = vmul.f32 %v14836_v47, %v14836_v47  ;;  %v1153_v6 = vadd.f32 %v1152_v46, %v6486_v29  ;;  %v1294_v42 = vmin.f32 %v1290_v37, %v14838_v58  ;;  %v1295_v14 = vmin.f32 %v1291_v56, %v14839_v13  ;;  %v14842_v63 = vld [vmem:[#allocation81_spill] sm:$0xff]  ;;  %v14844_v29 = vld [vmem:[#allocation82_spill] sm:$0xff]  ;;  %v14845_v37 = vld [vmem:[#allocation83_spill] sm:$0xff] }
 0x298   : > { %v635_v36 = vadd.f32 %v634_v51, %v14793_v3  ;;  %v1296_v2 = vmin.f32 %v1292_v53, %v14840_v61  ;;  %v14841_v51 = vld [vmem:[#allocation210_spill] sm:$0xff]  ;;  %v1297_v9 = vmin.f32 %v1293_v40, %v14842_v63  ;;  %v1499_v50 = vmax.f32 %v6569_v4, %v14843_v54  ;;  %v14846_v56 = vld [vmem:[#allocation84_spill] sm:$0xff]  ;;  %v14848_v58 = vld [vmem:[#allocation85_spill] sm:$0xff] }
 0x299   : > { %v6616_v11 = vmul.f32 %v14841_v51, %v14841_v51  ;;  %v1154_v60 = vadd.f32 %v1153_v6, %v6495_v5  ;;  %v1298_v46 = vmin.f32 %v1294_v42, %v14844_v29  ;;  %v1299_v15 = vmin.f32 %v1295_v14, %v14845_v37  ;;  %v14849_v40 = vld [vmem:[#allocation20_spill] sm:$0xff]  ;;  %v14850_v5 = vld [vmem:[#allocation86_spill] sm:$0xff]  ;;  %v14851_v42 = vld [vmem:[#allocation87_spill] sm:$0xff] }
 0x29a   : > { %v636_v41 = vadd.f32 %v635_v36, %v14794_v57  ;;  %v1300_v13 = vmin.f32 %v1296_v2, %v14846_v56  ;;  %v14847_v36 = vld [vmem:[#allocation211_spill] sm:$0xff]  ;;  %v1301_v57 = vmin.f32 %v1297_v9, %v14848_v58  ;;  %v1500_v63 = vmax.f32 %v6582_v43, %v14849_v40  ;;  %v14852_v14 = vld [vmem:[#allocation88_spill] sm:$0xff]  ;;  %v14854_v29 = vld [vmem:[#allocation89_spill] sm:$0xff] }
 0x29b   : > { %v6628_v61 = vmul.f32 %v14847_v36, %v14847_v36  ;;  %v1155_v4 = vadd.f32 %v1154_v60, %v6499_v33  ;;  %v1302_v6 = vmin.f32 %v1298_v46, %v14850_v5  ;;  %v1303_v54 = vmin.f32 %v1299_v15, %v14851_v42  ;;  %v14855_v33 = vld [vmem:[#allocation90_spill] sm:$0xff]  ;;  %v14856_v46 = vld [vmem:[#allocation91_spill] sm:$0xff]  ;;  %v14857_v15 = vld [vmem:[#allocation92_spill] sm:$0xff] }
 0x29c   : > { %v637_v53 = vadd.f32 %v636_v41, %v14795_v62  ;;  %v1304_v37 = vmin.f32 %v1300_v13, %v14852_v14  ;;  %v14853_v41 = vld [vmem:[#allocation212_spill] sm:$0xff]  ;;  %v1305_v62 = vmin.f32 %v1301_v57, %v14854_v29  ;;  %v1501_v9 = vmax.f32 %v6595_v25, %v5151_v18  ;;  %v14859_v5 = vld [vmem:[#allocation93_spill] sm:$0xff] }
 0x29d   : > { %v6640_v56 = vmul.f32 %v14853_v41, %v14853_v41  ;;  %v1156_v43 = vadd.f32 %v1155_v4, %v6508_v8  ;;  %v1306_v60 = vmin.f32 %v1302_v6, %v14855_v33  ;;  %v1307_v40 = vmin.f32 %v1303_v54, %v14856_v46  ;;  %v14860_v8 = vld [vmem:[#allocation94_spill] sm:$0xff]  ;;  %v14861_v6 = vld [vmem:[#allocation95_spill] sm:$0xff]  ;;  %v14862_v54 = vld [vmem:[#allocation96_spill] sm:$0xff] }
 0x29e   : > { %v638_v2 = vadd.f32 %v637_v53, %v14801_v45  ;;  %v1308_v42 = vmin.f32 %v1304_v37, %v14857_v15  ;;  %v14858_v53 = vld [vmem:[#allocation213_spill] sm:$0xff]  ;;  %v1309_v58 = vmin.f32 %v1305_v62, %v14859_v5  ;;  %v6656_v57 = vmax.f32 %v1498_v44, %v5154_v19  ;;  %v14865_v62 = vld [vmem:[#allocation23_spill] sm:$0xff] }
 0x29f   : > { %v6652_v14 = vmul.f32 %v14858_v53, %v14858_v53  ;;  %v1157_v25 = vadd.f32 %v1156_v43, %v6519_v12  ;;  %v1310_v4 = vmin.f32 %v1306_v60, %v14860_v8  ;;  %v1311_v18 = vmin.f32 %v1307_v40, %v14861_v6  ;;  %v14864_v33 = vld [vmem:[#allocation97_spill] sm:$0xff]  ;;  %v14866_v12 = vld [vmem:[#allocation98_spill] sm:$0xff]  ;;  %v14867_v60 = vld [vmem:[#allocation99_spill] sm:$0xff] }
 0x2a0   : > { %v639_v13 = vadd.f32 %v638_v2, %v14808_v7  ;;  %v1312_v46 = vmin.f32 %v1308_v42, %v14862_v54  ;;  %v14863_v2 = vld [vmem:[#allocation214_spill] sm:$0xff]  ;;  %v1313_v29 = vmin.f32 %v1309_v58, %v14864_v33  ;;  %v6669_v5 = vmax.f32 %v1499_v50, %v14865_v62  ;;  %v14868_v40 = vld [vmem:[#allocation100_spill] sm:$0xff]  ;;  %v14870_v8 = vld [vmem:[#allocation101_spill] sm:$0xff] }
 0x2a1   : > { %v6665_v15 = vmul.f32 %v14863_v2, %v14863_v2  ;;  %v1158_v44 = vadd.f32 %v1157_v25, %v6530_v52  ;;  %v1314_v43 = vmin.f32 %v1310_v4, %v14866_v12  ;;  %v1315_v19 = vmin.f32 %v1311_v18, %v14867_v60  ;;  %v14871_v58 = vld [vmem:[#allocation24_spill] sm:$0xff]  ;;  %v14872_v52 = vld [vmem:[#allocation102_spill] sm:$0xff]  ;;  %v14873_v4 = vld [vmem:[#allocation103_spill] sm:$0xff] }
 0x2a2   : > { %v640_v37 = vadd.f32 %v639_v13, %v14814_v32  ;;  %v1316_v6 = vmin.f32 %v1312_v46, %v14868_v40  ;;  %v14869_v13 = vld [vmem:[#allocation215_spill] sm:$0xff]  ;;  %v1317_v32 = vmin.f32 %v1313_v29, %v14870_v8  ;;  %v6682_v33 = vmax.f32 %v1500_v63, %v14871_v58  ;;  %v14874_v18 = vld [vmem:[#allocation104_spill] sm:$0xff]  ;;  %v14876_v12 = vld [vmem:[#allocation105_spill] sm:$0xff] }
 0x2a3   : > { %v6678_v54 = vmul.f32 %v14869_v13, %v14869_v13  ;;  %v1159_v50 = vadd.f32 %v1158_v44, %v6541_v20  ;;  %v1318_v25 = vmin.f32 %v1314_v43, %v14872_v52  ;;  %v1319_v62 = vmin.f32 %v1315_v19, %v14873_v4  ;;  %v14877_v20 = vld [vmem:[#allocation106_spill] sm:$0xff]  ;;  %v14878_v43 = vld [vmem:[#allocation107_spill] sm:$0xff]  ;;  %v14879_v19 = vld [vmem:[#allocation108_spill] sm:$0xff] }
 0x2a4   : > { %v641_v42 = vadd.f32 %v640_v37, %v14819_v21  ;;  %v1320_v60 = vmin.f32 %v1316_v6, %v14874_v18  ;;  %v14875_v37 = vld [vmem:[#allocation216_spill] sm:$0xff]  ;;  %v1321_v21 = vmin.f32 %v1317_v32, %v14876_v12  ;;  %v6695_v29 = vmax.f32 %v1501_v9, %v5163_v22  ;;  %v14881_v52 = vld [vmem:[#allocation109_spill] sm:$0xff] }
 0x2a5   : > { %v6691_v40 = vmul.f32 %v14875_v37, %v14875_v37  ;;  %v1160_v63 = vadd.f32 %v1159_v50, %v6552_v16  ;;  %v1322_v44 = vmin.f32 %v1318_v25, %v14877_v20  ;;  %v1323_v58 = vmin.f32 %v1319_v62, %v14878_v43  ;;  %v14882_v16 = vld [vmem:[#allocation110_spill] sm:$0xff]  ;;  %v14883_v25 = vld [vmem:[#allocation111_spill] sm:$0xff]  ;;  %v14884_v62 = vld [vmem:[#allocation112_spill] sm:$0xff] }
 0x2a6   : > { %v642_v46 = vadd.f32 %v641_v42, %v14825_v17  ;;  %v1324_v4 = vmin.f32 %v1320_v60, %v14879_v19  ;;  %v14880_v42 = vld [vmem:[#allocation217_spill] sm:$0xff]  ;;  %v1325_v8 = vmin.f32 %v1321_v21, %v14881_v52  ;;  %v1506_v32 = vmax.f32 %v6656_v57, %v5166_v23 }
 0x2a7   : > { %v6704_v18 = vmul.f32 %v14880_v42, %v14880_v42  ;;  %v1161_v9 = vadd.f32 %v1160_v63, %v6565_v48  ;;  %v1326_v50 = vmin.f32 %v1322_v44, %v14882_v16  ;;  %v1327_v22 = vmin.f32 %v1323_v58, %v14883_v25  ;;  %v14886_v20 = vld [vmem:[#allocation113_spill] sm:$0xff]  ;;  %v14887_v48 = vld [vmem:[#allocation114_spill] sm:$0xff]  ;;  %v14888_v44 = vld [vmem:[#allocation115_spill] sm:$0xff] }
 0x2a8   : > { %v643_v6 = vadd.f32 %v642_v46, %v14831_v0  ;;  %v1328_v43 = vmin.f32 %v1324_v4, %v14884_v62  ;;  %v14885_v46 = vld [vmem:[#allocation218_spill] sm:$0xff]  ;;  %v1329_v12 = vmin.f32 %v1325_v8, %v14886_v20  ;;  %v1507_v21 = vmax.f32 %v6669_v5, %v5169_v24  ;;  %v14889_v58 = vld [vmem:[#allocation116_spill] sm:$0xff]  ;;  %v14891_v16 = vld [vmem:[#allocation117_spill] sm:$0xff] }
 0x2a9   : > { %v6716_v19 = vmul.f32 %v14885_v46, %v14885_v46  ;;  %v1162_v57 = vadd.f32 %v1161_v9, %v6578_v28  ;;  %v1330_v63 = vmin.f32 %v1326_v50, %v14887_v48  ;;  %v1331_v23 = vmin.f32 %v1327_v22, %v14888_v44  ;;  %v14892_v8 = vld [vmem:[#allocation28_spill] sm:$0xff]  ;;  %v14893_v28 = vld [vmem:[#allocation118_spill] sm:$0xff]  ;;  %v14894_v50 = vld [vmem:[#allocation119_spill] sm:$0xff] }
 0x2aa   : > { %v644_v60 = vadd.f32 %v643_v6, %v14836_v47  ;;  %v1332_v25 = vmin.f32 %v1328_v43, %v14889_v58  ;;  %v14890_v6 = vld [vmem:[#allocation219_spill] sm:$0xff]  ;;  %v1333_v52 = vmin.f32 %v1329_v12, %v14891_v16  ;;  %v1508_v20 = vmax.f32 %v6682_v33, %v14892_v8  ;;  %v14895_v22 = vld [vmem:[#allocation120_spill] sm:$0xff]  ;;  %v14897_v48 = vld [vmem:[#allocation121_spill] sm:$0xff] }
 0x2ab   : > { %v6728_v62 = vmul.f32 %v14890_v6, %v14890_v6  ;;  %v1163_v5 = vadd.f32 %v1162_v57, %v6591_v1  ;;  %v1334_v9 = vmin.f32 %v1330_v63, %v14893_v28  ;;  %v1335_v24 = vmin.f32 %v1331_v23, %v14894_v50  ;;  %v14898_v1 = vld [vmem:[#allocation122_spill] sm:$0xff]  ;;  %v14899_v63 = vld [vmem:[#allocation123_spill] sm:$0xff]  ;;  %v14900_v23 = vld [vmem:[#allocation124_spill] sm:$0xff] }
 0x2ac   : > { %v645_v4 = vadd.f32 %v644_v60, %v14841_v51  ;;  %v1336_v44 = vmin.f32 %v1332_v25, %v14895_v22  ;;  %v14896_v60 = vld [vmem:[#allocation220_spill] sm:$0xff]  ;;  %v1337_v51 = vmin.f32 %v1333_v52, %v14897_v48  ;;  %v1509_v12 = vmax.f32 %v6695_v29, %v5175_v26  ;;  %v14902_v28 = vld [vmem:[#allocation125_spill] sm:$0xff] }
 0x2ad   : > { %v6740_v58 = vmul.f32 %v14896_v60, %v14896_v60  ;;  %v1164_v33 = vadd.f32 %v1163_v5, %v6604_v10  ;;  %v1338_v57 = vmin.f32 %v1334_v9, %v14898_v1  ;;  %v1339_v8 = vmin.f32 %v1335_v24, %v14899_v63  ;;  %v14903_v10 = vld [vmem:[#allocation126_spill] sm:$0xff]  ;;  %v14904_v9 = vld [vmem:[#allocation127_spill] sm:$0xff]  ;;  %v14905_v24 = vld [vmem:[#allocation128_spill] sm:$0xff] }
 0x2ae   : > { %v646_v43 = vadd.f32 %v645_v4, %v14847_v36  ;;  %v1340_v50 = vmin.f32 %v1336_v44, %v14900_v23  ;;  %v14901_v4 = vld [vmem:[#allocation221_spill] sm:$0xff]  ;;  %v1341_v16 = vmin.f32 %v1337_v51, %v14902_v28  ;;  %v6756_v52 = vmax.f32 %v1506_v32, %v5178_v27  ;;  %v14908_v51 = vld [vmem:[#allocation31_spill] sm:$0xff] }
 0x2af   : > { %v6752_v22 = vmul.f32 %v14901_v4, %v14901_v4  ;;  %v1165_v29 = vadd.f32 %v1164_v33, %v6616_v11  ;;  %v1342_v5 = vmin.f32 %v1338_v57, %v14903_v10  ;;  %v1343_v26 = vmin.f32 %v1339_v8, %v14904_v9  ;;  %v14907_v1 = vld [vmem:[#allocation129_spill] sm:$0xff]  ;;  %v14909_v11 = vld [vmem:[#allocation130_spill] sm:$0xff]  ;;  %v14910_v57 = vld [vmem:[#allocation131_spill] sm:$0xff] }
 0x2b0   : > { %v647_v25 = vadd.f32 %v646_v43, %v14853_v41  ;;  %v1344_v63 = vmin.f32 %v1340_v50, %v14905_v24  ;;  %v14906_v43 = vld [vmem:[#allocation222_spill] sm:$0xff]  ;;  %v1345_v48 = vmin.f32 %v1341_v16, %v14907_v1  ;;  %v6769_v28 = vmax.f32 %v1507_v21, %v14908_v51  ;;  %v14911_v8 = vld [vmem:[#allocation132_spill] sm:$0xff]  ;;  %v14913_v10 = vld [vmem:[#allocation133_spill] sm:$0xff] }
 0x2b1   : > { %v6765_v23 = vmul.f32 %v14906_v43, %v14906_v43  ;;  %v1166_v32 = vadd.f32 %v1165_v29, %v6628_v61  ;;  %v1346_v33 = vmin.f32 %v1342_v5, %v14909_v11  ;;  %v1347_v27 = vmin.f32 %v1343_v26, %v14910_v57  ;;  %v14914_v16 = vld [vmem:[#allocation32_spill] sm:$0xff]  ;;  %v14915_v61 = vld [vmem:[#allocation134_spill] sm:$0xff]  ;;  %v14916_v5 = vld [vmem:[#allocation135_spill] sm:$0xff] }
 0x2b2   : > { %v648_v44 = vadd.f32 %v647_v25, %v14858_v53  ;;  %v1348_v9 = vmin.f32 %v1344_v63, %v14911_v8  ;;  %v14912_v25 = vld [vmem:[#allocation223_spill] sm:$0xff]  ;;  %v1349_v53 = vmin.f32 %v1345_v48, %v14913_v10  ;;  %v6782_v1 = vmax.f32 %v1508_v20, %v14914_v16  ;;  %v14917_v26 = vld [vmem:[#allocation136_spill] sm:$0xff]  ;;  %v14919_v11 = vld [vmem:[#allocation137_spill] sm:$0xff] }
 0x2b3   : > { %v6778_v24 = vmul.f32 %v14912_v25, %v14912_v25  ;;  %v1167_v21 = vadd.f32 %v1166_v32, %v6640_v56  ;;  %v1350_v29 = vmin.f32 %v1346_v33, %v14915_v61  ;;  %v1351_v51 = vmin.f32 %v1347_v27, %v14916_v5  ;;  %v14920_v56 = vld [vmem:[#allocation138_spill] sm:$0xff]  ;;  %v14921_v33 = vld [vmem:[#allocation139_spill] sm:$0xff]  ;;  %v14922_v27 = vld [vmem:[#allocation140_spill] sm:$0xff] }
 0x2b4   : > { %v649_v50 = vadd.f32 %v648_v44, %v14863_v2  ;;  %v1352_v57 = vmin.f32 %v1348_v9, %v14917_v26  ;;  %v14918_v44 = vld [vmem:[#allocation224_spill] sm:$0xff]  ;;  %v1353_v2 = vmin.f32 %v1349_v53, %v14919_v11  ;;  %v6795_v48 = vmax.f32 %v1509_v12, %v5187_v30  ;;  %v14924_v61 = vld [vmem:[#allocation141_spill] sm:$0xff] }
 0x2b5   : > { %v6791_v8 = vmul.f32 %v14918_v44, %v14918_v44  ;;  %v1168_v20 = vadd.f32 %v1167_v21, %v6652_v14  ;;  %v1354_v32 = vmin.f32 %v1350_v29, %v14920_v56  ;;  %v1355_v16 = vmin.f32 %v1351_v51, %v14921_v33  ;;  %v14925_v14 = vld [vmem:[#allocation142_spill] sm:$0xff]  ;;  %v14926_v29 = vld [vmem:[#allocation143_spill] sm:$0xff]  ;;  %v14927_v51 = vld [vmem:[#allocation144_spill] sm:$0xff] }
 0x2b6   : > { %v650_v63 = vadd.f32 %v649_v50, %v14869_v13  ;;  %v1356_v5 = vmin.f32 %v1352_v57, %v14922_v27  ;;  %v14923_v50 = vld [vmem:[#allocation225_spill] sm:$0xff]  ;;  %v1357_v10 = vmin.f32 %v1353_v2, %v14924_v61  ;;  %v1514_v53 = vmax.f32 %v6756_v52, %v5190_v31  ;;  %v14930_v2 = vld [vmem:[#allocation35_spill] sm:$0xff] }
 0x2b7   : > { %v6804_v26 = vmul.f32 %v14923_v50, %v14923_v50  ;;  %v1169_v12 = vadd.f32 %v1168_v20, %v6665_v15  ;;  %v1358_v21 = vmin.f32 %v1354_v32, %v14925_v14  ;;  %v1359_v30 = vmin.f32 %v1355_v16, %v14926_v29  ;;  %v14929_v56 = vld [vmem:[#allocation145_spill] sm:$0xff]  ;;  %v14931_v15 = vld [vmem:[#allocation146_spill] sm:$0xff]  ;;  %v14932_v32 = vld [vmem:[#allocation147_spill] sm:$0xff] }
 0x2b8   : > { %v651_v9 = vadd.f32 %v650_v63, %v14875_v37  ;;  %v1360_v33 = vmin.f32 %v1356_v5, %v14927_v51  ;;  %v14928_v63 = vld [vmem:[#allocation226_spill] sm:$0xff]  ;;  %v1361_v11 = vmin.f32 %v1357_v10, %v14929_v56  ;;  %v1515_v61 = vmax.f32 %v6769_v28, %v14930_v2  ;;  %v14933_v16 = vld [vmem:[#allocation148_spill] sm:$0xff]  ;;  %v14935_v14 = vld [vmem:[#allocation149_spill] sm:$0xff] }
 0x2b9   : > { %v6816_v27 = vmul.f32 %v14928_v63, %v14928_v63  ;;  %v1170_v52 = vadd.f32 %v1169_v12, %v6678_v54  ;;  %v1362_v20 = vmin.f32 %v1358_v21, %v14931_v15  ;;  %v1363_v31 = vmin.f32 %v1359_v30, %v14932_v32  ;;  %v14936_v10 = vld [vmem:[#allocation36_spill] sm:$0xff]  ;;  %v14937_v54 = vld [vmem:[#allocation150_spill] sm:$0xff]  ;;  %v14938_v21 = vld [vmem:[#allocation151_spill] sm:$0xff] }
 0x2ba   : > { %v652_v57 = vadd.f32 %v651_v9, %v14880_v42  ;;  %v1364_v29 = vmin.f32 %v1360_v33, %v14933_v16  ;;  %v14934_v9 = vld [vmem:[#allocation227_spill] sm:$0xff]  ;;  %v1365_v42 = vmin.f32 %v1361_v11, %v14935_v14  ;;  %v1516_v56 = vmax.f32 %v6782_v1, %v14936_v10  ;;  %v14939_v30 = vld [vmem:[#allocation152_spill] sm:$0xff]  ;;  %v14941_v15 = vld [vmem:[#allocation153_spill] sm:$0xff] }
 0x2bb   : > { %v6828_v51 = vmul.f32 %v14934_v9, %v14934_v9  ;;  %v1171_v28 = vadd.f32 %v1170_v52, %v6691_v40  ;;  %v1366_v12 = vmin.f32 %v1362_v20, %v14937_v54  ;;  %v1367_v2 = vmin.f32 %v1363_v31, %v14938_v21  ;;  %v14942_v40 = vld [vmem:[#allocation154_spill] sm:$0xff]  ;;  %v14943_v20 = vld [vmem:[#allocation155_spill] sm:$0xff]  ;;  %v14944_v31 = vld [vmem:[#allocation156_spill] sm:$0xff] }
 0x2bc   : > { %v653_v5 = vadd.f32 %v652_v57, %v14885_v46  ;;  %v1368_v32 = vmin.f32 %v1364_v29, %v14939_v30  ;;  %v14940_v57 = vld [vmem:[#allocation228_spill] sm:$0xff]  ;;  %v1369_v46 = vmin.f32 %v1365_v42, %v14941_v15  ;;  %v1517_v11 = vmax.f32 %v6795_v48, %v5199_v34  ;;  %v14946_v54 = vld [vmem:[#allocation157_spill] sm:$0xff] }
 0x2bd   : > { %v6840_v16 = vmul.f32 %v14940_v57, %v14940_v57  ;;  %v1172_v1 = vadd.f32 %v1171_v28, %v6704_v18  ;;  %v1370_v52 = vmin.f32 %v1366_v12, %v14942_v40  ;;  %v1371_v10 = vmin.f32 %v1367_v2, %v14943_v20  ;;  %v14947_v18 = vld [vmem:[#allocation158_spill] sm:$0xff]  ;;  %v14948_v12 = vld [vmem:[#allocation159_spill] sm:$0xff]  ;;  %v14949_v2 = vld [vmem:[#allocation160_spill] sm:$0xff] }
 0x2be   : > { %v654_v33 = vadd.f32 %v653_v5, %v14890_v6  ;;  %v1372_v21 = vmin.f32 %v1368_v32, %v14944_v31  ;;  %v14945_v5 = vld [vmem:[#allocation229_spill] sm:$0xff]  ;;  %v1373_v14 = vmin.f32 %v1369_v46, %v14946_v54  ;;  %v6856_v42 = vmax.f32 %v1514_v53, %v5202_v35  ;;  %v14952_v46 = vld [vmem:[#allocation39_spill] sm:$0xff] }
 0x2bf   : > { %v6852_v30 = vmul.f32 %v14945_v5, %v14945_v5  ;;  %v1173_v48 = vadd.f32 %v1172_v1, %v6716_v19  ;;  %v1374_v28 = vmin.f32 %v1370_v52, %v14947_v18  ;;  %v1375_v34 = vmin.f32 %v1371_v10, %v14948_v12  ;;  %v14951_v40 = vld [vmem:[#allocation161_spill] sm:$0xff]  ;;  %v14953_v19 = vld [vmem:[#allocation162_spill] sm:$0xff]  ;;  %v14954_v52 = vld [vmem:[#allocation163_spill] sm:$0xff] }
 0x2c0   : > { %v655_v29 = vadd.f32 %v654_v33, %v14896_v60  ;;  %v1376_v20 = vmin.f32 %v1372_v21, %v14949_v2  ;;  %v14950_v33 = vld [vmem:[#allocation230_spill] sm:$0xff]  ;;  %v1377_v15 = vmin.f32 %v1373_v14, %v14951_v40  ;;  %v6869_v54 = vmax.f32 %v1515_v61, %v14952_v46  ;;  %v14955_v10 = vld [vmem:[#allocation164_spill] sm:$0xff]  ;;  %v14957_v18 = vld [vmem:[#allocation165_spill] sm:$0xff] }
 0x2c1   : > { %v6865_v31 = vmul.f32 %v14950_v33, %v14950_v33  ;;  %v1174_v53 = vadd.f32 %v1173_v48, %v6728_v62  ;;  %v1378_v1 = vmin.f32 %v1374_v28, %v14953_v19  ;;  %v1379_v35 = vmin.f32 %v1375_v34, %v14954_v52  ;;  %v14958_v14 = vld [vmem:[#allocation40_spill] sm:$0xff]  ;;  %v14959_v62 = vld [vmem:[#allocation166_spill] sm:$0xff]  ;;  %v14960_v28 = vld [vmem:[#allocation167_spill] sm:$0xff] }
 0x2c2   : > { %v656_v32 = vadd.f32 %v655_v29, %v14901_v4  ;;  %v1380_v12 = vmin.f32 %v1376_v20, %v14955_v10  ;;  %v14956_v29 = vld [vmem:[#allocation231_spill] sm:$0xff]  ;;  %v1381_v4 = vmin.f32 %v1377_v15, %v14957_v18  ;;  %v6882_v40 = vmax.f32 %v1516_v56, %v14958_v14  ;;  %v14961_v34 = vld [vmem:[#allocation168_spill] sm:$0xff]  ;;  %v14963_v19 = vld [vmem:[#allocation169_spill] sm:$0xff] }
 0x2c3   : > { %v6878_v2 = vmul.f32 %v14956_v29, %v14956_v29  ;;  %v1175_v61 = vadd.f32 %v1174_v53, %v6740_v58  ;;  %v1382_v48 = vmin.f32 %v1378_v1, %v14959_v62  ;;  %v1383_v46 = vmin.f32 %v1379_v35, %v14960_v28  ;;  %v14964_v58 = vld [vmem:[#allocation170_spill] sm:$0xff]  ;;  %v14965_v1 = vld [vmem:[#allocation171_spill] sm:$0xff]  ;;  %v14966_v35 = vld [vmem:[#allocation172_spill] sm:$0xff] }
 0x2c4   : > { %v657_v21 = vadd.f32 %v656_v32, %v14906_v43  ;;  %v1384_v52 = vmin.f32 %v1380_v12, %v14961_v34  ;;  %v14962_v32 = vld [vmem:[#allocation232_spill] sm:$0xff]  ;;  %v1385_v43 = vmin.f32 %v1381_v4, %v14963_v19  ;;  %v6895_v15 = vmax.f32 %v1517_v11, %v5211_v38  ;;  %v14968_v62 = vld [vmem:[#allocation173_spill] sm:$0xff] }
 0x2c5   : > { %v6891_v10 = vmul.f32 %v14962_v32, %v14962_v32  ;;  %v1176_v56 = vadd.f32 %v1175_v61, %v6752_v22  ;;  %v1386_v53 = vmin.f32 %v1382_v48, %v14964_v58  ;;  %v1387_v14 = vmin.f32 %v1383_v46, %v14965_v1  ;;  %v14969_v22 = vld [vmem:[#allocation174_spill] sm:$0xff]  ;;  %v14970_v48 = vld [vmem:[#allocation175_spill] sm:$0xff]  ;;  %v14971_v46 = vld [vmem:[#allocation176_spill] sm:$0xff] }
 0x2c6   : > { %v658_v20 = vadd.f32 %v657_v21, %v14912_v25  ;;  %v1388_v28 = vmin.f32 %v1384_v52, %v14966_v35  ;;  %v14967_v21 = vld [vmem:[#allocation233_spill] sm:$0xff]  ;;  %v1389_v18 = vmin.f32 %v1385_v43, %v14968_v62  ;;  %v1522_v4 = vmax.f32 %v6856_v42, %v5214_v39  ;;  %v14974_v43 = vld [vmem:[#allocation43_spill] sm:$0xff] }
 0x2c7   : > { %v6904_v34 = vmul.f32 %v14967_v21, %v14967_v21  ;;  %v1177_v11 = vadd.f32 %v1176_v56, %v6765_v23  ;;  %v1390_v61 = vmin.f32 %v1386_v53, %v14969_v22  ;;  %v1391_v38 = vmin.f32 %v1387_v14, %v14970_v48  ;;  %v14973_v58 = vld [vmem:[#allocation177_spill] sm:$0xff]  ;;  %v14975_v23 = vld [vmem:[#allocation178_spill] sm:$0xff]  ;;  %v14976_v53 = vld [vmem:[#allocation179_spill] sm:$0xff] }
 0x2c8   : > { %v659_v12 = vadd.f32 %v658_v20, %v14918_v44  ;;  %v1392_v1 = vmin.f32 %v1388_v28, %v14971_v46  ;;  %v14972_v20 = vld [vmem:[#allocation234_spill] sm:$0xff]  ;;  %v1393_v19 = vmin.f32 %v1389_v18, %v14973_v58  ;;  %v1523_v62 = vmax.f32 %v6869_v54, %v14974_v43  ;;  %v14977_v14 = vld [vmem:[#allocation180_spill] sm:$0xff]  ;;  %v14979_v22 = vld [vmem:[#allocation181_spill] sm:$0xff] }
 0x2c9   : > { %v6916_v35 = vmul.f32 %v14972_v20, %v14972_v20  ;;  %v1178_v42 = vadd.f32 %v1177_v11, %v6778_v24  ;;  %v1394_v56 = vmin.f32 %v1390_v61, %v14975_v23  ;;  %v1395_v39 = vmin.f32 %v1391_v38, %v14976_v53  ;;  %v14980_v18 = vld [vmem:[#allocation44_spill] sm:$0xff]  ;;  %v14981_v24 = vld [vmem:[#allocation182_spill] sm:$0xff]  ;;  %v14982_v61 = vld [vmem:[#allocation183_spill] sm:$0xff] }
 0x2ca   : > { %v660_v52 = vadd.f32 %v659_v12, %v14923_v50  ;;  %v1396_v48 = vmin.f32 %v1392_v1, %v14977_v14  ;;  %v14978_v12 = vld [vmem:[#allocation235_spill] sm:$0xff]  ;;  %v1397_v50 = vmin.f32 %v1393_v19, %v14979_v22  ;;  %v1524_v58 = vmax.f32 %v6882_v40, %v14980_v18  ;;  %v14983_v38 = vld [vmem:[#allocation184_spill] sm:$0xff]  ;;  %v14986_v23 = vld [vmem:[#allocation185_spill] sm:$0xff] }
 0x2cb   : > { %v6928_v46 = vmul.f32 %v14978_v12, %v14978_v12  ;;  %v1179_v54 = vadd.f32 %v1178_v42, %v6791_v8  ;;  %v1398_v11 = vmin.f32 %v1394_v56, %v14981_v24  ;;  %v1399_v43 = vmin.f32 %v1395_v39, %v14982_v61  ;;  %v14987_v19 = vld [vmem:[#allocation45_spill] sm:$0xff]  ;;  %v14988_v8 = vld [vmem:[#allocation186_spill] sm:$0xff]  ;;  %v14989_v56 = vld [vmem:[#allocation187_spill] sm:$0xff] }
 0x2cc   : > { %v661_v28 = vadd.f32 %v660_v52, %v14928_v63  ;;  %v1400_v53 = vmin.f32 %v1396_v48, %v14983_v38  ;;  %v14984_v52 = vld [vmem:[#allocation236_spill] sm:$0xff]  ;;  %v1401_v63 = vmin.f32 %v1397_v50, %v14986_v23  ;;  %v1525_v22 = vmax.f32 %v6895_v15, %v14987_v19  ;;  %v14993_v24 = vld [vmem:[#allocation189_spill] sm:$0xff]  ;;  %v14994_v50 = vld [vmem:[#allocation46_spill] sm:$0xff] }
 0x2cd   : > { %v6940_v14 = vmul.f32 %v14984_v52, %v14984_v52  ;;  %v1180_v40 = vadd.f32 %v1179_v54, %v6804_v26  ;;  %v1402_v42 = vmin.f32 %v1398_v11, %v14988_v8  ;;  %v1403_v18 = vmin.f32 %v1399_v43, %v14989_v56  ;;  %v14990_v39 = vld [vmem:[#allocation188_spill] sm:$0xff]  ;;  %v14995_v26 = vld [vmem:[#allocation190_spill] sm:$0xff]  ;;  %v14996_v11 = vld [vmem:[#allocation191_spill] sm:$0xff] }
 0x2ce   : > { %v662_v1 = vadd.f32 %v661_v28, %v14934_v9  ;;  %v1404_v61 = vmin.f32 %v1400_v53, %v14990_v39  ;;  %v14991_v28 = vld [vmem:[#allocation237_spill] sm:$0xff]  ;;  %v6956_v23 = vmax.f32 %v1522_v4, %v14994_v50  ;;  %v14997_v43 = vld [vmem:[#allocation192_spill] sm:$0xff] }
 0x2cf   : > { %14985 = vst [vmem:[#allocation262_spill] sm:$0xff] %v6940_v14  ;;  %v6952_v38 = vmul.f32 %v14991_v28, %v14991_v28  ;;  %v1405_v14 = vmin.f32 %v1401_v63, %v14993_v24  ;;  %v1181_v15 = vadd.f32 %v1180_v40, %v6816_v27  ;;  %v1406_v54 = vmin.f32 %v1402_v42, %v14995_v26  ;;  %v14999_v8 = vld [vmem:[#allocation193_spill] sm:$0xff]  ;;  %v15000_v63 = vld [vmem:[#allocation47_spill] sm:$0xff]  ;;  %v15001_v27 = vld [vmem:[#allocation194_spill] sm:$0xff] }
 0x2d0   : > { %v663_v48 = vadd.f32 %v662_v1, %v14940_v57  ;;  %v1407_v19 = vmin.f32 %v1403_v18, %v14996_v11  ;;  %v1408_v56 = vmin.f32 %v1404_v61, %v14997_v43  ;;  %v14998_v1 = vld [vmem:[#allocation238_spill] sm:$0xff]  ;;  %v6969_v24 = vmax.f32 %v1523_v62, %v15000_v63  ;;  %v15003_v43 = vld [vmem:[#allocation197_spill] sm:$0xff] }
 0x2d1   : > { %14992 = vst [vmem:[#allocation263_spill] sm:$0xff] %v6952_v38  ;;  %v6965_v39 = vmul.f32 %v14998_v1, %v14998_v1  ;;  %v1409_v38 = vmin.f32 %v1405_v14, %v14999_v8  ;;  %v1182_v4 = vadd.f32 %v1181_v15, %v6828_v51  ;;  %v1410_v40 = vmin.f32 %v1406_v54, %v15001_v27  ;;  %v15004_v14 = vld [vmem:[#allocation48_spill] sm:$0xff]  ;;  %v15005_v63 = vld [vmem:[#allocation198_spill] sm:$0xff]  ;;  %v15008_v27 = vld [vmem:[#allocation49_spill] sm:$0xff] }
 0x2d2   : > { %v664_v53 = vadd.f32 %v663_v48, %v14945_v5  ;;  %v1411_v42 = vmin.f32 %v1407_v19, %v14788_v59  ;;  %v1412_v18 = vmin.f32 %v1408_v56, %v14789_v49  ;;  %v15002_v48 = vld [vmem:[#allocation239_spill] sm:$0xff]  ;;  %v1528_v8 = vmax.f32 %v1524_v58, %v15004_v14  ;;  %v15006_v19 = vld [vmem:[#allocation240_spill] sm:$0xff]  ;;  %v15007_v49 = vld [vmem:[#allocation201_spill] sm:$0xff] }
 0x2d3   : > { %v6978_v50 = vmul.f32 %v15002_v48, %v15002_v48  ;;  %v1413_v11 = vmin.f32 %v1409_v38, %v15003_v43  ;;  %v1183_v62 = vadd.f32 %v1182_v4, %v6840_v16  ;;  %v1414_v51 = vmin.f32 %v1410_v40, %v15005_v63  ;;  %v15009_v14 = vld [vmem:[#allocation202_spill] sm:$0xff] }
 0x2d4   : > { %v665_v61 = vadd.f32 %v664_v53, %v14950_v33  ;;  %v1415_v15 = vmin.f32 %v1411_v42, %v14792_v55  ;;  %v1416_v54 = vmin.f32 %v1412_v18, %v14793_v3  ;;  %v6989_v53 = vmul.f32 %v15006_v19, %v15006_v19  ;;  %v15010_v18 = vld [vmem:[#allocation241_spill] sm:$0xff]  ;;  %v15012_v63 = vld [vmem:[#allocation50_spill] sm:$0xff] }
 0x2d5   : > { %v1417_v59 = vmin.f32 %v1413_v11, %v15007_v49  ;;  %v1529_v38 = vmax.f32 %v1525_v22, %v15008_v27  ;;  %v1184_v58 = vadd.f32 %v1183_v62, %v6852_v30  ;;  %v1418_v16 = vmin.f32 %v1414_v51, %v15009_v14  ;;  %v15011_v3 = vld [vmem:[#allocation205_spill] sm:$0xff]  ;;  %v15013_v30 = vld [vmem:[#allocation206_spill] sm:$0xff] }
 0x2d6   : > { %v666_v56 = vadd.f32 %v665_v61, %v14956_v29  ;;  %v1419_v4 = vmin.f32 %v1415_v15, %v14801_v45  ;;  %v1420_v40 = vmin.f32 %v1416_v54, %v14808_v7  ;;  %v7000_v61 = vmul.f32 %v15010_v18, %v15010_v18  ;;  %v15014_v54 = vld [vmem:[#allocation242_spill] sm:$0xff] }
 0x2d7   : > { %v1421_v55 = vmin.f32 %v1417_v59, %v15011_v3  ;;  %v1530_v11 = vmax.f32 %v6956_v23, %v15012_v63  ;;  %v1185_v22 = vadd.f32 %v1184_v58, %v6865_v31  ;;  %v1422_v27 = vmin.f32 %v1418_v16, %v15013_v30  ;;  %v15015_v59 = vld [vmem:[#allocation51_spill] sm:$0xff]  ;;  %v15016_v31 = vld [vmem:[#allocation210_spill] sm:$0xff] }
 0x2d8   : > { %v667_v42 = vadd.f32 %v666_v56, %v14962_v32  ;;  %v1423_v62 = vmin.f32 %v1419_v4, %v14825_v17  ;;  %v1424_v51 = vmin.f32 %v1420_v40, %v14831_v0  ;;  %v7012_v56 = vmul.f32 %v15014_v54, %v15014_v54  ;;  %v15017_v40 = vld [vmem:[#allocation243_spill] sm:$0xff]  ;;  %v15018_v0 = vld [vmem:[#allocation213_spill] sm:$0xff] }
 0x2d9   : > { %v1425_v7 = vmin.f32 %v1421_v55, %v14836_v47  ;;  %v1531_v3 = vmax.f32 %v6969_v24, %v15015_v59  ;;  %v1186_v23 = vadd.f32 %v1185_v22, %v6878_v2  ;;  %v1426_v63 = vmin.f32 %v1422_v27, %v15016_v31  ;;  %v15019_v55 = vld [vmem:[#allocation52_spill] sm:$0xff]  ;;  %v15020_v59 = vld [vmem:[#allocation214_spill] sm:$0xff]  ;;  %v15023_v31 = vld [vmem:[#allocation53_spill] sm:$0xff] }
 0x2da   : > { %v668_v15 = vadd.f32 %v667_v42, %v14967_v21  ;;  %v1427_v58 = vmin.f32 %v1423_v62, %v14847_v36  ;;  %v1428_v16 = vmin.f32 %v1424_v51, %v14853_v41  ;;  %v7024_v42 = vmul.f32 %v15017_v40, %v15017_v40  ;;  %v15021_v51 = vld [vmem:[#allocation244_spill] sm:$0xff]  ;;  %v15022_v41 = vld [vmem:[#allocation217_spill] sm:$0xff] }
 0x2db   : > { %v1429_v17 = vmin.f32 %v1425_v7, %v15018_v0  ;;  %v1532_v47 = vmax.f32 %v1528_v8, %v15019_v55  ;;  %v1187_v24 = vadd.f32 %v1186_v23, %v6891_v10  ;;  %v1430_v2 = vmin.f32 %v1426_v63, %v15020_v59  ;;  %v15024_v55 = vld [vmem:[#allocation218_spill] sm:$0xff] }
 0x2dc   : > { %v669_v4 = vadd.f32 %v668_v15, %v14972_v20  ;;  %v1431_v22 = vmin.f32 %v1427_v58, %v14869_v13  ;;  %v1432_v27 = vmin.f32 %v1428_v16, %v14875_v37  ;;  %v7035_v15 = vmul.f32 %v15021_v51, %v15021_v51  ;;  %v15025_v16 = vld [vmem:[#allocation245_spill] sm:$0xff]  ;;  %v15027_v59 = vld [vmem:[#allocation54_spill] sm:$0xff] }
 0x2dd   : > { %v1433_v36 = vmin.f32 %v1429_v17, %v15022_v41  ;;  %v1533_v7 = vmax.f32 %v1529_v38, %v15023_v31  ;;  %v1188_v8 = vadd.f32 %v1187_v24, %v6904_v34  ;;  %v1434_v10 = vmin.f32 %v1430_v2, %v15024_v55  ;;  %v15026_v37 = vld [vmem:[#allocation221_spill] sm:$0xff]  ;;  %v15028_v31 = vld [vmem:[#allocation222_spill] sm:$0xff]  ;;  %v15031_v55 = vld [vmem:[#allocation56_spill] sm:$0xff] }
 0x2de   : > { %v670_v62 = vadd.f32 %v669_v4, %v14978_v12  ;;  %v1435_v23 = vmin.f32 %v1431_v22, %v14890_v6  ;;  %v1436_v63 = vmin.f32 %v1432_v27, %v14896_v60  ;;  %v7046_v4 = vmul.f32 %v15025_v16, %v15025_v16  ;;  %v15029_v27 = vld [vmem:[#allocation225_spill] sm:$0xff]  ;;  %v15030_v60 = vld [vmem:[#allocation55_spill] sm:$0xff] }
 0x2df   : > { %v1437_v13 = vmin.f32 %v1433_v36, %v15026_v37  ;;  %v1534_v17 = vmax.f32 %v1530_v11, %v15027_v59  ;;  %v1189_v38 = vadd.f32 %v1188_v8, %v6916_v35  ;;  %v1438_v34 = vmin.f32 %v1434_v10, %v15028_v31  ;;  %v15032_v37 = vld [vmem:[#allocation226_spill] sm:$0xff] }
 0x2e0   : > { %v671_v58 = vadd.f32 %v670_v62, %v14984_v52  ;;  %v1439_v24 = vmin.f32 %v1435_v23, %v14912_v25  ;;  %v1440_v2 = vmin.f32 %v1436_v63, %v14918_v44  ;;  %v1535_v6 = vmax.f32 %v1531_v3, %v15030_v60  ;;  %v15033_v23 = vld [vmem:[#allocation57_spill] sm:$0xff] }
 0x2e1   : > { %v1441_v62 = vmin.f32 %v1437_v13, %v15029_v27  ;;  %v1536_v41 = vmax.f32 %v1532_v47, %v15031_v55  ;;  %v1190_v36 = vadd.f32 %v1189_v38, %v6928_v46  ;;  %v1442_v11 = vmin.f32 %v1438_v34, %v15032_v37  ;;  %v15035_v27 = vld [vmem:[#allocation262_spill] sm:$0xff]  ;;  %v15036_v34 = vld [vmem:[#allocation59_spill] sm:$0xff] }
 0x2e2   : > { %v672_v22 = vadd.f32 %v671_v58, %v14991_v28  ;;  %v1443_v35 = vmin.f32 %v1439_v24, %v14934_v9  ;;  %v1444_v59 = vmin.f32 %v1440_v2, %v14940_v57  ;;  %v1537_v63 = vmax.f32 %v1533_v7, %v15033_v23  ;;  %v15034_v58 = vld [vmem:[#allocation58_spill] sm:$0xff]  ;;  %v15037_v2 = vld [vmem:[#allocation60_spill] sm:$0xff] }
 0x2e3   : > { %v1445_v10 = vmin.f32 %v1441_v62, %v14945_v5  ;;  %v1538_v13 = vmax.f32 %v1534_v17, %v15034_v58  ;;  %v1191_v3 = vadd.f32 %v1190_v36, %v15035_v27  ;;  %v1446_v47 = vmin.f32 %v1442_v11, %v14950_v33  ;;  %v15038_v62 = vld [vmem:[#allocation263_spill] sm:$0xff]  ;;  %v15040_v23 = vld [vmem:[#allocation62_spill] sm:$0xff] }
 0x2e4   : > { %v673_v8 = vadd.f32 %v672_v22, %v14998_v1  ;;  %v1447_v60 = vmin.f32 %v1443_v35, %v14956_v29  ;;  %v1448_v46 = vmin.f32 %v1444_v59, %v14962_v32  ;;  %v1539_v24 = vmax.f32 %v1535_v6, %v15036_v34  ;;  %v15039_v59 = vld [vmem:[#allocation61_spill] sm:$0xff]  ;;  %v15042_v34 = vld [vmem:[#allocation64_spill] sm:$0xff] }
 0x2e5   : > { %v1449_v38 = vmin.f32 %v1445_v10, %v14967_v21  ;;  %v1540_v22 = vmax.f32 %v1536_v41, %v15037_v2  ;;  %v1192_v7 = vadd.f32 %v1191_v3, %v15038_v62  ;;  %v1450_v17 = vmin.f32 %v1446_v47, %v14972_v20  ;;  %v15071_v20 = vld [vmem:[#allocation77_spill] sm:$0xff] }
 0x2e6   : > { %v674_v55 = vadd.f32 %v673_v8, %v15002_v48  ;;  %v1451_v27 = vmin.f32 %v1447_v60, %v14978_v12  ;;  %v1452_v36 = vmin.f32 %v1448_v46, %v14984_v52  ;;  %v1541_v8 = vmax.f32 %v1537_v63, %v15039_v59  ;;  %v15041_v46 = vld [vmem:[#allocation63_spill] sm:$0xff]  ;;  %v15070_v12 = vld [vmem:[#allocation76_spill] sm:$0xff] }
 0x2e7   : > { %v1453_v35 = vmin.f32 %v1449_v38, %v14991_v28  ;;  %v1542_v10 = vmax.f32 %v1538_v13, %v15040_v23  ;;  %v1193_v6 = vadd.f32 %v1192_v7, %v6965_v39  ;;  %v1454_v41 = vmin.f32 %v1450_v17, %v14998_v1  ;;  %v15043_v17 = vld [vmem:[#allocation65_spill] sm:$0xff]  ;;  %v15046_v59 = vld [vmem:[#allocation247_spill] sm:$0xff]  ;;  %v15047_v23 = vld [vmem:[#allocation248_spill] sm:$0xff] }
 0x2e8   : > { %v675_v11 = vadd.f32 %v674_v55, %v15006_v19  ;;  %v1455_v58 = vmin.f32 %v1451_v27, %v15002_v48  ;;  %v1456_v3 = vmin.f32 %v1452_v36, %v15006_v19  ;;  %v1543_v55 = vmax.f32 %v1539_v24, %v15041_v46  ;;  %v15044_v36 = vld [vmem:[#allocation66_spill] sm:$0xff]  ;;  %v15049_v46 = vld [vmem:[#allocation67_spill] sm:$0xff]  ;;  %v15067_v1 = vld [vmem:[#allocation73_spill] sm:$0xff] }
 0x2e9   : > { %v1457_v60 = vmin.f32 %v1453_v35, %v15010_v18  ;;  %v1544_v38 = vmax.f32 %v1540_v22, %v15042_v34  ;;  %v1194_v63 = vadd.f32 %v1193_v6, %v6978_v50  ;;  %v1458_v13 = vmin.f32 %v1454_v41, %v15014_v54  ;;  %v15045_v35 = vld [vmem:[#allocation246_spill] sm:$0xff]  ;;  %v15050_v34 = vld [vmem:[#allocation68_spill] sm:$0xff] }
 0x2ea   : > { %v676_v47 = vadd.f32 %v675_v11, %v15010_v18  ;;  %v1459_v39 = vmin.f32 %v1455_v58, %v15017_v40  ;;  %v1460_v2 = vmin.f32 %v1456_v3, %v15021_v51  ;;  %v1545_v27 = vmax.f32 %v1541_v8, %v15043_v17  ;;  %v15048_v58 = vld [vmem:[#allocation249_spill] sm:$0xff]  ;;  %v15051_v17 = vld [vmem:[#allocation250_spill] sm:$0xff] }
 0x2eb   : > { %v1461_v7 = vmin.f32 %v1457_v60, %v15025_v16  ;;  %v1546_v11 = vmax.f32 %v1542_v10, %v15044_v36  ;;  %v1195_v24 = vadd.f32 %v1194_v63, %v6989_v53  ;;  %v1462_v22 = vmin.f32 %v1458_v13, %v15045_v35  ;;  %v15052_v36 = vld [vmem:[#allocation251_spill] sm:$0xff]  ;;  %v15053_v63 = vld [vmem:[#allocation252_spill] sm:$0xff]  ;;  %v15055_v18 = vld [vmem:[#allocation69_spill] sm:$0xff] }
 0x2ec   : > { %v677_v62 = vadd.f32 %v676_v47, %v15014_v54  ;;  %v1463_v50 = vmin.f32 %v1459_v39, %v15046_v59  ;;  %v1464_v6 = vmin.f32 %v1460_v2, %v15047_v23  ;;  %v1547_v47 = vmax.f32 %v1543_v55, %v15049_v46  ;;  %v15054_v54 = vld [vmem:[#allocation253_spill] sm:$0xff]  ;;  %v15057_v46 = vld [vmem:[#allocation254_spill] sm:$0xff] }
 0x2ed   : > { %v1465_v3 = vmin.f32 %v1461_v7, %v15048_v58  ;;  %v1548_v60 = vmax.f32 %v1544_v38, %v15050_v34  ;;  %v1196_v8 = vadd.f32 %v1195_v24, %v7000_v61  ;;  %v1466_v10 = vmin.f32 %v1462_v22, %v15051_v17  ;;  %v15058_v34 = vld [vmem:[#allocation255_spill] sm:$0xff]  ;;  %v15059_v24 = vld [vmem:[#allocation256_spill] sm:$0xff] }
 0x2ee   : > { %v678_v41 = vadd.f32 %v677_v62, %v15017_v40  ;;  %v1467_v53 = vmin.f32 %v1463_v50, %v15052_v36  ;;  %v1468_v13 = vmin.f32 %v1464_v6, %v15053_v63  ;;  %v1549_v62 = vmax.f32 %v1545_v27, %v15055_v18  ;;  %v15056_v40 = vld [vmem:[#allocation70_spill] sm:$0xff] }
 0x2ef   : > { %v1469_v2 = vmin.f32 %v1465_v3, %v15054_v54  ;;  %v1550_v7 = vmax.f32 %v1546_v11, %v15056_v40  ;;  %v1197_v55 = vadd.f32 %v1196_v8, %v7012_v56  ;;  %v1470_v38 = vmin.f32 %v1466_v10, %v15057_v46  ;;  %v15061_v3 = vld [vmem:[#allocation71_spill] sm:$0xff]  ;;  %v15062_v40 = vld [vmem:[#allocation258_spill] sm:$0xff]  ;;  %v15064_v8 = vld [vmem:[#allocation260_spill] sm:$0xff] }
 0x2f0   : > { %v679_v39 = vadd.f32 %v678_v41, %v15021_v51  ;;  %v1471_v61 = vmin.f32 %v1467_v53, %v15058_v34  ;;  %v1472_v22 = vmin.f32 %v1468_v13, %v15059_v24  ;;  %v946_v6 = vmul.f32 %v15045_v35, %v15045_v35  ;;  %v15060_v41 = vld [vmem:[#allocation257_spill] sm:$0xff]  ;;  %v15063_v56 = vld [vmem:[#allocation259_spill] sm:$0xff] }
 0x2f1   : > { %v1473_v51 = vmin.f32 %v1469_v2, %v15060_v41  ;;  %v1551_v19 = vmax.f32 %v1547_v47, %v15061_v3  ;;  %v1198_v18 = vadd.f32 %v1197_v55, %v7024_v42  ;;  %v1474_v27 = vmin.f32 %v1470_v38, %v15062_v40  ;;  %v15065_v13 = vld [vmem:[#allocation261_spill] sm:$0xff]  ;;  %v15068_v47 = vld [vmem:[#allocation74_spill] sm:$0xff]  ;;  %v15069_v42 = vld [vmem:[#allocation75_spill] sm:$0xff] }
 0x2f2   : > { %v680_v50 = vadd.f32 %v679_v39, %v15025_v16  ;;  %v1475_v11 = vmin.f32 %v1471_v61, %v15063_v56  ;;  %v1476_v10 = vmin.f32 %v1472_v22, %v15064_v8  ;;  %v15066_v39 = vld [vmem:[#allocation72_spill] sm:$0xff]  ;;  %v1553_v28 = vmax.f32 %v1549_v62, %v15067_v1  ;;  %v15072_v1 = vld [vmem:[#allocation78_spill] sm:$0xff] }
 0x2f3   : > { %v1477_v48 = vmin.f32 %v1473_v51, %v15065_v13  ;;  %v1552_v16 = vmax.f32 %v1548_v60, %v15066_v39  ;;  %v1199_v2 = vadd.f32 %v1198_v18, %v7035_v15  ;;  %v1554_v3 = vmax.f32 %v1550_v7, %v15068_v47  ;;  %v15073_v15 = vld [vmem:[#allocation79_spill] sm:$0xff]  ;;  %v15078_v47 = vld [vmem:[#allocation84_spill] sm:$0xff] }
 0x2f4   : > { %v681_v53 = vadd.f32 %v680_v50, %v15045_v35  ;;  %v1478_v52 = vmin.f32 %v1474_v27, %v1475_v11  ;;  %v1555_v55 = vmax.f32 %v1551_v19, %v15069_v42  ;;  %v1557_v50 = vmax.f32 %v1553_v28, %v15071_v20  ;;  %v15074_v19 = vld [vmem:[#allocation80_spill] sm:$0xff]  ;;  %v15076_v28 = vld [vmem:[#allocation82_spill] sm:$0xff]  ;;  %v15079_v42 = vld [vmem:[#allocation85_spill] sm:$0xff] }
 0x2f5   : > { %v1479_v61 = vmin.f32 %v1476_v10, %v1477_v48  ;;  %v1556_v22 = vmax.f32 %v1552_v16, %v15070_v12  ;;  %v947_v51 = vmul.f32 %v15046_v59, %v15046_v59  ;;  %v1200_v60 = vadd.f32 %v1199_v2, %v7046_v4  ;;  %v15077_v10 = vld [vmem:[#allocation83_spill] sm:$0xff] }
 0x2f6   : > { %v682_v38 = vadd.f32 %v681_v53, %v15046_v59  ;;  %v1558_v62 = vmax.f32 %v1554_v3, %v15072_v1  ;;  %v1559_v18 = vmax.f32 %v1555_v55, %v15073_v15  ;;  %v15075_v53 = vld [vmem:[#allocation81_spill] sm:$0xff]  ;;  %v948_v12 = vmul.f32 %v15047_v23, %v15047_v23 }
 0x2f7   : > { %v1480_v27 = vmin.f32 %v1478_v52, %v1479_v61  ;;  %v1560_v11 = vmax.f32 %v1556_v22, %v15074_v19  ;;  %v1561_v48 = vmax.f32 %v1557_v50, %v15075_v53  ;;  %v1201_v20 = vadd.f32 %v1200_v60, %v946_v6  ;;  %v15080_v61 = vld [vmem:[#allocation86_spill] sm:$0xff]  ;;  %v15081_v50 = vld [vmem:[#allocation87_spill] sm:$0xff] }
 0x2f8   : > { %v683_v7 = vadd.f32 %v682_v38, %v15047_v23  ;;  %v1562_v16 = vmax.f32 %v1558_v62, %v15076_v28  ;;  %v1563_v39 = vmax.f32 %v1559_v18, %v15077_v10  ;;  %v949_v52 = vmul.f32 %v15048_v58, %v15048_v58  ;;  %v15082_v62 = vld [vmem:[#allocation88_spill] sm:$0xff]  ;;  %v15083_v18 = vld [vmem:[#allocation89_spill] sm:$0xff]  ;;  %v15084_v53 = vld [vmem:[#allocation90_spill] sm:$0xff] }
 0x2f9   : > { %v1481_v2 = vrot.slane %v1480_v27, 4  ;;  %v1564_v3 = vmax.f32 %v1560_v11, %v15078_v47  ;;  %v1565_v55 = vmax.f32 %v1561_v48, %v15079_v42  ;;  %v1202_v38 = vadd.f32 %v1201_v20, %v947_v51  ;;  %v15085_v28 = vld [vmem:[#allocation91_spill] sm:$0xff]  ;;  %v15087_v47 = vld [vmem:[#allocation93_spill] sm:$0xff] }
 0x2fa   : > { %v684_v4 = vadd.f32 %v683_v7, %v15048_v58  ;;  %v1566_v22 = vmax.f32 %v1562_v16, %v15080_v61  ;;  %v1567_v1 = vmax.f32 %v1563_v39, %v15081_v50  ;;  %v950_v19 = vmul.f32 %v15051_v17, %v15051_v17  ;;  %v15086_v16 = vld [vmem:[#allocation92_spill] sm:$0xff] }
 0x2fb   : > { %v1482_v60 = vmin.f32 %v1480_v27, %v1481_v2  ;;  %v1568_v15 = vmax.f32 %v1564_v3, %v15082_v62  ;;  %v1569_v7 = vmax.f32 %v1565_v55, %v15083_v18  ;;  %v1203_v11 = vadd.f32 %v1202_v38, %v948_v12  ;;  %v15088_v3 = vld [vmem:[#allocation94_spill] sm:$0xff]  ;;  %v15089_v55 = vld [vmem:[#allocation95_spill] sm:$0xff] }
 0x2fc   : > { %v685_v6 = vadd.f32 %v684_v4, %v15051_v17  ;;  %v1570_v48 = vmax.f32 %v1566_v22, %v15084_v53  ;;  %v1571_v10 = vmax.f32 %v1567_v1, %v15085_v28  ;;  %v951_v27 = vmul.f32 %v15052_v36, %v15052_v36  ;;  %v15090_v22 = vld [vmem:[#allocation96_spill] sm:$0xff]  ;;  %v15091_v1 = vld [vmem:[#allocation97_spill] sm:$0xff]  ;;  %v15092_v18 = vld [vmem:[#allocation98_spill] sm:$0xff] }
 0x2fd   : > { %v1483_v20 = vrot.slane %v1482_v60, 2  ;;  %v1572_v39 = vmax.f32 %v1568_v15, %v15086_v16  ;;  %v1573_v4 = vmax.f32 %v1569_v7, %v15087_v47  ;;  %v1204_v2 = vadd.f32 %v1203_v11, %v949_v52  ;;  %v15093_v53 = vld [vmem:[#allocation99_spill] sm:$0xff]  ;;  %v15095_v16 = vld [vmem:[#allocation101_spill] sm:$0xff] }
 0x2fe   : > { %v686_v51 = vadd.f32 %v685_v6, %v15052_v36  ;;  %v1574_v42 = vmax.f32 %v1570_v48, %v15088_v3  ;;  %v1575_v61 = vmax.f32 %v1571_v10, %v15089_v55  ;;  %v952_v62 = vmul.f32 %v15053_v63, %v15053_v63  ;;  %v15094_v48 = vld [vmem:[#allocation100_spill] sm:$0xff] }
 0x2ff   : > { %v1484_v38 = vmin.f32 %v1482_v60, %v1483_v20  ;;  %v1576_v50 = vmax.f32 %v1572_v39, %v15090_v22  ;;  %v1577_v6 = vmax.f32 %v1573_v4, %v15091_v1  ;;  %v1205_v15 = vadd.f32 %v1204_v2, %v950_v19  ;;  %v15096_v39 = vld [vmem:[#allocation102_spill] sm:$0xff]  ;;  %v15097_v4 = vld [vmem:[#allocation103_spill] sm:$0xff]  ;;  %v1225_v2 = vld [vmem:[#allocation4] sm:$0x1] }
 0x300   : > { %v687_v12 = vadd.f32 %v686_v51, %v15053_v63  ;;  %v1578_v7 = vmax.f32 %v1574_v42, %v15092_v18  ;;  %v1579_v28 = vmax.f32 %v1575_v61, %v15093_v53  ;;  %v953_v60 = vmul.f32 %v15054_v54, %v15054_v54  ;;  %v15098_v55 = vld [vmem:[#allocation104_spill] sm:$0xff]  ;;  %v15101_v53 = vld [vmem:[#allocation107_spill] sm:$0xff] }
 0x301   : > { %v1485_v11 = vrot.slane %v1484_v38, 1  ;;  %v1580_v10 = vmax.f32 %v1576_v50, %v15094_v48  ;;  %v1581_v51 = vmax.f32 %v1577_v6, %v15095_v16  ;;  %v1206_v20 = vadd.f32 %v1205_v15, %v951_v27  ;;  %v15100_v6 = vld [vmem:[#allocation106_spill] sm:$0xff] }
 0x302   : > { %v688_v52 = vadd.f32 %v687_v12, %v15054_v54  ;;  %v1582_v47 = vmax.f32 %v1578_v7, %v15096_v39  ;;  %v1583_v3 = vmax.f32 %v1579_v28, %v15097_v4  ;;  %v15099_v12 = vld [vmem:[#allocation105_spill] sm:$0xff]  ;;  %v954_v50 = vmul.f32 %v15057_v46, %v15057_v46  ;;  %v15102_v28 = vld [vmem:[#allocation108_spill] sm:$0xff]  ;;  %v15105_v39 = vld [vmem:[#allocation111_spill] sm:$0xff] }
 0x303   : > { %v1486_v42 = vmin.f32 %v1484_v38, %v1485_v11  ;;  %v1584_v61 = vmax.f32 %v1580_v10, %v15098_v55  ;;  %v1585_v22 = vmax.f32 %v1581_v51, %v15099_v12  ;;  %v1207_v1 = vadd.f32 %v1206_v20, %v952_v62  ;;  %v15104_v10 = vld [vmem:[#allocation110_spill] sm:$0xff]  ;;  %v15106_v20 = vld [vmem:[#allocation112_spill] sm:$0xff]  ;;  %v15109_v12 = vld [vmem:[#allocation115_spill] sm:$0xff] }
 0x304   : > { %v689_v19 = vadd.f32 %v688_v52, %v15057_v46  ;;  %v1586_v18 = vmax.f32 %v1582_v47, %v15100_v6  ;;  %v1587_v27 = vmax.f32 %v1583_v3, %v15101_v53  ;;  %v15103_v52 = vld [vmem:[#allocation109_spill] sm:$0xff]  ;;  %v955_v38 = vmul.f32 %v15058_v34, %v15058_v34  ;;  %v15108_v55 = vld [vmem:[#allocation114_spill] sm:$0xff] }
 0x305   : > { %v1487_v7 = vmin.f32 %v1225_v2, %v1486_v42  ;;  %v1588_v48 = vmax.f32 %v1584_v61, %v15102_v28  ;;  %v1589_v16 = vmax.f32 %v1585_v22, %v15103_v52  ;;  %v1208_v11 = vadd.f32 %v1207_v1, %v953_v60  ;;  %v15107_v3 = vld [vmem:[#allocation113_spill] sm:$0xff]  ;;  %v15110_v1 = vld [vmem:[#allocation116_spill] sm:$0xff] }
 0x306   : > { %v690_v15 = vadd.f32 %v689_v19, %v15058_v34  ;;  %v1590_v51 = vmax.f32 %v1586_v18, %v15104_v10  ;;  %v1591_v4 = vmax.f32 %v1587_v27, %v15105_v39  ;;  %v956_v2 = vmul.f32 %v15059_v24, %v15059_v24  ;;  %v15111_v18 = vld [vmem:[#allocation117_spill] sm:$0xff] }
 0x307   : > { %1488 = vst [vmem:[#allocation4] sm:$0x1] %v1487_v7  ;;  %v1592_v47 = vmax.f32 %v1588_v48, %v15106_v20  ;;  %v1593_v19 = vmax.f32 %v1589_v16, %v15107_v3  ;;  %v1209_v42 = vadd.f32 %v1208_v11, %v954_v50  ;;  %v957_v27 = vmul.f32 %v15060_v41, %v15060_v41  ;;  %v15112_v7 = vld [vmem:[#allocation118_spill] sm:$0xff]  ;;  %v15113_v48 = vld [vmem:[#allocation119_spill] sm:$0xff]  ;;  %v15114_v16 = vld [vmem:[#allocation120_spill] sm:$0xff] }
 0x308   : > { %v691_v62 = vadd.f32 %v690_v15, %v15059_v24  ;;  %v1594_v61 = vmax.f32 %v1590_v51, %v15108_v55  ;;  %v1595_v22 = vmax.f32 %v1591_v4, %v15109_v12  ;;  %v15115_v10 = vld [vmem:[#allocation121_spill] sm:$0xff]  ;;  %v958_v39 = vmul.f32 %v15062_v40, %v15062_v40 }
 0x309   : > { %v1596_v6 = vmax.f32 %v1592_v47, %v15110_v1  ;;  %v1597_v53 = vmax.f32 %v1593_v19, %v15111_v18  ;;  %v1210_v15 = vadd.f32 %v1209_v42, %v955_v38  ;;  %v15117_v47 = vld [vmem:[#allocation123_spill] sm:$0xff]  ;;  %v15118_v19 = vld [vmem:[#allocation124_spill] sm:$0xff]  ;;  %v15119_v55 = vld [vmem:[#allocation125_spill] sm:$0xff]  ;;  %v959_v12 = vmul.f32 %v15063_v56, %v15063_v56 }
 0x30a   : > { %v692_v60 = vadd.f32 %v691_v62, %v15060_v41  ;;  %v1598_v28 = vmax.f32 %v1594_v61, %v15112_v7  ;;  %v1599_v52 = vmax.f32 %v1595_v22, %v15113_v48  ;;  %v15116_v62 = vld [vmem:[#allocation122_spill] sm:$0xff]  ;;  %v15123_v7 = vld [vmem:[#allocation129_spill] sm:$0xff]  ;;  %v960_v48 = vmul.f32 %v15064_v8, %v15064_v8 }
 0x30b   : > { %v1600_v11 = vmax.f32 %v1596_v6, %v15114_v16  ;;  %v1601_v51 = vmax.f32 %v1597_v53, %v15115_v10  ;;  %v1211_v4 = vadd.f32 %v1210_v15, %v956_v2  ;;  %v15121_v6 = vld [vmem:[#allocation127_spill] sm:$0xff]  ;;  %v15122_v53 = vld [vmem:[#allocation128_spill] sm:$0xff] }
 0x30c   : > { %v693_v50 = vadd.f32 %v692_v60, %v15062_v40  ;;  %v1602_v20 = vmax.f32 %v1598_v28, %v15116_v62  ;;  %v1603_v3 = vmax.f32 %v1599_v52, %v15117_v47  ;;  %v15120_v60 = vld [vmem:[#allocation126_spill] sm:$0xff]  ;;  %v15127_v62 = vld [vmem:[#allocation133_spill] sm:$0xff]  ;;  %v961_v47 = vmul.f32 %v15065_v13, %v15065_v13 }
 0x30d   : > { %v1604_v42 = vmax.f32 %v1600_v11, %v15118_v19  ;;  %v1605_v61 = vmax.f32 %v1601_v51, %v15119_v55  ;;  %v1212_v22 = vadd.f32 %v1211_v4, %v957_v27  ;;  %v15125_v11 = vld [vmem:[#allocation131_spill] sm:$0xff]  ;;  %v15126_v51 = vld [vmem:[#allocation132_spill] sm:$0xff] }
 0x30e   : > { %v694_v38 = vadd.f32 %v693_v50, %v15063_v56  ;;  %v1606_v1 = vmax.f32 %v1602_v20, %v15120_v60  ;;  %v1607_v18 = vmax.f32 %v1603_v3, %v15121_v6  ;;  %v15124_v50 = vld [vmem:[#allocation130_spill] sm:$0xff]  ;;  %v15131_v60 = vld [vmem:[#allocation137_spill] sm:$0xff] }
 0x30f   : > { %v1608_v15 = vmax.f32 %v1604_v42, %v15122_v53  ;;  %v1609_v28 = vmax.f32 %v1605_v61, %v15123_v7  ;;  %v1213_v52 = vadd.f32 %v1212_v22, %v958_v39  ;;  %v15129_v42 = vld [vmem:[#allocation135_spill] sm:$0xff]  ;;  %v15130_v39 = vld [vmem:[#allocation136_spill] sm:$0xff] }
 0x310   : > { %v695_v2 = vadd.f32 %v694_v38, %v15064_v8  ;;  %v1610_v16 = vmax.f32 %v1606_v1, %v15124_v50  ;;  %v1611_v10 = vmax.f32 %v1607_v18, %v15125_v11  ;;  %v15128_v38 = vld [vmem:[#allocation134_spill] sm:$0xff]  ;;  %v15133_v53 = vld [vmem:[#allocation139_spill] sm:$0xff]  ;;  %v15135_v11 = vld [vmem:[#allocation141_spill] sm:$0xff] }
 0x311   : > { %v1612_v4 = vmax.f32 %v1608_v15, %v15126_v51  ;;  %v1613_v20 = vmax.f32 %v1609_v28, %v15127_v62  ;;  %v1214_v3 = vadd.f32 %v1213_v52, %v959_v12  ;;  %v15132_v18 = vld [vmem:[#allocation138_spill] sm:$0xff]  ;;  %v15134_v28 = vld [vmem:[#allocation140_spill] sm:$0xff]  ;;  %v15137_v62 = vld [vmem:[#allocation143_spill] sm:$0xff] }
 0x312   : > { %v696_v27 = vadd.f32 %v695_v2, %v15065_v13  ;;  %v1614_v19 = vmax.f32 %v1610_v16, %v15128_v38  ;;  %v1615_v55 = vmax.f32 %v1611_v10, %v15129_v42  ;;  %v15136_v52 = vld [vmem:[#allocation142_spill] sm:$0xff]  ;;  %v15138_v42 = vld [vmem:[#allocation144_spill] sm:$0xff] }
 0x313   : > { %v1616_v22 = vmax.f32 %v1612_v4, %v15130_v39  ;;  %v1617_v1 = vmax.f32 %v1613_v20, %v15131_v60  ;;  %v1215_v6 = vadd.f32 %v1214_v3, %v960_v48  ;;  %v15139_v39 = vld [vmem:[#allocation145_spill] sm:$0xff]  ;;  %v15140_v3 = vld [vmem:[#allocation146_spill] sm:$0xff]  ;;  %v15141_v60 = vld [vmem:[#allocation147_spill] sm:$0xff] }
 0x314   : > { %v697_v61 = vrot.slane %v696_v27, 4  ;;  %v1618_v2 = vmax.f32 %v1614_v19, %v15132_v18  ;;  %v1619_v15 = vmax.f32 %v1615_v55, %v15133_v53  ;;  %v15143_v18 = vld [vmem:[#allocation149_spill] sm:$0xff]  ;;  %v15145_v53 = vld [vmem:[#allocation151_spill] sm:$0xff] }
 0x315   : > { %v1620_v50 = vmax.f32 %v1616_v22, %v15134_v28  ;;  %v1621_v51 = vmax.f32 %v1617_v1, %v15135_v11  ;;  %v1216_v12 = vadd.f32 %v1215_v6, %v961_v47  ;;  %v15144_v6 = vld [vmem:[#allocation150_spill] sm:$0xff]  ;;  %v15146_v11 = vld [vmem:[#allocation152_spill] sm:$0xff] }
 0x316   : > { %v698_v7 = vadd.f32 %v697_v61, %v696_v27  ;;  %v1622_v16 = vmax.f32 %v1618_v2, %v15136_v52  ;;  %v1623_v10 = vmax.f32 %v1619_v15, %v15137_v62  ;;  %v15142_v61 = vld [vmem:[#allocation148_spill] sm:$0xff]  ;;  %v15147_v52 = vld [vmem:[#allocation153_spill] sm:$0xff] }
 0x317   : > { %v1624_v4 = vmax.f32 %v1620_v50, %v15138_v42  ;;  %v1625_v20 = vmax.f32 %v1621_v51, %v15139_v39  ;;  %v1217_v48 = vrot.slane %v1216_v12, 4  ;;  %v441_v62 = vld [vmem:[#allocation2] sm:$0x1] }
 0x318   : > { %v699_v38 = vrot.slane %v698_v7, 2  ;;  %v1626_v19 = vmax.f32 %v1622_v16, %v15140_v3  ;;  %v1627_v55 = vmax.f32 %v1623_v10, %v15141_v60  ;;  %v15148_v16 = vld [vmem:[#allocation154_spill] sm:$0xff]  ;;  %v15149_v10 = vld [vmem:[#allocation155_spill] sm:$0xff] }
 0x319   : > { %v1628_v22 = vmax.f32 %v1624_v4, %v15142_v61  ;;  %v1629_v1 = vmax.f32 %v1625_v20, %v15143_v18  ;;  %v1218_v47 = vadd.f32 %v1217_v48, %v1216_v12  ;;  %v15150_v4 = vld [vmem:[#allocation156_spill] sm:$0xff]  ;;  %v15151_v20 = vld [vmem:[#allocation157_spill] sm:$0xff] }
 0x31a   : > { %v700_v27 = vadd.f32 %v699_v38, %v698_v7  ;;  %v1630_v2 = vmax.f32 %v1626_v19, %v15144_v6  ;;  %v1631_v15 = vmax.f32 %v1627_v55, %v15145_v53  ;;  %v15152_v19 = vld [vmem:[#allocation158_spill] sm:$0xff]  ;;  %v15153_v55 = vld [vmem:[#allocation159_spill] sm:$0xff] }
 0x31b   : > { %v1632_v50 = vmax.f32 %v1628_v22, %v15146_v11  ;;  %v1633_v51 = vmax.f32 %v1629_v1, %v15147_v52  ;;  %v1219_v42 = vrot.slane %v1218_v47, 2  ;;  %v15154_v22 = vld [vmem:[#allocation160_spill] sm:$0xff]  ;;  %v15155_v1 = vld [vmem:[#allocation161_spill] sm:$0xff]  ;;  %v15156_v52 = vld [vmem:[#allocation162_spill] sm:$0xff] }
 0x31c   : > { %v701_v28 = vrot.slane %v700_v27, 1  ;;  %v1634_v39 = vmax.f32 %v1630_v2, %v15148_v16  ;;  %v1635_v7 = vmax.f32 %v1631_v15, %v15149_v10  ;;  %v15157_v16 = vld [vmem:[#allocation163_spill] sm:$0xff] }
 0x31d   : > { %v1636_v3 = vmax.f32 %v1632_v50, %v15150_v4  ;;  %v1637_v12 = vmax.f32 %v1633_v51, %v15151_v20  ;;  %v1220_v48 = vadd.f32 %v1219_v42, %v1218_v47  ;;  %v15159_v51 = vld [vmem:[#allocation165_spill] sm:$0xff] }
 0x31e   : > { %v702_v38 = vadd.f32 %v701_v28, %v700_v27  ;;  %v1638_v60 = vmax.f32 %v1634_v39, %v15152_v19  ;;  %v1639_v61 = vmax.f32 %v1635_v7, %v15153_v55  ;;  %v705_v27 = vld [vmem:[#allocation3] sm:$0x1]  ;;  %v15158_v28 = vld [vmem:[#allocation164_spill] sm:$0xff]  ;;  %v15160_v39 = vld [vmem:[#allocation166_spill] sm:$0xff] }
 0x31f   : > { %v1640_v6 = vmax.f32 %v1636_v3, %v15154_v22  ;;  %v1641_v53 = vmax.f32 %v1637_v12, %v15155_v1  ;;  %v1221_v11 = vrot.slane %v1220_v48, 1  ;;  %v15161_v7 = vld [vmem:[#allocation167_spill] sm:$0xff]  ;;  %v15163_v3 = vld [vmem:[#allocation169_spill] sm:$0xff]  ;;  %v15164_v19 = vld [vmem:[#allocation170_spill] sm:$0xff] }
 0x320   : > { %v703_v18 = vadd.f32 %v702_v38, %v441_v62  ;;  %v1642_v2 = vmax.f32 %v1638_v60, %v15156_v52  ;;  %v1643_v15 = vmax.f32 %v1639_v61, %v15157_v16  ;;  %v15162_v38 = vld [vmem:[#allocation168_spill] sm:$0xff]  ;;  %v15165_v55 = vld [vmem:[#allocation171_spill] sm:$0xff]  ;;  %v15167_v1 = vld [vmem:[#allocation173_spill] sm:$0xff] }
 0x321   : > { %v1644_v50 = vmax.f32 %v1640_v6, %v15158_v28  ;;  %v1645_v47 = vmax.f32 %v1641_v53, %v15159_v51  ;;  %v1222_v42 = vadd.f32 %v1221_v11, %v1220_v48  ;;  %v15168_v53 = vld [vmem:[#allocation174_spill] sm:$0xff]  ;;  %v15169_v11 = vld [vmem:[#allocation175_spill] sm:$0xff] }
 0x322   : > { %704 = vst [vmem:[#allocation2] sm:$0x1] %v703_v18  ;;  %v1646_v10 = vmax.f32 %v1642_v2, %v15160_v39  ;;  %v1647_v62 = vmax.f32 %v1643_v15, %v15161_v7  ;;  %v15166_v18 = vld [vmem:[#allocation172_spill] sm:$0xff]  ;;  %v15171_v15 = vld [vmem:[#allocation177_spill] sm:$0xff] }
 0x323   : > { %v1648_v4 = vmax.f32 %v1644_v50, %v15162_v38  ;;  %v1649_v20 = vmax.f32 %v1645_v47, %v15163_v3  ;;  %v1223_v12 = vadd.f32 %v1222_v42, %v705_v27  ;;  %v15170_v2 = vld [vmem:[#allocation176_spill] sm:$0xff]  ;;  %v15172_v50 = vld [vmem:[#allocation178_spill] sm:$0xff]  ;;  %v15173_v27 = vld [vmem:[#allocation179_spill] sm:$0xff] }
 0x324   : > { %v1650_v60 = vmax.f32 %v1646_v10, %v15164_v19  ;;  %v1651_v61 = vmax.f32 %v1647_v62, %v15165_v55  ;;  %v15174_v42 = vld [vmem:[#allocation180_spill] sm:$0xff]  ;;  %v15175_v10 = vld [vmem:[#allocation181_spill] sm:$0xff]  ;;  %v15176_v62 = vld [vmem:[#allocation182_spill] sm:$0xff] }
 0x325   : > { %v1652_v22 = vmax.f32 %v1648_v4, %v15166_v18  ;;  %v1653_v6 = vmax.f32 %v1649_v20, %v15167_v1  ;;  %1224 = vst [vmem:[#allocation3] sm:$0x1] %v1223_v12  ;;  %v15177_v4 = vld [vmem:[#allocation183_spill] sm:$0xff]  ;;  %v15178_v20 = vld [vmem:[#allocation184_spill] sm:$0xff]  ;;  %v15179_v19 = vld [vmem:[#allocation185_spill] sm:$0xff] }
 0x326   : > { %v1654_v48 = vmax.f32 %v1650_v60, %v15168_v53  ;;  %v1655_v52 = vmax.f32 %v1651_v61, %v15169_v11  ;;  %v15180_v55 = vld [vmem:[#allocation186_spill] sm:$0xff]  ;;  %v15181_v18 = vld [vmem:[#allocation187_spill] sm:$0xff]  ;;  %v15182_v1 = vld [vmem:[#allocation188_spill] sm:$0xff] }
 0x327   : > { %v1656_v16 = vmax.f32 %v1652_v22, %v15170_v2  ;;  %v1657_v28 = vmax.f32 %v1653_v6, %v15171_v15  ;;  %v15183_v53 = vld [vmem:[#allocation189_spill] sm:$0xff] }
 0x328   : > { %v1658_v51 = vmax.f32 %v1654_v48, %v15172_v50  ;;  %v1659_v47 = vmax.f32 %v1655_v52, %v15173_v27  ;;  %v15184_v52 = vld [vmem:[#allocation191_spill] sm:$0xff] }
 0x329   : > { %v1660_v39 = vmax.f32 %v1656_v16, %v15174_v42  ;;  %v1661_v7 = vmax.f32 %v1657_v28, %v15175_v10  ;;  %v15185_v16 = vld [vmem:[#allocation192_spill] sm:$0xff]  ;;  %v15186_v28 = vld [vmem:[#allocation193_spill] sm:$0xff] }
 0x32a   : > { %v1662_v38 = vmax.f32 %v1658_v51, %v15176_v62  ;;  %v1663_v3 = vmax.f32 %v1659_v47, %v15177_v4  ;;  %v15187_v51 = vld [vmem:[#allocation194_spill] sm:$0xff]  ;;  %v15188_v47 = vld [vmem:[#allocation195_spill] sm:$0xff] }
 0x32b   : > { %v1664_v12 = vmax.f32 %v1660_v39, %v15178_v20  ;;  %v1665_v60 = vmax.f32 %v1661_v7, %v15179_v19  ;;  %v15189_v39 = vld [vmem:[#allocation196_spill] sm:$0xff]  ;;  %v15190_v62 = vld [vmem:[#allocation198_spill] sm:$0xff]  ;;  %v15191_v4 = vld [vmem:[#allocation199_spill] sm:$0xff] }
 0x32c   : > { %v1666_v61 = vmax.f32 %v1662_v38, %v15180_v55  ;;  %v1667_v22 = vmax.f32 %v1663_v3, %v15181_v18  ;;  %v15192_v20 = vld [vmem:[#allocation200_spill] sm:$0xff]  ;;  %v15194_v18 = vld [vmem:[#allocation205_spill] sm:$0xff] }
 0x32d   : > { %v1668_v6 = vmax.f32 %v1664_v12, %v15182_v1  ;;  %v1669_v48 = vmax.f32 %v1665_v60, %v15183_v53  ;;  %v15193_v55 = vld [vmem:[#allocation204_spill] sm:$0xff] }
 0x32e   : > { %v1670_v11 = vmax.f32 %v1666_v61, %v14995_v26  ;;  %v1671_v2 = vmax.f32 %v1667_v22, %v15184_v52  ;;  %v15196_v53 = vld [vmem:[#allocation208_spill] sm:$0xff] }
 0x32f   : > { %v1672_v15 = vmax.f32 %v1668_v6, %v15185_v16  ;;  %v1673_v50 = vmax.f32 %v1669_v48, %v15186_v28  ;;  %v15195_v6 = vld [vmem:[#allocation207_spill] sm:$0xff]  ;;  %v15200_v28 = vld [vmem:[#allocation212_spill] sm:$0xff] }
 0x330   : > { %v1674_v27 = vmax.f32 %v1670_v11, %v15187_v51  ;;  %v1675_v42 = vmax.f32 %v1671_v2, %v15188_v47  ;;  %v15197_v11 = vld [vmem:[#allocation209_spill] sm:$0xff]  ;;  %v15198_v2 = vld [vmem:[#allocation210_spill] sm:$0xff] }
 0x331   : > { %v1676_v10 = vmax.f32 %v1672_v15, %v15189_v39  ;;  %v1677_v7 = vmax.f32 %v1673_v50, %v15003_v43  ;;  %v15199_v15 = vld [vmem:[#allocation211_spill] sm:$0xff]  ;;  %v15201_v50 = vld [vmem:[#allocation214_spill] sm:$0xff]  ;;  %v15204_v39 = vld [vmem:[#allocation217_spill] sm:$0xff] }
 0x332   : > { %v1678_v38 = vmax.f32 %v1674_v27, %v15190_v62  ;;  %v1679_v3 = vmax.f32 %v1675_v42, %v15191_v4  ;;  %v15202_v27 = vld [vmem:[#allocation215_spill] sm:$0xff]  ;;  %v15203_v42 = vld [vmem:[#allocation216_spill] sm:$0xff] }
 0x333   : > { %v1680_v26 = vmax.f32 %v1676_v10, %v15192_v20  ;;  %v1681_v12 = vmax.f32 %v1677_v7, %v15007_v49  ;;  %v15205_v7 = vld [vmem:[#allocation218_spill] sm:$0xff] }
 0x334   : > { %v1682_v19 = vmax.f32 %v1678_v38, %v15009_v14  ;;  %v1683_v60 = vmax.f32 %v1679_v3, %v14801_v45  ;;  %v15206_v38 = vld [vmem:[#allocation219_spill] sm:$0xff]  ;;  %v15207_v3 = vld [vmem:[#allocation220_spill] sm:$0xff] }
 0x335   : > { %v1684_v61 = vmax.f32 %v1680_v26, %v15193_v55  ;;  %v1685_v22 = vmax.f32 %v1681_v12, %v15194_v18  ;;  %v15208_v26 = vld [vmem:[#allocation221_spill] sm:$0xff] }
 0x336   : > { %v1686_v1 = vmax.f32 %v1682_v19, %v15013_v30  ;;  %v1687_v43 = vmax.f32 %v1683_v60, %v15195_v6  ;;  %v15209_v55 = vld [vmem:[#allocation225_spill] sm:$0xff] }
 0x337   : > { %v1688_v48 = vmax.f32 %v1684_v61, %v15196_v53  ;;  %v1689_v52 = vmax.f32 %v1685_v22, %v15197_v11  ;;  %v15211_v11 = vld [vmem:[#allocation235_spill] sm:$0xff] }
 0x338   : > { %v1690_v16 = vmax.f32 %v1686_v1, %v15198_v2  ;;  %v1691_v49 = vmax.f32 %v1687_v43, %v15199_v15  ;;  %v15212_v2 = vld [vmem:[#allocation236_spill] sm:$0xff]  ;;  %v15214_v15 = vld [vmem:[#allocation238_spill] sm:$0xff] }
 0x339   : > { %v1692_v14 = vmax.f32 %v1688_v48, %v15200_v28  ;;  %v1693_v45 = vmax.f32 %v1689_v52, %v15018_v0  ;;  %v15210_v48 = vld [vmem:[#allocation234_spill] sm:$0xff]  ;;  %v15216_v28 = vld [vmem:[#allocation240_spill] sm:$0xff] }
 0x33a   : > { %v1694_v51 = vmax.f32 %v1690_v16, %v15201_v50  ;;  %v1695_v47 = vmax.f32 %v1691_v49, %v15202_v27  ;;  %v15213_v16 = vld [vmem:[#allocation237_spill] sm:$0xff]  ;;  %v15215_v49 = vld [vmem:[#allocation239_spill] sm:$0xff] }
 0x33b   : > { %v1696_v30 = vmax.f32 %v1692_v14, %v15203_v42  ;;  %v1697_v10 = vmax.f32 %v1693_v45, %v15204_v39  ;;  %v15217_v14 = vld [vmem:[#allocation241_spill] sm:$0xff]  ;;  %v15218_v45 = vld [vmem:[#allocation242_spill] sm:$0xff]  ;;  %v15219_v50 = vld [vmem:[#allocation243_spill] sm:$0xff] }
 0x33c   : > { %v1698_v62 = vmax.f32 %v1694_v51, %v15205_v7  ;;  %v1699_v4 = vmax.f32 %v1695_v47, %v15206_v38  ;;  %v15220_v51 = vld [vmem:[#allocation244_spill] sm:$0xff]  ;;  %v15221_v47 = vld [vmem:[#allocation245_spill] sm:$0xff] }
 0x33d   : > { %v1700_v20 = vmax.f32 %v1696_v30, %v15207_v3  ;;  %v1701_v12 = vmax.f32 %v1697_v10, %v15208_v26 }
 0x33e   : > { %v1702_v19 = vmax.f32 %v1698_v62, %v15028_v31  ;;  %v1703_v0 = vmax.f32 %v1699_v4, %v14912_v25 }
 0x33f   : > { %v1704_v60 = vmax.f32 %v1700_v20, %v14918_v44  ;;  %v1705_v61 = vmax.f32 %v1701_v12, %v15209_v55  ;;  %v1489_v55 = vld [vmem:[#allocation5] sm:$0x1] }
 0x340   : > { %v1706_v18 = vmax.f32 %v1702_v19, %v15032_v37  ;;  %v1707_v22 = vmax.f32 %v1703_v0, %v14934_v9 }
 0x341   : > { %v1708_v1 = vmax.f32 %v1704_v60, %v14940_v57  ;;  %v1709_v6 = vmax.f32 %v1705_v61, %v14945_v5 }
 0x342   : > { %v1710_v43 = vmax.f32 %v1706_v18, %v14950_v33  ;;  %v1711_v53 = vmax.f32 %v1707_v22, %v14956_v29 }
 0x343   : > { %v1712_v31 = vmax.f32 %v1708_v1, %v14962_v32  ;;  %v1713_v25 = vmax.f32 %v1709_v6, %v14967_v21 }
 0x344   : > { %v1714_v44 = vmax.f32 %v1710_v43, %v15210_v48  ;;  %v1715_v52 = vmax.f32 %v1711_v53, %v15211_v11 }
 0x345   : > { %v1716_v37 = vmax.f32 %v1712_v31, %v15212_v2  ;;  %v1717_v9 = vmax.f32 %v1713_v25, %v15213_v16 }
 0x346   : > { %v1718_v57 = vmax.f32 %v1714_v44, %v15214_v15  ;;  %v1719_v5 = vmax.f32 %v1715_v52, %v15215_v49 }
 0x347   : > { %v1720_v33 = vmax.f32 %v1716_v37, %v15216_v28  ;;  %v1721_v29 = vmax.f32 %v1717_v9, %v15217_v14 }
 0x348   : > { %v1722_v32 = vmax.f32 %v1718_v57, %v15218_v45  ;;  %v1723_v21 = vmax.f32 %v1719_v5, %v15219_v50 }
 0x349   : > { %v1724_v27 = vmax.f32 %v1720_v33, %v15220_v51  ;;  %v1725_v42 = vmax.f32 %v1721_v29, %v15221_v47 }
 0x34a   : > { %v1726_v30 = vmax.f32 %v1722_v32, %v15045_v35  ;;  %v1727_v39 = vmax.f32 %v1723_v21, %v15046_v59 }
 0x34b   : > { %v1728_v10 = vmax.f32 %v1724_v27, %v15047_v23  ;;  %v1729_v7 = vmax.f32 %v1725_v42, %v15048_v58 }
 0x34c   : > { %v1730_v62 = vmax.f32 %v1726_v30, %v15051_v17  ;;  %v1731_v38 = vmax.f32 %v1727_v39, %v15052_v36 }
 0x34d   : > { %v1732_v4 = vmax.f32 %v1728_v10, %v15053_v63  ;;  %v1733_v3 = vmax.f32 %v1729_v7, %v15054_v54 }
 0x34e   : > { %v1734_v20 = vmax.f32 %v1730_v62, %v15057_v46  ;;  %v1735_v26 = vmax.f32 %v1731_v38, %v15058_v34 }
 0x34f   : > { %v1736_v35 = vmax.f32 %v1732_v4, %v15059_v24  ;;  %v1737_v59 = vmax.f32 %v1733_v3, %v15060_v41 }
 0x350   : > { %v1738_v23 = vmax.f32 %v1734_v20, %v15062_v40  ;;  %v1739_v58 = vmax.f32 %v1735_v26, %v15063_v56 }
 0x351   : > { %v1740_v17 = vmax.f32 %v1736_v35, %v15064_v8  ;;  %v1741_v36 = vmax.f32 %v1737_v59, %v15065_v13 }
 0x352   : > { %v1742_v12 = vmax.f32 %v1738_v23, %v1739_v58 }
 0x353   : > { %v1743_v63 = vmax.f32 %v1740_v17, %v1741_v36 }
 0x355   : > { %v1744_v19 = vmax.f32 %v1742_v12, %v1743_v63 }
 0x357   : > { %v1745_v54 = vrot.slane %v1744_v19, 4 }
 0x359   : > { %v1746_v0 = vmax.f32 %v1744_v19, %v1745_v54 }
 0x35b   : > { %v1747_v46 = vrot.slane %v1746_v0, 2 }
 0x35d   : > { %v1748_v60 = vmax.f32 %v1746_v0, %v1747_v46 }
 0x35f   : > { %v1749_v34 = vrot.slane %v1748_v60, 1 }
 0x361   : > { %v1750_v24 = vmax.f32 %v1748_v60, %v1749_v34 }
 0x363   : > { %v1751_v61 = vmax.f32 %v1489_v55, %v1750_v24 }
 0x365   : > { %1752 = vst [vmem:[#allocation5] sm:$0x1] %v1751_v61 }
 0x366 PF: > { %p1753_p7 = scmp.gt.s32.totalorder %s5093_s11, 0 }
 0x368   : > { %p1755_p8 = pnand %p5000_p6, %p1753_p7 }
 0x36a   : > { %1758 = sbr.rel (%p1755_p8) target bundleno = 1912 (0x778), region = 36 }
 0x36f   : > { %v1759_v41 = vlaneseq }
 0x371   : > { %v7369_v40 = vshrl.u32 %v1759_v41, 7  ;;  %v7377_v13 = vand.u32 127, %v1759_v41 }
 0x373   : > { %15222 = vst [vmem:[#allocation264_spill] sm:$0xff] %v7369_v40  ;;  %v7372_v56 = vadd.s32 296, %v7369_v40  ;;  %v7375_v8 = vadd.s32 304, %v7369_v40  ;;  %v7380_v18 = vadd.s32 312, %v7369_v40  ;;  %v7383_v22 = vadd.s32 320, %v7369_v40 }
 0x374   : > { %15223 = vst [vmem:[#allocation265_spill] sm:$0xff] %v7377_v13  ;;  %v7386_v1 = vadd.s32 328, %v7369_v40  ;;  %v7389_v6 = vadd.s32 336, %v7369_v40  ;;  %v7392_v43 = vadd.s32 344, %v7369_v40  ;;  %v7395_v53 = vadd.s32 352, %v7369_v40 }
 0x375   : > { %v7398_v31 = vadd.s32 360, %v7369_v40  ;;  %v7401_v25 = vadd.s32 368, %v7369_v40  ;;  %v7404_v48 = vadd.s32 376, %v7369_v40  ;;  %v7407_v44 = vadd.s32 384, %v7369_v40 }
 0x376   : > { %v7410_v11 = vadd.s32 392, %v7369_v40  ;;  %v7413_v52 = vadd.s32 400, %v7369_v40  ;;  %v7416_v2 = vadd.s32 408, %v7369_v40  ;;  %v7419_v37 = vadd.s32 416, %v7369_v40 }
 0x377   : > { %v7422_v16 = vadd.s32 424, %v7369_v40  ;;  %v7425_v9 = vadd.s32 432, %v7369_v40  ;;  %v7428_v15 = vadd.s32 440, %v7369_v40  ;;  %v7431_v57 = vadd.s32 448, %v7369_v40 }
 0x378   : > { %v7434_v49 = vadd.s32 456, %v7369_v40  ;;  %v7437_v5 = vadd.s32 464, %v7369_v40  ;;  %v7440_v28 = vadd.s32 472, %v7369_v40  ;;  %v7443_v33 = vadd.s32 480, %v7369_v40 }
 0x379   : > { %v7446_v14 = vadd.s32 488, %v7369_v40  ;;  %v7449_v29 = vadd.s32 496, %v7369_v40  ;;  %v7452_v45 = vadd.s32 504, %v7369_v40  ;;  %v7455_v32 = vadd.s32 512, %v7369_v40 }
 0x37a   : > { %v7458_v50 = vadd.s32 520, %v7369_v40  ;;  %v7461_v21 = vadd.s32 528, %v7369_v40  ;;  %v7464_v51 = vadd.s32 536, %v7369_v40  ;;  %v7467_v27 = vadd.s32 544, %v7369_v40 }
 0x37b   : > { %v7470_v47 = vadd.s32 552, %v7369_v40  ;;  %v7473_v42 = vadd.s32 560, %v7369_v40  ;;  %v7476_v30 = vadd.s32 568, %v7369_v40  ;;  %v7479_v39 = vadd.s32 576, %v7369_v40 }
 0x37c   : > { %v7482_v10 = vadd.s32 584, %v7369_v40  ;;  %v7485_v7 = vadd.s32 592, %v7369_v40  ;;  %v7488_v62 = vadd.s32 600, %v7369_v40  ;;  %v7491_v38 = vadd.s32 608, %v7369_v40 }
 0x37d   : > { %v7494_v4 = vadd.s32 616, %v7369_v40  ;;  %v7497_v3 = vadd.s32 624, %v7369_v40  ;;  %v7500_v20 = vadd.s32 632, %v7369_v40  ;;  %v7503_v26 = vadd.s32 640, %v7369_v40 }
 0x37e   : > { %v7506_v35 = vadd.s32 648, %v7369_v40  ;;  %v7509_v59 = vadd.s32 656, %v7369_v40  ;;  %v7512_v23 = vadd.s32 664, %v7369_v40  ;;  %v7515_v58 = vadd.s32 672, %v7369_v40 }
 0x37f   : > { %15224 = vst [vmem:[#allocation266_spill] sm:$0xff] %v7500_v20  ;;  %v7518_v17 = vadd.s32 680, %v7369_v40  ;;  %v7521_v36 = vadd.s32 688, %v7369_v40  ;;  %v7524_v12 = vadd.s32 696, %v7369_v40  ;;  %v7527_v63 = vadd.s32 704, %v7369_v40 }
 0x380   : > { %15225 = vst [vmem:[#allocation267_spill] sm:$0xff] %v7503_v26  ;;  %v7530_v19 = vadd.s32 712, %v7369_v40  ;;  %v7533_v54 = vadd.s32 720, %v7369_v40  ;;  %v7536_v0 = vadd.s32 728, %v7369_v40  ;;  %v7539_v46 = vadd.s32 736, %v7369_v40  ;;  %v15565_v26 = vld [vmem:[#allocation265_spill] sm:$0xff] }
 0x381   : > { %15226 = vst [vmem:[#allocation268_spill] sm:$0xff] %v7506_v35  ;;  %v7542_v60 = vadd.s32 744, %v7369_v40  ;;  %v7545_v34 = vadd.s32 752, %v7369_v40  ;;  %v7548_v55 = vadd.s32 760, %v7369_v40  ;;  %v7551_v24 = vadd.s32 768, %v7369_v40 }
 0x382   : > { %15227 = vst [vmem:[#allocation269_spill] sm:$0xff] %v7509_v59  ;;  %v7554_v61 = vadd.s32 776, %v7369_v40  ;;  %v7557_v41 = vadd.s32 784, %v7369_v40  ;;  %v7560_v13 = vadd.s32 792, %v7369_v40 }
 0x383   : > { %15228 = vst [vmem:[#allocation270_spill] sm:$0xff] %v7512_v23 }
 0x384   : > { %15229 = vst [vmem:[#allocation271_spill] sm:$0xff] %v7515_v58 }
 0x385   : > { %15230 = vst [vmem:[#allocation272_spill] sm:$0xff] %v7518_v17 }
 0x386   : > { %15231 = vst [vmem:[#allocation273_spill] sm:$0xff] %v7521_v36 }
 0x387   : > { %15232 = vst [vmem:[#allocation274_spill] sm:$0xff] %v7524_v12 }
 0x388   : > { %15233 = vst [vmem:[#allocation275_spill] sm:$0xff] %v7527_v63 }
 0x389   : > { %15234 = vst [vmem:[#allocation276_spill] sm:$0xff] %v7530_v19 }
 0x38a   : > { %15235 = vst [vmem:[#allocation277_spill] sm:$0xff] %v7533_v54  ;;  %v15570_v54 = vmul.u32 128, %v7383_v22  ;;  %v15574_v22 = vmul.u32 128, %v7395_v53  ;;  %v15581_v53 = vmul.u32 128, %v7407_v44  ;;  %v15589_v44 = vmul.u32 128, %v7419_v37 }
 0x38b   : > { %15236 = vst [vmem:[#allocation278_spill] sm:$0xff] %v7536_v0  ;;  %v15569_v0 = vmul.u32 128, %v7380_v18  ;;  %v15573_v18 = vmul.u32 128, %v7392_v43  ;;  %v15579_v43 = vmul.u32 128, %v7404_v48  ;;  %v15587_v48 = vmul.u32 128, %v7416_v2 }
 0x38c   : > { %15237 = vst [vmem:[#allocation279_spill] sm:$0xff] %v7539_v46  ;;  %v15595_v2 = vmul.u32 128, %v7428_v15  ;;  %v15597_v37 = vmul.u32 128, %v7431_v57  ;;  %v15603_v15 = vmul.u32 128, %v7440_v28  ;;  %v15605_v57 = vmul.u32 128, %v7443_v33 }
 0x38d   : > { %15238 = vst [vmem:[#allocation280_spill] sm:$0xff] %v7542_v60  ;;  %v7563_v60 = vadd.s32 800, %v7369_v40  ;;  %v15611_v28 = vmul.u32 128, %v7452_v45  ;;  %v15613_v33 = vmul.u32 128, %v7455_v32  ;;  %v15619_v45 = vmul.u32 128, %v7464_v51 }
 0x38e   : > { %15239 = vst [vmem:[#allocation281_spill] sm:$0xff] %v7545_v34  ;;  %v7566_v34 = vadd.s32 808, %v7369_v40  ;;  %v15621_v32 = vmul.u32 128, %v7467_v27  ;;  %v15627_v51 = vmul.u32 128, %v7476_v30  ;;  %v15629_v27 = vmul.u32 128, %v7479_v39 }
 0x38f   : > { %15240 = vst [vmem:[#allocation282_spill] sm:$0xff] %v7548_v55  ;;  %v7569_v55 = vadd.s32 816, %v7369_v40  ;;  %v15635_v30 = vmul.u32 128, %v7488_v62  ;;  %v15637_v39 = vmul.u32 128, %v7491_v38 }
 0x390   : > { %15241 = vst [vmem:[#allocation283_spill] sm:$0xff] %v7551_v24  ;;  %v7572_v24 = vadd.s32 824, %v7369_v40 }
 0x391   : > { %15242 = vst [vmem:[#allocation284_spill] sm:$0xff] %v7554_v61  ;;  %v7575_v61 = vadd.s32 832, %v7369_v40 }
 0x392   : > { %15243 = vst [vmem:[#allocation285_spill] sm:$0xff] %v7557_v41  ;;  %v7578_v41 = vadd.s32 840, %v7369_v40 }
 0x393   : > { %15244 = vst [vmem:[#allocation286_spill] sm:$0xff] %v7560_v13  ;;  %v7581_v13 = vadd.s32 848, %v7369_v40 }
 0x394   : > { %15245 = vst [vmem:[#allocation287_spill] sm:$0xff] %v7563_v60  ;;  %v7584_v60 = vadd.s32 856, %v7369_v40 }
 0x395   : > { %15246 = vst [vmem:[#allocation288_spill] sm:$0xff] %v7566_v34  ;;  %v7587_v34 = vadd.s32 864, %v7369_v40 }
 0x396   : > { %15247 = vst [vmem:[#allocation289_spill] sm:$0xff] %v7569_v55  ;;  %v7590_v55 = vadd.s32 872, %v7369_v40 }
 0x397   : > { %15248 = vst [vmem:[#allocation290_spill] sm:$0xff] %v7572_v24  ;;  %v7593_v24 = vadd.s32 880, %v7369_v40 }
 0x398   : > { %15249 = vst [vmem:[#allocation291_spill] sm:$0xff] %v7575_v61  ;;  %v7596_v61 = vadd.s32 888, %v7369_v40 }
 0x399   : > { %15250 = vst [vmem:[#allocation292_spill] sm:$0xff] %v7578_v41  ;;  %v7599_v41 = vadd.s32 896, %v7369_v40 }
 0x39a   : > { %15251 = vst [vmem:[#allocation293_spill] sm:$0xff] %v7581_v13  ;;  %v7602_v13 = vadd.s32 904, %v7369_v40 }
 0x39b   : > { %15252 = vst [vmem:[#allocation294_spill] sm:$0xff] %v7584_v60  ;;  %v7605_v60 = vadd.s32 912, %v7369_v40 }
 0x39c   : > { %15253 = vst [vmem:[#allocation295_spill] sm:$0xff] %v7587_v34  ;;  %v7608_v34 = vadd.s32 920, %v7369_v40 }
 0x39d   : > { %15254 = vst [vmem:[#allocation296_spill] sm:$0xff] %v7590_v55  ;;  %v7611_v55 = vadd.s32 928, %v7369_v40 }
 0x39e   : > { %15255 = vst [vmem:[#allocation297_spill] sm:$0xff] %v7593_v24  ;;  %v7614_v24 = vadd.s32 936, %v7369_v40 }
 0x39f   : > { %15256 = vst [vmem:[#allocation298_spill] sm:$0xff] %v7596_v61  ;;  %v7617_v61 = vadd.s32 944, %v7369_v40 }
 0x3a0   : > { %15257 = vst [vmem:[#allocation299_spill] sm:$0xff] %v7599_v41  ;;  %v7620_v41 = vadd.s32 952, %v7369_v40 }
 0x3a1   : > { %15258 = vst [vmem:[#allocation300_spill] sm:$0xff] %v7602_v13  ;;  %v7623_v13 = vadd.s32 960, %v7369_v40 }
 0x3a2   : > { %15259 = vst [vmem:[#allocation301_spill] sm:$0xff] %v7605_v60  ;;  %v7626_v60 = vadd.s32 968, %v7369_v40 }
 0x3a3   : > { %15260 = vst [vmem:[#allocation302_spill] sm:$0xff] %v7608_v34  ;;  %v7629_v34 = vadd.s32 976, %v7369_v40 }
 0x3a4   : > { %15261 = vst [vmem:[#allocation303_spill] sm:$0xff] %v7611_v55  ;;  %v7632_v55 = vadd.s32 984, %v7369_v40 }
 0x3a5   : > { %15262 = vst [vmem:[#allocation304_spill] sm:$0xff] %v7614_v24  ;;  %v7635_v24 = vadd.s32 992, %v7369_v40 }
 0x3a6   : > { %15263 = vst [vmem:[#allocation305_spill] sm:$0xff] %v7617_v61  ;;  %v7638_v61 = vadd.s32 1000, %v7369_v40 }
 0x3a7   : > { %15264 = vst [vmem:[#allocation306_spill] sm:$0xff] %v7620_v41  ;;  %v7641_v41 = vadd.s32 1008, %v7369_v40 }
 0x3a8   : > { %15265 = vst [vmem:[#allocation307_spill] sm:$0xff] %v7623_v13  ;;  %v7644_v13 = vadd.s32 1016, %v7369_v40 }
 0x3a9   : > { %15266 = vst [vmem:[#allocation308_spill] sm:$0xff] %v7626_v60  ;;  %v7647_v60 = vadd.s32 1024, %v7369_v40 }
 0x3aa   : > { %15267 = vst [vmem:[#allocation309_spill] sm:$0xff] %v7629_v34  ;;  %v7650_v34 = vadd.s32 1032, %v7369_v40 }
 0x3ab   : > { %15268 = vst [vmem:[#allocation310_spill] sm:$0xff] %v7632_v55  ;;  %v7653_v55 = vadd.s32 1040, %v7369_v40 }
 0x3ac   : > { %15269 = vst [vmem:[#allocation311_spill] sm:$0xff] %v7635_v24  ;;  %v7656_v24 = vadd.s32 1048, %v7369_v40 }
 0x3ad   : > { %15270 = vst [vmem:[#allocation312_spill] sm:$0xff] %v7638_v61  ;;  %v7659_v61 = vadd.s32 1056, %v7369_v40 }
 0x3ae   : > { %15271 = vst [vmem:[#allocation313_spill] sm:$0xff] %v7641_v41  ;;  %v7662_v41 = vadd.s32 1064, %v7369_v40 }
 0x3af   : > { %15272 = vst [vmem:[#allocation314_spill] sm:$0xff] %v7644_v13  ;;  %v7665_v13 = vadd.s32 1072, %v7369_v40 }
 0x3b0   : > { %15273 = vst [vmem:[#allocation315_spill] sm:$0xff] %v7647_v60  ;;  %v7668_v60 = vadd.s32 1080, %v7369_v40 }
 0x3b1   : > { %15274 = vst [vmem:[#allocation316_spill] sm:$0xff] %v7650_v34  ;;  %v7671_v34 = vadd.s32 1088, %v7369_v40 }
 0x3b2   : > { %15275 = vst [vmem:[#allocation317_spill] sm:$0xff] %v7653_v55  ;;  %v7674_v55 = vadd.s32 1096, %v7369_v40 }
 0x3b3   : > { %15276 = vst [vmem:[#allocation318_spill] sm:$0xff] %v7656_v24  ;;  %v7677_v24 = vadd.s32 1104, %v7369_v40 }
 0x3b4   : > { %15277 = vst [vmem:[#allocation319_spill] sm:$0xff] %v7659_v61  ;;  %v7680_v61 = vadd.s32 1112, %v7369_v40 }
 0x3b5   : > { %15278 = vst [vmem:[#allocation320_spill] sm:$0xff] %v7662_v41  ;;  %v7683_v41 = vadd.s32 1120, %v7369_v40 }
 0x3b6   : > { %15279 = vst [vmem:[#allocation321_spill] sm:$0xff] %v7665_v13  ;;  %v7686_v13 = vadd.s32 1128, %v7369_v40 }
 0x3b7   : > { %15280 = vst [vmem:[#allocation322_spill] sm:$0xff] %v7668_v60  ;;  %v7689_v60 = vadd.s32 1136, %v7369_v40 }
 0x3b8   : > { %15281 = vst [vmem:[#allocation323_spill] sm:$0xff] %v7671_v34  ;;  %v7692_v34 = vadd.s32 1144, %v7369_v40 }
 0x3b9   : > { %15282 = vst [vmem:[#allocation324_spill] sm:$0xff] %v7674_v55  ;;  %v7695_v55 = vadd.s32 1152, %v7369_v40 }
 0x3ba   : > { %15283 = vst [vmem:[#allocation325_spill] sm:$0xff] %v7677_v24  ;;  %v7698_v24 = vadd.s32 1160, %v7369_v40 }
 0x3bb   : > { %15284 = vst [vmem:[#allocation326_spill] sm:$0xff] %v7680_v61  ;;  %v7701_v61 = vadd.s32 1168, %v7369_v40 }
 0x3bc   : > { %15285 = vst [vmem:[#allocation327_spill] sm:$0xff] %v7683_v41  ;;  %v7704_v41 = vadd.s32 1176, %v7369_v40 }
 0x3bd   : > { %15286 = vst [vmem:[#allocation328_spill] sm:$0xff] %v7686_v13  ;;  %v7707_v13 = vadd.s32 1184, %v7369_v40 }
 0x3be   : > { %15287 = vst [vmem:[#allocation329_spill] sm:$0xff] %v7689_v60  ;;  %v7710_v60 = vadd.s32 1192, %v7369_v40 }
 0x3bf   : > { %15288 = vst [vmem:[#allocation330_spill] sm:$0xff] %v7692_v34  ;;  %v7713_v34 = vadd.s32 1200, %v7369_v40 }
 0x3c0   : > { %15289 = vst [vmem:[#allocation331_spill] sm:$0xff] %v7695_v55  ;;  %v7716_v55 = vadd.s32 1208, %v7369_v40 }
 0x3c1   : > { %15290 = vst [vmem:[#allocation332_spill] sm:$0xff] %v7698_v24  ;;  %v7719_v24 = vadd.s32 1216, %v7369_v40 }
 0x3c2   : > { %15291 = vst [vmem:[#allocation333_spill] sm:$0xff] %v7701_v61  ;;  %v7722_v61 = vadd.s32 1224, %v7369_v40 }
 0x3c3   : > { %15292 = vst [vmem:[#allocation334_spill] sm:$0xff] %v7704_v41  ;;  %v7725_v41 = vadd.s32 1232, %v7369_v40 }
 0x3c4   : > { %15293 = vst [vmem:[#allocation335_spill] sm:$0xff] %v7707_v13  ;;  %v7728_v13 = vadd.s32 1240, %v7369_v40 }
 0x3c5   : > { %15294 = vst [vmem:[#allocation336_spill] sm:$0xff] %v7710_v60  ;;  %v7731_v60 = vadd.s32 1248, %v7369_v40 }
 0x3c6   : > { %15295 = vst [vmem:[#allocation337_spill] sm:$0xff] %v7713_v34  ;;  %v7734_v34 = vadd.s32 1256, %v7369_v40 }
 0x3c7   : > { %15296 = vst [vmem:[#allocation338_spill] sm:$0xff] %v7716_v55  ;;  %v7737_v55 = vadd.s32 1264, %v7369_v40 }
 0x3c8   : > { %15297 = vst [vmem:[#allocation339_spill] sm:$0xff] %v7719_v24  ;;  %v7740_v24 = vadd.s32 1272, %v7369_v40 }
 0x3c9   : > { %15298 = vst [vmem:[#allocation340_spill] sm:$0xff] %v7722_v61  ;;  %v7743_v61 = vadd.s32 1280, %v7369_v40 }
 0x3ca   : > { %15299 = vst [vmem:[#allocation341_spill] sm:$0xff] %v7725_v41  ;;  %v7746_v41 = vadd.s32 1288, %v7369_v40 }
 0x3cb   : > { %15300 = vst [vmem:[#allocation342_spill] sm:$0xff] %v7728_v13  ;;  %v7749_v13 = vadd.s32 1296, %v7369_v40 }
 0x3cc   : > { %15301 = vst [vmem:[#allocation343_spill] sm:$0xff] %v7731_v60  ;;  %v7752_v60 = vadd.s32 1304, %v7369_v40 }
 0x3cd   : > { %15302 = vst [vmem:[#allocation344_spill] sm:$0xff] %v7734_v34  ;;  %v7755_v34 = vadd.s32 1312, %v7369_v40 }
 0x3ce   : > { %15303 = vst [vmem:[#allocation345_spill] sm:$0xff] %v7737_v55  ;;  %v7758_v55 = vadd.s32 1320, %v7369_v40 }
 0x3cf   : > { %15304 = vst [vmem:[#allocation346_spill] sm:$0xff] %v7740_v24  ;;  %v7761_v24 = vadd.s32 1328, %v7369_v40 }
 0x3d0   : > { %15305 = vst [vmem:[#allocation347_spill] sm:$0xff] %v7743_v61  ;;  %v7764_v61 = vadd.s32 1336, %v7369_v40 }
 0x3d1   : > { %15306 = vst [vmem:[#allocation348_spill] sm:$0xff] %v7746_v41  ;;  %v7767_v41 = vadd.s32 1344, %v7369_v40 }
 0x3d2   : > { %15307 = vst [vmem:[#allocation349_spill] sm:$0xff] %v7749_v13  ;;  %v7770_v13 = vadd.s32 1352, %v7369_v40 }
 0x3d3   : > { %15308 = vst [vmem:[#allocation350_spill] sm:$0xff] %v7752_v60  ;;  %v7773_v60 = vadd.s32 1360, %v7369_v40 }
 0x3d4   : > { %15309 = vst [vmem:[#allocation351_spill] sm:$0xff] %v7755_v34  ;;  %v7776_v34 = vadd.s32 1368, %v7369_v40 }
 0x3d5   : > { %15310 = vst [vmem:[#allocation352_spill] sm:$0xff] %v7758_v55  ;;  %v7779_v55 = vadd.s32 1376, %v7369_v40 }
 0x3d6   : > { %15311 = vst [vmem:[#allocation353_spill] sm:$0xff] %v7761_v24  ;;  %v7782_v24 = vadd.s32 1384, %v7369_v40 }
 0x3d7   : > { %15312 = vst [vmem:[#allocation354_spill] sm:$0xff] %v7764_v61  ;;  %v7785_v61 = vadd.s32 1392, %v7369_v40 }
 0x3d8   : > { %15313 = vst [vmem:[#allocation355_spill] sm:$0xff] %v7767_v41  ;;  %v7788_v41 = vadd.s32 1400, %v7369_v40 }
 0x3d9   : > { %15314 = vst [vmem:[#allocation356_spill] sm:$0xff] %v7770_v13  ;;  %v7791_v13 = vadd.s32 1408, %v7369_v40 }
 0x3da   : > { %15315 = vst [vmem:[#allocation357_spill] sm:$0xff] %v7773_v60  ;;  %v7794_v60 = vadd.s32 1416, %v7369_v40 }
 0x3db   : > { %15316 = vst [vmem:[#allocation358_spill] sm:$0xff] %v7776_v34  ;;  %v7797_v34 = vadd.s32 1424, %v7369_v40 }
 0x3dc   : > { %15317 = vst [vmem:[#allocation359_spill] sm:$0xff] %v7779_v55  ;;  %v7800_v55 = vadd.s32 1432, %v7369_v40 }
 0x3dd   : > { %15318 = vst [vmem:[#allocation360_spill] sm:$0xff] %v7782_v24  ;;  %v7803_v24 = vadd.s32 1440, %v7369_v40 }
 0x3de   : > { %15319 = vst [vmem:[#allocation361_spill] sm:$0xff] %v7785_v61  ;;  %v7806_v61 = vadd.s32 1448, %v7369_v40 }
 0x3df   : > { %15320 = vst [vmem:[#allocation362_spill] sm:$0xff] %v7788_v41  ;;  %v7809_v41 = vadd.s32 1456, %v7369_v40 }
 0x3e0   : > { %15321 = vst [vmem:[#allocation363_spill] sm:$0xff] %v7791_v13  ;;  %v7812_v13 = vadd.s32 1464, %v7369_v40 }
 0x3e1   : > { %15322 = vst [vmem:[#allocation364_spill] sm:$0xff] %v7794_v60  ;;  %v7815_v60 = vadd.s32 1472, %v7369_v40 }
 0x3e2   : > { %15323 = vst [vmem:[#allocation365_spill] sm:$0xff] %v7797_v34  ;;  %v7818_v34 = vadd.s32 1480, %v7369_v40 }
 0x3e3   : > { %15324 = vst [vmem:[#allocation366_spill] sm:$0xff] %v7800_v55  ;;  %v7821_v55 = vadd.s32 1488, %v7369_v40 }
 0x3e4   : > { %15325 = vst [vmem:[#allocation367_spill] sm:$0xff] %v7803_v24  ;;  %v7824_v24 = vadd.s32 1496, %v7369_v40 }
 0x3e5   : > { %15326 = vst [vmem:[#allocation368_spill] sm:$0xff] %v7806_v61  ;;  %v7827_v61 = vadd.s32 1504, %v7369_v40 }
 0x3e6   : > { %15327 = vst [vmem:[#allocation369_spill] sm:$0xff] %v7809_v41  ;;  %v7830_v41 = vadd.s32 1512, %v7369_v40 }
 0x3e7   : > { %15328 = vst [vmem:[#allocation370_spill] sm:$0xff] %v7812_v13  ;;  %v7833_v13 = vadd.s32 1520, %v7369_v40 }
 0x3e8   : > { %15329 = vst [vmem:[#allocation371_spill] sm:$0xff] %v7815_v60  ;;  %v7836_v60 = vadd.s32 1528, %v7369_v40 }
 0x3e9   : > { %15330 = vst [vmem:[#allocation372_spill] sm:$0xff] %v7818_v34  ;;  %v7839_v34 = vadd.s32 1536, %v7369_v40 }
 0x3ea   : > { %15331 = vst [vmem:[#allocation373_spill] sm:$0xff] %v7821_v55  ;;  %v7842_v55 = vadd.s32 1544, %v7369_v40 }
 0x3eb   : > { %15332 = vst [vmem:[#allocation374_spill] sm:$0xff] %v7824_v24  ;;  %v7845_v24 = vadd.s32 1552, %v7369_v40 }
 0x3ec   : > { %15333 = vst [vmem:[#allocation375_spill] sm:$0xff] %v7827_v61  ;;  %v7848_v61 = vadd.s32 1560, %v7369_v40 }
 0x3ed   : > { %15334 = vst [vmem:[#allocation376_spill] sm:$0xff] %v7830_v41  ;;  %v7851_v41 = vadd.s32 1568, %v7369_v40 }
 0x3ee   : > { %15335 = vst [vmem:[#allocation377_spill] sm:$0xff] %v7833_v13  ;;  %v7854_v13 = vadd.s32 1576, %v7369_v40 }
 0x3ef   : > { %15336 = vst [vmem:[#allocation378_spill] sm:$0xff] %v7836_v60  ;;  %v7857_v60 = vadd.s32 1584, %v7369_v40 }
 0x3f0   : > { %15337 = vst [vmem:[#allocation379_spill] sm:$0xff] %v7839_v34  ;;  %v7860_v34 = vadd.s32 1592, %v7369_v40 }
 0x3f1   : > { %15338 = vst [vmem:[#allocation380_spill] sm:$0xff] %v7842_v55  ;;  %v7863_v55 = vadd.s32 1600, %v7369_v40 }
 0x3f2   : > { %15339 = vst [vmem:[#allocation381_spill] sm:$0xff] %v7845_v24  ;;  %v7866_v24 = vadd.s32 1608, %v7369_v40 }
 0x3f3   : > { %15340 = vst [vmem:[#allocation382_spill] sm:$0xff] %v7848_v61  ;;  %v7869_v61 = vadd.s32 1616, %v7369_v40 }
 0x3f4   : > { %15341 = vst [vmem:[#allocation383_spill] sm:$0xff] %v7851_v41  ;;  %v7872_v41 = vadd.s32 1624, %v7369_v40 }
 0x3f5   : > { %15342 = vst [vmem:[#allocation384_spill] sm:$0xff] %v7854_v13  ;;  %v7875_v13 = vadd.s32 1632, %v7369_v40 }
 0x3f6   : > { %15343 = vst [vmem:[#allocation385_spill] sm:$0xff] %v7857_v60  ;;  %v7878_v60 = vadd.s32 1640, %v7369_v40 }
 0x3f7   : > { %15344 = vst [vmem:[#allocation386_spill] sm:$0xff] %v7860_v34  ;;  %v7881_v34 = vadd.s32 1648, %v7369_v40 }
 0x3f8   : > { %15345 = vst [vmem:[#allocation387_spill] sm:$0xff] %v7863_v55  ;;  %v7884_v55 = vadd.s32 1656, %v7369_v40 }
 0x3f9   : > { %15346 = vst [vmem:[#allocation388_spill] sm:$0xff] %v7866_v24  ;;  %v7887_v24 = vadd.s32 1664, %v7369_v40 }
 0x3fa   : > { %15347 = vst [vmem:[#allocation389_spill] sm:$0xff] %v7869_v61  ;;  %v7890_v61 = vadd.s32 1672, %v7369_v40 }
 0x3fb   : > { %15348 = vst [vmem:[#allocation390_spill] sm:$0xff] %v7872_v41  ;;  %v7893_v41 = vadd.s32 1680, %v7369_v40 }
 0x3fc   : > { %15349 = vst [vmem:[#allocation391_spill] sm:$0xff] %v7875_v13  ;;  %v7896_v13 = vadd.s32 1688, %v7369_v40 }
 0x3fd   : > { %15350 = vst [vmem:[#allocation392_spill] sm:$0xff] %v7878_v60  ;;  %v7899_v60 = vadd.s32 1696, %v7369_v40 }
 0x3fe   : > { %15351 = vst [vmem:[#allocation393_spill] sm:$0xff] %v7881_v34  ;;  %v7902_v34 = vadd.s32 1704, %v7369_v40 }
 0x3ff   : > { %15352 = vst [vmem:[#allocation394_spill] sm:$0xff] %v7884_v55  ;;  %v7905_v55 = vadd.s32 1712, %v7369_v40 }
 0x400   : > { %15353 = vst [vmem:[#allocation395_spill] sm:$0xff] %v7887_v24  ;;  %v7908_v24 = vadd.s32 1720, %v7369_v40 }
 0x401   : > { %15354 = vst [vmem:[#allocation396_spill] sm:$0xff] %v7890_v61  ;;  %v7911_v61 = vadd.s32 1728, %v7369_v40 }
 0x402   : > { %15355 = vst [vmem:[#allocation397_spill] sm:$0xff] %v7893_v41  ;;  %v7914_v41 = vadd.s32 1736, %v7369_v40 }
 0x403   : > { %15356 = vst [vmem:[#allocation398_spill] sm:$0xff] %v7896_v13  ;;  %v7917_v13 = vadd.s32 1744, %v7369_v40 }
 0x404   : > { %15357 = vst [vmem:[#allocation399_spill] sm:$0xff] %v7899_v60  ;;  %v7920_v60 = vadd.s32 1752, %v7369_v40 }
 0x405   : > { %15358 = vst [vmem:[#allocation400_spill] sm:$0xff] %v7902_v34  ;;  %v7923_v34 = vadd.s32 1760, %v7369_v40 }
 0x406   : > { %15359 = vst [vmem:[#allocation401_spill] sm:$0xff] %v7905_v55  ;;  %v7926_v55 = vadd.s32 1768, %v7369_v40 }
 0x407   : > { %15360 = vst [vmem:[#allocation402_spill] sm:$0xff] %v7908_v24  ;;  %v7929_v24 = vadd.s32 1776, %v7369_v40 }
 0x408   : > { %15361 = vst [vmem:[#allocation403_spill] sm:$0xff] %v7911_v61  ;;  %v7932_v61 = vadd.s32 1784, %v7369_v40 }
 0x409   : > { %15362 = vst [vmem:[#allocation404_spill] sm:$0xff] %v7914_v41  ;;  %v7935_v41 = vadd.s32 1792, %v7369_v40 }
 0x40a   : > { %15363 = vst [vmem:[#allocation405_spill] sm:$0xff] %v7917_v13  ;;  %v7938_v13 = vadd.s32 1800, %v7369_v40 }
 0x40b   : > { %15364 = vst [vmem:[#allocation406_spill] sm:$0xff] %v7920_v60  ;;  %v7941_v60 = vadd.s32 1808, %v7369_v40 }
 0x40c   : > { %15365 = vst [vmem:[#allocation407_spill] sm:$0xff] %v7923_v34  ;;  %v7944_v34 = vadd.s32 1816, %v7369_v40 }
 0x40d   : > { %15366 = vst [vmem:[#allocation408_spill] sm:$0xff] %v7926_v55  ;;  %v7947_v55 = vadd.s32 1824, %v7369_v40 }
 0x40e   : > { %15367 = vst [vmem:[#allocation409_spill] sm:$0xff] %v7929_v24  ;;  %v7950_v24 = vadd.s32 1832, %v7369_v40 }
 0x40f   : > { %15368 = vst [vmem:[#allocation410_spill] sm:$0xff] %v7932_v61  ;;  %v7953_v61 = vadd.s32 1840, %v7369_v40 }
 0x410   : > { %15369 = vst [vmem:[#allocation411_spill] sm:$0xff] %v7935_v41  ;;  %v7956_v41 = vadd.s32 1848, %v7369_v40 }
 0x411   : > { %15370 = vst [vmem:[#allocation412_spill] sm:$0xff] %v7938_v13  ;;  %v7959_v13 = vadd.s32 1856, %v7369_v40 }
 0x412   : > { %15371 = vst [vmem:[#allocation413_spill] sm:$0xff] %v7941_v60  ;;  %v7962_v60 = vadd.s32 1864, %v7369_v40 }
 0x413   : > { %15372 = vst [vmem:[#allocation414_spill] sm:$0xff] %v7944_v34  ;;  %v7965_v34 = vadd.s32 1872, %v7369_v40 }
 0x414   : > { %15373 = vst [vmem:[#allocation415_spill] sm:$0xff] %v7947_v55  ;;  %v7968_v55 = vadd.s32 1880, %v7369_v40 }
 0x415   : > { %15374 = vst [vmem:[#allocation416_spill] sm:$0xff] %v7950_v24  ;;  %v7971_v24 = vadd.s32 1888, %v7369_v40 }
 0x416   : > { %15375 = vst [vmem:[#allocation417_spill] sm:$0xff] %v7953_v61  ;;  %v7974_v61 = vadd.s32 1896, %v7369_v40 }
 0x417   : > { %15376 = vst [vmem:[#allocation418_spill] sm:$0xff] %v7956_v41  ;;  %v7977_v41 = vadd.s32 1904, %v7369_v40 }
 0x418   : > { %15377 = vst [vmem:[#allocation419_spill] sm:$0xff] %v7959_v13  ;;  %v7980_v13 = vadd.s32 1912, %v7369_v40 }
 0x419   : > { %15378 = vst [vmem:[#allocation420_spill] sm:$0xff] %v7962_v60  ;;  %v7983_v60 = vadd.s32 1920, %v7369_v40 }
 0x41a   : > { %15379 = vst [vmem:[#allocation421_spill] sm:$0xff] %v7965_v34  ;;  %v7986_v34 = vadd.s32 1928, %v7369_v40 }
 0x41b   : > { %15380 = vst [vmem:[#allocation422_spill] sm:$0xff] %v7968_v55  ;;  %v7989_v55 = vadd.s32 1936, %v7369_v40 }
 0x41c   : > { %15381 = vst [vmem:[#allocation423_spill] sm:$0xff] %v7971_v24  ;;  %v7992_v24 = vadd.s32 1944, %v7369_v40 }
 0x41d   : > { %15382 = vst [vmem:[#allocation424_spill] sm:$0xff] %v7974_v61  ;;  %v7995_v61 = vadd.s32 1952, %v7369_v40 }
 0x41e   : > { %15383 = vst [vmem:[#allocation425_spill] sm:$0xff] %v7977_v41  ;;  %v7998_v41 = vadd.s32 1960, %v7369_v40 }
 0x41f   : > { %15384 = vst [vmem:[#allocation426_spill] sm:$0xff] %v7980_v13  ;;  %v8001_v13 = vadd.s32 1968, %v7369_v40 }
 0x420   : > { %15385 = vst [vmem:[#allocation427_spill] sm:$0xff] %v7983_v60  ;;  %v8004_v60 = vadd.s32 1976, %v7369_v40 }
 0x421   : > { %15386 = vst [vmem:[#allocation428_spill] sm:$0xff] %v7986_v34  ;;  %v8007_v34 = vadd.s32 1984, %v7369_v40 }
 0x422   : > { %15387 = vst [vmem:[#allocation429_spill] sm:$0xff] %v7989_v55  ;;  %v8010_v55 = vadd.s32 1992, %v7369_v40 }
 0x423   : > { %15388 = vst [vmem:[#allocation430_spill] sm:$0xff] %v7992_v24  ;;  %v8013_v24 = vadd.s32 2000, %v7369_v40 }
 0x424   : > { %15389 = vst [vmem:[#allocation431_spill] sm:$0xff] %v7995_v61  ;;  %v8016_v61 = vadd.s32 2008, %v7369_v40  ;;  %v15559_v58 = vmov %v8010_v55 }
 0x425   : > { %15390 = vst [vmem:[#allocation432_spill] sm:$0xff] %v7998_v41  ;;  %v8019_v41 = vadd.s32 2016, %v7369_v40  ;;  %v15560_v17 = vmov %v8013_v24 }
 0x426   : > { %15391 = vst [vmem:[#allocation433_spill] sm:$0xff] %v8001_v13  ;;  %v8022_v13 = vadd.s32 2024, %v7369_v40  ;;  %v15561_v36 = vmov %v8016_v61 }
 0x427   : > { %15392 = vst [vmem:[#allocation434_spill] sm:$0xff] %v8004_v60  ;;  %v8025_v60 = vadd.s32 2032, %v7369_v40  ;;  %v15562_v12 = vmov %v8019_v41 }
 0x428   : > { %15393 = vst [vmem:[#allocation435_spill] sm:$0xff] %v8007_v34  ;;  %v8028_v34 = vadd.s32 2040, %v7369_v40  ;;  %v15563_v63 = vmov %v8022_v13  ;;  %v15566_v40 = vmul.u32 128, %v7372_v56  ;;  %v15571_v56 = vmul.u32 128, %v7386_v1 }
 0x429   : > { %15394 = vst [vmem:[#allocation436_spill] sm:$0xff] %v8010_v55  ;;  %v15564_v19 = vmov %v8025_v60  ;;  %v15575_v1 = vmul.u32 128, %v7398_v31  ;;  %v15583_v31 = vmul.u32 128, %v7410_v11  ;;  %v15591_v11 = vmul.u32 128, %v7422_v16 }
 0x42a   : > { %15395 = vst [vmem:[#allocation437_spill] sm:$0xff] %v8013_v24  ;;  %v8252_v55 = vadd.s32 %v15566_v40, %v15565_v26  ;;  %v15568_v24 = vmul.u32 128, %v7375_v8  ;;  %v8272_v40 = vadd.s32 %v15571_v56, %v15565_v26  ;;  %v15572_v8 = vmul.u32 128, %v7389_v6 }
 0x42b   : > { %15396 = vst [vmem:[#allocation438_spill] sm:$0xff] %v8016_v61  ;;  %v15554_v20 = vld [vmem:[#allocation431_spill] sm:$0xff]  ;;  %v8292_v56 = vadd.s32 %v15575_v1, %v15565_v26  ;;  %v15577_v6 = vmul.u32 128, %v7401_v25  ;;  %v8312_v1 = vadd.s32 %v15583_v31, %v15565_v26  ;;  %v15585_v25 = vmul.u32 128, %v7413_v52 }
 0x42c   : > { %15397 = vst [vmem:[#allocation439_spill] sm:$0xff] %v8019_v41  ;;  %v8257_v46 = vadd.s32 %v15568_v24, %v15565_v26  ;;  %v8262_v41 = vadd.s32 %v15569_v0, %v15565_v26  ;;  %v8277_v24 = vadd.s32 %v15572_v8, %v15565_v26  ;;  %v8282_v0 = vadd.s32 %v15573_v18, %v15565_v26  ;;  %v15646_v61 = vld [vmem:[#allocation267_spill] sm:$0xff] }
 0x42d   : > { %15398 = vst [vmem:[#allocation440_spill] sm:$0xff] %v8022_v13  ;;  %v15556_v35 = vld [vmem:[#allocation433_spill] sm:$0xff]  ;;  %v8267_v13 = vadd.s32 %v15570_v54, %v15565_v26  ;;  %v8287_v54 = vadd.s32 %v15574_v22, %v15565_v26  ;;  %v8297_v8 = vadd.s32 %v15577_v6, %v15565_v26  ;;  %v8302_v18 = vadd.s32 %v15579_v43, %v15565_v26 }
 0x42e   : > { %15399 = vst [vmem:[#allocation441_spill] sm:$0xff] %v8025_v60  ;;  %v15557_v59 = vld [vmem:[#allocation434_spill] sm:$0xff]  ;;  %v8307_v22 = vadd.s32 %v15581_v53, %v15565_v26  ;;  %v8317_v6 = vadd.s32 %v15585_v25, %v15565_v26  ;;  %v8322_v43 = vadd.s32 %v15587_v48, %v15565_v26  ;;  %v8327_v53 = vadd.s32 %v15589_v44, %v15565_v26 }
 0x42f   : > { %v15558_v23 = vld [vmem:[#allocation435_spill] sm:$0xff]  ;;  %15567 = vst [vmem:[#allocation431_spill] sm:$0xff] %v8252_v55  ;;  %v8332_v31 = vadd.s32 %v15591_v11, %v15565_v26  ;;  %v15593_v52 = vmul.u32 128, %v7425_v9  ;;  %v8342_v48 = vadd.s32 %v15595_v2, %v15565_v26  ;;  %v8347_v44 = vadd.s32 %v15597_v37, %v15565_v26  ;;  %v15643_v60 = vld [vmem:[#allocation266_spill] sm:$0xff]  ;;  %v15649_v55 = vld [vmem:[#allocation268_spill] sm:$0xff] }
 0x430   : > { %15576 = vst [vmem:[#allocation433_spill] sm:$0xff] %v8292_v56  ;;  %v15599_v16 = vmul.u32 128, %v7434_v49  ;;  %v15601_v9 = vmul.u32 128, %v7437_v5  ;;  %v8362_v2 = vadd.s32 %v15603_v15, %v15565_v26  ;;  %v8367_v37 = vadd.s32 %v15605_v57, %v15565_v26 }
 0x431   : > { %15578 = vst [vmem:[#allocation434_spill] sm:$0xff] %v8297_v8  ;;  %v8337_v25 = vadd.s32 %v15593_v52, %v15565_v26  ;;  %v15607_v49 = vmul.u32 128, %v7446_v14  ;;  %v15609_v5 = vmul.u32 128, %v7449_v29  ;;  %v8382_v15 = vadd.s32 %v15611_v28, %v15565_v26  ;;  %v16351_v8 = vld [vmem:[#allocation21_spill] sm:$0xff] }
 0x432   : > { %15580 = vst [vmem:[#allocation435_spill] sm:$0xff] %v8302_v18  ;;  %v8352_v11 = vadd.s32 %v15599_v16, %v15565_v26  ;;  %v8357_v52 = vadd.s32 %v15601_v9, %v15565_v26  ;;  %v8387_v57 = vadd.s32 %v15613_v33, %v15565_v26  ;;  %v15615_v14 = vmul.u32 128, %v7458_v50 }
 0x433   : > { %15582 = vst [vmem:[#allocation436_spill] sm:$0xff] %v8307_v22  ;;  %v8372_v16 = vadd.s32 %v15607_v49, %v15565_v26  ;;  %v8377_v9 = vadd.s32 %v15609_v5, %v15565_v26  ;;  %v15617_v29 = vmul.u32 128, %v7461_v21  ;;  %v8402_v28 = vadd.s32 %v15619_v45, %v15565_v26 }
 0x434   : > { %15584 = vst [vmem:[#allocation437_spill] sm:$0xff] %v8312_v1  ;;  %v8392_v49 = vadd.s32 %v15615_v14, %v15565_v26  ;;  %v8407_v33 = vadd.s32 %v15621_v32, %v15565_v26  ;;  %v15623_v50 = vmul.u32 128, %v7470_v47  ;;  %v15625_v21 = vmul.u32 128, %v7473_v42  ;;  %v16350_v1 = vld [vmem:[#allocation20_spill] sm:$0xff] }
 0x435   : > { %15586 = vst [vmem:[#allocation438_spill] sm:$0xff] %v8317_v6  ;;  %v8397_v5 = vadd.s32 %v15617_v29, %v15565_v26  ;;  %v8422_v45 = vadd.s32 %v15627_v51, %v15565_v26  ;;  %v8427_v32 = vadd.s32 %v15629_v27, %v15565_v26  ;;  %v15631_v47 = vmul.u32 128, %v7482_v10 }
 0x436   : > { %15588 = vst [vmem:[#allocation439_spill] sm:$0xff] %v8322_v43  ;;  %v8412_v14 = vadd.s32 %v15623_v50, %v15565_v26  ;;  %v8417_v29 = vadd.s32 %v15625_v21, %v15565_v26  ;;  %v15633_v42 = vmul.u32 128, %v7485_v7  ;;  %v8442_v51 = vadd.s32 %v15635_v30, %v15565_v26  ;;  %v16346_v43 = vld [vmem:[#allocation17_spill] sm:$0xff] }
 0x437   : > { %15590 = vst [vmem:[#allocation440_spill] sm:$0xff] %v8327_v53  ;;  %v8432_v50 = vadd.s32 %v15631_v47, %v15565_v26  ;;  %v8447_v27 = vadd.s32 %v15637_v39, %v15565_v26  ;;  %v15639_v10 = vmul.u32 128, %v7494_v4  ;;  %v15641_v7 = vmul.u32 128, %v7497_v3 }
 0x438   : > { %15592 = vst [vmem:[#allocation441_spill] sm:$0xff] %v8332_v31  ;;  %v8437_v21 = vadd.s32 %v15633_v42, %v15565_v26  ;;  %v15644_v62 = vmul.u32 128, %v15643_v60  ;;  %v15647_v38 = vmul.u32 128, %v15646_v61  ;;  %v15650_v4 = vmul.u32 128, %v15649_v55 }
 0x439   : > { %15594 = vst [vmem:[#allocation265_spill] sm:$0xff] %v8337_v25  ;;  %v8452_v47 = vadd.s32 %v15639_v10, %v15565_v26  ;;  %v8457_v42 = vadd.s32 %v15641_v7, %v15565_v26 }
 0x43a   : > { %15596 = vst [vmem:[#allocation442_spill] sm:$0xff] %v8342_v48  ;;  %v8462_v30 = vadd.s32 %v15644_v62, %v15565_v26  ;;  %v8467_v39 = vadd.s32 %v15647_v38, %v15565_v26  ;;  %v8472_v10 = vadd.s32 %v15650_v4, %v15565_v26 }
 0x43b   : > { %15598 = vst [vmem:[#allocation443_spill] sm:$0xff] %v8347_v44 }
 0x43c   : > { %15600 = vst [vmem:[#allocation444_spill] sm:$0xff] %v8352_v11 }
 0x43d   : > { %15602 = vst [vmem:[#allocation445_spill] sm:$0xff] %v8357_v52 }
 0x43e   : > { %15604 = vst [vmem:[#allocation446_spill] sm:$0xff] %v8362_v2 }
 0x43f   : > { %15606 = vst [vmem:[#allocation447_spill] sm:$0xff] %v8367_v37 }
 0x440   : > { %15608 = vst [vmem:[#allocation448_spill] sm:$0xff] %v8372_v16 }
 0x441   : > { %15610 = vst [vmem:[#allocation449_spill] sm:$0xff] %v8377_v9 }
 0x442   : > { %15612 = vst [vmem:[#allocation450_spill] sm:$0xff] %v8382_v15 }
 0x443   : > { %15614 = vst [vmem:[#allocation451_spill] sm:$0xff] %v8387_v57 }
 0x444   : > { %15616 = vst [vmem:[#allocation452_spill] sm:$0xff] %v8392_v49 }
 0x445   : > { %15618 = vst [vmem:[#allocation453_spill] sm:$0xff] %v8397_v5 }
 0x446   : > { %15620 = vst [vmem:[#allocation454_spill] sm:$0xff] %v8402_v28 }
 0x447   : > { %15622 = vst [vmem:[#allocation455_spill] sm:$0xff] %v8407_v33 }
 0x448   : > { %15624 = vst [vmem:[#allocation456_spill] sm:$0xff] %v8412_v14 }
 0x449   : > { %15626 = vst [vmem:[#allocation457_spill] sm:$0xff] %v8417_v29 }
 0x44a   : > { %15628 = vst [vmem:[#allocation458_spill] sm:$0xff] %v8422_v45 }
 0x44b   : > { %15630 = vst [vmem:[#allocation459_spill] sm:$0xff] %v8427_v32 }
 0x44c   : > { %15632 = vst [vmem:[#allocation460_spill] sm:$0xff] %v8432_v50 }
 0x44d   : > { %15634 = vst [vmem:[#allocation461_spill] sm:$0xff] %v8437_v21 }
 0x44e   : > { %15636 = vst [vmem:[#allocation462_spill] sm:$0xff] %v8442_v51 }
 0x44f   : > { %15638 = vst [vmem:[#allocation463_spill] sm:$0xff] %v8447_v27 }
 0x450   : > { %15640 = vst [vmem:[#allocation464_spill] sm:$0xff] %v8452_v47  ;;  %v15652_v47 = vld [vmem:[#allocation269_spill] sm:$0xff] }
 0x451   : > { %15642 = vst [vmem:[#allocation465_spill] sm:$0xff] %v8457_v42  ;;  %v15653_v3 = vmul.u32 128, %v15652_v47  ;;  %v15655_v42 = vld [vmem:[#allocation270_spill] sm:$0xff] }
 0x452   : > { %15645 = vst [vmem:[#allocation266_spill] sm:$0xff] %v8462_v30  ;;  %v15656_v60 = vmul.u32 128, %v15655_v42  ;;  %v15658_v30 = vld [vmem:[#allocation271_spill] sm:$0xff] }
 0x453   : > { %15648 = vst [vmem:[#allocation267_spill] sm:$0xff] %v8467_v39  ;;  %v8477_v7 = vadd.s32 %v15653_v3, %v15565_v26  ;;  %v15659_v61 = vmul.u32 128, %v15658_v30  ;;  %v15661_v39 = vld [vmem:[#allocation272_spill] sm:$0xff] }
 0x454   : > { %15651 = vst [vmem:[#allocation268_spill] sm:$0xff] %v8472_v10  ;;  %v8482_v62 = vadd.s32 %v15656_v60, %v15565_v26  ;;  %v15662_v55 = vmul.u32 128, %v15661_v39  ;;  %v15664_v10 = vld [vmem:[#allocation273_spill] sm:$0xff] }
 0x455   : > { %15654 = vst [vmem:[#allocation269_spill] sm:$0xff] %v8477_v7  ;;  %v8487_v38 = vadd.s32 %v15659_v61, %v15565_v26  ;;  %v15665_v47 = vmul.u32 128, %v15664_v10  ;;  %v15667_v7 = vld [vmem:[#allocation274_spill] sm:$0xff] }
 0x456   : > { %15657 = vst [vmem:[#allocation270_spill] sm:$0xff] %v8482_v62  ;;  %v8492_v4 = vadd.s32 %v15662_v55, %v15565_v26  ;;  %v15668_v42 = vmul.u32 128, %v15667_v7  ;;  %v15670_v62 = vld [vmem:[#allocation275_spill] sm:$0xff] }
 0x457   : > { %15660 = vst [vmem:[#allocation271_spill] sm:$0xff] %v8487_v38  ;;  %v8497_v3 = vadd.s32 %v15665_v47, %v15565_v26  ;;  %v15671_v30 = vmul.u32 128, %v15670_v62  ;;  %v15673_v38 = vld [vmem:[#allocation276_spill] sm:$0xff] }
 0x458   : > { %15663 = vst [vmem:[#allocation272_spill] sm:$0xff] %v8492_v4  ;;  %v8502_v60 = vadd.s32 %v15668_v42, %v15565_v26  ;;  %v15674_v39 = vmul.u32 128, %v15673_v38  ;;  %v15676_v4 = vld [vmem:[#allocation277_spill] sm:$0xff] }
 0x459   : > { %15666 = vst [vmem:[#allocation273_spill] sm:$0xff] %v8497_v3  ;;  %v8507_v61 = vadd.s32 %v15671_v30, %v15565_v26  ;;  %v15677_v10 = vmul.u32 128, %v15676_v4  ;;  %v15679_v3 = vld [vmem:[#allocation278_spill] sm:$0xff] }
 0x45a   : > { %15669 = vst [vmem:[#allocation274_spill] sm:$0xff] %v8502_v60  ;;  %v8512_v55 = vadd.s32 %v15674_v39, %v15565_v26  ;;  %v15680_v7 = vmul.u32 128, %v15679_v3  ;;  %v15682_v60 = vld [vmem:[#allocation279_spill] sm:$0xff] }
 0x45b   : > { %15672 = vst [vmem:[#allocation275_spill] sm:$0xff] %v8507_v61  ;;  %v8517_v47 = vadd.s32 %v15677_v10, %v15565_v26  ;;  %v15683_v62 = vmul.u32 128, %v15682_v60  ;;  %v15685_v61 = vld [vmem:[#allocation280_spill] sm:$0xff] }
 0x45c   : > { %15675 = vst [vmem:[#allocation276_spill] sm:$0xff] %v8512_v55  ;;  %v8522_v42 = vadd.s32 %v15680_v7, %v15565_v26  ;;  %v15686_v38 = vmul.u32 128, %v15685_v61  ;;  %v15688_v55 = vld [vmem:[#allocation281_spill] sm:$0xff] }
 0x45d   : > { %15678 = vst [vmem:[#allocation277_spill] sm:$0xff] %v8517_v47  ;;  %v8527_v30 = vadd.s32 %v15683_v62, %v15565_v26  ;;  %v15689_v4 = vmul.u32 128, %v15688_v55  ;;  %v15691_v47 = vld [vmem:[#allocation282_spill] sm:$0xff] }
 0x45e   : > { %15681 = vst [vmem:[#allocation278_spill] sm:$0xff] %v8522_v42  ;;  %v8532_v39 = vadd.s32 %v15686_v38, %v15565_v26  ;;  %v15692_v3 = vmul.u32 128, %v15691_v47  ;;  %v15694_v42 = vld [vmem:[#allocation283_spill] sm:$0xff] }
 0x45f   : > { %15684 = vst [vmem:[#allocation279_spill] sm:$0xff] %v8527_v30  ;;  %v8537_v10 = vadd.s32 %v15689_v4, %v15565_v26  ;;  %v15695_v60 = vmul.u32 128, %v15694_v42  ;;  %v15697_v30 = vld [vmem:[#allocation284_spill] sm:$0xff] }
 0x460   : > { %15687 = vst [vmem:[#allocation280_spill] sm:$0xff] %v8532_v39  ;;  %v8542_v7 = vadd.s32 %v15692_v3, %v15565_v26  ;;  %v15698_v61 = vmul.u32 128, %v15697_v30  ;;  %v15700_v39 = vld [vmem:[#allocation285_spill] sm:$0xff] }
 0x461   : > { %15690 = vst [vmem:[#allocation281_spill] sm:$0xff] %v8537_v10  ;;  %v8547_v62 = vadd.s32 %v15695_v60, %v15565_v26  ;;  %v15701_v55 = vmul.u32 128, %v15700_v39  ;;  %v15703_v10 = vld [vmem:[#allocation286_spill] sm:$0xff] }
 0x462   : > { %15693 = vst [vmem:[#allocation282_spill] sm:$0xff] %v8542_v7  ;;  %v8552_v38 = vadd.s32 %v15698_v61, %v15565_v26  ;;  %v15704_v47 = vmul.u32 128, %v15703_v10  ;;  %v15706_v7 = vld [vmem:[#allocation287_spill] sm:$0xff] }
 0x463   : > { %15696 = vst [vmem:[#allocation283_spill] sm:$0xff] %v8547_v62  ;;  %v8557_v4 = vadd.s32 %v15701_v55, %v15565_v26  ;;  %v15707_v42 = vmul.u32 128, %v15706_v7  ;;  %v15709_v62 = vld [vmem:[#allocation288_spill] sm:$0xff] }
 0x464   : > { %15699 = vst [vmem:[#allocation284_spill] sm:$0xff] %v8552_v38  ;;  %v8562_v3 = vadd.s32 %v15704_v47, %v15565_v26  ;;  %v15710_v30 = vmul.u32 128, %v15709_v62  ;;  %v15712_v38 = vld [vmem:[#allocation289_spill] sm:$0xff] }
 0x465   : > { %15702 = vst [vmem:[#allocation285_spill] sm:$0xff] %v8557_v4  ;;  %v8567_v60 = vadd.s32 %v15707_v42, %v15565_v26  ;;  %v15713_v39 = vmul.u32 128, %v15712_v38  ;;  %v15715_v4 = vld [vmem:[#allocation290_spill] sm:$0xff] }
 0x466   : > { %15705 = vst [vmem:[#allocation286_spill] sm:$0xff] %v8562_v3  ;;  %v8572_v61 = vadd.s32 %v15710_v30, %v15565_v26  ;;  %v15716_v10 = vmul.u32 128, %v15715_v4  ;;  %v15718_v3 = vld [vmem:[#allocation291_spill] sm:$0xff] }
 0x467   : > { %15708 = vst [vmem:[#allocation287_spill] sm:$0xff] %v8567_v60  ;;  %v8577_v55 = vadd.s32 %v15713_v39, %v15565_v26  ;;  %v15719_v7 = vmul.u32 128, %v15718_v3  ;;  %v15721_v60 = vld [vmem:[#allocation292_spill] sm:$0xff] }
 0x468   : > { %15711 = vst [vmem:[#allocation288_spill] sm:$0xff] %v8572_v61  ;;  %v8582_v47 = vadd.s32 %v15716_v10, %v15565_v26  ;;  %v15722_v62 = vmul.u32 128, %v15721_v60  ;;  %v15724_v61 = vld [vmem:[#allocation293_spill] sm:$0xff] }
 0x469   : > { %15714 = vst [vmem:[#allocation289_spill] sm:$0xff] %v8577_v55  ;;  %v8587_v42 = vadd.s32 %v15719_v7, %v15565_v26  ;;  %v15725_v38 = vmul.u32 128, %v15724_v61  ;;  %v15727_v55 = vld [vmem:[#allocation294_spill] sm:$0xff] }
 0x46a   : > { %15717 = vst [vmem:[#allocation290_spill] sm:$0xff] %v8582_v47  ;;  %v8592_v30 = vadd.s32 %v15722_v62, %v15565_v26  ;;  %v15728_v4 = vmul.u32 128, %v15727_v55  ;;  %v15730_v47 = vld [vmem:[#allocation295_spill] sm:$0xff] }
 0x46b   : > { %15720 = vst [vmem:[#allocation291_spill] sm:$0xff] %v8587_v42  ;;  %v8597_v39 = vadd.s32 %v15725_v38, %v15565_v26  ;;  %v15731_v3 = vmul.u32 128, %v15730_v47  ;;  %v15733_v42 = vld [vmem:[#allocation296_spill] sm:$0xff] }
 0x46c   : > { %15723 = vst [vmem:[#allocation292_spill] sm:$0xff] %v8592_v30  ;;  %v8602_v10 = vadd.s32 %v15728_v4, %v15565_v26  ;;  %v15734_v60 = vmul.u32 128, %v15733_v42  ;;  %v15736_v30 = vld [vmem:[#allocation297_spill] sm:$0xff] }
 0x46d   : > { %15726 = vst [vmem:[#allocation293_spill] sm:$0xff] %v8597_v39  ;;  %v8607_v7 = vadd.s32 %v15731_v3, %v15565_v26  ;;  %v15737_v61 = vmul.u32 128, %v15736_v30  ;;  %v15739_v39 = vld [vmem:[#allocation298_spill] sm:$0xff] }
 0x46e   : > { %15729 = vst [vmem:[#allocation294_spill] sm:$0xff] %v8602_v10  ;;  %v8612_v62 = vadd.s32 %v15734_v60, %v15565_v26  ;;  %v15740_v55 = vmul.u32 128, %v15739_v39  ;;  %v15742_v10 = vld [vmem:[#allocation299_spill] sm:$0xff] }
 0x46f   : > { %15732 = vst [vmem:[#allocation295_spill] sm:$0xff] %v8607_v7  ;;  %v8617_v38 = vadd.s32 %v15737_v61, %v15565_v26  ;;  %v15743_v47 = vmul.u32 128, %v15742_v10  ;;  %v15745_v7 = vld [vmem:[#allocation300_spill] sm:$0xff] }
 0x470   : > { %15735 = vst [vmem:[#allocation296_spill] sm:$0xff] %v8612_v62  ;;  %v8622_v4 = vadd.s32 %v15740_v55, %v15565_v26  ;;  %v15746_v42 = vmul.u32 128, %v15745_v7  ;;  %v15748_v62 = vld [vmem:[#allocation301_spill] sm:$0xff] }
 0x471   : > { %15738 = vst [vmem:[#allocation297_spill] sm:$0xff] %v8617_v38  ;;  %v8627_v3 = vadd.s32 %v15743_v47, %v15565_v26  ;;  %v15749_v30 = vmul.u32 128, %v15748_v62  ;;  %v15751_v38 = vld [vmem:[#allocation302_spill] sm:$0xff] }
 0x472   : > { %15741 = vst [vmem:[#allocation298_spill] sm:$0xff] %v8622_v4  ;;  %v8632_v60 = vadd.s32 %v15746_v42, %v15565_v26  ;;  %v15752_v39 = vmul.u32 128, %v15751_v38  ;;  %v15754_v4 = vld [vmem:[#allocation303_spill] sm:$0xff] }
 0x473   : > { %15744 = vst [vmem:[#allocation299_spill] sm:$0xff] %v8627_v3  ;;  %v8637_v61 = vadd.s32 %v15749_v30, %v15565_v26  ;;  %v15755_v10 = vmul.u32 128, %v15754_v4  ;;  %v15757_v3 = vld [vmem:[#allocation304_spill] sm:$0xff] }
 0x474   : > { %15747 = vst [vmem:[#allocation300_spill] sm:$0xff] %v8632_v60  ;;  %v8642_v55 = vadd.s32 %v15752_v39, %v15565_v26  ;;  %v15758_v7 = vmul.u32 128, %v15757_v3  ;;  %v15760_v60 = vld [vmem:[#allocation305_spill] sm:$0xff] }
 0x475   : > { %15750 = vst [vmem:[#allocation301_spill] sm:$0xff] %v8637_v61  ;;  %v8647_v47 = vadd.s32 %v15755_v10, %v15565_v26  ;;  %v15761_v62 = vmul.u32 128, %v15760_v60  ;;  %v15763_v61 = vld [vmem:[#allocation306_spill] sm:$0xff] }
 0x476   : > { %15753 = vst [vmem:[#allocation302_spill] sm:$0xff] %v8642_v55  ;;  %v8652_v42 = vadd.s32 %v15758_v7, %v15565_v26  ;;  %v15764_v38 = vmul.u32 128, %v15763_v61  ;;  %v15766_v55 = vld [vmem:[#allocation307_spill] sm:$0xff] }
 0x477   : > { %15756 = vst [vmem:[#allocation303_spill] sm:$0xff] %v8647_v47  ;;  %v8657_v30 = vadd.s32 %v15761_v62, %v15565_v26  ;;  %v15767_v4 = vmul.u32 128, %v15766_v55  ;;  %v15769_v47 = vld [vmem:[#allocation308_spill] sm:$0xff] }
 0x478   : > { %15759 = vst [vmem:[#allocation304_spill] sm:$0xff] %v8652_v42  ;;  %v8662_v39 = vadd.s32 %v15764_v38, %v15565_v26  ;;  %v15770_v3 = vmul.u32 128, %v15769_v47  ;;  %v15772_v42 = vld [vmem:[#allocation309_spill] sm:$0xff] }
 0x479   : > { %15762 = vst [vmem:[#allocation305_spill] sm:$0xff] %v8657_v30  ;;  %v8667_v10 = vadd.s32 %v15767_v4, %v15565_v26  ;;  %v15773_v60 = vmul.u32 128, %v15772_v42  ;;  %v15775_v30 = vld [vmem:[#allocation310_spill] sm:$0xff] }
 0x47a   : > { %15765 = vst [vmem:[#allocation306_spill] sm:$0xff] %v8662_v39  ;;  %v8672_v7 = vadd.s32 %v15770_v3, %v15565_v26  ;;  %v15776_v61 = vmul.u32 128, %v15775_v30  ;;  %v15778_v39 = vld [vmem:[#allocation311_spill] sm:$0xff] }
 0x47b   : > { %15768 = vst [vmem:[#allocation307_spill] sm:$0xff] %v8667_v10  ;;  %v8677_v62 = vadd.s32 %v15773_v60, %v15565_v26  ;;  %v15779_v55 = vmul.u32 128, %v15778_v39  ;;  %v15781_v10 = vld [vmem:[#allocation312_spill] sm:$0xff] }
 0x47c   : > { %15771 = vst [vmem:[#allocation308_spill] sm:$0xff] %v8672_v7  ;;  %v8682_v38 = vadd.s32 %v15776_v61, %v15565_v26  ;;  %v15782_v47 = vmul.u32 128, %v15781_v10  ;;  %v15784_v7 = vld [vmem:[#allocation313_spill] sm:$0xff] }
 0x47d   : > { %15774 = vst [vmem:[#allocation309_spill] sm:$0xff] %v8677_v62  ;;  %v8687_v4 = vadd.s32 %v15779_v55, %v15565_v26  ;;  %v15785_v42 = vmul.u32 128, %v15784_v7  ;;  %v15787_v62 = vld [vmem:[#allocation314_spill] sm:$0xff] }
 0x47e   : > { %15777 = vst [vmem:[#allocation310_spill] sm:$0xff] %v8682_v38  ;;  %v8692_v3 = vadd.s32 %v15782_v47, %v15565_v26  ;;  %v15788_v30 = vmul.u32 128, %v15787_v62  ;;  %v15790_v38 = vld [vmem:[#allocation315_spill] sm:$0xff] }
 0x47f   : > { %15780 = vst [vmem:[#allocation311_spill] sm:$0xff] %v8687_v4  ;;  %v8697_v60 = vadd.s32 %v15785_v42, %v15565_v26  ;;  %v15791_v39 = vmul.u32 128, %v15790_v38  ;;  %v15793_v4 = vld [vmem:[#allocation316_spill] sm:$0xff] }
 0x480   : > { %15783 = vst [vmem:[#allocation312_spill] sm:$0xff] %v8692_v3  ;;  %v8702_v61 = vadd.s32 %v15788_v30, %v15565_v26  ;;  %v15794_v10 = vmul.u32 128, %v15793_v4  ;;  %v15796_v3 = vld [vmem:[#allocation317_spill] sm:$0xff] }
 0x481   : > { %15786 = vst [vmem:[#allocation313_spill] sm:$0xff] %v8697_v60  ;;  %v8707_v55 = vadd.s32 %v15791_v39, %v15565_v26  ;;  %v15797_v7 = vmul.u32 128, %v15796_v3  ;;  %v15799_v60 = vld [vmem:[#allocation318_spill] sm:$0xff] }
 0x482   : > { %15789 = vst [vmem:[#allocation314_spill] sm:$0xff] %v8702_v61  ;;  %v8712_v47 = vadd.s32 %v15794_v10, %v15565_v26  ;;  %v15800_v62 = vmul.u32 128, %v15799_v60  ;;  %v15802_v61 = vld [vmem:[#allocation319_spill] sm:$0xff] }
 0x483   : > { %15792 = vst [vmem:[#allocation315_spill] sm:$0xff] %v8707_v55  ;;  %v8717_v42 = vadd.s32 %v15797_v7, %v15565_v26  ;;  %v15803_v38 = vmul.u32 128, %v15802_v61  ;;  %v15805_v55 = vld [vmem:[#allocation320_spill] sm:$0xff] }
 0x484   : > { %15795 = vst [vmem:[#allocation316_spill] sm:$0xff] %v8712_v47  ;;  %v8722_v30 = vadd.s32 %v15800_v62, %v15565_v26  ;;  %v15806_v4 = vmul.u32 128, %v15805_v55  ;;  %v15808_v47 = vld [vmem:[#allocation321_spill] sm:$0xff] }
 0x485   : > { %15798 = vst [vmem:[#allocation317_spill] sm:$0xff] %v8717_v42  ;;  %v8727_v39 = vadd.s32 %v15803_v38, %v15565_v26  ;;  %v15809_v3 = vmul.u32 128, %v15808_v47  ;;  %v15811_v42 = vld [vmem:[#allocation322_spill] sm:$0xff] }
 0x486   : > { %15801 = vst [vmem:[#allocation318_spill] sm:$0xff] %v8722_v30  ;;  %v8732_v10 = vadd.s32 %v15806_v4, %v15565_v26  ;;  %v15812_v60 = vmul.u32 128, %v15811_v42  ;;  %v15814_v30 = vld [vmem:[#allocation323_spill] sm:$0xff] }
 0x487   : > { %15804 = vst [vmem:[#allocation319_spill] sm:$0xff] %v8727_v39  ;;  %v8737_v7 = vadd.s32 %v15809_v3, %v15565_v26  ;;  %v15815_v61 = vmul.u32 128, %v15814_v30  ;;  %v15817_v39 = vld [vmem:[#allocation324_spill] sm:$0xff] }
 0x488   : > { %15807 = vst [vmem:[#allocation320_spill] sm:$0xff] %v8732_v10  ;;  %v8742_v62 = vadd.s32 %v15812_v60, %v15565_v26  ;;  %v15818_v55 = vmul.u32 128, %v15817_v39  ;;  %v15820_v10 = vld [vmem:[#allocation325_spill] sm:$0xff] }
 0x489   : > { %15810 = vst [vmem:[#allocation321_spill] sm:$0xff] %v8737_v7  ;;  %v8747_v38 = vadd.s32 %v15815_v61, %v15565_v26  ;;  %v15821_v47 = vmul.u32 128, %v15820_v10  ;;  %v15823_v7 = vld [vmem:[#allocation326_spill] sm:$0xff] }
 0x48a   : > { %15813 = vst [vmem:[#allocation322_spill] sm:$0xff] %v8742_v62  ;;  %v8752_v4 = vadd.s32 %v15818_v55, %v15565_v26  ;;  %v15824_v42 = vmul.u32 128, %v15823_v7  ;;  %v15826_v62 = vld [vmem:[#allocation327_spill] sm:$0xff] }
 0x48b   : > { %15816 = vst [vmem:[#allocation323_spill] sm:$0xff] %v8747_v38  ;;  %v8757_v3 = vadd.s32 %v15821_v47, %v15565_v26  ;;  %v15827_v30 = vmul.u32 128, %v15826_v62  ;;  %v15829_v38 = vld [vmem:[#allocation328_spill] sm:$0xff] }
 0x48c   : > { %15819 = vst [vmem:[#allocation324_spill] sm:$0xff] %v8752_v4  ;;  %v8762_v60 = vadd.s32 %v15824_v42, %v15565_v26  ;;  %v15830_v39 = vmul.u32 128, %v15829_v38  ;;  %v15832_v4 = vld [vmem:[#allocation329_spill] sm:$0xff] }
 0x48d   : > { %15822 = vst [vmem:[#allocation325_spill] sm:$0xff] %v8757_v3  ;;  %v8767_v61 = vadd.s32 %v15827_v30, %v15565_v26  ;;  %v15833_v10 = vmul.u32 128, %v15832_v4  ;;  %v15835_v3 = vld [vmem:[#allocation330_spill] sm:$0xff] }
 0x48e   : > { %15825 = vst [vmem:[#allocation326_spill] sm:$0xff] %v8762_v60  ;;  %v8772_v55 = vadd.s32 %v15830_v39, %v15565_v26  ;;  %v15836_v7 = vmul.u32 128, %v15835_v3  ;;  %v15838_v60 = vld [vmem:[#allocation331_spill] sm:$0xff] }
 0x48f   : > { %15828 = vst [vmem:[#allocation327_spill] sm:$0xff] %v8767_v61  ;;  %v8777_v47 = vadd.s32 %v15833_v10, %v15565_v26  ;;  %v15839_v62 = vmul.u32 128, %v15838_v60  ;;  %v15841_v61 = vld [vmem:[#allocation332_spill] sm:$0xff] }
 0x490   : > { %15831 = vst [vmem:[#allocation328_spill] sm:$0xff] %v8772_v55  ;;  %v8782_v42 = vadd.s32 %v15836_v7, %v15565_v26  ;;  %v15842_v38 = vmul.u32 128, %v15841_v61  ;;  %v15844_v55 = vld [vmem:[#allocation333_spill] sm:$0xff] }
 0x491   : > { %15834 = vst [vmem:[#allocation329_spill] sm:$0xff] %v8777_v47  ;;  %v8787_v30 = vadd.s32 %v15839_v62, %v15565_v26  ;;  %v15845_v4 = vmul.u32 128, %v15844_v55  ;;  %v15847_v47 = vld [vmem:[#allocation334_spill] sm:$0xff] }
 0x492   : > { %15837 = vst [vmem:[#allocation330_spill] sm:$0xff] %v8782_v42  ;;  %v8792_v39 = vadd.s32 %v15842_v38, %v15565_v26  ;;  %v15848_v3 = vmul.u32 128, %v15847_v47  ;;  %v15850_v42 = vld [vmem:[#allocation335_spill] sm:$0xff] }
 0x493   : > { %15840 = vst [vmem:[#allocation331_spill] sm:$0xff] %v8787_v30  ;;  %v8797_v10 = vadd.s32 %v15845_v4, %v15565_v26  ;;  %v15851_v60 = vmul.u32 128, %v15850_v42  ;;  %v15853_v30 = vld [vmem:[#allocation336_spill] sm:$0xff] }
 0x494   : > { %15843 = vst [vmem:[#allocation332_spill] sm:$0xff] %v8792_v39  ;;  %v8802_v7 = vadd.s32 %v15848_v3, %v15565_v26  ;;  %v15854_v61 = vmul.u32 128, %v15853_v30  ;;  %v15856_v39 = vld [vmem:[#allocation337_spill] sm:$0xff] }
 0x495   : > { %15846 = vst [vmem:[#allocation333_spill] sm:$0xff] %v8797_v10  ;;  %v8807_v62 = vadd.s32 %v15851_v60, %v15565_v26  ;;  %v15857_v55 = vmul.u32 128, %v15856_v39  ;;  %v15859_v10 = vld [vmem:[#allocation338_spill] sm:$0xff] }
 0x496   : > { %15849 = vst [vmem:[#allocation334_spill] sm:$0xff] %v8802_v7  ;;  %v8812_v38 = vadd.s32 %v15854_v61, %v15565_v26  ;;  %v15860_v47 = vmul.u32 128, %v15859_v10  ;;  %v15862_v7 = vld [vmem:[#allocation339_spill] sm:$0xff] }
 0x497   : > { %15852 = vst [vmem:[#allocation335_spill] sm:$0xff] %v8807_v62  ;;  %v8817_v4 = vadd.s32 %v15857_v55, %v15565_v26  ;;  %v15863_v42 = vmul.u32 128, %v15862_v7  ;;  %v15865_v62 = vld [vmem:[#allocation340_spill] sm:$0xff] }
 0x498   : > { %15855 = vst [vmem:[#allocation336_spill] sm:$0xff] %v8812_v38  ;;  %v8822_v3 = vadd.s32 %v15860_v47, %v15565_v26  ;;  %v15866_v30 = vmul.u32 128, %v15865_v62  ;;  %v15868_v38 = vld [vmem:[#allocation341_spill] sm:$0xff] }
 0x499   : > { %15858 = vst [vmem:[#allocation337_spill] sm:$0xff] %v8817_v4  ;;  %v8827_v60 = vadd.s32 %v15863_v42, %v15565_v26  ;;  %v15869_v39 = vmul.u32 128, %v15868_v38  ;;  %v15871_v4 = vld [vmem:[#allocation342_spill] sm:$0xff] }
 0x49a   : > { %15861 = vst [vmem:[#allocation338_spill] sm:$0xff] %v8822_v3  ;;  %v8832_v61 = vadd.s32 %v15866_v30, %v15565_v26  ;;  %v15872_v10 = vmul.u32 128, %v15871_v4  ;;  %v15874_v3 = vld [vmem:[#allocation343_spill] sm:$0xff] }
 0x49b   : > { %15864 = vst [vmem:[#allocation339_spill] sm:$0xff] %v8827_v60  ;;  %v8837_v55 = vadd.s32 %v15869_v39, %v15565_v26  ;;  %v15875_v7 = vmul.u32 128, %v15874_v3  ;;  %v15877_v60 = vld [vmem:[#allocation344_spill] sm:$0xff] }
 0x49c   : > { %15867 = vst [vmem:[#allocation340_spill] sm:$0xff] %v8832_v61  ;;  %v8842_v47 = vadd.s32 %v15872_v10, %v15565_v26  ;;  %v15878_v62 = vmul.u32 128, %v15877_v60  ;;  %v15880_v61 = vld [vmem:[#allocation345_spill] sm:$0xff] }
 0x49d   : > { %15870 = vst [vmem:[#allocation341_spill] sm:$0xff] %v8837_v55  ;;  %v8847_v42 = vadd.s32 %v15875_v7, %v15565_v26  ;;  %v15881_v38 = vmul.u32 128, %v15880_v61  ;;  %v15883_v55 = vld [vmem:[#allocation346_spill] sm:$0xff] }
 0x49e   : > { %15873 = vst [vmem:[#allocation342_spill] sm:$0xff] %v8842_v47  ;;  %v8852_v30 = vadd.s32 %v15878_v62, %v15565_v26  ;;  %v15884_v4 = vmul.u32 128, %v15883_v55  ;;  %v15886_v47 = vld [vmem:[#allocation347_spill] sm:$0xff] }
 0x49f   : > { %15876 = vst [vmem:[#allocation343_spill] sm:$0xff] %v8847_v42  ;;  %v8857_v39 = vadd.s32 %v15881_v38, %v15565_v26  ;;  %v15887_v3 = vmul.u32 128, %v15886_v47  ;;  %v15889_v42 = vld [vmem:[#allocation348_spill] sm:$0xff] }
 0x4a0   : > { %15879 = vst [vmem:[#allocation344_spill] sm:$0xff] %v8852_v30  ;;  %v8862_v10 = vadd.s32 %v15884_v4, %v15565_v26  ;;  %v15890_v60 = vmul.u32 128, %v15889_v42  ;;  %v15892_v30 = vld [vmem:[#allocation349_spill] sm:$0xff] }
 0x4a1   : > { %15882 = vst [vmem:[#allocation345_spill] sm:$0xff] %v8857_v39  ;;  %v8867_v7 = vadd.s32 %v15887_v3, %v15565_v26  ;;  %v15893_v61 = vmul.u32 128, %v15892_v30  ;;  %v15895_v39 = vld [vmem:[#allocation350_spill] sm:$0xff] }
 0x4a2   : > { %15885 = vst [vmem:[#allocation346_spill] sm:$0xff] %v8862_v10  ;;  %v8872_v62 = vadd.s32 %v15890_v60, %v15565_v26  ;;  %v15896_v55 = vmul.u32 128, %v15895_v39  ;;  %v15898_v10 = vld [vmem:[#allocation351_spill] sm:$0xff] }
 0x4a3   : > { %15888 = vst [vmem:[#allocation347_spill] sm:$0xff] %v8867_v7  ;;  %v8877_v38 = vadd.s32 %v15893_v61, %v15565_v26  ;;  %v15899_v47 = vmul.u32 128, %v15898_v10  ;;  %v15901_v7 = vld [vmem:[#allocation352_spill] sm:$0xff] }
 0x4a4   : > { %15891 = vst [vmem:[#allocation348_spill] sm:$0xff] %v8872_v62  ;;  %v8882_v4 = vadd.s32 %v15896_v55, %v15565_v26  ;;  %v15902_v42 = vmul.u32 128, %v15901_v7  ;;  %v15904_v62 = vld [vmem:[#allocation353_spill] sm:$0xff] }
 0x4a5   : > { %15894 = vst [vmem:[#allocation349_spill] sm:$0xff] %v8877_v38  ;;  %v8887_v3 = vadd.s32 %v15899_v47, %v15565_v26  ;;  %v15905_v30 = vmul.u32 128, %v15904_v62  ;;  %v15907_v38 = vld [vmem:[#allocation354_spill] sm:$0xff] }
 0x4a6   : > { %15897 = vst [vmem:[#allocation350_spill] sm:$0xff] %v8882_v4  ;;  %v8892_v60 = vadd.s32 %v15902_v42, %v15565_v26  ;;  %v15908_v39 = vmul.u32 128, %v15907_v38  ;;  %v15910_v4 = vld [vmem:[#allocation355_spill] sm:$0xff] }
 0x4a7   : > { %15900 = vst [vmem:[#allocation351_spill] sm:$0xff] %v8887_v3  ;;  %v8897_v61 = vadd.s32 %v15905_v30, %v15565_v26  ;;  %v15911_v10 = vmul.u32 128, %v15910_v4  ;;  %v15913_v3 = vld [vmem:[#allocation356_spill] sm:$0xff] }
 0x4a8   : > { %15903 = vst [vmem:[#allocation352_spill] sm:$0xff] %v8892_v60  ;;  %v8902_v55 = vadd.s32 %v15908_v39, %v15565_v26  ;;  %v15914_v7 = vmul.u32 128, %v15913_v3  ;;  %v15916_v60 = vld [vmem:[#allocation357_spill] sm:$0xff] }
 0x4a9   : > { %15906 = vst [vmem:[#allocation353_spill] sm:$0xff] %v8897_v61  ;;  %v8907_v47 = vadd.s32 %v15911_v10, %v15565_v26  ;;  %v15917_v62 = vmul.u32 128, %v15916_v60  ;;  %v15919_v61 = vld [vmem:[#allocation358_spill] sm:$0xff] }
 0x4aa   : > { %15909 = vst [vmem:[#allocation354_spill] sm:$0xff] %v8902_v55  ;;  %v8912_v42 = vadd.s32 %v15914_v7, %v15565_v26  ;;  %v15920_v38 = vmul.u32 128, %v15919_v61  ;;  %v15922_v55 = vld [vmem:[#allocation359_spill] sm:$0xff] }
 0x4ab   : > { %15912 = vst [vmem:[#allocation355_spill] sm:$0xff] %v8907_v47  ;;  %v8917_v30 = vadd.s32 %v15917_v62, %v15565_v26  ;;  %v15923_v4 = vmul.u32 128, %v15922_v55  ;;  %v15925_v47 = vld [vmem:[#allocation360_spill] sm:$0xff] }
 0x4ac   : > { %15915 = vst [vmem:[#allocation356_spill] sm:$0xff] %v8912_v42  ;;  %v8922_v39 = vadd.s32 %v15920_v38, %v15565_v26  ;;  %v15926_v3 = vmul.u32 128, %v15925_v47  ;;  %v15928_v42 = vld [vmem:[#allocation361_spill] sm:$0xff] }
 0x4ad   : > { %15918 = vst [vmem:[#allocation357_spill] sm:$0xff] %v8917_v30  ;;  %v8927_v10 = vadd.s32 %v15923_v4, %v15565_v26  ;;  %v15929_v60 = vmul.u32 128, %v15928_v42  ;;  %v15931_v30 = vld [vmem:[#allocation362_spill] sm:$0xff] }
 0x4ae   : > { %15921 = vst [vmem:[#allocation358_spill] sm:$0xff] %v8922_v39  ;;  %v8932_v7 = vadd.s32 %v15926_v3, %v15565_v26  ;;  %v15932_v61 = vmul.u32 128, %v15931_v30  ;;  %v15934_v39 = vld [vmem:[#allocation363_spill] sm:$0xff] }
 0x4af   : > { %15924 = vst [vmem:[#allocation359_spill] sm:$0xff] %v8927_v10  ;;  %v8937_v62 = vadd.s32 %v15929_v60, %v15565_v26  ;;  %v15935_v55 = vmul.u32 128, %v15934_v39  ;;  %v15937_v10 = vld [vmem:[#allocation364_spill] sm:$0xff] }
 0x4b0   : > { %15927 = vst [vmem:[#allocation360_spill] sm:$0xff] %v8932_v7  ;;  %v8942_v38 = vadd.s32 %v15932_v61, %v15565_v26  ;;  %v15938_v47 = vmul.u32 128, %v15937_v10  ;;  %v15940_v7 = vld [vmem:[#allocation365_spill] sm:$0xff] }
 0x4b1   : > { %15930 = vst [vmem:[#allocation361_spill] sm:$0xff] %v8937_v62  ;;  %v8947_v4 = vadd.s32 %v15935_v55, %v15565_v26  ;;  %v15941_v42 = vmul.u32 128, %v15940_v7  ;;  %v15943_v62 = vld [vmem:[#allocation366_spill] sm:$0xff] }
 0x4b2   : > { %15933 = vst [vmem:[#allocation362_spill] sm:$0xff] %v8942_v38  ;;  %v8952_v3 = vadd.s32 %v15938_v47, %v15565_v26  ;;  %v15944_v30 = vmul.u32 128, %v15943_v62  ;;  %v15946_v38 = vld [vmem:[#allocation367_spill] sm:$0xff] }
 0x4b3   : > { %15936 = vst [vmem:[#allocation363_spill] sm:$0xff] %v8947_v4  ;;  %v8957_v60 = vadd.s32 %v15941_v42, %v15565_v26  ;;  %v15947_v39 = vmul.u32 128, %v15946_v38  ;;  %v15949_v4 = vld [vmem:[#allocation368_spill] sm:$0xff] }
 0x4b4   : > { %15939 = vst [vmem:[#allocation364_spill] sm:$0xff] %v8952_v3  ;;  %v8962_v61 = vadd.s32 %v15944_v30, %v15565_v26  ;;  %v15950_v10 = vmul.u32 128, %v15949_v4  ;;  %v15952_v3 = vld [vmem:[#allocation369_spill] sm:$0xff] }
 0x4b5   : > { %15942 = vst [vmem:[#allocation365_spill] sm:$0xff] %v8957_v60  ;;  %v8967_v55 = vadd.s32 %v15947_v39, %v15565_v26  ;;  %v15953_v7 = vmul.u32 128, %v15952_v3  ;;  %v15955_v60 = vld [vmem:[#allocation370_spill] sm:$0xff] }
 0x4b6   : > { %15945 = vst [vmem:[#allocation366_spill] sm:$0xff] %v8962_v61  ;;  %v8972_v47 = vadd.s32 %v15950_v10, %v15565_v26  ;;  %v15956_v62 = vmul.u32 128, %v15955_v60  ;;  %v15958_v61 = vld [vmem:[#allocation371_spill] sm:$0xff] }
 0x4b7   : > { %15948 = vst [vmem:[#allocation367_spill] sm:$0xff] %v8967_v55  ;;  %v8977_v42 = vadd.s32 %v15953_v7, %v15565_v26  ;;  %v15959_v38 = vmul.u32 128, %v15958_v61  ;;  %v15961_v55 = vld [vmem:[#allocation372_spill] sm:$0xff] }
 0x4b8   : > { %15951 = vst [vmem:[#allocation368_spill] sm:$0xff] %v8972_v47  ;;  %v8982_v30 = vadd.s32 %v15956_v62, %v15565_v26  ;;  %v15962_v4 = vmul.u32 128, %v15961_v55  ;;  %v15964_v47 = vld [vmem:[#allocation373_spill] sm:$0xff] }
 0x4b9   : > { %15954 = vst [vmem:[#allocation369_spill] sm:$0xff] %v8977_v42  ;;  %v8987_v39 = vadd.s32 %v15959_v38, %v15565_v26  ;;  %v15965_v3 = vmul.u32 128, %v15964_v47  ;;  %v15967_v42 = vld [vmem:[#allocation374_spill] sm:$0xff] }
 0x4ba   : > { %15957 = vst [vmem:[#allocation370_spill] sm:$0xff] %v8982_v30  ;;  %v8992_v10 = vadd.s32 %v15962_v4, %v15565_v26  ;;  %v15968_v60 = vmul.u32 128, %v15967_v42  ;;  %v15970_v30 = vld [vmem:[#allocation375_spill] sm:$0xff] }
 0x4bb   : > { %15960 = vst [vmem:[#allocation371_spill] sm:$0xff] %v8987_v39  ;;  %v8997_v7 = vadd.s32 %v15965_v3, %v15565_v26  ;;  %v15971_v61 = vmul.u32 128, %v15970_v30  ;;  %v15973_v39 = vld [vmem:[#allocation376_spill] sm:$0xff] }
 0x4bc   : > { %15963 = vst [vmem:[#allocation372_spill] sm:$0xff] %v8992_v10  ;;  %v9002_v62 = vadd.s32 %v15968_v60, %v15565_v26  ;;  %v15974_v55 = vmul.u32 128, %v15973_v39  ;;  %v15976_v10 = vld [vmem:[#allocation377_spill] sm:$0xff] }
 0x4bd   : > { %15966 = vst [vmem:[#allocation373_spill] sm:$0xff] %v8997_v7  ;;  %v9007_v38 = vadd.s32 %v15971_v61, %v15565_v26  ;;  %v15977_v47 = vmul.u32 128, %v15976_v10  ;;  %v15979_v7 = vld [vmem:[#allocation378_spill] sm:$0xff] }
 0x4be   : > { %15969 = vst [vmem:[#allocation374_spill] sm:$0xff] %v9002_v62  ;;  %v9012_v4 = vadd.s32 %v15974_v55, %v15565_v26  ;;  %v15980_v42 = vmul.u32 128, %v15979_v7  ;;  %v15982_v62 = vld [vmem:[#allocation379_spill] sm:$0xff] }
 0x4bf   : > { %15972 = vst [vmem:[#allocation375_spill] sm:$0xff] %v9007_v38  ;;  %v9017_v3 = vadd.s32 %v15977_v47, %v15565_v26  ;;  %v15983_v30 = vmul.u32 128, %v15982_v62  ;;  %v15985_v38 = vld [vmem:[#allocation380_spill] sm:$0xff] }
 0x4c0   : > { %15975 = vst [vmem:[#allocation376_spill] sm:$0xff] %v9012_v4  ;;  %v9022_v60 = vadd.s32 %v15980_v42, %v15565_v26  ;;  %v15986_v39 = vmul.u32 128, %v15985_v38  ;;  %v15988_v4 = vld [vmem:[#allocation381_spill] sm:$0xff] }
 0x4c1   : > { %15978 = vst [vmem:[#allocation377_spill] sm:$0xff] %v9017_v3  ;;  %v9027_v61 = vadd.s32 %v15983_v30, %v15565_v26  ;;  %v15989_v10 = vmul.u32 128, %v15988_v4  ;;  %v15991_v3 = vld [vmem:[#allocation382_spill] sm:$0xff] }
 0x4c2   : > { %15981 = vst [vmem:[#allocation378_spill] sm:$0xff] %v9022_v60  ;;  %v9032_v55 = vadd.s32 %v15986_v39, %v15565_v26  ;;  %v15992_v7 = vmul.u32 128, %v15991_v3  ;;  %v15994_v60 = vld [vmem:[#allocation383_spill] sm:$0xff] }
 0x4c3   : > { %15984 = vst [vmem:[#allocation379_spill] sm:$0xff] %v9027_v61  ;;  %v9037_v47 = vadd.s32 %v15989_v10, %v15565_v26  ;;  %v15995_v62 = vmul.u32 128, %v15994_v60  ;;  %v15997_v61 = vld [vmem:[#allocation384_spill] sm:$0xff] }
 0x4c4   : > { %15987 = vst [vmem:[#allocation380_spill] sm:$0xff] %v9032_v55  ;;  %v9042_v42 = vadd.s32 %v15992_v7, %v15565_v26  ;;  %v15998_v38 = vmul.u32 128, %v15997_v61  ;;  %v16000_v55 = vld [vmem:[#allocation385_spill] sm:$0xff] }
 0x4c5   : > { %15990 = vst [vmem:[#allocation381_spill] sm:$0xff] %v9037_v47  ;;  %v9047_v30 = vadd.s32 %v15995_v62, %v15565_v26  ;;  %v16001_v4 = vmul.u32 128, %v16000_v55  ;;  %v16003_v47 = vld [vmem:[#allocation386_spill] sm:$0xff] }
 0x4c6   : > { %15993 = vst [vmem:[#allocation382_spill] sm:$0xff] %v9042_v42  ;;  %v9052_v39 = vadd.s32 %v15998_v38, %v15565_v26  ;;  %v16004_v3 = vmul.u32 128, %v16003_v47  ;;  %v16006_v42 = vld [vmem:[#allocation387_spill] sm:$0xff] }
 0x4c7   : > { %15996 = vst [vmem:[#allocation383_spill] sm:$0xff] %v9047_v30  ;;  %v9057_v10 = vadd.s32 %v16001_v4, %v15565_v26  ;;  %v16007_v60 = vmul.u32 128, %v16006_v42  ;;  %v16009_v30 = vld [vmem:[#allocation388_spill] sm:$0xff] }
 0x4c8   : > { %15999 = vst [vmem:[#allocation384_spill] sm:$0xff] %v9052_v39  ;;  %v9062_v7 = vadd.s32 %v16004_v3, %v15565_v26  ;;  %v16010_v61 = vmul.u32 128, %v16009_v30  ;;  %v16012_v39 = vld [vmem:[#allocation389_spill] sm:$0xff] }
 0x4c9   : > { %16002 = vst [vmem:[#allocation385_spill] sm:$0xff] %v9057_v10  ;;  %v9067_v62 = vadd.s32 %v16007_v60, %v15565_v26  ;;  %v16013_v55 = vmul.u32 128, %v16012_v39  ;;  %v16015_v10 = vld [vmem:[#allocation390_spill] sm:$0xff] }
 0x4ca   : > { %16005 = vst [vmem:[#allocation386_spill] sm:$0xff] %v9062_v7  ;;  %v9072_v38 = vadd.s32 %v16010_v61, %v15565_v26  ;;  %v16016_v47 = vmul.u32 128, %v16015_v10  ;;  %v16018_v7 = vld [vmem:[#allocation391_spill] sm:$0xff] }
 0x4cb   : > { %16008 = vst [vmem:[#allocation387_spill] sm:$0xff] %v9067_v62  ;;  %v9077_v4 = vadd.s32 %v16013_v55, %v15565_v26  ;;  %v16019_v42 = vmul.u32 128, %v16018_v7  ;;  %v16021_v62 = vld [vmem:[#allocation392_spill] sm:$0xff] }
 0x4cc   : > { %16011 = vst [vmem:[#allocation388_spill] sm:$0xff] %v9072_v38  ;;  %v9082_v3 = vadd.s32 %v16016_v47, %v15565_v26  ;;  %v16022_v30 = vmul.u32 128, %v16021_v62  ;;  %v16024_v38 = vld [vmem:[#allocation393_spill] sm:$0xff] }
 0x4cd   : > { %16014 = vst [vmem:[#allocation389_spill] sm:$0xff] %v9077_v4  ;;  %v9087_v60 = vadd.s32 %v16019_v42, %v15565_v26  ;;  %v16025_v39 = vmul.u32 128, %v16024_v38  ;;  %v16027_v4 = vld [vmem:[#allocation394_spill] sm:$0xff] }
 0x4ce   : > { %16017 = vst [vmem:[#allocation390_spill] sm:$0xff] %v9082_v3  ;;  %v9092_v61 = vadd.s32 %v16022_v30, %v15565_v26  ;;  %v16028_v10 = vmul.u32 128, %v16027_v4  ;;  %v16030_v3 = vld [vmem:[#allocation395_spill] sm:$0xff] }
 0x4cf   : > { %16020 = vst [vmem:[#allocation391_spill] sm:$0xff] %v9087_v60  ;;  %v9097_v55 = vadd.s32 %v16025_v39, %v15565_v26  ;;  %v16031_v7 = vmul.u32 128, %v16030_v3  ;;  %v16033_v60 = vld [vmem:[#allocation396_spill] sm:$0xff] }
 0x4d0   : > { %16023 = vst [vmem:[#allocation392_spill] sm:$0xff] %v9092_v61  ;;  %v9102_v47 = vadd.s32 %v16028_v10, %v15565_v26  ;;  %v16034_v62 = vmul.u32 128, %v16033_v60  ;;  %v16036_v61 = vld [vmem:[#allocation397_spill] sm:$0xff] }
 0x4d1   : > { %16026 = vst [vmem:[#allocation393_spill] sm:$0xff] %v9097_v55  ;;  %v9107_v42 = vadd.s32 %v16031_v7, %v15565_v26  ;;  %v16037_v38 = vmul.u32 128, %v16036_v61  ;;  %v16039_v55 = vld [vmem:[#allocation398_spill] sm:$0xff] }
 0x4d2   : > { %16029 = vst [vmem:[#allocation394_spill] sm:$0xff] %v9102_v47  ;;  %v9112_v30 = vadd.s32 %v16034_v62, %v15565_v26  ;;  %v16040_v4 = vmul.u32 128, %v16039_v55  ;;  %v16042_v47 = vld [vmem:[#allocation399_spill] sm:$0xff] }
 0x4d3   : > { %16032 = vst [vmem:[#allocation395_spill] sm:$0xff] %v9107_v42  ;;  %v9117_v39 = vadd.s32 %v16037_v38, %v15565_v26  ;;  %v16043_v3 = vmul.u32 128, %v16042_v47  ;;  %v16045_v42 = vld [vmem:[#allocation400_spill] sm:$0xff] }
 0x4d4   : > { %16035 = vst [vmem:[#allocation396_spill] sm:$0xff] %v9112_v30  ;;  %v9122_v10 = vadd.s32 %v16040_v4, %v15565_v26  ;;  %v16046_v60 = vmul.u32 128, %v16045_v42  ;;  %v16048_v30 = vld [vmem:[#allocation401_spill] sm:$0xff] }
 0x4d5   : > { %16038 = vst [vmem:[#allocation397_spill] sm:$0xff] %v9117_v39  ;;  %v9127_v7 = vadd.s32 %v16043_v3, %v15565_v26  ;;  %v16049_v61 = vmul.u32 128, %v16048_v30  ;;  %v16051_v39 = vld [vmem:[#allocation402_spill] sm:$0xff] }
 0x4d6   : > { %16041 = vst [vmem:[#allocation398_spill] sm:$0xff] %v9122_v10  ;;  %v9132_v62 = vadd.s32 %v16046_v60, %v15565_v26  ;;  %v16052_v55 = vmul.u32 128, %v16051_v39  ;;  %v16054_v10 = vld [vmem:[#allocation403_spill] sm:$0xff] }
 0x4d7   : > { %16044 = vst [vmem:[#allocation399_spill] sm:$0xff] %v9127_v7  ;;  %v9137_v38 = vadd.s32 %v16049_v61, %v15565_v26  ;;  %v16055_v47 = vmul.u32 128, %v16054_v10  ;;  %v16057_v7 = vld [vmem:[#allocation404_spill] sm:$0xff] }
 0x4d8   : > { %16047 = vst [vmem:[#allocation400_spill] sm:$0xff] %v9132_v62  ;;  %v9142_v4 = vadd.s32 %v16052_v55, %v15565_v26  ;;  %v16058_v42 = vmul.u32 128, %v16057_v7  ;;  %v16060_v62 = vld [vmem:[#allocation405_spill] sm:$0xff] }
 0x4d9   : > { %16050 = vst [vmem:[#allocation401_spill] sm:$0xff] %v9137_v38  ;;  %v9147_v3 = vadd.s32 %v16055_v47, %v15565_v26  ;;  %v16061_v30 = vmul.u32 128, %v16060_v62  ;;  %v16063_v38 = vld [vmem:[#allocation406_spill] sm:$0xff] }
 0x4da   : > { %16053 = vst [vmem:[#allocation402_spill] sm:$0xff] %v9142_v4  ;;  %v9152_v60 = vadd.s32 %v16058_v42, %v15565_v26  ;;  %v16064_v39 = vmul.u32 128, %v16063_v38  ;;  %v16066_v4 = vld [vmem:[#allocation407_spill] sm:$0xff] }
 0x4db   : > { %16056 = vst [vmem:[#allocation403_spill] sm:$0xff] %v9147_v3  ;;  %v9157_v61 = vadd.s32 %v16061_v30, %v15565_v26  ;;  %v16067_v10 = vmul.u32 128, %v16066_v4  ;;  %v16069_v3 = vld [vmem:[#allocation408_spill] sm:$0xff] }
 0x4dc   : > { %16059 = vst [vmem:[#allocation404_spill] sm:$0xff] %v9152_v60  ;;  %v9162_v55 = vadd.s32 %v16064_v39, %v15565_v26  ;;  %v16070_v7 = vmul.u32 128, %v16069_v3  ;;  %v16072_v60 = vld [vmem:[#allocation409_spill] sm:$0xff] }
 0x4dd   : > { %16062 = vst [vmem:[#allocation405_spill] sm:$0xff] %v9157_v61  ;;  %v9167_v47 = vadd.s32 %v16067_v10, %v15565_v26  ;;  %v16073_v62 = vmul.u32 128, %v16072_v60  ;;  %v16075_v61 = vld [vmem:[#allocation410_spill] sm:$0xff] }
 0x4de   : > { %16065 = vst [vmem:[#allocation406_spill] sm:$0xff] %v9162_v55  ;;  %v9172_v42 = vadd.s32 %v16070_v7, %v15565_v26  ;;  %v16076_v38 = vmul.u32 128, %v16075_v61  ;;  %v16078_v55 = vld [vmem:[#allocation411_spill] sm:$0xff] }
 0x4df   : > { %16068 = vst [vmem:[#allocation407_spill] sm:$0xff] %v9167_v47  ;;  %v9177_v30 = vadd.s32 %v16073_v62, %v15565_v26  ;;  %v16079_v4 = vmul.u32 128, %v16078_v55  ;;  %v16081_v47 = vld [vmem:[#allocation412_spill] sm:$0xff] }
 0x4e0   : > { %16071 = vst [vmem:[#allocation408_spill] sm:$0xff] %v9172_v42  ;;  %v9182_v39 = vadd.s32 %v16076_v38, %v15565_v26  ;;  %v16082_v3 = vmul.u32 128, %v16081_v47  ;;  %v16084_v42 = vld [vmem:[#allocation413_spill] sm:$0xff] }
 0x4e1   : > { %16074 = vst [vmem:[#allocation409_spill] sm:$0xff] %v9177_v30  ;;  %v9187_v10 = vadd.s32 %v16079_v4, %v15565_v26  ;;  %v16085_v60 = vmul.u32 128, %v16084_v42  ;;  %v16087_v30 = vld [vmem:[#allocation414_spill] sm:$0xff] }
 0x4e2   : > { %16077 = vst [vmem:[#allocation410_spill] sm:$0xff] %v9182_v39  ;;  %v9192_v7 = vadd.s32 %v16082_v3, %v15565_v26  ;;  %v16088_v61 = vmul.u32 128, %v16087_v30  ;;  %v16090_v39 = vld [vmem:[#allocation415_spill] sm:$0xff] }
 0x4e3   : > { %16080 = vst [vmem:[#allocation411_spill] sm:$0xff] %v9187_v10  ;;  %v9197_v62 = vadd.s32 %v16085_v60, %v15565_v26  ;;  %v16091_v55 = vmul.u32 128, %v16090_v39  ;;  %v16093_v10 = vld [vmem:[#allocation416_spill] sm:$0xff] }
 0x4e4   : > { %16083 = vst [vmem:[#allocation412_spill] sm:$0xff] %v9192_v7  ;;  %v9202_v38 = vadd.s32 %v16088_v61, %v15565_v26  ;;  %v16094_v47 = vmul.u32 128, %v16093_v10  ;;  %v16096_v7 = vld [vmem:[#allocation417_spill] sm:$0xff] }
 0x4e5   : > { %16086 = vst [vmem:[#allocation413_spill] sm:$0xff] %v9197_v62  ;;  %v9207_v4 = vadd.s32 %v16091_v55, %v15565_v26  ;;  %v16097_v42 = vmul.u32 128, %v16096_v7  ;;  %v16099_v62 = vld [vmem:[#allocation418_spill] sm:$0xff] }
 0x4e6   : > { %16089 = vst [vmem:[#allocation414_spill] sm:$0xff] %v9202_v38  ;;  %v9212_v3 = vadd.s32 %v16094_v47, %v15565_v26  ;;  %v16100_v30 = vmul.u32 128, %v16099_v62  ;;  %v16102_v38 = vld [vmem:[#allocation419_spill] sm:$0xff] }
 0x4e7   : > { %16092 = vst [vmem:[#allocation415_spill] sm:$0xff] %v9207_v4  ;;  %v9217_v60 = vadd.s32 %v16097_v42, %v15565_v26  ;;  %v16103_v39 = vmul.u32 128, %v16102_v38  ;;  %v16105_v4 = vld [vmem:[#allocation420_spill] sm:$0xff] }
 0x4e8   : > { %16095 = vst [vmem:[#allocation416_spill] sm:$0xff] %v9212_v3  ;;  %v9222_v61 = vadd.s32 %v16100_v30, %v15565_v26  ;;  %v16106_v10 = vmul.u32 128, %v16105_v4  ;;  %v16108_v3 = vld [vmem:[#allocation421_spill] sm:$0xff] }
 0x4e9   : > { %16098 = vst [vmem:[#allocation417_spill] sm:$0xff] %v9217_v60  ;;  %v9227_v55 = vadd.s32 %v16103_v39, %v15565_v26  ;;  %v16109_v7 = vmul.u32 128, %v16108_v3  ;;  %v16111_v60 = vld [vmem:[#allocation422_spill] sm:$0xff] }
 0x4ea   : > { %16101 = vst [vmem:[#allocation418_spill] sm:$0xff] %v9222_v61  ;;  %v9232_v47 = vadd.s32 %v16106_v10, %v15565_v26  ;;  %v16112_v62 = vmul.u32 128, %v16111_v60  ;;  %v16114_v61 = vld [vmem:[#allocation423_spill] sm:$0xff] }
 0x4eb   : > { %16104 = vst [vmem:[#allocation419_spill] sm:$0xff] %v9227_v55  ;;  %v9237_v42 = vadd.s32 %v16109_v7, %v15565_v26  ;;  %v16115_v38 = vmul.u32 128, %v16114_v61  ;;  %v16117_v55 = vld [vmem:[#allocation424_spill] sm:$0xff] }
 0x4ec   : > { %16107 = vst [vmem:[#allocation420_spill] sm:$0xff] %v9232_v47  ;;  %v9242_v30 = vadd.s32 %v16112_v62, %v15565_v26  ;;  %v16118_v4 = vmul.u32 128, %v16117_v55  ;;  %v16120_v47 = vld [vmem:[#allocation425_spill] sm:$0xff] }
 0x4ed   : > { %16110 = vst [vmem:[#allocation421_spill] sm:$0xff] %v9237_v42  ;;  %v9247_v39 = vadd.s32 %v16115_v38, %v15565_v26  ;;  %v16121_v3 = vmul.u32 128, %v16120_v47  ;;  %v16123_v42 = vld [vmem:[#allocation426_spill] sm:$0xff]  ;;  %v16132_v47 = vld [vmem:[#allocation429_spill] sm:$0xff] }
 0x4ee   : > { %16113 = vst [vmem:[#allocation422_spill] sm:$0xff] %v9242_v30  ;;  %v9252_v10 = vadd.s32 %v16118_v4, %v15565_v26  ;;  %v16124_v60 = vmul.u32 128, %v16123_v42  ;;  %v16126_v30 = vld [vmem:[#allocation427_spill] sm:$0xff]  ;;  %v16135_v42 = vld [vmem:[#allocation430_spill] sm:$0xff] }
 0x4ef   : > { %16116 = vst [vmem:[#allocation423_spill] sm:$0xff] %v9247_v39  ;;  %v9257_v7 = vadd.s32 %v16121_v3, %v15565_v26  ;;  %v16127_v61 = vmul.u32 128, %v16126_v30  ;;  %v16129_v39 = vld [vmem:[#allocation428_spill] sm:$0xff]  ;;  %v16133_v3 = vmul.u32 128, %v16132_v47  ;;  %v16138_v30 = vmul.u32 128, %v15554_v20 }
 0x4f0   : > { %16119 = vst [vmem:[#allocation424_spill] sm:$0xff] %v9252_v10  ;;  %v9262_v62 = vadd.s32 %v16124_v60, %v15565_v26  ;;  %v16130_v55 = vmul.u32 128, %v16129_v39  ;;  %v16136_v60 = vmul.u32 128, %v16135_v42  ;;  %v16140_v39 = vld [vmem:[#allocation432_spill] sm:$0xff]  ;;  %v16143_v47 = vmul.u32 128, %v15556_v35 }
 0x4f1   : > { %16122 = vst [vmem:[#allocation425_spill] sm:$0xff] %v9257_v7  ;;  %v9267_v38 = vadd.s32 %v16127_v61, %v15565_v26  ;;  %v9277_v7 = vadd.s32 %v16133_v3, %v15565_v26  ;;  %v9287_v61 = vadd.s32 %v16138_v30, %v15565_v26  ;;  %v16145_v42 = vmul.u32 128, %v15557_v59 }
 0x4f2   : > { %16125 = vst [vmem:[#allocation426_spill] sm:$0xff] %v9262_v62  ;;  %v9272_v4 = vadd.s32 %v16130_v55, %v15565_v26  ;;  %v9282_v62 = vadd.s32 %v16136_v60, %v15565_v26  ;;  %v9297_v3 = vadd.s32 %v16143_v47, %v15565_v26  ;;  %v16147_v20 = vmul.u32 128, %v15558_v23 }
 0x4f3   : > { %16128 = vst [vmem:[#allocation427_spill] sm:$0xff] %v9267_v38  ;;  %v16141_v38 = vmul.u32 128, %v16140_v39  ;;  %v9302_v60 = vadd.s32 %v16145_v42, %v15565_v26  ;;  %v16149_v39 = vmul.u32 128, %v15559_v58  ;;  %v16151_v35 = vmul.u32 128, %v15560_v17 }
 0x4f4   : > { %16131 = vst [vmem:[#allocation428_spill] sm:$0xff] %v9272_v4  ;;  %v9307_v30 = vadd.s32 %v16147_v20, %v15565_v26  ;;  %v16153_v59 = vmul.u32 128, %v15561_v36  ;;  %v16155_v23 = vmul.u32 128, %v15562_v12  ;;  %v16157_v58 = vmul.u32 128, %v15563_v63 }
 0x4f5   : > { %16134 = vst [vmem:[#allocation429_spill] sm:$0xff] %v9277_v7  ;;  %v9292_v55 = vadd.s32 %v16141_v38, %v15565_v26  ;;  %v9312_v38 = vadd.s32 %v16149_v39, %v15565_v26  ;;  %v9317_v47 = vadd.s32 %v16151_v35, %v15565_v26  ;;  %v16159_v17 = vmul.u32 128, %v15564_v19 }
 0x4f6   : > { %16137 = vst [vmem:[#allocation430_spill] sm:$0xff] %v9282_v62  ;;  %v9322_v42 = vadd.s32 %v16153_v59, %v15565_v26  ;;  %v9327_v20 = vadd.s32 %v16155_v23, %v15565_v26  ;;  %v9332_v39 = vadd.s32 %v16157_v58, %v15565_v26  ;;  %v16161_v36 = vmul.u32 128, %v8028_v34 }
 0x4f7   : > { %16139 = vst [vmem:[#allocation466_spill] sm:$0xff] %v9287_v61  ;;  %v9337_v35 = vadd.s32 %v16159_v17, %v15565_v26 }
 0x4f8   : > { %16142 = vst [vmem:[#allocation432_spill] sm:$0xff] %v9292_v55  ;;  %v9342_v59 = vadd.s32 %v16161_v36, %v15565_v26 }
 0x4f9   : > { %16144 = vst [vmem:[#allocation467_spill] sm:$0xff] %v9297_v3 }
 0x4fa   : > { %16146 = vst [vmem:[#allocation468_spill] sm:$0xff] %v9302_v60 }
 0x4fb   : > { %16148 = vst [vmem:[#allocation469_spill] sm:$0xff] %v9307_v30  ;;  %v16327_v30 = vld [vmem:[#allocation264_spill] sm:$0xff] }
 0x4fc   : > { %16150 = vst [vmem:[#allocation470_spill] sm:$0xff] %v9312_v38  ;;  %v9784_v38 = vadd.s32 8, %v16327_v30  ;;  %v9790_v61 = vadd.s32 24, %v16327_v30  ;;  %v9805_v60 = vadd.s32 64, %v16327_v30  ;;  %v9808_v3 = vadd.s32 72, %v16327_v30 }
 0x4fd   : > { %16152 = vst [vmem:[#allocation471_spill] sm:$0xff] %v9317_v47  ;;  %v9787_v47 = vadd.s32 16, %v16327_v30  ;;  %v9811_v55 = vadd.s32 80, %v16327_v30  ;;  %v9814_v62 = vadd.s32 88, %v16327_v30  ;;  %v9817_v7 = vadd.s32 96, %v16327_v30 }
 0x4fe   : > { %16154 = vst [vmem:[#allocation472_spill] sm:$0xff] %v9322_v42  ;;  %v9345_v42 = vstv %s5093_s11  ;;  %v9820_v4 = vadd.s32 104, %v16327_v30  ;;  %v9823_v19 = vadd.s32 112, %v16327_v30  ;;  %v9826_v63 = vadd.s32 120, %v16327_v30 }
 0x4ff   : > { %16156 = vst [vmem:[#allocation473_spill] sm:$0xff] %v9327_v20  ;;  %vm2569_vm0 = vcmp.lt.s32.totalorder %v8257_v46, %v9345_v42  ;;  %vm2570_vm1 = vcmp.lt.s32.totalorder %v8262_v41, %v9345_v42  ;;  %v9793_v20 = vadd.s32 32, %v16327_v30  ;;  %v9829_v36 = vadd.s32 128, %v16327_v30 }
 0x500   : > { %16158 = vst [vmem:[#allocation474_spill] sm:$0xff] %v9332_v39  ;;  %v9796_v39 = vadd.s32 40, %v16327_v30  ;;  %v9832_v10 = vadd.s32 136, %v16327_v30  ;;  %v9835_v58 = vadd.s32 144, %v16327_v30  ;;  %v9838_v23 = vadd.s32 152, %v16327_v30 }
 0x501   : > { %16160 = vst [vmem:[#allocation475_spill] sm:$0xff] %v9337_v35  ;;  %v9799_v35 = vadd.s32 48, %v16327_v30  ;;  %v9841_v34 = vadd.s32 160, %v16327_v30  ;;  %v9844_v17 = vadd.s32 168, %v16327_v30  ;;  %v9847_v12 = vadd.s32 176, %v16327_v30 }
 0x502   : > { %16162 = vst [vmem:[#allocation476_spill] sm:$0xff] %v9342_v59  ;;  %v9802_v59 = vadd.s32 56, %v16327_v30  ;;  %v9850_v27 = vadd.s32 184, %v16327_v30  ;;  %v9853_v51 = vadd.s32 192, %v16327_v30  ;;  %v9856_v21 = vadd.s32 200, %v16327_v30 }
 0x503   : > { %v9859_v50 = vadd.s32 208, %v16327_v30  ;;  %v9862_v32 = vadd.s32 216, %v16327_v30  ;;  %v9865_v45 = vadd.s32 224, %v16327_v30  ;;  %v9868_v29 = vadd.s32 232, %v16327_v30 }
 0x504   : > { %v9871_v14 = vadd.s32 240, %v16327_v30  ;;  %v9874_v33 = vadd.s32 248, %v16327_v30  ;;  %v9877_v28 = vadd.s32 256, %v16327_v30  ;;  %v9880_v5 = vadd.s32 264, %v16327_v30 }
 0x505   : > { %v9883_v49 = vadd.s32 272, %v16327_v30  ;;  %v9886_v57 = vadd.s32 280, %v16327_v30  ;;  %v9889_v15 = vadd.s32 288, %v16327_v30  ;;  %v2018_v9 = vmul.u32 128, %v16327_v30 }
 0x506   : > { %v2019_v16 = vmul.u32 128, %v9784_v38  ;;  %v2020_v37 = vmul.u32 128, %v9787_v47  ;;  %v2021_v2 = vmul.u32 128, %v9790_v61  ;;  %v2022_v52 = vmul.u32 128, %v9793_v20 }
 0x507   : > { %v2023_v11 = vmul.u32 128, %v9796_v39  ;;  %v2024_v44 = vmul.u32 128, %v9799_v35  ;;  %v2025_v48 = vmul.u32 128, %v9802_v59  ;;  %v2026_v25 = vmul.u32 128, %v9805_v60 }
 0x508   : > { %v2027_v31 = vmul.u32 128, %v9808_v3  ;;  %v2028_v30 = vmul.u32 128, %v9811_v55  ;;  %v2029_v38 = vmul.u32 128, %v9814_v62  ;;  %v2030_v47 = vmul.u32 128, %v9817_v7 }
 0x509   : > { %v2031_v61 = vmul.u32 128, %v9820_v4  ;;  %v2032_v20 = vmul.u32 128, %v9823_v19  ;;  %v2033_v39 = vmul.u32 128, %v9826_v63  ;;  %v2034_v35 = vmul.u32 128, %v9829_v36 }
 0x50a   : > { %v2035_v59 = vmul.u32 128, %v9832_v10  ;;  %v2036_v60 = vmul.u32 128, %v9835_v58  ;;  %v2037_v3 = vmul.u32 128, %v9838_v23  ;;  %v2038_v55 = vmul.u32 128, %v9841_v34 }
 0x50b   : > { %v2039_v62 = vmul.u32 128, %v9844_v17  ;;  %v2040_v7 = vmul.u32 128, %v9847_v12  ;;  %v2041_v4 = vmul.u32 128, %v9850_v27  ;;  %v2042_v19 = vmul.u32 128, %v9853_v51 }
 0x50c   : > { %v2043_v63 = vmul.u32 128, %v9856_v21  ;;  %v2044_v36 = vmul.u32 128, %v9859_v50  ;;  %v2045_v10 = vmul.u32 128, %v9862_v32  ;;  %v2046_v58 = vmul.u32 128, %v9865_v45 }
 0x50d   : > { %v2047_v23 = vmul.u32 128, %v9868_v29  ;;  %v2048_v34 = vmul.u32 128, %v9871_v14  ;;  %v2049_v17 = vmul.u32 128, %v9874_v33  ;;  %v2050_v12 = vmul.u32 128, %v9877_v28 }
 0x50e   : > { %v2051_v27 = vmul.u32 128, %v9880_v5  ;;  %v2052_v51 = vmul.u32 128, %v9883_v49  ;;  %v2053_v21 = vmul.u32 128, %v9886_v57  ;;  %v2054_v50 = vmul.u32 128, %v9889_v15 }
 0x50f   : > { %v9929_v32 = vadd.s32 %v2018_v9, %v15565_v26  ;;  %v9932_v45 = vadd.s32 %v2019_v16, %v15565_v26  ;;  %v9935_v14 = vadd.s32 %v2020_v37, %v15565_v26  ;;  %v9938_v33 = vadd.s32 %v2021_v2, %v15565_v26 }
 0x510   : > { %v9941_v5 = vadd.s32 %v2022_v52, %v15565_v26  ;;  %v9944_v49 = vadd.s32 %v2023_v11, %v15565_v26  ;;  %v9947_v15 = vadd.s32 %v2024_v44, %v15565_v26  ;;  %v9950_v9 = vadd.s32 %v2025_v48, %v15565_v26 }
 0x511   : > { %16328 = vst [vmem:[#allocation264_spill] sm:$0xff] %v9929_v32  ;;  %v9953_v16 = vadd.s32 %v2026_v25, %v15565_v26  ;;  %v9956_v37 = vadd.s32 %v2027_v31, %v15565_v26  ;;  %v9959_v2 = vadd.s32 %v2028_v30, %v15565_v26  ;;  %v9962_v52 = vadd.s32 %v2029_v38, %v15565_v26 }
 0x512   : > { %16329 = vst [vmem:[#allocation477_spill] sm:$0xff] %v9932_v45  ;;  %v9965_v11 = vadd.s32 %v2030_v47, %v15565_v26  ;;  %v9968_v44 = vadd.s32 %v2031_v61, %v15565_v26  ;;  %v9971_v48 = vadd.s32 %v2032_v20, %v15565_v26  ;;  %v9974_v25 = vadd.s32 %v2033_v39, %v15565_v26 }
 0x513   : > { %16330 = vst [vmem:[#allocation478_spill] sm:$0xff] %v9935_v14  ;;  %v9977_v31 = vadd.s32 %v2034_v35, %v15565_v26  ;;  %v9980_v57 = vadd.s32 %v2035_v59, %v15565_v26  ;;  %v9983_v28 = vadd.s32 %v2036_v60, %v15565_v26  ;;  %v9986_v29 = vadd.s32 %v2037_v3, %v15565_v26 }
 0x514   : > { %16331 = vst [vmem:[#allocation479_spill] sm:$0xff] %v9938_v33  ;;  %v9989_v30 = vadd.s32 %v2038_v55, %v15565_v26  ;;  %v9992_v38 = vadd.s32 %v2039_v62, %v15565_v26  ;;  %vm14355_vm14 = vcmp.lt.s32.totalorder %v9929_v32, %v9345_v42  ;;  %vm14354_vm13 = vcmp.lt.s32.totalorder %v9932_v45, %v9345_v42  ;;  %v16336_v62 = vld [vmem:[#allocation6_spill] sm:$0xff] }
 0x515   : > { %16332 = vst [vmem:[#allocation480_spill] sm:$0xff] %v9941_v5  ;;  %v9999_v47 = vadd.s32 %v2040_v7, %v15565_v26  ;;  %v10002_v61 = vadd.s32 %v2041_v4, %v15565_v26  ;;  %v10005_v20 = vadd.s32 %v2042_v19, %v15565_v26  ;;  %v10008_v39 = vadd.s32 %v2043_v63, %v15565_v26  ;;  %v16337_v4 = vld [vmem:[#allocation7_spill] sm:$0xff]  ;;  %v16342_v32 = vld [vmem:[#allocation14_spill] sm:$0xff] }
 0x516   : > { %16333 = vst [vmem:[#allocation481_spill] sm:$0xff] %v9944_v49  ;;  %v10011_v35 = vadd.s32 %v2044_v36, %v15565_v26  ;;  %v10014_v59 = vadd.s32 %v2045_v10, %v15565_v26  ;;  %v10017_v60 = vadd.s32 %v2046_v58, %v15565_v26  ;;  %vm14358_vm12 = vcmp.lt.s32.totalorder %v9935_v14, %v9345_v42 }
 0x517   : > { %16334 = vst [vmem:[#allocation482_spill] sm:$0xff] %v9947_v15  ;;  %v10022_v3 = vadd.s32 %v2047_v23, %v15565_v26  ;;  %v10025_v55 = vadd.s32 %v2048_v34, %v15565_v26  ;;  %v2787_v7 = vsel %vm14355_vm14, %v16336_v62, 0.0  ;;  %v2788_v19 = vsel %vm14354_vm13, %v16337_v4, 0.0  ;;  %v16338_v34 = vld [vmem:[#allocation8_spill] sm:$0xff] }
 0x518   : > { %16335 = vst [vmem:[#allocation483_spill] sm:$0xff] %v9950_v9  ;;  %v10036_v63 = vadd.s32 %v2049_v17, %v15565_v26  ;;  %v10039_v36 = vadd.s32 %v2050_v12, %v15565_v26  ;;  %v10042_v10 = vadd.s32 %v2051_v27, %v15565_v26  ;;  %vm14359_vm11 = vcmp.lt.s32.totalorder %v9938_v33, %v9345_v42  ;;  %v16341_v33 = vld [vmem:[#allocation11_spill] sm:$0xff] }
 0x519   : > { %v10047_v58 = vadd.s32 %v2052_v51, %v15565_v26  ;;  %v10050_v23 = vadd.s32 %v2053_v21, %v15565_v26  ;;  %v2789_v17 = vsel %vm14358_vm12, %v16338_v34, 0.0  ;;  %v3044_v45 = vadd.f32 %v2788_v19, %v2787_v7  ;;  %v16339_v51 = vld [vmem:[#allocation9_spill] sm:$0xff] }
 0x51a   : > { %v10057_v12 = vadd.s32 %v2054_v50, %v15565_v26  ;;  %vm14373_vm13 = vcmp.lt.s32.totalorder %v9941_v5, %v9345_v42  ;;  %v3308_v27 = vmul.f32 %v2787_v7, %v2787_v7  ;;  %v3309_v4 = vmul.f32 %v2788_v19, %v2788_v19  ;;  %v16340_v50 = vld [vmem:[#allocation10_spill] sm:$0xff] }
 0x51b   : > { %vm14368_vm14 = vcmp.lt.s32.totalorder %v9944_v49, %v9345_v42  ;;  %vm14378_vm10 = vcmp.lt.s32.totalorder %v9947_v15, %v9345_v42  ;;  %v2790_v21 = vsel %vm14359_vm11, %v16339_v51, 0.0  ;;  %v3045_v14 = vadd.f32 %v3044_v45, %v2789_v17 }
 0x51c   : > { %vm14381_vm12 = vcmp.lt.s32.totalorder %v9950_v9, %v9345_v42  ;;  %vm2539_vm9 = vcmp.lt.s32.totalorder %v9953_v16, %v9345_v42  ;;  %vm2540_vm15 = vcmp.lt.s32.totalorder %v9956_v37, %v9345_v42  ;;  %v3310_v26 = vmul.f32 %v2789_v17, %v2789_v17 }
 0x51d   : > { %vm2541_vm8 = vcmp.lt.s32.totalorder %v9959_v2, %v9345_v42  ;;  %vm2542_vm7 = vcmp.lt.s32.totalorder %v9962_v52, %v9345_v42  ;;  %v2791_v45 = vsel %vm14373_vm13, %v16340_v50, 0.0  ;;  %v3046_v7 = vadd.f32 %v3045_v14, %v2790_v21  ;;  %v16343_v14 = vld [vmem:[#allocation15_spill] sm:$0xff] }
 0x51e   : > { %vm2543_vm11 = vcmp.lt.s32.totalorder %v9965_v11, %v9345_v42  ;;  %vm2544_vm6 = vcmp.lt.s32.totalorder %v9968_v44, %v9345_v42  ;;  %v3311_v19 = vmul.f32 %v2790_v21, %v2790_v21  ;;  %v3564_v17 = vadd.f32 %v3309_v4, %v3308_v27  ;;  %v16344_v4 = vld [vmem:[#allocation16_spill] sm:$0xff] }
 0x51f   : > { %v2792_v51 = vsel %vm14368_vm14, %v16341_v33, 0.0  ;;  %v3047_v34 = vadd.f32 %v3046_v7, %v2791_v45  ;;  %v3836_v5 = vsel %vm2539_vm9, %v16342_v32, inf  ;;  %v3837_v50 = vsel %vm2540_vm15, %v16343_v14, inf  ;;  %v16345_v7 = vld [vmem:[#allocation12_spill] sm:$0xff] }
 0x520   : > { %v3312_v62 = vmul.f32 %v2791_v45, %v2791_v45  ;;  %v3565_v53 = vadd.f32 %v3564_v17, %v3310_v26  ;;  %v4088_v21 = vmin.f32 %v3837_v50, %v3836_v5  ;;  %v3838_v27 = vsel %vm2541_vm8, %v16344_v4, inf  ;;  %v16347_v17 = vld [vmem:[#allocation13_spill] sm:$0xff] }
 0x521   : > { %vm2545_vm14 = vcmp.lt.s32.totalorder %v9971_v48, %v9345_v42  ;;  %v2793_v49 = vsel %vm14378_vm10, %v16345_v7, 0.0  ;;  %v3048_v33 = vadd.f32 %v3047_v34, %v2792_v51  ;;  %v3839_v26 = vsel %vm2542_vm7, %v16346_v43, inf  ;;  %v16348_v7 = vld [vmem:[#allocation18_spill] sm:$0xff] }
 0x522   : > { %vm2546_vm13 = vcmp.lt.s32.totalorder %v9974_v25, %v9345_v42  ;;  %v3313_v5 = vmul.f32 %v2792_v51, %v2792_v51  ;;  %v3566_v50 = vadd.f32 %v3565_v53, %v3311_v19  ;;  %v4089_v45 = vmin.f32 %v3838_v27, %v4088_v21  ;;  %v16349_v27 = vld [vmem:[#allocation19_spill] sm:$0xff] }
 0x523   : > { %vm2547_vm5 = vcmp.lt.s32.totalorder %v9977_v31, %v9345_v42  ;;  %v2794_v15 = vsel %vm14381_vm12, %v16347_v17, 0.0  ;;  %v3049_v34 = vadd.f32 %v3048_v33, %v2793_v49  ;;  %v3840_v6 = vsel %vm2543_vm11, %v16348_v7, inf }
 0x524   : > { %vm2548_vm10 = vcmp.lt.s32.totalorder %v9980_v57, %v9345_v42  ;;  %v3314_v51 = vmul.f32 %v2793_v49, %v2793_v49  ;;  %v3567_v53 = vadd.f32 %v3566_v50, %v3312_v62  ;;  %v4090_v19 = vmin.f32 %v3839_v26, %v4089_v45 }
 0x525   : > { %vm2549_vm4 = vcmp.lt.s32.totalorder %v9983_v28, %v9345_v42  ;;  %v2795_v21 = vsel %vm2539_vm9, %v16342_v32, 0.0  ;;  %v3050_v33 = vadd.f32 %v3049_v34, %v2794_v15  ;;  %v3841_v9 = vsel %vm2544_vm6, %v16349_v27, inf }
 0x526   : > { %vm2550_vm12 = vcmp.lt.s32.totalorder %v9986_v29, %v9345_v42  ;;  %v2796_v49 = vsel %vm2540_vm15, %v16343_v14, 0.0  ;;  %v3315_v62 = vmul.f32 %v2794_v15, %v2794_v15  ;;  %v3568_v26 = vadd.f32 %v3567_v53, %v3313_v5 }
 0x527   : > { %v4091_v50 = vmin.f32 %v3840_v6, %v4090_v19  ;;  %v2797_v45 = vsel %vm2541_vm8, %v16344_v4, 0.0  ;;  %v2798_v34 = vsel %vm2542_vm7, %v16346_v43, 0.0  ;;  %v3051_v17 = vadd.f32 %v3050_v33, %v2795_v21 }
 0x528   : > { %v3842_v22 = vsel %vm2545_vm14, %v16350_v1, inf  ;;  %vm2551_vm3 = vcmp.lt.s32.totalorder %v9989_v30, %v9345_v42  ;;  %v3316_v6 = vmul.f32 %v2795_v21, %v2795_v21  ;;  %v3569_v15 = vadd.f32 %v3568_v26, %v3314_v51 }
 0x529   : > { %v4092_v5 = vmin.f32 %v3841_v9, %v4091_v50  ;;  %v4356_v53 = vsel %vm2539_vm9, %v16342_v32, -inf  ;;  %v3052_v19 = vadd.f32 %v3051_v17, %v2796_v49  ;;  %v3317_v18 = vmul.f32 %v2796_v49, %v2796_v49  ;;  %v16352_v49 = vld [vmem:[#allocation22_spill] sm:$0xff]  ;;  %v16353_v50 = vld [vmem:[#allocation23_spill] sm:$0xff] }
 0x52a   : > { %v3843_v33 = vsel %vm2546_vm13, %v16351_v8, inf  ;;  %v4357_v56 = vsel %vm2540_vm15, %v16343_v14, -inf  ;;  %vm2552_vm2 = vcmp.lt.s32.totalorder %v9992_v38, %v9345_v42  ;;  %v3570_v9 = vadd.f32 %v3569_v15, %v3315_v62 }
 0x52b   : > { %v4093_v51 = vmin.f32 %v3842_v22, %v4092_v5  ;;  %v4608_v21 = vmax.f32 %v4357_v56, %v4356_v53  ;;  %v4358_v32 = vsel %vm2541_vm8, %v16344_v4, -inf  ;;  %v2799_v16 = vsel %vm2543_vm11, %v16348_v7, 0.0 }
 0x52c   : > { %v3053_v17 = vadd.f32 %v3052_v19, %v2797_v45  ;;  %v3844_v37 = vsel %vm2547_vm5, %v16352_v49, inf  ;;  %v4359_v56 = vsel %vm2542_vm7, %v16346_v43, -inf  ;;  %vm2553_vm9 = vcmp.lt.s32.totalorder %v9999_v47, %v9345_v42 }
 0x52d   : > { %v3318_v22 = vmul.f32 %v2797_v45, %v2797_v45  ;;  %v3571_v2 = vadd.f32 %v3570_v9, %v3316_v6  ;;  %v4094_v14 = vmin.f32 %v3843_v33, %v4093_v51  ;;  %v4609_v4 = vmax.f32 %v4358_v32, %v4608_v21  ;;  %v16354_v33 = vld [vmem:[#allocation24_spill] sm:$0xff] }
 0x52e   : > { %v2800_v62 = vsel %vm2544_vm6, %v16349_v27, 0.0  ;;  %v3054_v26 = vadd.f32 %v3053_v17, %v2798_v34  ;;  %v3845_v15 = vsel %vm2548_vm10, %v16353_v50, inf  ;;  %v4360_v43 = vsel %vm2543_vm11, %v16348_v7, -inf  ;;  %v16355_v17 = vld [vmem:[#allocation25_spill] sm:$0xff] }
 0x52f   : > { %vm2554_vm7 = vcmp.lt.s32.totalorder %v10002_v61, %v9345_v42  ;;  %v3319_v52 = vmul.f32 %v2798_v34, %v2798_v34  ;;  %v3572_v45 = vadd.f32 %v3571_v2, %v3317_v18  ;;  %v4095_v6 = vmin.f32 %v3844_v37, %v4094_v14 }
 0x530   : > { %v4610_v5 = vmax.f32 %v4359_v56, %v4609_v4  ;;  %v2801_v53 = vsel %vm2545_vm14, %v16350_v1, 0.0  ;;  %v3055_v19 = vadd.f32 %v3054_v26, %v2799_v16  ;;  %v3846_v9 = vsel %vm2549_vm4, %v16354_v33, inf  ;;  %v16356_v4 = vld [vmem:[#allocation26_spill] sm:$0xff] }
 0x531   : > { %v4361_v11 = vsel %vm2544_vm6, %v16349_v27, -inf  ;;  %vm2555_vm8 = vcmp.lt.s32.totalorder %v10005_v20, %v9345_v42  ;;  %v3320_v18 = vmul.f32 %v2799_v16, %v2799_v16  ;;  %v3573_v7 = vadd.f32 %v3572_v45, %v3318_v22 }
 0x532   : > { %v4096_v34 = vmin.f32 %v3845_v15, %v4095_v6  ;;  %v4611_v51 = vmax.f32 %v4360_v43, %v4610_v5  ;;  %v2802_v21 = vsel %vm2546_vm13, %v16351_v8, 0.0  ;;  %v3056_v32 = vadd.f32 %v3055_v19, %v2800_v62  ;;  %v16357_v6 = vld [vmem:[#allocation27_spill] sm:$0xff] }
 0x533   : > { %v3847_v37 = vsel %vm2550_vm12, %v16355_v17, inf  ;;  %v4362_v44 = vsel %vm2545_vm14, %v16350_v1, -inf  ;;  %vm2556_vm6 = vcmp.lt.s32.totalorder %v10008_v39, %v9345_v42  ;;  %v3321_v27 = vmul.f32 %v2800_v62, %v2800_v62 }
 0x534   : > { %v3574_v16 = vadd.f32 %v3573_v7, %v3319_v52  ;;  %v4097_v56 = vmin.f32 %v3846_v9, %v4096_v34  ;;  %v4612_v22 = vmax.f32 %v4361_v11, %v4611_v51  ;;  %v2803_v2 = vsel %vm2547_vm5, %v16352_v49, 0.0  ;;  %v16358_v7 = vld [vmem:[#allocation28_spill] sm:$0xff] }
 0x535   : > { %v3057_v14 = vadd.f32 %v3056_v32, %v2801_v53  ;;  %v3848_v26 = vsel %vm2551_vm3, %v16356_v4, inf  ;;  %v4363_v1 = vsel %vm2546_vm13, %v16351_v8, -inf  ;;  %vm2557_vm11 = vcmp.lt.s32.totalorder %v10011_v35, %v9345_v42 }
 0x536   : > { %v3322_v48 = vmul.f32 %v2801_v53, %v2801_v53  ;;  %v3575_v62 = vadd.f32 %v3574_v16, %v3320_v18  ;;  %v4098_v15 = vmin.f32 %v3847_v37, %v4097_v56  ;;  %v4613_v43 = vmax.f32 %v4362_v44, %v4612_v22 }
 0x537   : > { %v2804_v52 = vsel %vm2548_vm10, %v16353_v50, 0.0  ;;  %v3058_v45 = vadd.f32 %v3057_v14, %v2802_v21  ;;  %v3849_v5 = vsel %vm2552_vm2, %v16357_v6, inf  ;;  %v4364_v8 = vsel %vm2547_vm5, %v16352_v49, -inf }
 0x538   : > { %vm2558_vm13 = vcmp.lt.s32.totalorder %v10014_v59, %v9345_v42  ;;  %v3323_v25 = vmul.f32 %v2802_v21, %v2802_v21  ;;  %v3576_v53 = vadd.f32 %v3575_v62, %v3321_v27  ;;  %v4099_v19 = vmin.f32 %v3848_v26, %v4098_v15  ;;  %v16359_v27 = vld [vmem:[#allocation29_spill] sm:$0xff] }
 0x539   : > { %v4614_v9 = vmax.f32 %v4363_v1, %v4613_v43  ;;  %v2805_v11 = vsel %vm2549_vm4, %v16354_v33, 0.0  ;;  %v3059_v18 = vadd.f32 %v3058_v45, %v2803_v2  ;;  %v3850_v34 = vsel %vm2553_vm9, %v16358_v7, inf  ;;  %v16360_v1 = vld [vmem:[#allocation30_spill] sm:$0xff] }
 0x53a   : > { %v4365_v31 = vsel %vm2548_vm10, %v16353_v50, -inf  ;;  %vm2559_vm5 = vcmp.lt.s32.totalorder %v10017_v60, %v9345_v42  ;;  %v3324_v49 = vmul.f32 %v2803_v2, %v2803_v2  ;;  %v3577_v51 = vadd.f32 %v3576_v53, %v3322_v48 }
 0x53b   : > { %v4100_v21 = vmin.f32 %v3849_v5, %v4099_v19  ;;  %v4615_v32 = vmax.f32 %v4364_v8, %v4614_v9  ;;  %v2806_v37 = vsel %vm2550_vm12, %v16355_v17, 0.0  ;;  %v3060_v44 = vadd.f32 %v3059_v18, %v2804_v52  ;;  %v16361_v5 = vld [vmem:[#allocation31_spill] sm:$0xff]  ;;  %v16362_v18 = vld [vmem:[#allocation32_spill] sm:$0xff] }
 0x53c   : > { %v3851_v16 = vsel %vm2554_vm7, %v16359_v27, inf  ;;  %v4366_v57 = vsel %vm2549_vm4, %v16354_v33, -inf  ;;  %vm2560_vm10 = vcmp.lt.s32.totalorder %v10022_v3, %v9345_v42  ;;  %v3325_v50 = vmul.f32 %v2804_v52, %v2804_v52 }
 0x53d   : > { %v3578_v56 = vadd.f32 %v3577_v51, %v3323_v25  ;;  %v4101_v22 = vmin.f32 %v3850_v34, %v4100_v21  ;;  %v4616_v2 = vmax.f32 %v4365_v31, %v4615_v32  ;;  %v2807_v14 = vsel %vm2551_vm3, %v16356_v4, 0.0 }
 0x53e   : > { %v3061_v26 = vadd.f32 %v3060_v44, %v2805_v11  ;;  %v3852_v48 = vsel %vm2555_vm8, %v16360_v1, inf  ;;  %v4367_v28 = vsel %vm2550_vm12, %v16355_v17, -inf  ;;  %vm2561_vm4 = vcmp.lt.s32.totalorder %v10025_v55, %v9345_v42 }
 0x53f   : > { %v3326_v33 = vmul.f32 %v2805_v11, %v2805_v11  ;;  %v3579_v62 = vadd.f32 %v3578_v56, %v3324_v49  ;;  %v4102_v15 = vmin.f32 %v3851_v16, %v4101_v22  ;;  %v4617_v43 = vmax.f32 %v4366_v57, %v4616_v2  ;;  %v16364_v2 = vld [vmem:[#allocation34_spill] sm:$0xff] }
 0x540   : > { %v2808_v52 = vsel %vm2552_vm2, %v16357_v6, 0.0  ;;  %v3062_v45 = vadd.f32 %v3061_v26, %v2806_v37  ;;  %v3853_v8 = vsel %vm2556_vm6, %v16361_v5, inf  ;;  %v4368_v29 = vsel %vm2551_vm3, %v16356_v4, -inf }
 0x541   : > { %vm2562_vm12 = vcmp.lt.s32.totalorder %v10036_v63, %v9345_v42  ;;  %v3327_v17 = vmul.f32 %v2806_v37, %v2806_v37  ;;  %v3580_v25 = vadd.f32 %v3579_v62, %v3325_v50  ;;  %v4103_v53 = vmin.f32 %v3852_v48, %v4102_v15  ;;  %v16363_v37 = vld [vmem:[#allocation33_spill] sm:$0xff]  ;;  %v16365_v15 = vld [vmem:[#allocation35_spill] sm:$0xff] }
 0x542   : > { %v4618_v19 = vmax.f32 %v4367_v28, %v4617_v43  ;;  %v2809_v9 = vsel %vm2553_vm9, %v16358_v7, 0.0  ;;  %v3063_v11 = vadd.f32 %v3062_v45, %v2807_v14  ;;  %v3854_v34 = vsel %vm2557_vm11, %v16362_v18, inf }
 0x543   : > { %v4369_v30 = vsel %vm2552_vm2, %v16357_v6, -inf  ;;  %vm2563_vm3 = vcmp.lt.s32.totalorder %v10039_v36, %v9345_v42  ;;  %v3328_v4 = vmul.f32 %v2807_v14, %v2807_v14  ;;  %v3581_v31 = vadd.f32 %v3580_v25, %v3326_v33  ;;  %v16366_v25 = vld [vmem:[#allocation36_spill] sm:$0xff] }
 0x544   : > { %v4104_v49 = vmin.f32 %v3853_v8, %v4103_v53  ;;  %v4619_v51 = vmax.f32 %v4368_v29, %v4618_v19  ;;  %v2810_v21 = vsel %vm2554_vm7, %v16359_v27, 0.0  ;;  %v3064_v32 = vadd.f32 %v3063_v11, %v2808_v52 }
 0x545   : > { %v3855_v44 = vsel %vm2558_vm13, %v16363_v37, inf  ;;  %v4370_v38 = vsel %vm2553_vm9, %v16358_v7, -inf  ;;  %vm2564_vm2 = vcmp.lt.s32.totalorder %v10042_v10, %v9345_v42  ;;  %v3329_v6 = vmul.f32 %v2808_v52, %v2808_v52 }
 0x546   : > { %v3582_v16 = vadd.f32 %v3581_v31, %v3327_v17  ;;  %v4105_v57 = vmin.f32 %v3854_v34, %v4104_v49  ;;  %v4620_v50 = vmax.f32 %v4369_v30, %v4619_v51  ;;  %v2811_v56 = vsel %vm2555_vm8, %v16360_v1, 0.0 }
 0x547   : > { %v3065_v22 = vadd.f32 %v3064_v32, %v2809_v9  ;;  %v3856_v14 = vsel %vm2559_vm5, %v16364_v2, inf  ;;  %v4371_v47 = vsel %vm2554_vm7, %v16359_v27, -inf  ;;  %vm2565_vm14 = vcmp.lt.s32.totalorder %v10047_v58, %v9345_v42 }
 0x548   : > { %v3330_v7 = vmul.f32 %v2809_v9, %v2809_v9  ;;  %v3583_v26 = vadd.f32 %v3582_v16, %v3328_v4  ;;  %v4106_v48 = vmin.f32 %v3855_v44, %v4105_v57  ;;  %v4621_v28 = vmax.f32 %v4370_v38, %v4620_v50  ;;  %v16367_v4 = vld [vmem:[#allocation37_spill] sm:$0xff] }
 0x549   : > { %v2812_v33 = vsel %vm2556_vm6, %v16361_v5, 0.0  ;;  %v3066_v62 = vadd.f32 %v3065_v22, %v2810_v21  ;;  %v3857_v43 = vsel %vm2560_vm10, %v16365_v15, inf  ;;  %v4372_v61 = vsel %vm2555_vm8, %v16360_v1, -inf }
 0x54a   : > { %vm2566_vm15 = vcmp.lt.s32.totalorder %v10050_v23, %v9345_v42  ;;  %v3331_v27 = vmul.f32 %v2810_v21, %v2810_v21  ;;  %v3584_v52 = vadd.f32 %v3583_v26, %v3329_v6  ;;  %v4107_v45 = vmin.f32 %v3856_v14, %v4106_v48  ;;  %v16369_v6 = vld [vmem:[#allocation38_spill] sm:$0xff] }
 0x54b   : > { %v4622_v8 = vmax.f32 %v4371_v47, %v4621_v28  ;;  %v2813_v29 = vsel %vm2557_vm11, %v16362_v18, 0.0  ;;  %v3067_v17 = vadd.f32 %v3066_v62, %v2811_v56  ;;  %v3858_v53 = vsel %vm2561_vm4, %v16366_v25, inf  ;;  %v16370_v47 = vld [vmem:[#allocation39_spill] sm:$0xff] }
 0x54c   : > { %v4373_v20 = vsel %vm2556_vm6, %v16361_v5, -inf  ;;  %vm2567_vm9 = vcmp.lt.s32.totalorder %v10057_v12, %v9345_v42  ;;  %v3332_v1 = vmul.f32 %v2811_v56, %v2811_v56  ;;  %v3585_v19 = vadd.f32 %v3584_v52, %v3330_v7  ;;  %v16368_v5 = vld [vmem:[#allocation431_spill] sm:$0xff] }
 0x54d   : > { %v4108_v9 = vmin.f32 %v3857_v43, %v4107_v45  ;;  %v4623_v11 = vmax.f32 %v4372_v61, %v4622_v8  ;;  %v2814_v34 = vsel %vm2558_vm13, %v16363_v37, 0.0  ;;  %v3068_v30 = vadd.f32 %v3067_v17, %v2812_v33  ;;  %v16371_v43 = vld [vmem:[#allocation40_spill] sm:$0xff]  ;;  %v16372_v17 = vld [vmem:[#allocation41_spill] sm:$0xff] }
 0x54e   : > { %v3859_v31 = vsel %vm2562_vm12, %v16367_v4, inf  ;;  %v4374_v39 = vsel %vm2557_vm11, %v16362_v18, -inf  ;;  %vm2568_vm7 = vcmp.lt.s32.totalorder %v16368_v5, %v9345_v42  ;;  %v3333_v49 = vmul.f32 %v2812_v33, %v2812_v33 }
 0x54f   : > { %v3586_v51 = vadd.f32 %v3585_v19, %v3331_v27  ;;  %v4109_v21 = vmin.f32 %v3858_v53, %v4108_v9  ;;  %v4624_v32 = vmax.f32 %v4373_v20, %v4623_v11  ;;  %v2815_v44 = vsel %vm2559_vm5, %v16364_v2, 0.0 }
 0x550   : > { %v3069_v38 = vadd.f32 %v3068_v30, %v2813_v29  ;;  %v3860_v16 = vsel %vm2563_vm3, %v16369_v6, inf  ;;  %v4375_v35 = vsel %vm2558_vm13, %v16363_v37, -inf  ;;  %v3334_v18 = vmul.f32 %v2813_v29, %v2813_v29 }
 0x551   : > { %v3587_v57 = vadd.f32 %v3586_v51, %v3332_v1  ;;  %v4110_v50 = vmin.f32 %v3859_v31, %v4109_v21  ;;  %v4625_v56 = vmax.f32 %v4374_v39, %v4624_v32  ;;  %v2816_v22 = vsel %vm2560_vm10, %v16365_v15, 0.0  ;;  %v16374_v32 = vld [vmem:[#allocation43_spill] sm:$0xff] }
 0x552   : > { %v3070_v14 = vadd.f32 %v3069_v38, %v2814_v34  ;;  %v3861_v7 = vsel %vm2564_vm2, %v16370_v47, inf  ;;  %v4376_v59 = vsel %vm2559_vm5, %v16364_v2, -inf  ;;  %v3335_v37 = vmul.f32 %v2814_v34, %v2814_v34  ;;  %v16373_v34 = vld [vmem:[#allocation42_spill] sm:$0xff] }
 0x553   : > { %v3588_v26 = vadd.f32 %v3587_v57, %v3333_v49  ;;  %v4111_v48 = vmin.f32 %v3860_v16, %v4110_v50  ;;  %v4626_v28 = vmax.f32 %v4375_v35, %v4625_v56  ;;  %v2817_v33 = vsel %vm2561_vm4, %v16366_v25, 0.0  ;;  %v16375_v50 = vld [vmem:[#allocation44_spill] sm:$0xff] }
 0x554   : > { %v3071_v62 = vadd.f32 %v3070_v14, %v2815_v44  ;;  %v3862_v61 = vsel %vm2565_vm14, %v16371_v43, inf  ;;  %v4377_v60 = vsel %vm2560_vm10, %v16365_v15, -inf  ;;  %v3336_v2 = vmul.f32 %v2815_v44, %v2815_v44 }
 0x555   : > { %v3589_v27 = vadd.f32 %v3588_v26, %v3334_v18  ;;  %v4112_v52 = vmin.f32 %v3861_v7, %v4111_v48  ;;  %v4627_v45 = vmax.f32 %v4376_v59, %v4626_v28  ;;  %v2818_v8 = vsel %vm2562_vm12, %v16367_v4, 0.0  ;;  %v16376_v26 = vld [vmem:[#allocation45_spill] sm:$0xff] }
 0x556   : > { %v3072_v29 = vadd.f32 %v3071_v62, %v2816_v22  ;;  %v3863_v53 = vsel %vm2566_vm15, %v16372_v17, inf  ;;  %v4378_v3 = vsel %vm2561_vm4, %v16366_v25, -inf  ;;  %v3337_v15 = vmul.f32 %v2816_v22, %v2816_v22 }
 0x557   : > { %v3590_v20 = vadd.f32 %v3589_v27, %v3335_v37  ;;  %v4113_v1 = vmin.f32 %v3862_v61, %v4112_v52  ;;  %v4628_v19 = vmax.f32 %v4377_v60, %v4627_v45  ;;  %v2819_v9 = vsel %vm2563_vm3, %v16369_v6, 0.0 }
 0x558   : > { %v3073_v11 = vadd.f32 %v3072_v29, %v2817_v33  ;;  %v3864_v30 = vsel %vm2567_vm9, %v16373_v34, inf  ;;  %v4379_v55 = vsel %vm2562_vm12, %v16367_v4, -inf  ;;  %v3338_v25 = vmul.f32 %v2817_v33, %v2817_v33 }
 0x559   : > { %v3591_v31 = vadd.f32 %v3590_v20, %v3336_v2  ;;  %v4114_v39 = vmin.f32 %v3863_v53, %v4113_v1  ;;  %v4629_v49 = vmax.f32 %v4378_v3, %v4628_v19  ;;  %v2820_v51 = vsel %vm2564_vm2, %v16370_v47, 0.0  ;;  %v16377_v2 = vld [vmem:[#allocation46_spill] sm:$0xff]  ;;  %v16379_v3 = vld [vmem:[#allocation47_spill] sm:$0xff] }
 0x55a   : > { %v3074_v21 = vadd.f32 %v3073_v11, %v2818_v8  ;;  %v3865_v44 = vsel %vm2568_vm7, %v16374_v32, inf  ;;  %v4380_v63 = vsel %vm2563_vm3, %v16369_v6, -inf  ;;  %v3339_v4 = vmul.f32 %v2818_v8, %v2818_v8 }
 0x55b   : > { %v3592_v38 = vadd.f32 %v3591_v31, %v3337_v15  ;;  %v4115_v16 = vmin.f32 %v3864_v30, %v4114_v39  ;;  %v4630_v35 = vmax.f32 %v4379_v55, %v4629_v49  ;;  %v2821_v18 = vsel %vm2565_vm14, %v16371_v43, 0.0  ;;  %v16381_v30 = vld [vmem:[#allocation48_spill] sm:$0xff] }
 0x55c   : > { %v3075_v57 = vadd.f32 %v3074_v21, %v2819_v9  ;;  %v3866_v56 = vsel %vm2569_vm0, %v16375_v50, inf  ;;  %v4381_v36 = vsel %vm2564_vm2, %v16370_v47, -inf  ;;  %v3340_v6 = vmul.f32 %v2819_v9, %v2819_v9  ;;  %v16383_v21 = vld [vmem:[#allocation49_spill] sm:$0xff] }
 0x55d   : > { %v3593_v22 = vadd.f32 %v3592_v38, %v3338_v25  ;;  %v4116_v14 = vmin.f32 %v3865_v44, %v4115_v16  ;;  %v4631_v7 = vmax.f32 %v4380_v63, %v4630_v35  ;;  %v2822_v59 = vsel %vm2566_vm15, %v16372_v17, 0.0 }
 0x55e   : > { %v3076_v37 = vadd.f32 %v3075_v57, %v2820_v51  ;;  %v3867_v48 = vsel %vm2570_vm1, %v16376_v26, inf  ;;  %v4382_v10 = vsel %vm2565_vm14, %v16371_v43, -inf  ;;  %v3341_v47 = vmul.f32 %v2820_v51, %v2820_v51 }
 0x55f   : > { %v3594_v28 = vadd.f32 %v3593_v22, %v3339_v4  ;;  %v4117_v33 = vmin.f32 %v3866_v56, %v4116_v14  ;;  %v4632_v62 = vmax.f32 %v4381_v36, %v4631_v7  ;;  %v2823_v61 = vsel %vm2567_vm9, %v16373_v34, 0.0  ;;  %v16389_v7 = vld [vmem:[#allocation51_spill] sm:$0xff] }
 0x560   : > { %v3077_v60 = vadd.f32 %v3076_v37, %v2821_v18  ;;  %vm16378_vm8 = vcmp.lt.s32.totalorder %v8267_v13, %v9345_v42  ;;  %v4383_v58 = vsel %vm2566_vm15, %v16372_v17, -inf  ;;  %v3342_v43 = vmul.f32 %v2821_v18, %v2821_v18  ;;  %v16386_v18 = vld [vmem:[#allocation50_spill] sm:$0xff] }
 0x561   : > { %v3868_v27 = vsel %vm16378_vm8, %v16377_v2, inf  ;;  %v3595_v52 = vadd.f32 %v3594_v28, %v3340_v6  ;;  %v4118_v45 = vmin.f32 %v3867_v48, %v4117_v33  ;;  %v4633_v8 = vmax.f32 %v4382_v10, %v4632_v62  ;;  %vm16385_vm5 = vmmov %vm16378_vm8  ;;  %v16394_v62 = vld [vmem:[#allocation52_spill] sm:$0xff] }
 0x562   : > { %v2824_v29 = vsel %vm2568_vm7, %v16374_v32, 0.0  ;;  %v3078_v53 = vadd.f32 %v3077_v60, %v2822_v59  ;;  %vm16380_vm6 = vcmp.lt.s32.totalorder %v8272_v40, %v9345_v42  ;;  %v4384_v23 = vsel %vm2567_vm9, %v16373_v34, -inf  ;;  %vm16392_vm12 = vmmov %vm16385_vm5 }
 0x563   : > { %v3869_v15 = vsel %vm16380_vm6, %v16379_v3, inf  ;;  %v3343_v17 = vmul.f32 %v2822_v59, %v2822_v59  ;;  %v3596_v20 = vadd.f32 %v3595_v52, %v3341_v47  ;;  %v4119_v1 = vmin.f32 %v3868_v27, %v4118_v45  ;;  %v16390_v59 = vld [vmem:[#allocation433_spill] sm:$0xff] }
 0x564   : > { %v4634_v19 = vmax.f32 %v4383_v58, %v4633_v8  ;;  %v2825_v9 = vsel %vm2569_vm0, %v16375_v50, 0.0  ;;  %v3079_v11 = vadd.f32 %v3078_v53, %v2823_v61  ;;  %vm16382_vm11 = vcmp.lt.s32.totalorder %v8277_v24, %v9345_v42  ;;  %v16399_v8 = vld [vmem:[#allocation53_spill] sm:$0xff] }
 0x565   : > { %v3870_v55 = vsel %vm16382_vm11, %v16381_v30, inf  ;;  %v4385_v12 = vsel %vm2568_vm7, %v16374_v32, -inf  ;;  %v3344_v34 = vmul.f32 %v2823_v61, %v2823_v61  ;;  %v3597_v25 = vadd.f32 %v3596_v20, %v3342_v43  ;;  %v16395_v61 = vld [vmem:[#allocation434_spill] sm:$0xff] }
 0x566   : > { %v4120_v31 = vmin.f32 %v3869_v15, %v4119_v1  ;;  %v4635_v39 = vmax.f32 %v4384_v23, %v4634_v19  ;;  %v2826_v49 = vsel %vm2570_vm1, %v16376_v26, 0.0  ;;  %v3080_v51 = vadd.f32 %v3079_v11, %v2824_v29  ;;  %v16404_v19 = vld [vmem:[#allocation54_spill] sm:$0xff] }
 0x567   : > { %vm16384_vm13 = vcmp.lt.s32.totalorder %v8282_v0, %v9345_v42  ;;  %v4386_v5 = vsel %vm2569_vm0, %v16375_v50, -inf  ;;  %v3345_v32 = vmul.f32 %v2824_v29, %v2824_v29  ;;  %v3598_v63 = vadd.f32 %v3597_v25, %v3343_v17  ;;  %vm16388_vm0 = vmmov %vm16380_vm6  ;;  %v16400_v29 = vld [vmem:[#allocation435_spill] sm:$0xff] }
 0x568   : > { %v3871_v44 = vsel %vm16384_vm13, %v16383_v21, inf  ;;  %v4121_v4 = vmin.f32 %v3870_v55, %v4120_v31  ;;  %v4636_v38 = vmax.f32 %v4385_v12, %v4635_v39  ;;  %v2827_v16 = vsel %vm16385_vm5, %v16377_v2, 0.0  ;;  %vm16397_vm2 = vmmov %vm16388_vm0  ;;  %v16409_v39 = vld [vmem:[#allocation55_spill] sm:$0xff] }
 0x569   : > { %v3081_v35 = vadd.f32 %v3080_v51, %v2825_v9  ;;  %vm16387_vm10 = vcmp.lt.s32.totalorder %v8287_v54, %v9345_v42  ;;  %v4387_v46 = vsel %vm2570_vm1, %v16376_v26, -inf  ;;  %v3346_v50 = vmul.f32 %v2825_v9, %v2825_v9  ;;  %vm16393_vm1 = vmmov %vm16382_vm11  ;;  %v16405_v9 = vld [vmem:[#allocation436_spill] sm:$0xff] }
 0x56a   : > { %v3872_v57 = vsel %vm16387_vm10, %v16386_v18, inf  ;;  %v3599_v56 = vadd.f32 %v3598_v63, %v3344_v34  ;;  %v4122_v36 = vmin.f32 %v3871_v44, %v4121_v4  ;;  %v4637_v6 = vmax.f32 %v4386_v5, %v4636_v38  ;;  %vm16398_vm14 = vmmov %vm16384_vm13  ;;  %v16414_v38 = vld [vmem:[#allocation56_spill] sm:$0xff] }
 0x56b   : > { %v2828_v22 = vsel %vm16388_vm0, %v16379_v3, 0.0  ;;  %v3082_v14 = vadd.f32 %v3081_v35, %v2826_v49  ;;  %vm16391_vm4 = vcmp.lt.s32.totalorder %v16390_v59, %v9345_v42  ;;  %v4388_v41 = vsel %vm16392_vm12, %v16377_v2, -inf  ;;  %vm16402_vm9 = vmmov %vm16393_vm1 }
 0x56c   : > { %v3873_v37 = vsel %vm16391_vm4, %v16389_v7, inf  ;;  %v3347_v26 = vmul.f32 %v2826_v49, %v2826_v49  ;;  %v3600_v48 = vadd.f32 %v3599_v56, %v3345_v32  ;;  %v4123_v10 = vmin.f32 %v3872_v57, %v4122_v36  ;;  %vm16403_vm7 = vmmov %vm16387_vm10  ;;  %v16410_v49 = vld [vmem:[#allocation437_spill] sm:$0xff] }
 0x56d   : > { %v4638_v47 = vmax.f32 %v4387_v46, %v4637_v6  ;;  %v2829_v28 = vsel %vm16393_vm1, %v16381_v30, 0.0  ;;  %v3083_v33 = vadd.f32 %v3082_v14, %v2827_v16  ;;  %vm16396_vm3 = vcmp.lt.s32.totalorder %v16395_v61, %v9345_v42  ;;  %vm16407_vm6 = vmmov %vm16384_vm13  ;;  %v16418_v6 = vld [vmem:[#allocation57_spill] sm:$0xff] }
 0x56e   : > { %v3874_v60 = vsel %vm16396_vm3, %v16394_v62, inf  ;;  %v4389_v13 = vsel %vm16397_vm2, %v16379_v3, -inf  ;;  %v3348_v2 = vmul.f32 %v2827_v16, %v2827_v16  ;;  %v3601_v27 = vadd.f32 %v3600_v48, %v3346_v50  ;;  %vm16408_vm11 = vmmov %vm16391_vm4  ;;  %v16415_v16 = vld [vmem:[#allocation438_spill] sm:$0xff] }
 0x56f   : > { %v4124_v58 = vmin.f32 %v3873_v37, %v4123_v10  ;;  %v4639_v43 = vmax.f32 %v4388_v41, %v4638_v47  ;;  %v2830_v52 = vsel %vm16398_vm14, %v16383_v21, 0.0  ;;  %v3084_v45 = vadd.f32 %v3083_v33, %v2828_v22  ;;  %vm16412_vm5 = vmmov %vm16403_vm7  ;;  %v16422_v47 = vld [vmem:[#allocation58_spill] sm:$0xff] }
 0x570   : > { %vm16401_vm15 = vcmp.lt.s32.totalorder %v16400_v29, %v9345_v42  ;;  %v4390_v40 = vsel %vm16402_vm9, %v16381_v30, -inf  ;;  %v3349_v3 = vmul.f32 %v2828_v22, %v2828_v22  ;;  %v3602_v15 = vadd.f32 %v3601_v27, %v3347_v26  ;;  %vm16413_vm10 = vmmov %vm16396_vm3  ;;  %v16419_v22 = vld [vmem:[#allocation439_spill] sm:$0xff] }
 0x571   : > { %v3875_v53 = vsel %vm16401_vm15, %v16399_v8, inf  ;;  %v4125_v23 = vmin.f32 %v3874_v60, %v4124_v58  ;;  %v4640_v17 = vmax.f32 %v4389_v13, %v4639_v43  ;;  %v2831_v20 = vsel %vm16403_vm7, %v16386_v18, 0.0  ;;  %vm16417_vm12 = vmmov %vm16401_vm15  ;;  %v16427_v43 = vld [vmem:[#allocation59_spill] sm:$0xff] }
 0x572   : > { %v3085_v1 = vadd.f32 %v3084_v45, %v2829_v28  ;;  %vm16406_vm8 = vcmp.lt.s32.totalorder %v16405_v9, %v9345_v42  ;;  %v4391_v24 = vsel %vm16407_vm6, %v16383_v21, -inf  ;;  %v3350_v30 = vmul.f32 %v2829_v28, %v2829_v28  ;;  %v16423_v28 = vld [vmem:[#allocation440_spill] sm:$0xff]  ;;  %vm16425_vm15 = vmmov %vm16417_vm12 }
 0x573   : > { %v3876_v11 = vsel %vm16406_vm8, %v16404_v19, inf  ;;  %v3603_v55 = vadd.f32 %v3602_v15, %v3348_v2  ;;  %v4126_v12 = vmin.f32 %v3875_v53, %v4125_v23  ;;  %v4641_v34 = vmax.f32 %v4390_v40, %v4640_v17  ;;  %vm16421_vm2 = vmmov %vm16406_vm8  ;;  %v16432_v17 = vld [vmem:[#allocation60_spill] sm:$0xff] }
 0x574   : > { %v2832_v25 = vsel %vm16408_vm11, %v16389_v7, 0.0  ;;  %v3086_v31 = vadd.f32 %v3085_v1, %v2830_v52  ;;  %vm16411_vm13 = vcmp.lt.s32.totalorder %v16410_v49, %v9345_v42  ;;  %v4392_v0 = vsel %vm16412_vm5, %v16386_v18, -inf  ;;  %vm16430_vm8 = vmmov %vm16421_vm2 }
 0x575   : > { %v3877_v51 = vsel %vm16411_vm13, %v16409_v39, inf  ;;  %v3351_v21 = vmul.f32 %v2830_v52, %v2830_v52  ;;  %v3604_v44 = vadd.f32 %v3603_v55, %v3349_v3  ;;  %v4127_v5 = vmin.f32 %v3876_v11, %v4126_v12  ;;  %vm16426_vm9 = vmmov %vm16411_vm13  ;;  %v16428_v52 = vld [vmem:[#allocation441_spill] sm:$0xff] }
 0x576   : > { %v4642_v32 = vmax.f32 %v4391_v24, %v4641_v34  ;;  %v2833_v63 = vsel %vm16413_vm10, %v16394_v62, 0.0  ;;  %v3087_v4 = vadd.f32 %v3086_v31, %v2831_v20  ;;  %vm16416_vm0 = vcmp.lt.s32.totalorder %v16415_v16, %v9345_v42  ;;  %vm16435_vm13 = vmmov %vm16426_vm9  ;;  %v16437_v34 = vld [vmem:[#allocation61_spill] sm:$0xff] }
 0x577   : > { %v3878_v35 = vsel %vm16416_vm0, %v16414_v38, inf  ;;  %v4393_v54 = vsel %vm16391_vm4, %v16389_v7, -inf  ;;  %v3352_v18 = vmul.f32 %v2831_v20, %v2831_v20  ;;  %v3605_v57 = vadd.f32 %v3604_v44, %v3350_v30  ;;  %vm16431_vm6 = vmmov %vm16416_vm0  ;;  %v16433_v20 = vld [vmem:[#allocation265_spill] sm:$0xff] }
 0x578   : > { %v4128_v46 = vmin.f32 %v3877_v51, %v4127_v5  ;;  %v4643_v50 = vmax.f32 %v4392_v0, %v4642_v32  ;;  %v2834_v56 = vsel %vm16417_vm12, %v16399_v8, 0.0  ;;  %v3088_v36 = vadd.f32 %v3087_v4, %v2832_v25  ;;  %v16441_v32 = vld [vmem:[#allocation62_spill] sm:$0xff] }
 0x579   : > { %vm16420_vm1 = vcmp.lt.s32.totalorder %v16419_v22, %v9345_v42  ;;  %v4394_v7 = vsel %vm16396_vm3, %v16394_v62, -inf  ;;  %v3353_v59 = vmul.f32 %v2832_v25, %v2832_v25  ;;  %v3606_v37 = vadd.f32 %v3605_v57, %v3351_v21  ;;  %v16438_v25 = vld [vmem:[#allocation442_spill] sm:$0xff] }
 0x57a   : > { %v3879_v14 = vsel %vm16420_vm1, %v16418_v6, inf  ;;  %v4129_v41 = vmin.f32 %v3878_v35, %v4128_v46  ;;  %v4644_v26 = vmax.f32 %v4393_v54, %v4643_v50  ;;  %v2835_v48 = vsel %vm16421_vm2, %v16404_v19, 0.0  ;;  %vm16436_vm5 = vmmov %vm16420_vm1  ;;  %v16445_v50 = vld [vmem:[#allocation63_spill] sm:$0xff] }
 0x57b   : > { %v3089_v10 = vadd.f32 %v3088_v36, %v2833_v63  ;;  %vm16424_vm14 = vcmp.lt.s32.totalorder %v16423_v28, %v9345_v42  ;;  %v4395_v62 = vsel %vm16425_vm15, %v16399_v8, -inf  ;;  %v3354_v61 = vmul.f32 %v2833_v63, %v2833_v63  ;;  %v16442_v63 = vld [vmem:[#allocation443_spill] sm:$0xff] }
 0x57c   : > { %v3880_v33 = vsel %vm16424_vm14, %v16422_v47, inf  ;;  %v3607_v60 = vadd.f32 %v3606_v37, %v3352_v18  ;;  %v4130_v13 = vmin.f32 %v3879_v14, %v4129_v41  ;;  %v4645_v2 = vmax.f32 %v4394_v7, %v4644_v26  ;;  %vm16440_vm4 = vmmov %vm16424_vm14  ;;  %v16450_v26 = vld [vmem:[#allocation64_spill] sm:$0xff] }
 0x57d   : > { %v2836_v27 = vsel %vm16426_vm9, %v16409_v39, 0.0  ;;  %v3090_v58 = vadd.f32 %v3089_v10, %v2834_v56  ;;  %vm16429_vm7 = vcmp.lt.s32.totalorder %v16428_v52, %v9345_v42  ;;  %v4396_v8 = vsel %vm16430_vm8, %v16404_v19, -inf  ;;  %vm16448_vm14 = vmmov %vm16440_vm4 }
 0x57e   : > { %v3881_v45 = vsel %vm16429_vm7, %v16427_v43, inf  ;;  %v3355_v29 = vmul.f32 %v2834_v56, %v2834_v56  ;;  %v3608_v53 = vadd.f32 %v3607_v60, %v3353_v59  ;;  %v4131_v40 = vmin.f32 %v3880_v33, %v4130_v13  ;;  %vm16444_vm3 = vmmov %vm16429_vm7  ;;  %v16446_v56 = vld [vmem:[#allocation444_spill] sm:$0xff] }
 0x57f   : > { %v4646_v3 = vmax.f32 %v4395_v62, %v4645_v2  ;;  %v2837_v15 = vsel %vm16431_vm6, %v16414_v38, 0.0  ;;  %v3091_v23 = vadd.f32 %v3090_v58, %v2835_v48  ;;  %vm16434_vm11 = vcmp.lt.s32.totalorder %v16433_v20, %v9345_v42  ;;  %vm16453_vm7 = vmmov %vm16444_vm3  ;;  %v16455_v2 = vld [vmem:[#allocation65_spill] sm:$0xff] }
 0x580   : > { %v3882_v1 = vsel %vm16434_vm11, %v16432_v17, inf  ;;  %v4397_v19 = vsel %vm16435_vm13, %v16409_v39, -inf  ;;  %v3356_v9 = vmul.f32 %v2835_v48, %v2835_v48  ;;  %v3609_v11 = vadd.f32 %v3608_v53, %v3354_v61  ;;  %vm16449_vm15 = vmmov %vm16434_vm11  ;;  %v16451_v48 = vld [vmem:[#allocation445_spill] sm:$0xff] }
 0x581   : > { %v4132_v24 = vmin.f32 %v3881_v45, %v4131_v40  ;;  %v4647_v30 = vmax.f32 %v4396_v8, %v4646_v3  ;;  %v2838_v55 = vsel %vm16436_vm5, %v16418_v6, 0.0  ;;  %v3092_v12 = vadd.f32 %v3091_v23, %v2836_v27  ;;  %v16459_v3 = vld [vmem:[#allocation66_spill] sm:$0xff] }
 0x582   : > { %vm16439_vm10 = vcmp.lt.s32.totalorder %v16438_v25, %v9345_v42  ;;  %v4398_v39 = vsel %vm16416_vm0, %v16414_v38, -inf  ;;  %v3357_v49 = vmul.f32 %v2836_v27, %v2836_v27  ;;  %v3610_v51 = vadd.f32 %v3609_v11, %v3355_v29  ;;  %v16456_v27 = vld [vmem:[#allocation446_spill] sm:$0xff] }
 0x583   : > { %v3883_v31 = vsel %vm16439_vm10, %v16437_v34, inf  ;;  %v4133_v0 = vmin.f32 %v3882_v1, %v4132_v24  ;;  %v4648_v21 = vmax.f32 %v4397_v19, %v4647_v30  ;;  %v2839_v44 = vsel %vm16440_vm4, %v16422_v47, 0.0  ;;  %vm16454_vm8 = vmmov %vm16439_vm10  ;;  %v16464_v30 = vld [vmem:[#allocation67_spill] sm:$0xff] }
 0x584   : > { %v3093_v5 = vadd.f32 %v3092_v12, %v2837_v15  ;;  %vm16443_vm12 = vcmp.lt.s32.totalorder %v16442_v63, %v9345_v42  ;;  %v4399_v38 = vsel %vm16420_vm1, %v16418_v6, -inf  ;;  %v3358_v16 = vmul.f32 %v2837_v15, %v2837_v15  ;;  %v16460_v15 = vld [vmem:[#allocation447_spill] sm:$0xff]  ;;  %vm16462_vm10 = vmmov %vm16454_vm8 }
 0x585   : > { %v3884_v4 = vsel %vm16443_vm12, %v16441_v32, inf  ;;  %v3611_v35 = vadd.f32 %v3610_v51, %v3356_v9  ;;  %v4134_v54 = vmin.f32 %v3883_v31, %v4133_v0  ;;  %v4649_v18 = vmax.f32 %v4398_v39, %v4648_v21  ;;  %vm16458_vm13 = vmmov %vm16443_vm12  ;;  %v16468_v21 = vld [vmem:[#allocation68_spill] sm:$0xff] }
 0x586   : > { %v2840_v57 = vsel %vm16444_vm3, %v16427_v43, 0.0  ;;  %v3094_v46 = vadd.f32 %v3093_v5, %v2838_v55  ;;  %vm16447_vm2 = vcmp.lt.s32.totalorder %v16446_v56, %v9345_v42  ;;  %v4400_v6 = vsel %vm16448_vm14, %v16422_v47, -inf }
 0x587   : > { %v3885_v36 = vsel %vm16447_vm2, %v16445_v50, inf  ;;  %v3359_v22 = vmul.f32 %v2838_v55, %v2838_v55  ;;  %v3612_v14 = vadd.f32 %v3611_v35, %v3357_v49  ;;  %v4135_v7 = vmin.f32 %v3884_v4, %v4134_v54  ;;  %vm16463_vm0 = vmmov %vm16447_vm2  ;;  %v16465_v55 = vld [vmem:[#allocation448_spill] sm:$0xff] }
 0x588   : > { %v4650_v59 = vmax.f32 %v4399_v38, %v4649_v18  ;;  %v2841_v37 = vsel %vm16449_vm15, %v16432_v17, 0.0  ;;  %v3095_v41 = vadd.f32 %v3094_v46, %v2839_v44  ;;  %vm16452_vm9 = vcmp.lt.s32.totalorder %v16451_v48, %v9345_v42  ;;  %vm16471_vm2 = vmmov %vm16463_vm0  ;;  %v16473_v18 = vld [vmem:[#allocation69_spill] sm:$0xff] }
 0x589   : > { %v3886_v10 = vsel %vm16452_vm9, %v16450_v26, inf  ;;  %v4401_v47 = vsel %vm16453_vm7, %v16427_v43, -inf  ;;  %v3360_v28 = vmul.f32 %v2839_v44, %v2839_v44  ;;  %v3613_v33 = vadd.f32 %v3612_v14, %v3358_v16  ;;  %vm16467_vm1 = vmmov %vm16452_vm9  ;;  %v16469_v44 = vld [vmem:[#allocation449_spill] sm:$0xff] }
 0x58a   : > { %v4136_v62 = vmin.f32 %v3885_v36, %v4135_v7  ;;  %v4651_v61 = vmax.f32 %v4400_v6, %v4650_v59  ;;  %v2842_v60 = vsel %vm16454_vm8, %v16437_v34, 0.0  ;;  %v3096_v13 = vadd.f32 %v3095_v41, %v2840_v57  ;;  %vm16476_vm9 = vmmov %vm16467_vm1  ;;  %v16478_v59 = vld [vmem:[#allocation70_spill] sm:$0xff] }
 0x58b   : > { %vm16457_vm6 = vcmp.lt.s32.totalorder %v16456_v27, %v9345_v42  ;;  %v4402_v43 = vsel %vm16434_vm11, %v16432_v17, -inf  ;;  %v3361_v52 = vmul.f32 %v2840_v57, %v2840_v57  ;;  %v3614_v45 = vadd.f32 %v3613_v33, %v3359_v22  ;;  %v16474_v57 = vld [vmem:[#allocation450_spill] sm:$0xff] }
 0x58c   : > { %v3887_v58 = vsel %vm16457_vm6, %v16455_v2, inf  ;;  %v4137_v8 = vmin.f32 %v3886_v10, %v4136_v62  ;;  %v4652_v29 = vmax.f32 %v4401_v47, %v4651_v61  ;;  %v2843_v53 = vsel %vm16458_vm13, %v16441_v32, 0.0  ;;  %vm16472_vm14 = vmmov %vm16457_vm6  ;;  %v16482_v61 = vld [vmem:[#allocation71_spill] sm:$0xff] }
 0x58d   : > { %v3097_v40 = vadd.f32 %v3096_v13, %v2841_v37  ;;  %vm16461_vm5 = vcmp.lt.s32.totalorder %v16460_v15, %v9345_v42  ;;  %v4403_v17 = vsel %vm16462_vm10, %v16437_v34, -inf  ;;  %v3362_v20 = vmul.f32 %v2841_v37, %v2841_v37  ;;  %v16479_v37 = vld [vmem:[#allocation451_spill] sm:$0xff] }
 0x58e   : > { %v3888_v23 = vsel %vm16461_vm5, %v16459_v3, inf  ;;  %v3615_v1 = vadd.f32 %v3614_v45, %v3360_v28  ;;  %v4138_v19 = vmin.f32 %v3887_v58, %v4137_v8  ;;  %v4653_v9 = vmax.f32 %v4402_v43, %v4652_v29  ;;  %vm16477_vm7 = vmmov %vm16461_vm5  ;;  %v16486_v29 = vld [vmem:[#allocation72_spill] sm:$0xff] }
 0x58f   : > { %v2844_v11 = vsel %vm16463_vm0, %v16445_v50, 0.0  ;;  %v3098_v24 = vadd.f32 %v3097_v40, %v2842_v60  ;;  %vm16466_vm4 = vcmp.lt.s32.totalorder %v16465_v55, %v9345_v42  ;;  %v4404_v34 = vsel %vm16443_vm12, %v16441_v32, -inf }
 0x590   : > { %v3889_v12 = vsel %vm16466_vm4, %v16464_v30, inf  ;;  %v3363_v25 = vmul.f32 %v2842_v60, %v2842_v60  ;;  %v3616_v31 = vadd.f32 %v3615_v1, %v3361_v52  ;;  %v4139_v39 = vmin.f32 %v3888_v23, %v4138_v19  ;;  %vm16481_vm11 = vmmov %vm16466_vm4  ;;  %v16483_v60 = vld [vmem:[#allocation452_spill] sm:$0xff] }
 0x591   : > { %v4654_v49 = vmax.f32 %v4403_v17, %v4653_v9  ;;  %v2845_v51 = vsel %vm16467_vm1, %v16450_v26, 0.0  ;;  %v3099_v0 = vadd.f32 %v3098_v24, %v2843_v53  ;;  %vm16470_vm3 = vcmp.lt.s32.totalorder %v16469_v44, %v9345_v42  ;;  %v16490_v9 = vld [vmem:[#allocation73_spill] sm:$0xff] }
 0x592   : > { %v3890_v5 = vsel %vm16470_vm3, %v16468_v21, inf  ;;  %v4405_v32 = vsel %vm16471_vm2, %v16445_v50, -inf  ;;  %v3364_v63 = vmul.f32 %v2843_v53, %v2843_v53  ;;  %v3617_v4 = vadd.f32 %v3616_v31, %v3362_v20  ;;  %vm16485_vm10 = vmmov %vm16470_vm3  ;;  %v16487_v53 = vld [vmem:[#allocation453_spill] sm:$0xff] }
 0x593   : > { %v4140_v38 = vmin.f32 %v3889_v12, %v4139_v39  ;;  %v4655_v16 = vmax.f32 %v4404_v34, %v4654_v49  ;;  %v2846_v35 = vsel %vm16472_vm14, %v16455_v2, 0.0  ;;  %v3100_v54 = vadd.f32 %v3099_v0, %v2844_v11  ;;  %v16494_v49 = vld [vmem:[#allocation74_spill] sm:$0xff] }
 0x594   : > { %vm16475_vm15 = vcmp.lt.s32.totalorder %v16474_v57, %v9345_v42  ;;  %v4406_v50 = vsel %vm16476_vm9, %v16450_v26, -inf  ;;  %v3365_v56 = vmul.f32 %v2844_v11, %v2844_v11  ;;  %v3618_v36 = vadd.f32 %v3617_v4, %v3363_v25  ;;  %v16491_v11 = vld [vmem:[#allocation454_spill] sm:$0xff] }
 0x595   : > { %v3891_v46 = vsel %vm16475_vm15, %v16473_v18, inf  ;;  %v4141_v6 = vmin.f32 %v3890_v5, %v4140_v38  ;;  %v4656_v22 = vmax.f32 %v4405_v32, %v4655_v16  ;;  %v2847_v14 = vsel %vm16477_vm7, %v16459_v3, 0.0  ;;  %vm16489_vm12 = vmmov %vm16475_vm15  ;;  %v16499_v16 = vld [vmem:[#allocation75_spill] sm:$0xff] }
 0x596   : > { %v3101_v7 = vadd.f32 %v3100_v54, %v2845_v51  ;;  %vm16480_vm8 = vcmp.lt.s32.totalorder %v16479_v37, %v9345_v42  ;;  %v4407_v26 = vsel %vm16457_vm6, %v16455_v2, -inf  ;;  %v3366_v48 = vmul.f32 %v2845_v51, %v2845_v51  ;;  %v16495_v51 = vld [vmem:[#allocation455_spill] sm:$0xff]  ;;  %vm16497_vm15 = vmmov %vm16489_vm12 }
 0x597   : > { %v3892_v41 = vsel %vm16480_vm8, %v16478_v59, inf  ;;  %v3619_v10 = vadd.f32 %v3618_v36, %v3364_v63  ;;  %v4142_v47 = vmin.f32 %v3891_v46, %v4141_v6  ;;  %v4657_v28 = vmax.f32 %v4406_v50, %v4656_v22  ;;  %vm16493_vm2 = vmmov %vm16480_vm8  ;;  %v16504_v22 = vld [vmem:[#allocation76_spill] sm:$0xff] }
 0x598   : > { %v2848_v33 = vsel %vm16481_vm11, %v16464_v30, 0.0  ;;  %v3102_v62 = vadd.f32 %v3101_v7, %v2846_v35  ;;  %vm16484_vm13 = vcmp.lt.s32.totalorder %v16483_v60, %v9345_v42  ;;  %v4408_v2 = vsel %vm16461_vm5, %v16459_v3, -inf  ;;  %vm16502_vm8 = vmmov %vm16493_vm2 }
 0x599   : > { %v3893_v13 = vsel %vm16484_vm13, %v16482_v61, inf  ;;  %v3367_v27 = vmul.f32 %v2846_v35, %v2846_v35  ;;  %v3620_v58 = vadd.f32 %v3619_v10, %v3365_v56  ;;  %v4143_v43 = vmin.f32 %v3892_v41, %v4142_v47  ;;  %vm16498_vm9 = vmmov %vm16484_vm13  ;;  %v16500_v35 = vld [vmem:[#allocation456_spill] sm:$0xff] }
 0x59a   : > { %v4658_v52 = vmax.f32 %v4407_v26, %v4657_v28  ;;  %v2849_v45 = vsel %vm16485_vm10, %v16468_v21, 0.0  ;;  %v3103_v8 = vadd.f32 %v3102_v62, %v2847_v14  ;;  %vm16488_vm0 = vcmp.lt.s32.totalorder %v16487_v53, %v9345_v42  ;;  %vm16507_vm13 = vmmov %vm16498_vm9  ;;  %v16509_v28 = vld [vmem:[#allocation77_spill] sm:$0xff] }
 0x59b   : > { %v3894_v40 = vsel %vm16488_vm0, %v16486_v29, inf  ;;  %v4409_v3 = vsel %vm16466_vm4, %v16464_v30, -inf  ;;  %v3368_v15 = vmul.f32 %v2847_v14, %v2847_v14  ;;  %v3621_v23 = vadd.f32 %v3620_v58, %v3366_v48  ;;  %vm16503_vm6 = vmmov %vm16488_vm0  ;;  %v16505_v14 = vld [vmem:[#allocation457_spill] sm:$0xff] }
 0x59c   : > { %v4144_v17 = vmin.f32 %v3893_v13, %v4143_v43  ;;  %v4659_v20 = vmax.f32 %v4408_v2, %v4658_v52  ;;  %v2850_v1 = vsel %vm16489_vm12, %v16473_v18, 0.0  ;;  %v3104_v19 = vadd.f32 %v3103_v8, %v2848_v33  ;;  %v16513_v52 = vld [vmem:[#allocation78_spill] sm:$0xff] }
 0x59d   : > { %vm16492_vm1 = vcmp.lt.s32.totalorder %v16491_v11, %v9345_v42  ;;  %v4410_v30 = vsel %vm16470_vm3, %v16468_v21, -inf  ;;  %v3369_v55 = vmul.f32 %v2848_v33, %v2848_v33  ;;  %v3622_v12 = vadd.f32 %v3621_v23, %v3367_v27  ;;  %v16510_v33 = vld [vmem:[#allocation458_spill] sm:$0xff] }
 0x59e   : > { %v3895_v24 = vsel %vm16492_vm1, %v16490_v9, inf  ;;  %v4145_v34 = vmin.f32 %v3894_v40, %v4144_v17  ;;  %v4660_v25 = vmax.f32 %v4409_v3, %v4659_v20  ;;  %v2851_v31 = vsel %vm16493_vm2, %v16478_v59, 0.0  ;;  %vm16508_vm5 = vmmov %vm16492_vm1  ;;  %v16517_v20 = vld [vmem:[#allocation79_spill] sm:$0xff] }
 0x59f   : > { %v3105_v39 = vadd.f32 %v3104_v19, %v2849_v45  ;;  %vm16496_vm14 = vcmp.lt.s32.totalorder %v16495_v51, %v9345_v42  ;;  %v4411_v21 = vsel %vm16497_vm15, %v16473_v18, -inf  ;;  %v3370_v44 = vmul.f32 %v2849_v45, %v2849_v45  ;;  %v16514_v45 = vld [vmem:[#allocation459_spill] sm:$0xff] }
 0x5a0   : > { %v3896_v0 = vsel %vm16496_vm14, %v16494_v49, inf  ;;  %v3623_v5 = vadd.f32 %v3622_v12, %v3368_v15  ;;  %v4146_v32 = vmin.f32 %v3895_v24, %v4145_v34  ;;  %v4661_v63 = vmax.f32 %v4410_v30, %v4660_v25  ;;  %vm16512_vm4 = vmmov %vm16496_vm14  ;;  %v16522_v25 = vld [vmem:[#allocation80_spill] sm:$0xff] }
 0x5a1   : > { %v2852_v4 = vsel %vm16498_vm9, %v16482_v61, 0.0  ;;  %v3106_v38 = vadd.f32 %v3105_v39, %v2850_v1  ;;  %vm16501_vm7 = vcmp.lt.s32.totalorder %v16500_v35, %v9345_v42  ;;  %v4412_v18 = vsel %vm16502_vm8, %v16478_v59, -inf  ;;  %vm16520_vm14 = vmmov %vm16512_vm4 }
 0x5a2   : > { %v3897_v54 = vsel %vm16501_vm7, %v16499_v16, inf  ;;  %v3371_v57 = vmul.f32 %v2850_v1, %v2850_v1  ;;  %v3624_v46 = vadd.f32 %v3623_v5, %v3369_v55  ;;  %v4147_v50 = vmin.f32 %v3896_v0, %v4146_v32  ;;  %vm16516_vm3 = vmmov %vm16501_vm7  ;;  %v16518_v1 = vld [vmem:[#allocation460_spill] sm:$0xff] }
 0x5a3   : > { %v4662_v56 = vmax.f32 %v4411_v21, %v4661_v63  ;;  %v2853_v36 = vsel %vm16503_vm6, %v16486_v29, 0.0  ;;  %v3107_v6 = vadd.f32 %v3106_v38, %v2851_v31  ;;  %vm16506_vm11 = vcmp.lt.s32.totalorder %v16505_v14, %v9345_v42  ;;  %vm16525_vm7 = vmmov %vm16516_vm3  ;;  %v16527_v63 = vld [vmem:[#allocation81_spill] sm:$0xff] }
 0x5a4   : > { %v3898_v7 = vsel %vm16506_vm11, %v16504_v22, inf  ;;  %v4413_v59 = vsel %vm16507_vm13, %v16482_v61, -inf  ;;  %v3372_v37 = vmul.f32 %v2851_v31, %v2851_v31  ;;  %v3625_v41 = vadd.f32 %v3624_v46, %v3370_v44  ;;  %vm16521_vm15 = vmmov %vm16506_vm11  ;;  %v16523_v31 = vld [vmem:[#allocation461_spill] sm:$0xff] }
 0x5a5   : > { %v4148_v26 = vmin.f32 %v3897_v54, %v4147_v50  ;;  %v4663_v48 = vmax.f32 %v4412_v18, %v4662_v56  ;;  %v2854_v10 = vsel %vm16508_vm5, %v16490_v9, 0.0  ;;  %v3108_v47 = vadd.f32 %v3107_v6, %v2852_v4  ;;  %v16531_v56 = vld [vmem:[#allocation82_spill] sm:$0xff] }
 0x5a6   : > { %vm16511_vm10 = vcmp.lt.s32.totalorder %v16510_v33, %v9345_v42  ;;  %v4414_v61 = vsel %vm16488_vm0, %v16486_v29, -inf  ;;  %v3373_v60 = vmul.f32 %v2852_v4, %v2852_v4  ;;  %v3626_v13 = vadd.f32 %v3625_v41, %v3371_v57  ;;  %v16528_v4 = vld [vmem:[#allocation462_spill] sm:$0xff] }
 0x5a7   : > { %v3899_v62 = vsel %vm16511_vm10, %v16509_v28, inf  ;;  %v4149_v2 = vmin.f32 %v3898_v7, %v4148_v26  ;;  %v4664_v27 = vmax.f32 %v4413_v59, %v4663_v48  ;;  %v2855_v58 = vsel %vm16512_vm4, %v16494_v49, 0.0  ;;  %vm16526_vm8 = vmmov %vm16511_vm10  ;;  %v16536_v48 = vld [vmem:[#allocation83_spill] sm:$0xff] }
 0x5a8   : > { %v3109_v43 = vadd.f32 %v3108_v47, %v2853_v36  ;;  %vm16515_vm12 = vcmp.lt.s32.totalorder %v16514_v45, %v9345_v42  ;;  %v4415_v29 = vsel %vm16492_vm1, %v16490_v9, -inf  ;;  %v3374_v53 = vmul.f32 %v2853_v36, %v2853_v36  ;;  %v16532_v36 = vld [vmem:[#allocation463_spill] sm:$0xff]  ;;  %vm16534_vm10 = vmmov %vm16526_vm8 }
 0x5a9   : > { %v3900_v8 = vsel %vm16515_vm12, %v16513_v52, inf  ;;  %v3627_v40 = vadd.f32 %v3626_v13, %v3372_v37  ;;  %v4150_v3 = vmin.f32 %v3899_v62, %v4149_v2  ;;  %v4665_v15 = vmax.f32 %v4414_v61, %v4664_v27  ;;  %vm16530_vm13 = vmmov %vm16515_vm12  ;;  %v16540_v27 = vld [vmem:[#allocation84_spill] sm:$0xff] }
 0x5aa   : > { %v2856_v23 = vsel %vm16516_vm3, %v16499_v16, 0.0  ;;  %v3110_v17 = vadd.f32 %v3109_v43, %v2854_v10  ;;  %vm16519_vm2 = vcmp.lt.s32.totalorder %v16518_v1, %v9345_v42  ;;  %v4416_v9 = vsel %vm16520_vm14, %v16494_v49, -inf }
 0x5ab   : > { %v3901_v19 = vsel %vm16519_vm2, %v16517_v20, inf  ;;  %v3375_v11 = vmul.f32 %v2854_v10, %v2854_v10  ;;  %v3628_v24 = vadd.f32 %v3627_v40, %v3373_v60  ;;  %v4151_v30 = vmin.f32 %v3900_v8, %v4150_v3  ;;  %vm16535_vm0 = vmmov %vm16519_vm2  ;;  %v16537_v10 = vld [vmem:[#allocation464_spill] sm:$0xff] }
 0x5ac   : > { %v4666_v55 = vmax.f32 %v4415_v29, %v4665_v15  ;;  %v2857_v12 = vsel %vm16521_vm15, %v16504_v22, 0.0  ;;  %v3111_v34 = vadd.f32 %v3110_v17, %v2855_v58  ;;  %vm16524_vm9 = vcmp.lt.s32.totalorder %v16523_v31, %v9345_v42  ;;  %vm16543_vm2 = vmmov %vm16535_vm0  ;;  %v16545_v15 = vld [vmem:[#allocation85_spill] sm:$0xff] }
 0x5ad   : > { %v3902_v39 = vsel %vm16524_vm9, %v16522_v25, inf  ;;  %v4417_v49 = vsel %vm16525_vm7, %v16499_v16, -inf  ;;  %v3376_v51 = vmul.f32 %v2855_v58, %v2855_v58  ;;  %v3629_v0 = vadd.f32 %v3628_v24, %v3374_v53  ;;  %vm16539_vm1 = vmmov %vm16524_vm9  ;;  %v16541_v58 = vld [vmem:[#allocation465_spill] sm:$0xff] }
 0x5ae   : > { %v4152_v21 = vmin.f32 %v3901_v19, %v4151_v30  ;;  %v4667_v44 = vmax.f32 %v4416_v9, %v4666_v55  ;;  %v2858_v5 = vsel %vm16526_vm8, %v16509_v28, 0.0  ;;  %v3112_v32 = vadd.f32 %v3111_v34, %v2856_v23  ;;  %vm16548_vm9 = vmmov %vm16539_vm1  ;;  %v16550_v55 = vld [vmem:[#allocation86_spill] sm:$0xff] }
 0x5af   : > { %vm16529_vm6 = vcmp.lt.s32.totalorder %v16528_v4, %v9345_v42  ;;  %v4418_v16 = vsel %vm16506_vm11, %v16504_v22, -inf  ;;  %v3377_v35 = vmul.f32 %v2856_v23, %v2856_v23  ;;  %v3630_v54 = vadd.f32 %v3629_v0, %v3375_v11  ;;  %v16546_v23 = vld [vmem:[#allocation266_spill] sm:$0xff] }
 0x5b0   : > { %v3903_v38 = vsel %vm16529_vm6, %v16527_v63, inf  ;;  %v4153_v18 = vmin.f32 %v3902_v39, %v4152_v21  ;;  %v4668_v57 = vmax.f32 %v4417_v49, %v4667_v44  ;;  %v2859_v46 = vsel %vm16530_vm13, %v16513_v52, 0.0  ;;  %vm16544_vm14 = vmmov %vm16529_vm6  ;;  %v16554_v44 = vld [vmem:[#allocation87_spill] sm:$0xff] }
 0x5b1   : > { %v3113_v50 = vadd.f32 %v3112_v32, %v2857_v12  ;;  %vm16533_vm5 = vcmp.lt.s32.totalorder %v16532_v36, %v9345_v42  ;;  %v4419_v22 = vsel %vm16534_vm10, %v16509_v28, -inf  ;;  %v3378_v14 = vmul.f32 %v2857_v12, %v2857_v12  ;;  %v16551_v12 = vld [vmem:[#allocation267_spill] sm:$0xff] }
 0x5b2   : > { %v3904_v6 = vsel %vm16533_vm5, %v16531_v56, inf  ;;  %v3631_v7 = vadd.f32 %v3630_v54, %v3376_v51  ;;  %v4154_v59 = vmin.f32 %v3903_v38, %v4153_v18  ;;  %v4669_v37 = vmax.f32 %v4418_v16, %v4668_v57  ;;  %vm16549_vm7 = vmmov %vm16533_vm5  ;;  %v16558_v57 = vld [vmem:[#allocation88_spill] sm:$0xff] }
 0x5b3   : > { %v2860_v41 = vsel %vm16535_vm0, %v16517_v20, 0.0  ;;  %v3114_v26 = vadd.f32 %v3113_v50, %v2858_v5  ;;  %vm16538_vm4 = vcmp.lt.s32.totalorder %v16537_v10, %v9345_v42  ;;  %v4420_v28 = vsel %vm16515_vm12, %v16513_v52, -inf }
 0x5b4   : > { %v3905_v47 = vsel %vm16538_vm4, %v16536_v48, inf  ;;  %v3379_v33 = vmul.f32 %v2858_v5, %v2858_v5  ;;  %v3632_v62 = vadd.f32 %v3631_v7, %v3377_v35  ;;  %v4155_v61 = vmin.f32 %v3904_v6, %v4154_v59  ;;  %vm16553_vm11 = vmmov %vm16538_vm4  ;;  %v16555_v5 = vld [vmem:[#allocation268_spill] sm:$0xff] }
 0x5b5   : > { %v4670_v60 = vmax.f32 %v4419_v22, %v4669_v37  ;;  %v2861_v13 = vsel %vm16539_vm1, %v16522_v25, 0.0  ;;  %v3115_v2 = vadd.f32 %v3114_v26, %v2859_v46  ;;  %vm16542_vm3 = vcmp.lt.s32.totalorder %v16541_v58, %v9345_v42  ;;  %v16562_v37 = vld [vmem:[#allocation89_spill] sm:$0xff] }
 0x5b6   : > { %v3906_v43 = vsel %vm16542_vm3, %v16540_v27, inf  ;;  %v4421_v52 = vsel %vm16543_vm2, %v16517_v20, -inf  ;;  %v3380_v45 = vmul.f32 %v2859_v46, %v2859_v46  ;;  %v3633_v8 = vadd.f32 %v3632_v62, %v3378_v14  ;;  %vm16557_vm10 = vmmov %vm16542_vm3  ;;  %v16559_v46 = vld [vmem:[#allocation269_spill] sm:$0xff] }
 0x5b7   : > { %v4156_v29 = vmin.f32 %v3905_v47, %v4155_v61  ;;  %v4671_v53 = vmax.f32 %v4420_v28, %v4670_v60  ;;  %v2862_v40 = vsel %vm16544_vm14, %v16527_v63, 0.0  ;;  %v3116_v3 = vadd.f32 %v3115_v2, %v2860_v41  ;;  %v16566_v60 = vld [vmem:[#allocation90_spill] sm:$0xff] }
 0x5b8   : > { %vm16547_vm15 = vcmp.lt.s32.totalorder %v16546_v23, %v9345_v42  ;;  %v4422_v20 = vsel %vm16548_vm9, %v16522_v25, -inf  ;;  %v3381_v1 = vmul.f32 %v2860_v41, %v2860_v41  ;;  %v3634_v19 = vadd.f32 %v3633_v8, %v3379_v33  ;;  %v16563_v41 = vld [vmem:[#allocation270_spill] sm:$0xff] }
 0x5b9   : > { %v3907_v17 = vsel %vm16547_vm15, %v16545_v15, inf  ;;  %v4157_v9 = vmin.f32 %v3906_v43, %v4156_v29  ;;  %v4672_v11 = vmax.f32 %v4421_v52, %v4671_v53  ;;  %v2863_v24 = vsel %vm16549_vm7, %v16531_v56, 0.0  ;;  %vm16561_vm12 = vmmov %vm16547_vm15  ;;  %v16571_v53 = vld [vmem:[#allocation91_spill] sm:$0xff] }
 0x5ba   : > { %v3117_v30 = vadd.f32 %v3116_v3, %v2861_v13  ;;  %vm16552_vm8 = vcmp.lt.s32.totalorder %v16551_v12, %v9345_v42  ;;  %v4423_v25 = vsel %vm16529_vm6, %v16527_v63, -inf  ;;  %v3382_v31 = vmul.f32 %v2861_v13, %v2861_v13  ;;  %v16567_v13 = vld [vmem:[#allocation271_spill] sm:$0xff]  ;;  %vm16569_vm15 = vmmov %vm16561_vm12 }
 0x5bb   : > { %v3908_v34 = vsel %vm16552_vm8, %v16550_v55, inf  ;;  %v3635_v39 = vadd.f32 %v3634_v19, %v3380_v45  ;;  %v4158_v49 = vmin.f32 %v3907_v17, %v4157_v9  ;;  %v4673_v51 = vmax.f32 %v4422_v20, %v4672_v11  ;;  %vm16565_vm2 = vmmov %vm16552_vm8  ;;  %v16576_v11 = vld [vmem:[#allocation92_spill] sm:$0xff] }
 0x5bc   : > { %v2864_v0 = vsel %vm16553_vm11, %v16536_v48, 0.0  ;;  %v3118_v21 = vadd.f32 %v3117_v30, %v2862_v40  ;;  %vm16556_vm13 = vcmp.lt.s32.totalorder %v16555_v5, %v9345_v42  ;;  %v4424_v63 = vsel %vm16533_vm5, %v16531_v56, -inf  ;;  %vm16574_vm8 = vmmov %vm16565_vm2 }
 0x5bd   : > { %v3909_v32 = vsel %vm16556_vm13, %v16554_v44, inf  ;;  %v3383_v4 = vmul.f32 %v2862_v40, %v2862_v40  ;;  %v3636_v38 = vadd.f32 %v3635_v39, %v3381_v1  ;;  %v4159_v16 = vmin.f32 %v3908_v34, %v4158_v49  ;;  %vm16570_vm9 = vmmov %vm16556_vm13  ;;  %v16572_v40 = vld [vmem:[#allocation272_spill] sm:$0xff] }
 0x5be   : > { %v4674_v35 = vmax.f32 %v4423_v25, %v4673_v51  ;;  %v2865_v54 = vsel %vm16557_vm10, %v16540_v27, 0.0  ;;  %v3119_v18 = vadd.f32 %v3118_v21, %v2863_v24  ;;  %vm16560_vm0 = vcmp.lt.s32.totalorder %v16559_v46, %v9345_v42  ;;  %vm16579_vm13 = vmmov %vm16570_vm9  ;;  %v16581_v51 = vld [vmem:[#allocation93_spill] sm:$0xff] }
 0x5bf   : > { %v3910_v50 = vsel %vm16560_vm0, %v16558_v57, inf  ;;  %v4425_v56 = vsel %vm16538_vm4, %v16536_v48, -inf  ;;  %v3384_v36 = vmul.f32 %v2863_v24, %v2863_v24  ;;  %v3637_v6 = vadd.f32 %v3636_v38, %v3382_v31  ;;  %vm16575_vm6 = vmmov %vm16560_vm0  ;;  %v16577_v24 = vld [vmem:[#allocation273_spill] sm:$0xff] }
 0x5c0   : > { %v4160_v22 = vmin.f32 %v3909_v32, %v4159_v16  ;;  %v4675_v14 = vmax.f32 %v4424_v63, %v4674_v35  ;;  %v2866_v7 = vsel %vm16561_vm12, %v16545_v15, 0.0  ;;  %v3120_v59 = vadd.f32 %v3119_v18, %v2864_v0  ;;  %v16585_v35 = vld [vmem:[#allocation94_spill] sm:$0xff] }
 0x5c1   : > { %vm16564_vm1 = vcmp.lt.s32.totalorder %v16563_v41, %v9345_v42  ;;  %v4426_v48 = vsel %vm16542_vm3, %v16540_v27, -inf  ;;  %v3385_v10 = vmul.f32 %v2864_v0, %v2864_v0  ;;  %v3638_v47 = vadd.f32 %v3637_v6, %v3383_v4  ;;  %v16582_v0 = vld [vmem:[#allocation274_spill] sm:$0xff] }
 0x5c2   : > { %v3911_v26 = vsel %vm16564_vm1, %v16562_v37, inf  ;;  %v4161_v28 = vmin.f32 %v3910_v50, %v4160_v22  ;;  %v4676_v33 = vmax.f32 %v4425_v56, %v4675_v14  ;;  %v2867_v62 = vsel %vm16565_vm2, %v16550_v55, 0.0  ;;  %vm16580_vm5 = vmmov %vm16564_vm1  ;;  %v16589_v14 = vld [vmem:[#allocation95_spill] sm:$0xff] }
 0x5c3   : > { %v3121_v61 = vadd.f32 %v3120_v59, %v2865_v54  ;;  %vm16568_vm14 = vcmp.lt.s32.totalorder %v16567_v13, %v9345_v42  ;;  %v4427_v27 = vsel %vm16569_vm15, %v16545_v15, -inf  ;;  %v3386_v58 = vmul.f32 %v2865_v54, %v2865_v54  ;;  %v16586_v54 = vld [vmem:[#allocation275_spill] sm:$0xff] }
 0x5c4   : > { %v3912_v2 = vsel %vm16568_vm14, %v16566_v60, inf  ;;  %v3639_v43 = vadd.f32 %v3638_v47, %v3384_v36  ;;  %v4162_v52 = vmin.f32 %v3911_v26, %v4161_v28  ;;  %v4677_v45 = vmax.f32 %v4426_v48, %v4676_v33  ;;  %vm16584_vm4 = vmmov %vm16568_vm14  ;;  %v16594_v33 = vld [vmem:[#allocation96_spill] sm:$0xff] }
 0x5c5   : > { %v2868_v8 = vsel %vm16570_vm9, %v16554_v44, 0.0  ;;  %v3122_v29 = vadd.f32 %v3121_v61, %v2866_v7  ;;  %vm16573_vm7 = vcmp.lt.s32.totalorder %v16572_v40, %v9345_v42  ;;  %v4428_v15 = vsel %vm16574_vm8, %v16550_v55, -inf  ;;  %vm16592_vm14 = vmmov %vm16584_vm4 }
 0x5c6   : > { %v3913_v3 = vsel %vm16573_vm7, %v16571_v53, inf  ;;  %v3387_v23 = vmul.f32 %v2866_v7, %v2866_v7  ;;  %v3640_v17 = vadd.f32 %v3639_v43, %v3385_v10  ;;  %v4163_v20 = vmin.f32 %v3912_v2, %v4162_v52  ;;  %vm16588_vm3 = vmmov %vm16573_vm7  ;;  %v16590_v7 = vld [vmem:[#allocation276_spill] sm:$0xff] }
 0x5c7   : > { %v4678_v1 = vmax.f32 %v4427_v27, %v4677_v45  ;;  %v2869_v19 = vsel %vm16575_vm6, %v16558_v57, 0.0  ;;  %v3123_v9 = vadd.f32 %v3122_v29, %v2867_v62  ;;  %vm16578_vm11 = vcmp.lt.s32.totalorder %v16577_v24, %v9345_v42  ;;  %vm16597_vm7 = vmmov %vm16588_vm3  ;;  %v16599_v45 = vld [vmem:[#allocation97_spill] sm:$0xff] }
 0x5c8   : > { %v3914_v30 = vsel %vm16578_vm11, %v16576_v11, inf  ;;  %v4429_v55 = vsel %vm16579_vm13, %v16554_v44, -inf  ;;  %v3388_v12 = vmul.f32 %v2867_v62, %v2867_v62  ;;  %v3641_v34 = vadd.f32 %v3640_v17, %v3386_v58  ;;  %vm16593_vm15 = vmmov %vm16578_vm11  ;;  %v16595_v62 = vld [vmem:[#allocation277_spill] sm:$0xff] }
 0x5c9   : > { %v4164_v25 = vmin.f32 %v3913_v3, %v4163_v20  ;;  %v4679_v31 = vmax.f32 %v4428_v15, %v4678_v1  ;;  %v2870_v39 = vsel %vm16580_vm5, %v16562_v37, 0.0  ;;  %v3124_v49 = vadd.f32 %v3123_v9, %v2868_v8  ;;  %v16603_v1 = vld [vmem:[#allocation98_spill] sm:$0xff] }
 0x5ca   : > { %vm16583_vm10 = vcmp.lt.s32.totalorder %v16582_v0, %v9345_v42  ;;  %v4430_v44 = vsel %vm16560_vm0, %v16558_v57, -inf  ;;  %v3389_v5 = vmul.f32 %v2868_v8, %v2868_v8  ;;  %v3642_v32 = vadd.f32 %v3641_v34, %v3387_v23  ;;  %v16600_v8 = vld [vmem:[#allocation278_spill] sm:$0xff] }
 0x5cb   : > { %v3915_v21 = vsel %vm16583_vm10, %v16581_v51, inf  ;;  %v4165_v63 = vmin.f32 %v3914_v30, %v4164_v25  ;;  %v4680_v4 = vmax.f32 %v4429_v55, %v4679_v31  ;;  %v2871_v38 = vsel %vm16584_vm4, %v16566_v60, 0.0  ;;  %vm16598_vm8 = vmmov %vm16583_vm10  ;;  %v16608_v31 = vld [vmem:[#allocation99_spill] sm:$0xff] }
 0x5cc   : > { %v3125_v16 = vadd.f32 %v3124_v49, %v2869_v19  ;;  %vm16587_vm12 = vcmp.lt.s32.totalorder %v16586_v54, %v9345_v42  ;;  %v4431_v57 = vsel %vm16564_vm1, %v16562_v37, -inf  ;;  %v3390_v46 = vmul.f32 %v2869_v19, %v2869_v19  ;;  %v16604_v19 = vld [vmem:[#allocation279_spill] sm:$0xff]  ;;  %vm16606_vm10 = vmmov %vm16598_vm8 }
 0x5cd   : > { %v3916_v18 = vsel %vm16587_vm12, %v16585_v35, inf  ;;  %v3643_v50 = vadd.f32 %v3642_v32, %v3388_v12  ;;  %v4166_v56 = vmin.f32 %v3915_v21, %v4165_v63  ;;  %v4681_v36 = vmax.f32 %v4430_v44, %v4680_v4  ;;  %vm16602_vm13 = vmmov %vm16587_vm12  ;;  %v16612_v4 = vld [vmem:[#allocation100_spill] sm:$0xff] }
 0x5ce   : > { %v2872_v6 = vsel %vm16588_vm3, %v16571_v53, 0.0  ;;  %v3126_v22 = vadd.f32 %v3125_v16, %v2870_v39  ;;  %vm16591_vm2 = vcmp.lt.s32.totalorder %v16590_v7, %v9345_v42  ;;  %v4432_v37 = vsel %vm16592_vm14, %v16566_v60, -inf }
 0x5cf   : > { %v3917_v59 = vsel %vm16591_vm2, %v16589_v14, inf  ;;  %v3391_v41 = vmul.f32 %v2870_v39, %v2870_v39  ;;  %v3644_v26 = vadd.f32 %v3643_v50, %v3389_v5  ;;  %v4167_v48 = vmin.f32 %v3916_v18, %v4166_v56  ;;  %vm16607_vm0 = vmmov %vm16591_vm2  ;;  %v16609_v39 = vld [vmem:[#allocation280_spill] sm:$0xff] }
 0x5d0   : > { %v4682_v10 = vmax.f32 %v4431_v57, %v4681_v36  ;;  %v2873_v47 = vsel %vm16593_vm15, %v16576_v11, 0.0  ;;  %v3127_v28 = vadd.f32 %v3126_v22, %v2871_v38  ;;  %vm16596_vm9 = vcmp.lt.s32.totalorder %v16595_v62, %v9345_v42  ;;  %vm16615_vm2 = vmmov %vm16607_vm0  ;;  %v16617_v36 = vld [vmem:[#allocation101_spill] sm:$0xff] }
 0x5d1   : > { %v3918_v61 = vsel %vm16596_vm9, %v16594_v33, inf  ;;  %v4433_v60 = vsel %vm16597_vm7, %v16571_v53, -inf  ;;  %v3392_v13 = vmul.f32 %v2871_v38, %v2871_v38  ;;  %v3645_v2 = vadd.f32 %v3644_v26, %v3390_v46  ;;  %vm16611_vm1 = vmmov %vm16596_vm9  ;;  %v16613_v38 = vld [vmem:[#allocation281_spill] sm:$0xff] }
 0x5d2   : > { %v4168_v27 = vmin.f32 %v3917_v59, %v4167_v48  ;;  %v4683_v58 = vmax.f32 %v4432_v37, %v4682_v10  ;;  %v2874_v43 = vsel %vm16598_vm8, %v16581_v51, 0.0  ;;  %v3128_v52 = vadd.f32 %v3127_v28, %v2872_v6  ;;  %vm16620_vm9 = vmmov %vm16611_vm1  ;;  %v16622_v10 = vld [vmem:[#allocation102_spill] sm:$0xff] }
 0x5d3   : > { %vm16601_vm6 = vcmp.lt.s32.totalorder %v16600_v8, %v9345_v42  ;;  %v4434_v53 = vsel %vm16578_vm11, %v16576_v11, -inf  ;;  %v3393_v40 = vmul.f32 %v2872_v6, %v2872_v6  ;;  %v3646_v3 = vadd.f32 %v3645_v2, %v3391_v41  ;;  %v16618_v6 = vld [vmem:[#allocation282_spill] sm:$0xff] }
 0x5d4   : > { %v3919_v29 = vsel %vm16601_vm6, %v16599_v45, inf  ;;  %v4169_v15 = vmin.f32 %v3918_v61, %v4168_v27  ;;  %v4684_v23 = vmax.f32 %v4433_v60, %v4683_v58  ;;  %v2875_v17 = vsel %vm16602_vm13, %v16585_v35, 0.0  ;;  %vm16616_vm14 = vmmov %vm16601_vm6  ;;  %v16626_v58 = vld [vmem:[#allocation103_spill] sm:$0xff] }
 0x5d5   : > { %v3129_v20 = vadd.f32 %v3128_v52, %v2873_v47  ;;  %vm16605_vm5 = vcmp.lt.s32.totalorder %v16604_v19, %v9345_v42  ;;  %v4435_v11 = vsel %vm16606_vm10, %v16581_v51, -inf  ;;  %v3394_v24 = vmul.f32 %v2873_v47, %v2873_v47  ;;  %v16623_v47 = vld [vmem:[#allocation283_spill] sm:$0xff] }
 0x5d6   : > { %v3920_v9 = vsel %vm16605_vm5, %v16603_v1, inf  ;;  %v3647_v30 = vadd.f32 %v3646_v3, %v3392_v13  ;;  %v4170_v55 = vmin.f32 %v3919_v29, %v4169_v15  ;;  %v4685_v12 = vmax.f32 %v4434_v53, %v4684_v23  ;;  %vm16621_vm7 = vmmov %vm16605_vm5  ;;  %v16630_v23 = vld [vmem:[#allocation104_spill] sm:$0xff] }
 0x5d7   : > { %v2876_v34 = vsel %vm16607_vm0, %v16589_v14, 0.0  ;;  %v3130_v25 = vadd.f32 %v3129_v20, %v2874_v43  ;;  %vm16610_vm4 = vcmp.lt.s32.totalorder %v16609_v39, %v9345_v42  ;;  %v4436_v51 = vsel %vm16587_vm12, %v16585_v35, -inf }
 0x5d8   : > { %v3921_v49 = vsel %vm16610_vm4, %v16608_v31, inf  ;;  %v3395_v0 = vmul.f32 %v2874_v43, %v2874_v43  ;;  %v3648_v21 = vadd.f32 %v3647_v30, %v3393_v40  ;;  %v4171_v44 = vmin.f32 %v3920_v9, %v4170_v55  ;;  %vm16625_vm11 = vmmov %vm16610_vm4  ;;  %v16627_v43 = vld [vmem:[#allocation284_spill] sm:$0xff] }
 0x5d9   : > { %v4686_v5 = vmax.f32 %v4435_v11, %v4685_v12  ;;  %v2877_v32 = vsel %vm16611_vm1, %v16594_v33, 0.0  ;;  %v3131_v63 = vadd.f32 %v3130_v25, %v2875_v17  ;;  %vm16614_vm3 = vcmp.lt.s32.totalorder %v16613_v38, %v9345_v42  ;;  %v16634_v12 = vld [vmem:[#allocation105_spill] sm:$0xff] }
 0x5da   : > { %v3922_v16 = vsel %vm16614_vm3, %v16612_v4, inf  ;;  %v4437_v35 = vsel %vm16615_vm2, %v16589_v14, -inf  ;;  %v3396_v54 = vmul.f32 %v2875_v17, %v2875_v17  ;;  %v3649_v18 = vadd.f32 %v3648_v21, %v3394_v24  ;;  %vm16629_vm10 = vmmov %vm16614_vm3  ;;  %v16631_v17 = vld [vmem:[#allocation285_spill] sm:$0xff] }
 0x5db   : > { %v4172_v57 = vmin.f32 %v3921_v49, %v4171_v44  ;;  %v4687_v46 = vmax.f32 %v4436_v51, %v4686_v5  ;;  %v2878_v50 = vsel %vm16616_vm14, %v16599_v45, 0.0  ;;  %v3132_v56 = vadd.f32 %v3131_v63, %v2876_v34  ;;  %v16638_v5 = vld [vmem:[#allocation106_spill] sm:$0xff] }
 0x5dc   : > { %vm16619_vm15 = vcmp.lt.s32.totalorder %v16618_v6, %v9345_v42  ;;  %v4438_v14 = vsel %vm16620_vm9, %v16594_v33, -inf  ;;  %v3397_v7 = vmul.f32 %v2876_v34, %v2876_v34  ;;  %v3650_v59 = vadd.f32 %v3649_v18, %v3395_v0  ;;  %v16635_v34 = vld [vmem:[#allocation286_spill] sm:$0xff] }
 0x5dd   : > { %v3923_v22 = vsel %vm16619_vm15, %v16617_v36, inf  ;;  %v4173_v37 = vmin.f32 %v3922_v16, %v4172_v57  ;;  %v4688_v41 = vmax.f32 %v4437_v35, %v4687_v46  ;;  %v2879_v26 = vsel %vm16621_vm7, %v16603_v1, 0.0  ;;  %vm16633_vm12 = vmmov %vm16619_vm15  ;;  %v16643_v46 = vld [vmem:[#allocation107_spill] sm:$0xff] }
 0x5de   : > { %v3133_v48 = vadd.f32 %v3132_v56, %v2877_v32  ;;  %vm16624_vm8 = vcmp.lt.s32.totalorder %v16623_v47, %v9345_v42  ;;  %v4439_v33 = vsel %vm16601_vm6, %v16599_v45, -inf  ;;  %v3398_v62 = vmul.f32 %v2877_v32, %v2877_v32  ;;  %v16639_v32 = vld [vmem:[#allocation287_spill] sm:$0xff]  ;;  %vm16641_vm15 = vmmov %vm16633_vm12 }
 0x5df   : > { %v3924_v28 = vsel %vm16624_vm8, %v16622_v10, inf  ;;  %v3651_v61 = vadd.f32 %v3650_v59, %v3396_v54  ;;  %v4174_v60 = vmin.f32 %v3923_v22, %v4173_v37  ;;  %v4689_v13 = vmax.f32 %v4438_v14, %v4688_v41  ;;  %vm16637_vm2 = vmmov %vm16624_vm8  ;;  %v16648_v41 = vld [vmem:[#allocation108_spill] sm:$0xff] }
 0x5e0   : > { %v2880_v2 = vsel %vm16625_vm11, %v16608_v31, 0.0  ;;  %v3134_v27 = vadd.f32 %v3133_v48, %v2878_v50  ;;  %vm16628_vm13 = vcmp.lt.s32.totalorder %v16627_v43, %v9345_v42  ;;  %v4440_v45 = vsel %vm16605_vm5, %v16603_v1, -inf  ;;  %vm16646_vm8 = vmmov %vm16637_vm2 }
 0x5e1   : > { %v3925_v52 = vsel %vm16628_vm13, %v16626_v58, inf  ;;  %v3399_v8 = vmul.f32 %v2878_v50, %v2878_v50  ;;  %v3652_v29 = vadd.f32 %v3651_v61, %v3397_v7  ;;  %v4175_v53 = vmin.f32 %v3924_v28, %v4174_v60  ;;  %vm16642_vm9 = vmmov %vm16628_vm13  ;;  %v16644_v50 = vld [vmem:[#allocation288_spill] sm:$0xff] }
 0x5e2   : > { %v4690_v40 = vmax.f32 %v4439_v33, %v4689_v13  ;;  %v2881_v3 = vsel %vm16629_vm10, %v16612_v4, 0.0  ;;  %v3135_v15 = vadd.f32 %v3134_v27, %v2879_v26  ;;  %vm16632_vm0 = vcmp.lt.s32.totalorder %v16631_v17, %v9345_v42  ;;  %vm16651_vm13 = vmmov %vm16642_vm9  ;;  %v16653_v13 = vld [vmem:[#allocation109_spill] sm:$0xff] }
 0x5e3   : > { %v3926_v20 = vsel %vm16632_vm0, %v16630_v23, inf  ;;  %v4441_v1 = vsel %vm16610_vm4, %v16608_v31, -inf  ;;  %v3400_v19 = vmul.f32 %v2879_v26, %v2879_v26  ;;  %v3653_v9 = vadd.f32 %v3652_v29, %v3398_v62  ;;  %vm16647_vm6 = vmmov %vm16632_vm0  ;;  %v16649_v26 = vld [vmem:[#allocation289_spill] sm:$0xff] }
 0x5e4   : > { %v4176_v11 = vmin.f32 %v3925_v52, %v4175_v53  ;;  %v4691_v24 = vmax.f32 %v4440_v45, %v4690_v40  ;;  %v2882_v30 = vsel %vm16633_vm12, %v16617_v36, 0.0  ;;  %v3136_v55 = vadd.f32 %v3135_v15, %v2880_v2  ;;  %v16657_v40 = vld [vmem:[#allocation110_spill] sm:$0xff] }
 0x5e5   : > { %vm16636_vm1 = vcmp.lt.s32.totalorder %v16635_v34, %v9345_v42  ;;  %v4442_v31 = vsel %vm16614_vm3, %v16612_v4, -inf  ;;  %v3401_v39 = vmul.f32 %v2880_v2, %v2880_v2  ;;  %v3654_v49 = vadd.f32 %v3653_v9, %v3399_v8  ;;  %v16654_v2 = vld [vmem:[#allocation290_spill] sm:$0xff] }
 0x5e6   : > { %v3927_v25 = vsel %vm16636_vm1, %v16634_v12, inf  ;;  %v4177_v51 = vmin.f32 %v3926_v20, %v4176_v11  ;;  %v4692_v0 = vmax.f32 %v4441_v1, %v4691_v24  ;;  %v2883_v21 = vsel %vm16637_vm2, %v16622_v10, 0.0  ;;  %vm16652_vm5 = vmmov %vm16636_vm1  ;;  %v16661_v24 = vld [vmem:[#allocation111_spill] sm:$0xff] }
 0x5e7   : > { %v3137_v44 = vadd.f32 %v3136_v55, %v2881_v3  ;;  %vm16640_vm14 = vcmp.lt.s32.totalorder %v16639_v32, %v9345_v42  ;;  %v4443_v4 = vsel %vm16641_vm15, %v16617_v36, -inf  ;;  %v3402_v38 = vmul.f32 %v2881_v3, %v2881_v3  ;;  %v16658_v3 = vld [vmem:[#allocation291_spill] sm:$0xff] }
 0x5e8   : > { %v3928_v63 = vsel %vm16640_vm14, %v16638_v5, inf  ;;  %v3655_v16 = vadd.f32 %v3654_v49, %v3400_v19  ;;  %v4178_v35 = vmin.f32 %v3927_v25, %v4177_v51  ;;  %v4693_v54 = vmax.f32 %v4442_v31, %v4692_v0  ;;  %vm16656_vm4 = vmmov %vm16640_vm14  ;;  %v16666_v0 = vld [vmem:[#allocation112_spill] sm:$0xff] }
 0x5e9   : > { %v2884_v18 = vsel %vm16642_vm9, %v16626_v58, 0.0  ;;  %v3138_v57 = vadd.f32 %v3137_v44, %v2882_v30  ;;  %vm16645_vm7 = vcmp.lt.s32.totalorder %v16644_v50, %v9345_v42  ;;  %v4444_v36 = vsel %vm16646_vm8, %v16622_v10, -inf  ;;  %vm16664_vm14 = vmmov %vm16656_vm4 }
 0x5ea   : > { %v3929_v56 = vsel %vm16645_vm7, %v16643_v46, inf  ;;  %v3403_v6 = vmul.f32 %v2882_v30, %v2882_v30  ;;  %v3656_v22 = vadd.f32 %v3655_v16, %v3401_v39  ;;  %v4179_v14 = vmin.f32 %v3928_v63, %v4178_v35  ;;  %vm16660_vm3 = vmmov %vm16645_vm7  ;;  %v16662_v30 = vld [vmem:[#allocation292_spill] sm:$0xff] }
 0x5eb   : > { %v4694_v7 = vmax.f32 %v4443_v4, %v4693_v54  ;;  %v2885_v59 = vsel %vm16647_vm6, %v16630_v23, 0.0  ;;  %v3139_v37 = vadd.f32 %v3138_v57, %v2883_v21  ;;  %vm16650_vm11 = vcmp.lt.s32.totalorder %v16649_v26, %v9345_v42  ;;  %vm16669_vm7 = vmmov %vm16660_vm3  ;;  %v16671_v54 = vld [vmem:[#allocation113_spill] sm:$0xff] }
 0x5ec   : > { %v3930_v48 = vsel %vm16650_vm11, %v16648_v41, inf  ;;  %v4445_v10 = vsel %vm16651_vm13, %v16626_v58, -inf  ;;  %v3404_v47 = vmul.f32 %v2883_v21, %v2883_v21  ;;  %v3657_v28 = vadd.f32 %v3656_v22, %v3402_v38  ;;  %vm16665_vm15 = vmmov %vm16650_vm11  ;;  %v16667_v21 = vld [vmem:[#allocation293_spill] sm:$0xff] }
 0x5ed   : > { %v4180_v33 = vmin.f32 %v3929_v56, %v4179_v14  ;;  %v4695_v62 = vmax.f32 %v4444_v36, %v4694_v7  ;;  %v2886_v61 = vsel %vm16652_vm5, %v16634_v12, 0.0  ;;  %v3140_v60 = vadd.f32 %v3139_v37, %v2884_v18  ;;  %v16675_v7 = vld [vmem:[#allocation114_spill] sm:$0xff] }
 0x5ee   : > { %vm16655_vm10 = vcmp.lt.s32.totalorder %v16654_v2, %v9345_v42  ;;  %v4446_v58 = vsel %vm16632_vm0, %v16630_v23, -inf  ;;  %v3405_v43 = vmul.f32 %v2884_v18, %v2884_v18  ;;  %v3658_v52 = vadd.f32 %v3657_v28, %v3403_v6  ;;  %v16672_v18 = vld [vmem:[#allocation294_spill] sm:$0xff] }
 0x5ef   : > { %v3931_v27 = vsel %vm16655_vm10, %v16653_v13, inf  ;;  %v4181_v45 = vmin.f32 %v3930_v48, %v4180_v33  ;;  %v4696_v8 = vmax.f32 %v4445_v10, %v4695_v62  ;;  %v2887_v29 = vsel %vm16656_vm4, %v16638_v5, 0.0  ;;  %vm16670_vm8 = vmmov %vm16655_vm10  ;;  %v16680_v62 = vld [vmem:[#allocation115_spill] sm:$0xff] }
 0x5f0   : > { %v3141_v53 = vadd.f32 %v3140_v60, %v2885_v59  ;;  %vm16659_vm12 = vcmp.lt.s32.totalorder %v16658_v3, %v9345_v42  ;;  %v4447_v23 = vsel %vm16636_vm1, %v16634_v12, -inf  ;;  %v3406_v17 = vmul.f32 %v2885_v59, %v2885_v59  ;;  %v16676_v59 = vld [vmem:[#allocation295_spill] sm:$0xff]  ;;  %vm16678_vm10 = vmmov %vm16670_vm8 }
 0x5f1   : > { %v3932_v15 = vsel %vm16659_vm12, %v16657_v40, inf  ;;  %v3659_v20 = vadd.f32 %v3658_v52, %v3404_v47  ;;  %v4182_v1 = vmin.f32 %v3931_v27, %v4181_v45  ;;  %v4697_v19 = vmax.f32 %v4446_v58, %v4696_v8  ;;  %vm16674_vm13 = vmmov %vm16659_vm12  ;;  %v16684_v8 = vld [vmem:[#allocation116_spill] sm:$0xff] }
 0x5f2   : > { %v2888_v9 = vsel %vm16660_vm3, %v16643_v46, 0.0  ;;  %v3142_v11 = vadd.f32 %v3141_v53, %v2886_v61  ;;  %vm16663_vm2 = vcmp.lt.s32.totalorder %v16662_v30, %v9345_v42  ;;  %v4448_v12 = vsel %vm16664_vm14, %v16638_v5, -inf }
 0x5f3   : > { %v3933_v55 = vsel %vm16663_vm2, %v16661_v24, inf  ;;  %v3407_v34 = vmul.f32 %v2886_v61, %v2886_v61  ;;  %v3660_v25 = vadd.f32 %v3659_v20, %v3405_v43  ;;  %v4183_v31 = vmin.f32 %v3932_v15, %v4182_v1  ;;  %vm16679_vm0 = vmmov %vm16663_vm2  ;;  %v16681_v61 = vld [vmem:[#allocation296_spill] sm:$0xff] }
 0x5f4   : > { %v4698_v39 = vmax.f32 %v4447_v23, %v4697_v19  ;;  %v2889_v49 = vsel %vm16665_vm15, %v16648_v41, 0.0  ;;  %v3143_v51 = vadd.f32 %v3142_v11, %v2887_v29  ;;  %vm16668_vm9 = vcmp.lt.s32.totalorder %v16667_v21, %v9345_v42  ;;  %vm16687_vm2 = vmmov %vm16679_vm0  ;;  %v16689_v19 = vld [vmem:[#allocation117_spill] sm:$0xff] }
 0x5f5   : > { %v3934_v44 = vsel %vm16668_vm9, %v16666_v0, inf  ;;  %v4449_v5 = vsel %vm16669_vm7, %v16643_v46, -inf  ;;  %v3408_v32 = vmul.f32 %v2887_v29, %v2887_v29  ;;  %v3661_v63 = vadd.f32 %v3660_v25, %v3406_v17  ;;  %vm16683_vm1 = vmmov %vm16668_vm9  ;;  %v16685_v29 = vld [vmem:[#allocation297_spill] sm:$0xff] }
 0x5f6   : > { %v4184_v4 = vmin.f32 %v3933_v55, %v4183_v31  ;;  %v4699_v38 = vmax.f32 %v4448_v12, %v4698_v39  ;;  %v2890_v16 = vsel %vm16670_vm8, %v16653_v13, 0.0  ;;  %v3144_v35 = vadd.f32 %v3143_v51, %v2888_v9  ;;  %vm16692_vm9 = vmmov %vm16683_vm1  ;;  %v16694_v39 = vld [vmem:[#allocation118_spill] sm:$0xff] }
 0x5f7   : > { %vm16673_vm6 = vcmp.lt.s32.totalorder %v16672_v18, %v9345_v42  ;;  %v4450_v46 = vsel %vm16650_vm11, %v16648_v41, -inf  ;;  %v3409_v50 = vmul.f32 %v2888_v9, %v2888_v9  ;;  %v3662_v56 = vadd.f32 %v3661_v63, %v3407_v34  ;;  %v16690_v9 = vld [vmem:[#allocation298_spill] sm:$0xff] }
 0x5f8   : > { %v3935_v57 = vsel %vm16673_vm6, %v16671_v54, inf  ;;  %v4185_v36 = vmin.f32 %v3934_v44, %v4184_v4  ;;  %v4700_v6 = vmax.f32 %v4449_v5, %v4699_v38  ;;  %v2891_v22 = vsel %vm16674_vm13, %v16657_v40, 0.0  ;;  %vm16688_vm14 = vmmov %vm16673_vm6  ;;  %v16698_v38 = vld [vmem:[#allocation119_spill] sm:$0xff] }
 0x5f9   : > { %v3145_v14 = vadd.f32 %v3144_v35, %v2889_v49  ;;  %vm16677_vm5 = vcmp.lt.s32.totalorder %v16676_v59, %v9345_v42  ;;  %v4451_v41 = vsel %vm16678_vm10, %v16653_v13, -inf  ;;  %v3410_v26 = vmul.f32 %v2889_v49, %v2889_v49  ;;  %v16695_v49 = vld [vmem:[#allocation299_spill] sm:$0xff] }
 0x5fa   : > { %v3936_v37 = vsel %vm16677_vm5, %v16675_v7, inf  ;;  %v3663_v48 = vadd.f32 %v3662_v56, %v3408_v32  ;;  %v4186_v10 = vmin.f32 %v3935_v57, %v4185_v36  ;;  %v4701_v47 = vmax.f32 %v4450_v46, %v4700_v6  ;;  %vm16693_vm7 = vmmov %vm16677_vm5  ;;  %v16702_v6 = vld [vmem:[#allocation120_spill] sm:$0xff] }
 0x5fb   : > { %v2892_v28 = vsel %vm16679_vm0, %v16661_v24, 0.0  ;;  %v3146_v33 = vadd.f32 %v3145_v14, %v2890_v16  ;;  %vm16682_vm4 = vcmp.lt.s32.totalorder %v16681_v61, %v9345_v42  ;;  %v4452_v13 = vsel %vm16659_vm12, %v16657_v40, -inf }
 0x5fc   : > { %v3937_v60 = vsel %vm16682_vm4, %v16680_v62, inf  ;;  %v3411_v2 = vmul.f32 %v2890_v16, %v2890_v16  ;;  %v3664_v27 = vadd.f32 %v3663_v48, %v3409_v50  ;;  %v4187_v58 = vmin.f32 %v3936_v37, %v4186_v10  ;;  %vm16697_vm11 = vmmov %vm16682_vm4  ;;  %v16699_v16 = vld [vmem:[#allocation300_spill] sm:$0xff] }
 0x5fd   : > { %v4702_v43 = vmax.f32 %v4451_v41, %v4701_v47  ;;  %v2893_v52 = vsel %vm16683_vm1, %v16666_v0, 0.0  ;;  %v3147_v45 = vadd.f32 %v3146_v33, %v2891_v22  ;;  %vm16686_vm3 = vcmp.lt.s32.totalorder %v16685_v29, %v9345_v42  ;;  %v16706_v47 = vld [vmem:[#allocation121_spill] sm:$0xff] }
 0x5fe   : > { %v3938_v53 = vsel %vm16686_vm3, %v16684_v8, inf  ;;  %v4453_v40 = vsel %vm16687_vm2, %v16661_v24, -inf  ;;  %v3412_v3 = vmul.f32 %v2891_v22, %v2891_v22  ;;  %v3665_v15 = vadd.f32 %v3664_v27, %v3410_v26  ;;  %vm16701_vm10 = vmmov %vm16686_vm3  ;;  %v16703_v22 = vld [vmem:[#allocation301_spill] sm:$0xff] }
 0x5ff   : > { %v4188_v23 = vmin.f32 %v3937_v60, %v4187_v58  ;;  %v4703_v17 = vmax.f32 %v4452_v13, %v4702_v43  ;;  %v2894_v20 = vsel %vm16688_vm14, %v16671_v54, 0.0  ;;  %v3148_v1 = vadd.f32 %v3147_v45, %v2892_v28  ;;  %v16710_v43 = vld [vmem:[#allocation122_spill] sm:$0xff] }
 0x600   : > { %vm16691_vm15 = vcmp.lt.s32.totalorder %v16690_v9, %v9345_v42  ;;  %v4454_v24 = vsel %vm16692_vm9, %v16666_v0, -inf  ;;  %v3413_v30 = vmul.f32 %v2892_v28, %v2892_v28  ;;  %v3666_v55 = vadd.f32 %v3665_v15, %v3411_v2  ;;  %v16707_v28 = vld [vmem:[#allocation302_spill] sm:$0xff] }
 0x601   : > { %v3939_v11 = vsel %vm16691_vm15, %v16689_v19, inf  ;;  %v4189_v12 = vmin.f32 %v3938_v53, %v4188_v23  ;;  %v4704_v34 = vmax.f32 %v4453_v40, %v4703_v17  ;;  %v2895_v25 = vsel %vm16693_vm7, %v16675_v7, 0.0  ;;  %vm16705_vm12 = vmmov %vm16691_vm15  ;;  %v16715_v17 = vld [vmem:[#allocation123_spill] sm:$0xff] }
 0x602   : > { %v3149_v31 = vadd.f32 %v3148_v1, %v2893_v52  ;;  %vm16696_vm8 = vcmp.lt.s32.totalorder %v16695_v49, %v9345_v42  ;;  %v4455_v0 = vsel %vm16673_vm6, %v16671_v54, -inf  ;;  %v3414_v21 = vmul.f32 %v2893_v52, %v2893_v52  ;;  %v16711_v52 = vld [vmem:[#allocation303_spill] sm:$0xff]  ;;  %vm16713_vm15 = vmmov %vm16705_vm12 }
 0x603   : > { %v3940_v51 = vsel %vm16696_vm8, %v16694_v39, inf  ;;  %v3667_v44 = vadd.f32 %v3666_v55, %v3412_v3  ;;  %v4190_v5 = vmin.f32 %v3939_v11, %v4189_v12  ;;  %v4705_v32 = vmax.f32 %v4454_v24, %v4704_v34  ;;  %vm16709_vm2 = vmmov %vm16696_vm8  ;;  %v16720_v34 = vld [vmem:[#allocation124_spill] sm:$0xff] }
 0x604   : > { %v2896_v63 = vsel %vm16697_vm11, %v16680_v62, 0.0  ;;  %v3150_v4 = vadd.f32 %v3149_v31, %v2894_v20  ;;  %vm16700_vm13 = vcmp.lt.s32.totalorder %v16699_v16, %v9345_v42  ;;  %v4456_v54 = vsel %vm16677_vm5, %v16675_v7, -inf  ;;  %vm16718_vm8 = vmmov %vm16709_vm2 }
 0x605   : > { %v3941_v35 = vsel %vm16700_vm13, %v16698_v38, inf  ;;  %v3415_v18 = vmul.f32 %v2894_v20, %v2894_v20  ;;  %v3668_v57 = vadd.f32 %v3667_v44, %v3413_v30  ;;  %v4191_v46 = vmin.f32 %v3940_v51, %v4190_v5  ;;  %vm16714_vm9 = vmmov %vm16700_vm13  ;;  %v16716_v20 = vld [vmem:[#allocation304_spill] sm:$0xff] }
 0x606   : > { %v4706_v50 = vmax.f32 %v4455_v0, %v4705_v32  ;;  %v2897_v56 = vsel %vm16701_vm10, %v16684_v8, 0.0  ;;  %v3151_v36 = vadd.f32 %v3150_v4, %v2895_v25  ;;  %vm16704_vm0 = vcmp.lt.s32.totalorder %v16703_v22, %v9345_v42  ;;  %vm16723_vm13 = vmmov %vm16714_vm9  ;;  %v16725_v32 = vld [vmem:[#allocation125_spill] sm:$0xff] }
 0x607   : > { %v3942_v14 = vsel %vm16704_vm0, %v16702_v6, inf  ;;  %v4457_v7 = vsel %vm16682_vm4, %v16680_v62, -inf  ;;  %v3416_v59 = vmul.f32 %v2895_v25, %v2895_v25  ;;  %v3669_v37 = vadd.f32 %v3668_v57, %v3414_v21  ;;  %vm16719_vm6 = vmmov %vm16704_vm0  ;;  %v16721_v25 = vld [vmem:[#allocation305_spill] sm:$0xff] }
 0x608   : > { %v4192_v41 = vmin.f32 %v3941_v35, %v4191_v46  ;;  %v4707_v26 = vmax.f32 %v4456_v54, %v4706_v50  ;;  %v2898_v48 = vsel %vm16705_vm12, %v16689_v19, 0.0  ;;  %v3152_v10 = vadd.f32 %v3151_v36, %v2896_v63  ;;  %v16729_v50 = vld [vmem:[#allocation126_spill] sm:$0xff] }
 0x609   : > { %vm16708_vm1 = vcmp.lt.s32.totalorder %v16707_v28, %v9345_v42  ;;  %v4458_v62 = vsel %vm16686_vm3, %v16684_v8, -inf  ;;  %v3417_v61 = vmul.f32 %v2896_v63, %v2896_v63  ;;  %v3670_v60 = vadd.f32 %v3669_v37, %v3415_v18  ;;  %v16726_v63 = vld [vmem:[#allocation306_spill] sm:$0xff] }
 0x60a   : > { %v3943_v33 = vsel %vm16708_vm1, %v16706_v47, inf  ;;  %v4193_v13 = vmin.f32 %v3942_v14, %v4192_v41  ;;  %v4708_v2 = vmax.f32 %v4457_v7, %v4707_v26  ;;  %v2899_v27 = vsel %vm16709_vm2, %v16694_v39, 0.0  ;;  %vm16724_vm5 = vmmov %vm16708_vm1  ;;  %v16733_v26 = vld [vmem:[#allocation127_spill] sm:$0xff] }
 0x60b   : > { %v3153_v58 = vadd.f32 %v3152_v10, %v2897_v56  ;;  %vm16712_vm14 = vcmp.lt.s32.totalorder %v16711_v52, %v9345_v42  ;;  %v4459_v8 = vsel %vm16713_vm15, %v16689_v19, -inf  ;;  %v3418_v29 = vmul.f32 %v2897_v56, %v2897_v56  ;;  %v16730_v56 = vld [vmem:[#allocation307_spill] sm:$0xff] }
 0x60c   : > { %v3944_v45 = vsel %vm16712_vm14, %v16710_v43, inf  ;;  %v3671_v53 = vadd.f32 %v3670_v60, %v3416_v59  ;;  %v4194_v40 = vmin.f32 %v3943_v33, %v4193_v13  ;;  %v4709_v3 = vmax.f32 %v4458_v62, %v4708_v2  ;;  %vm16728_vm4 = vmmov %vm16712_vm14  ;;  %v16738_v2 = vld [vmem:[#allocation128_spill] sm:$0xff] }
 0x60d   : > { %v2900_v15 = vsel %vm16714_vm9, %v16698_v38, 0.0  ;;  %v3154_v23 = vadd.f32 %v3153_v58, %v2898_v48  ;;  %vm16717_vm7 = vcmp.lt.s32.totalorder %v16716_v20, %v9345_v42  ;;  %v4460_v19 = vsel %vm16718_vm8, %v16694_v39, -inf  ;;  %vm16736_vm14 = vmmov %vm16728_vm4 }
 0x60e   : > { %v3945_v1 = vsel %vm16717_vm7, %v16715_v17, inf  ;;  %v3419_v9 = vmul.f32 %v2898_v48, %v2898_v48  ;;  %v3672_v11 = vadd.f32 %v3671_v53, %v3417_v61  ;;  %v4195_v24 = vmin.f32 %v3944_v45, %v4194_v40  ;;  %vm16732_vm3 = vmmov %vm16717_vm7  ;;  %v16734_v48 = vld [vmem:[#allocation308_spill] sm:$0xff] }
 0x60f   : > { %v4710_v30 = vmax.f32 %v4459_v8, %v4709_v3  ;;  %v2901_v55 = vsel %vm16719_vm6, %v16702_v6, 0.0  ;;  %v3155_v12 = vadd.f32 %v3154_v23, %v2899_v27  ;;  %vm16722_vm11 = vcmp.lt.s32.totalorder %v16721_v25, %v9345_v42  ;;  %vm16741_vm7 = vmmov %vm16732_vm3  ;;  %v16743_v3 = vld [vmem:[#allocation129_spill] sm:$0xff] }
 0x610   : > { %v3946_v31 = vsel %vm16722_vm11, %v16720_v34, inf  ;;  %v4461_v39 = vsel %vm16723_vm13, %v16698_v38, -inf  ;;  %v3420_v49 = vmul.f32 %v2899_v27, %v2899_v27  ;;  %v3673_v51 = vadd.f32 %v3672_v11, %v3418_v29  ;;  %vm16737_vm15 = vmmov %vm16722_vm11  ;;  %v16739_v27 = vld [vmem:[#allocation309_spill] sm:$0xff] }
 0x611   : > { %v4196_v0 = vmin.f32 %v3945_v1, %v4195_v24  ;;  %v4711_v21 = vmax.f32 %v4460_v19, %v4710_v30  ;;  %v2902_v44 = vsel %vm16724_vm5, %v16706_v47, 0.0  ;;  %v3156_v5 = vadd.f32 %v3155_v12, %v2900_v15  ;;  %v16747_v30 = vld [vmem:[#allocation130_spill] sm:$0xff] }
 0x612   : > { %vm16727_vm10 = vcmp.lt.s32.totalorder %v16726_v63, %v9345_v42  ;;  %v4462_v38 = vsel %vm16704_vm0, %v16702_v6, -inf  ;;  %v3421_v16 = vmul.f32 %v2900_v15, %v2900_v15  ;;  %v3674_v35 = vadd.f32 %v3673_v51, %v3419_v9  ;;  %v16744_v15 = vld [vmem:[#allocation310_spill] sm:$0xff] }
 0x613   : > { %v3947_v4 = vsel %vm16727_vm10, %v16725_v32, inf  ;;  %v4197_v54 = vmin.f32 %v3946_v31, %v4196_v0  ;;  %v4712_v18 = vmax.f32 %v4461_v39, %v4711_v21  ;;  %v2903_v57 = vsel %vm16728_vm4, %v16710_v43, 0.0  ;;  %vm16742_vm8 = vmmov %vm16727_vm10  ;;  %v16752_v21 = vld [vmem:[#allocation131_spill] sm:$0xff] }
 0x614   : > { %v3157_v46 = vadd.f32 %v3156_v5, %v2901_v55  ;;  %vm16731_vm12 = vcmp.lt.s32.totalorder %v16730_v56, %v9345_v42  ;;  %v4463_v6 = vsel %vm16708_vm1, %v16706_v47, -inf  ;;  %v3422_v22 = vmul.f32 %v2901_v55, %v2901_v55  ;;  %v16748_v55 = vld [vmem:[#allocation311_spill] sm:$0xff]  ;;  %vm16750_vm10 = vmmov %vm16742_vm8 }
 0x615   : > { %v3948_v36 = vsel %vm16731_vm12, %v16729_v50, inf  ;;  %v3675_v14 = vadd.f32 %v3674_v35, %v3420_v49  ;;  %v4198_v7 = vmin.f32 %v3947_v4, %v4197_v54  ;;  %v4713_v59 = vmax.f32 %v4462_v38, %v4712_v18  ;;  %vm16746_vm13 = vmmov %vm16731_vm12  ;;  %v16756_v18 = vld [vmem:[#allocation132_spill] sm:$0xff] }
 0x616   : > { %v2904_v37 = vsel %vm16732_vm3, %v16715_v17, 0.0  ;;  %v3158_v41 = vadd.f32 %v3157_v46, %v2902_v44  ;;  %vm16735_vm2 = vcmp.lt.s32.totalorder %v16734_v48, %v9345_v42  ;;  %v4464_v47 = vsel %vm16736_vm14, %v16710_v43, -inf }
 0x617   : > { %v3949_v10 = vsel %vm16735_vm2, %v16733_v26, inf  ;;  %v3423_v28 = vmul.f32 %v2902_v44, %v2902_v44  ;;  %v3676_v33 = vadd.f32 %v3675_v14, %v3421_v16  ;;  %v4199_v62 = vmin.f32 %v3948_v36, %v4198_v7  ;;  %vm16751_vm0 = vmmov %vm16735_vm2  ;;  %v16753_v44 = vld [vmem:[#allocation312_spill] sm:$0xff] }
 0x618   : > { %v4714_v61 = vmax.f32 %v4463_v6, %v4713_v59  ;;  %v2905_v60 = vsel %vm16737_vm15, %v16720_v34, 0.0  ;;  %v3159_v13 = vadd.f32 %v3158_v41, %v2903_v57  ;;  %vm16740_vm9 = vcmp.lt.s32.totalorder %v16739_v27, %v9345_v42  ;;  %vm16759_vm2 = vmmov %vm16751_vm0  ;;  %v16761_v59 = vld [vmem:[#allocation133_spill] sm:$0xff] }
 0x619   : > { %v3950_v58 = vsel %vm16740_vm9, %v16738_v2, inf  ;;  %v4465_v43 = vsel %vm16741_vm7, %v16715_v17, -inf  ;;  %v3424_v52 = vmul.f32 %v2903_v57, %v2903_v57  ;;  %v3677_v45 = vadd.f32 %v3676_v33, %v3422_v22  ;;  %vm16755_vm1 = vmmov %vm16740_vm9  ;;  %v16757_v57 = vld [vmem:[#allocation313_spill] sm:$0xff] }
 0x61a   : > { %v4200_v8 = vmin.f32 %v3949_v10, %v4199_v62  ;;  %v4715_v29 = vmax.f32 %v4464_v47, %v4714_v61  ;;  %v2906_v53 = vsel %vm16742_vm8, %v16725_v32, 0.0  ;;  %v3160_v40 = vadd.f32 %v3159_v13, %v2904_v37  ;;  %vm16764_vm9 = vmmov %vm16755_vm1  ;;  %v16766_v61 = vld [vmem:[#allocation134_spill] sm:$0xff] }
 0x61b   : > { %vm16745_vm6 = vcmp.lt.s32.totalorder %v16744_v15, %v9345_v42  ;;  %v4466_v17 = vsel %vm16722_vm11, %v16720_v34, -inf  ;;  %v3425_v20 = vmul.f32 %v2904_v37, %v2904_v37  ;;  %v3678_v1 = vadd.f32 %v3677_v45, %v3423_v28  ;;  %v16762_v37 = vld [vmem:[#allocation314_spill] sm:$0xff] }
 0x61c   : > { %v3951_v23 = vsel %vm16745_vm6, %v16743_v3, inf  ;;  %v4201_v19 = vmin.f32 %v3950_v58, %v4200_v8  ;;  %v4716_v9 = vmax.f32 %v4465_v43, %v4715_v29  ;;  %v2907_v11 = vsel %vm16746_vm13, %v16729_v50, 0.0  ;;  %vm16760_vm14 = vmmov %vm16745_vm6  ;;  %v16770_v29 = vld [vmem:[#allocation135_spill] sm:$0xff] }
 0x61d   : > { %v3161_v24 = vadd.f32 %v3160_v40, %v2905_v60  ;;  %vm16749_vm5 = vcmp.lt.s32.totalorder %v16748_v55, %v9345_v42  ;;  %v4467_v34 = vsel %vm16750_vm10, %v16725_v32, -inf  ;;  %v3426_v25 = vmul.f32 %v2905_v60, %v2905_v60  ;;  %v16767_v60 = vld [vmem:[#allocation315_spill] sm:$0xff] }
 0x61e   : > { %v3952_v12 = vsel %vm16749_vm5, %v16747_v30, inf  ;;  %v3679_v31 = vadd.f32 %v3678_v1, %v3424_v52  ;;  %v4202_v39 = vmin.f32 %v3951_v23, %v4201_v19  ;;  %v4717_v49 = vmax.f32 %v4466_v17, %v4716_v9  ;;  %vm16765_vm7 = vmmov %vm16749_vm5  ;;  %v16774_v9 = vld [vmem:[#allocation136_spill] sm:$0xff] }
 0x61f   : > { %v2908_v51 = vsel %vm16751_vm0, %v16733_v26, 0.0  ;;  %v3162_v0 = vadd.f32 %v3161_v24, %v2906_v53  ;;  %vm16754_vm4 = vcmp.lt.s32.totalorder %v16753_v44, %v9345_v42  ;;  %v4468_v32 = vsel %vm16731_vm12, %v16729_v50, -inf }
 0x620   : > { %v3953_v5 = vsel %vm16754_vm4, %v16752_v21, inf  ;;  %v3427_v63 = vmul.f32 %v2906_v53, %v2906_v53  ;;  %v3680_v4 = vadd.f32 %v3679_v31, %v3425_v20  ;;  %v4203_v38 = vmin.f32 %v3952_v12, %v4202_v39  ;;  %vm16769_vm11 = vmmov %vm16754_vm4  ;;  %v16771_v53 = vld [vmem:[#allocation316_spill] sm:$0xff] }
 0x621   : > { %v4718_v16 = vmax.f32 %v4467_v34, %v4717_v49  ;;  %v2909_v35 = vsel %vm16755_vm1, %v16738_v2, 0.0  ;;  %v3163_v54 = vadd.f32 %v3162_v0, %v2907_v11  ;;  %vm16758_vm3 = vcmp.lt.s32.totalorder %v16757_v57, %v9345_v42  ;;  %v16778_v49 = vld [vmem:[#allocation137_spill] sm:$0xff] }
 0x622   : > { %v3954_v46 = vsel %vm16758_vm3, %v16756_v18, inf  ;;  %v4469_v50 = vsel %vm16759_vm2, %v16733_v26, -inf  ;;  %v3428_v56 = vmul.f32 %v2907_v11, %v2907_v11  ;;  %v3681_v36 = vadd.f32 %v3680_v4, %v3426_v25  ;;  %vm16773_vm10 = vmmov %vm16758_vm3  ;;  %v16775_v11 = vld [vmem:[#allocation317_spill] sm:$0xff] }
 0x623   : > { %v4204_v6 = vmin.f32 %v3953_v5, %v4203_v38  ;;  %v4719_v22 = vmax.f32 %v4468_v32, %v4718_v16  ;;  %v2910_v14 = vsel %vm16760_vm14, %v16743_v3, 0.0  ;;  %v3164_v7 = vadd.f32 %v3163_v54, %v2908_v51  ;;  %v16782_v16 = vld [vmem:[#allocation138_spill] sm:$0xff] }
 0x624   : > { %vm16763_vm15 = vcmp.lt.s32.totalorder %v16762_v37, %v9345_v42  ;;  %v4470_v26 = vsel %vm16764_vm9, %v16738_v2, -inf  ;;  %v3429_v48 = vmul.f32 %v2908_v51, %v2908_v51  ;;  %v3682_v10 = vadd.f32 %v3681_v36, %v3427_v63  ;;  %v16779_v51 = vld [vmem:[#allocation318_spill] sm:$0xff] }
 0x625   : > { %v3955_v41 = vsel %vm16763_vm15, %v16761_v59, inf  ;;  %v4205_v47 = vmin.f32 %v3954_v46, %v4204_v6  ;;  %v4720_v28 = vmax.f32 %v4469_v50, %v4719_v22  ;;  %v2911_v33 = vsel %vm16765_vm7, %v16747_v30, 0.0  ;;  %vm16777_vm12 = vmmov %vm16763_vm15  ;;  %v16787_v22 = vld [vmem:[#allocation139_spill] sm:$0xff] }
 0x626   : > { %v3165_v62 = vadd.f32 %v3164_v7, %v2909_v35  ;;  %vm16768_vm8 = vcmp.lt.s32.totalorder %v16767_v60, %v9345_v42  ;;  %v4471_v2 = vsel %vm16745_vm6, %v16743_v3, -inf  ;;  %v3430_v27 = vmul.f32 %v2909_v35, %v2909_v35  ;;  %v16783_v35 = vld [vmem:[#allocation319_spill] sm:$0xff]  ;;  %vm16785_vm15 = vmmov %vm16777_vm12 }
 0x627   : > { %v3956_v13 = vsel %vm16768_vm8, %v16766_v61, inf  ;;  %v3683_v58 = vadd.f32 %v3682_v10, %v3428_v56  ;;  %v4206_v43 = vmin.f32 %v3955_v41, %v4205_v47  ;;  %v4721_v52 = vmax.f32 %v4470_v26, %v4720_v28  ;;  %vm16781_vm2 = vmmov %vm16768_vm8  ;;  %v16792_v28 = vld [vmem:[#allocation140_spill] sm:$0xff] }
 0x628   : > { %v2912_v45 = vsel %vm16769_vm11, %v16752_v21, 0.0  ;;  %v3166_v8 = vadd.f32 %v3165_v62, %v2910_v14  ;;  %vm16772_vm13 = vcmp.lt.s32.totalorder %v16771_v53, %v9345_v42  ;;  %v4472_v3 = vsel %vm16749_vm5, %v16747_v30, -inf  ;;  %vm16790_vm8 = vmmov %vm16781_vm2 }
 0x629   : > { %v3957_v40 = vsel %vm16772_vm13, %v16770_v29, inf  ;;  %v3431_v15 = vmul.f32 %v2910_v14, %v2910_v14  ;;  %v3684_v23 = vadd.f32 %v3683_v58, %v3429_v48  ;;  %v4207_v17 = vmin.f32 %v3956_v13, %v4206_v43  ;;  %vm16786_vm9 = vmmov %vm16772_vm13  ;;  %v16788_v14 = vld [vmem:[#allocation320_spill] sm:$0xff] }
 0x62a   : > { %v4722_v20 = vmax.f32 %v4471_v2, %v4721_v52  ;;  %v2913_v1 = vsel %vm16773_vm10, %v16756_v18, 0.0  ;;  %v3167_v19 = vadd.f32 %v3166_v8, %v2911_v33  ;;  %vm16776_vm0 = vcmp.lt.s32.totalorder %v16775_v11, %v9345_v42  ;;  %vm16795_vm13 = vmmov %vm16786_vm9  ;;  %v16797_v52 = vld [vmem:[#allocation141_spill] sm:$0xff] }
 0x62b   : > { %v3958_v24 = vsel %vm16776_vm0, %v16774_v9, inf  ;;  %v4473_v30 = vsel %vm16754_vm4, %v16752_v21, -inf  ;;  %v3432_v55 = vmul.f32 %v2911_v33, %v2911_v33  ;;  %v3685_v12 = vadd.f32 %v3684_v23, %v3430_v27  ;;  %vm16791_vm6 = vmmov %vm16776_vm0  ;;  %v16793_v33 = vld [vmem:[#allocation321_spill] sm:$0xff] }
 0x62c   : > { %v4208_v34 = vmin.f32 %v3957_v40, %v4207_v17  ;;  %v4723_v25 = vmax.f32 %v4472_v3, %v4722_v20  ;;  %v2914_v31 = vsel %vm16777_vm12, %v16761_v59, 0.0  ;;  %v3168_v39 = vadd.f32 %v3167_v19, %v2912_v45  ;;  %v16801_v20 = vld [vmem:[#allocation142_spill] sm:$0xff] }
 0x62d   : > { %vm16780_vm1 = vcmp.lt.s32.totalorder %v16779_v51, %v9345_v42  ;;  %v4474_v21 = vsel %vm16758_vm3, %v16756_v18, -inf  ;;  %v3433_v44 = vmul.f32 %v2912_v45, %v2912_v45  ;;  %v3686_v5 = vadd.f32 %v3685_v12, %v3431_v15  ;;  %v16798_v45 = vld [vmem:[#allocation322_spill] sm:$0xff] }
 0x62e   : > { %v3959_v0 = vsel %vm16780_vm1, %v16778_v49, inf  ;;  %v4209_v32 = vmin.f32 %v3958_v24, %v4208_v34  ;;  %v4724_v63 = vmax.f32 %v4473_v30, %v4723_v25  ;;  %v2915_v4 = vsel %vm16781_vm2, %v16766_v61, 0.0  ;;  %vm16796_vm5 = vmmov %vm16780_vm1  ;;  %v16805_v25 = vld [vmem:[#allocation143_spill] sm:$0xff] }
 0x62f   : > { %v3169_v38 = vadd.f32 %v3168_v39, %v2913_v1  ;;  %vm16784_vm14 = vcmp.lt.s32.totalorder %v16783_v35, %v9345_v42  ;;  %v4475_v18 = vsel %vm16785_vm15, %v16761_v59, -inf  ;;  %v3434_v57 = vmul.f32 %v2913_v1, %v2913_v1  ;;  %v16802_v1 = vld [vmem:[#allocation323_spill] sm:$0xff] }
 0x630   : > { %v3960_v54 = vsel %vm16784_vm14, %v16782_v16, inf  ;;  %v3687_v46 = vadd.f32 %v3686_v5, %v3432_v55  ;;  %v4210_v50 = vmin.f32 %v3959_v0, %v4209_v32  ;;  %v4725_v56 = vmax.f32 %v4474_v21, %v4724_v63  ;;  %vm16800_vm4 = vmmov %vm16784_vm14  ;;  %v16810_v63 = vld [vmem:[#allocation144_spill] sm:$0xff] }
 0x631   : > { %v2916_v36 = vsel %vm16786_vm9, %v16770_v29, 0.0  ;;  %v3170_v6 = vadd.f32 %v3169_v38, %v2914_v31  ;;  %vm16789_vm7 = vcmp.lt.s32.totalorder %v16788_v14, %v9345_v42  ;;  %v4476_v59 = vsel %vm16790_vm8, %v16766_v61, -inf  ;;  %vm16808_vm14 = vmmov %vm16800_vm4 }
 0x632   : > { %v3961_v7 = vsel %vm16789_vm7, %v16787_v22, inf  ;;  %v3435_v37 = vmul.f32 %v2914_v31, %v2914_v31  ;;  %v3688_v41 = vadd.f32 %v3687_v46, %v3433_v44  ;;  %v4211_v26 = vmin.f32 %v3960_v54, %v4210_v50  ;;  %vm16804_vm3 = vmmov %vm16789_vm7  ;;  %v16806_v31 = vld [vmem:[#allocation324_spill] sm:$0xff] }
 0x633   : > { %v4726_v48 = vmax.f32 %v4475_v18, %v4725_v56  ;;  %v2917_v10 = vsel %vm16791_vm6, %v16774_v9, 0.0  ;;  %v3171_v47 = vadd.f32 %v3170_v6, %v2915_v4  ;;  %vm16794_vm11 = vcmp.lt.s32.totalorder %v16793_v33, %v9345_v42  ;;  %vm16813_vm7 = vmmov %vm16804_vm3  ;;  %v16815_v56 = vld [vmem:[#allocation145_spill] sm:$0xff] }
 0x634   : > { %v3962_v62 = vsel %vm16794_vm11, %v16792_v28, inf  ;;  %v4477_v61 = vsel %vm16795_vm13, %v16770_v29, -inf  ;;  %v3436_v60 = vmul.f32 %v2915_v4, %v2915_v4  ;;  %v3689_v13 = vadd.f32 %v3688_v41, %v3434_v57  ;;  %vm16809_vm15 = vmmov %vm16794_vm11  ;;  %v16811_v4 = vld [vmem:[#allocation325_spill] sm:$0xff] }
 0x635   : > { %v4212_v2 = vmin.f32 %v3961_v7, %v4211_v26  ;;  %v4727_v27 = vmax.f32 %v4476_v59, %v4726_v48  ;;  %v2918_v58 = vsel %vm16796_vm5, %v16778_v49, 0.0  ;;  %v3172_v43 = vadd.f32 %v3171_v47, %v2916_v36  ;;  %v16819_v48 = vld [vmem:[#allocation146_spill] sm:$0xff] }
 0x636   : > { %vm16799_vm10 = vcmp.lt.s32.totalorder %v16798_v45, %v9345_v42  ;;  %v4478_v29 = vsel %vm16776_vm0, %v16774_v9, -inf  ;;  %v3437_v53 = vmul.f32 %v2916_v36, %v2916_v36  ;;  %v3690_v40 = vadd.f32 %v3689_v13, %v3435_v37  ;;  %v16816_v36 = vld [vmem:[#allocation326_spill] sm:$0xff] }
 0x637   : > { %v3963_v8 = vsel %vm16799_vm10, %v16797_v52, inf  ;;  %v4213_v3 = vmin.f32 %v3962_v62, %v4212_v2  ;;  %v4728_v15 = vmax.f32 %v4477_v61, %v4727_v27  ;;  %v2919_v23 = vsel %vm16800_vm4, %v16782_v16, 0.0  ;;  %vm16814_vm8 = vmmov %vm16799_vm10  ;;  %v16824_v27 = vld [vmem:[#allocation147_spill] sm:$0xff] }
 0x638   : > { %v3173_v17 = vadd.f32 %v3172_v43, %v2917_v10  ;;  %vm16803_vm12 = vcmp.lt.s32.totalorder %v16802_v1, %v9345_v42  ;;  %v4479_v9 = vsel %vm16780_vm1, %v16778_v49, -inf  ;;  %v3438_v11 = vmul.f32 %v2917_v10, %v2917_v10  ;;  %v16820_v10 = vld [vmem:[#allocation327_spill] sm:$0xff]  ;;  %vm16822_vm10 = vmmov %vm16814_vm8 }
 0x639   : > { %v3964_v19 = vsel %vm16803_vm12, %v16801_v20, inf  ;;  %v3691_v24 = vadd.f32 %v3690_v40, %v3436_v60  ;;  %v4214_v30 = vmin.f32 %v3963_v8, %v4213_v3  ;;  %v4729_v55 = vmax.f32 %v4478_v29, %v4728_v15  ;;  %vm16818_vm13 = vmmov %vm16803_vm12  ;;  %v16828_v15 = vld [vmem:[#allocation148_spill] sm:$0xff] }
 0x63a   : > { %v2920_v12 = vsel %vm16804_vm3, %v16787_v22, 0.0  ;;  %v3174_v34 = vadd.f32 %v3173_v17, %v2918_v58  ;;  %vm16807_vm2 = vcmp.lt.s32.totalorder %v16806_v31, %v9345_v42  ;;  %v4480_v49 = vsel %vm16808_vm14, %v16782_v16, -inf }
 0x63b   : > { %v3965_v39 = vsel %vm16807_vm2, %v16805_v25, inf  ;;  %v3439_v51 = vmul.f32 %v2918_v58, %v2918_v58  ;;  %v3692_v0 = vadd.f32 %v3691_v24, %v3437_v53  ;;  %v4215_v21 = vmin.f32 %v3964_v19, %v4214_v30  ;;  %vm16823_vm0 = vmmov %vm16807_vm2  ;;  %v16825_v58 = vld [vmem:[#allocation328_spill] sm:$0xff] }
 0x63c   : > { %v4730_v44 = vmax.f32 %v4479_v9, %v4729_v55  ;;  %v2921_v5 = vsel %vm16809_vm15, %v16792_v28, 0.0  ;;  %v3175_v32 = vadd.f32 %v3174_v34, %v2919_v23  ;;  %vm16812_vm9 = vcmp.lt.s32.totalorder %v16811_v4, %v9345_v42  ;;  %vm16831_vm2 = vmmov %vm16823_vm0  ;;  %v16833_v55 = vld [vmem:[#allocation149_spill] sm:$0xff] }
 0x63d   : > { %v3966_v38 = vsel %vm16812_vm9, %v16810_v63, inf  ;;  %v4481_v16 = vsel %vm16813_vm7, %v16787_v22, -inf  ;;  %v3440_v35 = vmul.f32 %v2919_v23, %v2919_v23  ;;  %v3693_v54 = vadd.f32 %v3692_v0, %v3438_v11  ;;  %vm16827_vm1 = vmmov %vm16812_vm9  ;;  %v16829_v23 = vld [vmem:[#allocation329_spill] sm:$0xff] }
 0x63e   : > { %v4216_v18 = vmin.f32 %v3965_v39, %v4215_v21  ;;  %v4731_v57 = vmax.f32 %v4480_v49, %v4730_v44  ;;  %v2922_v46 = vsel %vm16814_vm8, %v16797_v52, 0.0  ;;  %v3176_v50 = vadd.f32 %v3175_v32, %v2920_v12  ;;  %vm16836_vm9 = vmmov %vm16827_vm1  ;;  %v16838_v44 = vld [vmem:[#allocation150_spill] sm:$0xff] }
 0x63f   : > { %vm16817_vm6 = vcmp.lt.s32.totalorder %v16816_v36, %v9345_v42  ;;  %v4482_v22 = vsel %vm16794_vm11, %v16792_v28, -inf  ;;  %v3441_v14 = vmul.f32 %v2920_v12, %v2920_v12  ;;  %v3694_v7 = vadd.f32 %v3693_v54, %v3439_v51  ;;  %v16834_v12 = vld [vmem:[#allocation330_spill] sm:$0xff] }
 0x640   : > { %v3967_v6 = vsel %vm16817_vm6, %v16815_v56, inf  ;;  %v4217_v59 = vmin.f32 %v3966_v38, %v4216_v18  ;;  %v4732_v37 = vmax.f32 %v4481_v16, %v4731_v57  ;;  %v2923_v41 = vsel %vm16818_vm13, %v16801_v20, 0.0  ;;  %vm16832_vm14 = vmmov %vm16817_vm6  ;;  %v16842_v57 = vld [vmem:[#allocation151_spill] sm:$0xff] }
 0x641   : > { %v3177_v26 = vadd.f32 %v3176_v50, %v2921_v5  ;;  %vm16821_vm5 = vcmp.lt.s32.totalorder %v16820_v10, %v9345_v42  ;;  %v4483_v28 = vsel %vm16822_vm10, %v16797_v52, -inf  ;;  %v3442_v33 = vmul.f32 %v2921_v5, %v2921_v5  ;;  %v16839_v5 = vld [vmem:[#allocation331_spill] sm:$0xff] }
 0x642   : > { %v3968_v47 = vsel %vm16821_vm5, %v16819_v48, inf  ;;  %v3695_v62 = vadd.f32 %v3694_v7, %v3440_v35  ;;  %v4218_v61 = vmin.f32 %v3967_v6, %v4217_v59  ;;  %v4733_v60 = vmax.f32 %v4482_v22, %v4732_v37  ;;  %vm16837_vm7 = vmmov %vm16821_vm5  ;;  %v16846_v37 = vld [vmem:[#allocation152_spill] sm:$0xff] }
 0x643   : > { %v2924_v13 = vsel %vm16823_vm0, %v16805_v25, 0.0  ;;  %v3178_v2 = vadd.f32 %v3177_v26, %v2922_v46  ;;  %vm16826_vm4 = vcmp.lt.s32.totalorder %v16825_v58, %v9345_v42  ;;  %v4484_v52 = vsel %vm16803_vm12, %v16801_v20, -inf }
 0x644   : > { %v3969_v43 = vsel %vm16826_vm4, %v16824_v27, inf  ;;  %v3443_v45 = vmul.f32 %v2922_v46, %v2922_v46  ;;  %v3696_v8 = vadd.f32 %v3695_v62, %v3441_v14  ;;  %v4219_v29 = vmin.f32 %v3968_v47, %v4218_v61  ;;  %vm16841_vm11 = vmmov %vm16826_vm4  ;;  %v16843_v46 = vld [vmem:[#allocation332_spill] sm:$0xff] }
 0x645   : > { %v4734_v53 = vmax.f32 %v4483_v28, %v4733_v60  ;;  %v2925_v40 = vsel %vm16827_vm1, %v16810_v63, 0.0  ;;  %v3179_v3 = vadd.f32 %v3178_v2, %v2923_v41  ;;  %vm16830_vm3 = vcmp.lt.s32.totalorder %v16829_v23, %v9345_v42  ;;  %v16850_v60 = vld [vmem:[#allocation153_spill] sm:$0xff] }
 0x646   : > { %v3970_v17 = vsel %vm16830_vm3, %v16828_v15, inf  ;;  %v4485_v20 = vsel %vm16831_vm2, %v16805_v25, -inf  ;;  %v3444_v1 = vmul.f32 %v2923_v41, %v2923_v41  ;;  %v3697_v19 = vadd.f32 %v3696_v8, %v3442_v33  ;;  %vm16845_vm10 = vmmov %vm16830_vm3  ;;  %v16847_v41 = vld [vmem:[#allocation333_spill] sm:$0xff] }
 0x647   : > { %v4220_v9 = vmin.f32 %v3969_v43, %v4219_v29  ;;  %v4735_v11 = vmax.f32 %v4484_v52, %v4734_v53  ;;  %v2926_v24 = vsel %vm16832_vm14, %v16815_v56, 0.0  ;;  %v3180_v30 = vadd.f32 %v3179_v3, %v2924_v13  ;;  %v16854_v53 = vld [vmem:[#allocation154_spill] sm:$0xff] }
 0x648   : > { %vm16835_vm15 = vcmp.lt.s32.totalorder %v16834_v12, %v9345_v42  ;;  %v4486_v25 = vsel %vm16836_vm9, %v16810_v63, -inf  ;;  %v3445_v31 = vmul.f32 %v2924_v13, %v2924_v13  ;;  %v3698_v39 = vadd.f32 %v3697_v19, %v3443_v45  ;;  %v16851_v13 = vld [vmem:[#allocation334_spill] sm:$0xff] }
 0x649   : > { %v3971_v34 = vsel %vm16835_vm15, %v16833_v55, inf  ;;  %v4221_v49 = vmin.f32 %v3970_v17, %v4220_v9  ;;  %v4736_v51 = vmax.f32 %v4485_v20, %v4735_v11  ;;  %v2927_v0 = vsel %vm16837_vm7, %v16819_v48, 0.0  ;;  %vm16849_vm12 = vmmov %vm16835_vm15  ;;  %v16859_v11 = vld [vmem:[#allocation155_spill] sm:$0xff] }
 0x64a   : > { %v3181_v21 = vadd.f32 %v3180_v30, %v2925_v40  ;;  %vm16840_vm8 = vcmp.lt.s32.totalorder %v16839_v5, %v9345_v42  ;;  %v4487_v63 = vsel %vm16817_vm6, %v16815_v56, -inf  ;;  %v3446_v4 = vmul.f32 %v2925_v40, %v2925_v40  ;;  %v16855_v40 = vld [vmem:[#allocation335_spill] sm:$0xff]  ;;  %vm16857_vm15 = vmmov %vm16849_vm12 }
 0x64b   : > { %v3972_v32 = vsel %vm16840_vm8, %v16838_v44, inf  ;;  %v3699_v38 = vadd.f32 %v3698_v39, %v3444_v1  ;;  %v4222_v16 = vmin.f32 %v3971_v34, %v4221_v49  ;;  %v4737_v35 = vmax.f32 %v4486_v25, %v4736_v51  ;;  %vm16853_vm2 = vmmov %vm16840_vm8  ;;  %v16864_v51 = vld [vmem:[#allocation156_spill] sm:$0xff] }
 0x64c   : > { %v2928_v54 = vsel %vm16841_vm11, %v16824_v27, 0.0  ;;  %v3182_v18 = vadd.f32 %v3181_v21, %v2926_v24  ;;  %vm16844_vm13 = vcmp.lt.s32.totalorder %v16843_v46, %v9345_v42  ;;  %v4488_v56 = vsel %vm16821_vm5, %v16819_v48, -inf  ;;  %vm16862_vm8 = vmmov %vm16853_vm2 }
 0x64d   : > { %v3973_v50 = vsel %vm16844_vm13, %v16842_v57, inf  ;;  %v3447_v36 = vmul.f32 %v2926_v24, %v2926_v24  ;;  %v3700_v6 = vadd.f32 %v3699_v38, %v3445_v31  ;;  %v4223_v22 = vmin.f32 %v3972_v32, %v4222_v16  ;;  %vm16858_vm9 = vmmov %vm16844_vm13  ;;  %v16860_v24 = vld [vmem:[#allocation336_spill] sm:$0xff] }
 0x64e   : > { %v4738_v14 = vmax.f32 %v4487_v63, %v4737_v35  ;;  %v2929_v7 = vsel %vm16845_vm10, %v16828_v15, 0.0  ;;  %v3183_v59 = vadd.f32 %v3182_v18, %v2927_v0  ;;  %vm16848_vm0 = vcmp.lt.s32.totalorder %v16847_v41, %v9345_v42  ;;  %vm16867_vm13 = vmmov %vm16858_vm9  ;;  %v16869_v35 = vld [vmem:[#allocation157_spill] sm:$0xff] }
 0x64f   : > { %v3974_v26 = vsel %vm16848_vm0, %v16846_v37, inf  ;;  %v4489_v48 = vsel %vm16826_vm4, %v16824_v27, -inf  ;;  %v3448_v10 = vmul.f32 %v2927_v0, %v2927_v0  ;;  %v3701_v47 = vadd.f32 %v3700_v6, %v3446_v4  ;;  %vm16863_vm6 = vmmov %vm16848_vm0  ;;  %v16865_v0 = vld [vmem:[#allocation337_spill] sm:$0xff] }
 0x650   : > { %v4224_v28 = vmin.f32 %v3973_v50, %v4223_v22  ;;  %v4739_v33 = vmax.f32 %v4488_v56, %v4738_v14  ;;  %v2930_v62 = vsel %vm16849_vm12, %v16833_v55, 0.0  ;;  %v3184_v61 = vadd.f32 %v3183_v59, %v2928_v54  ;;  %v16873_v14 = vld [vmem:[#allocation158_spill] sm:$0xff] }
 0x651   : > { %vm16852_vm1 = vcmp.lt.s32.totalorder %v16851_v13, %v9345_v42  ;;  %v4490_v27 = vsel %vm16830_vm3, %v16828_v15, -inf  ;;  %v3449_v58 = vmul.f32 %v2928_v54, %v2928_v54  ;;  %v3702_v43 = vadd.f32 %v3701_v47, %v3447_v36  ;;  %v16870_v54 = vld [vmem:[#allocation338_spill] sm:$0xff] }
 0x652   : > { %v3975_v2 = vsel %vm16852_vm1, %v16850_v60, inf  ;;  %v4225_v52 = vmin.f32 %v3974_v26, %v4224_v28  ;;  %v4740_v45 = vmax.f32 %v4489_v48, %v4739_v33  ;;  %v2931_v8 = vsel %vm16853_vm2, %v16838_v44, 0.0  ;;  %vm16868_vm5 = vmmov %vm16852_vm1  ;;  %v16877_v33 = vld [vmem:[#allocation159_spill] sm:$0xff] }
 0x653   : > { %v3185_v29 = vadd.f32 %v3184_v61, %v2929_v7  ;;  %vm16856_vm14 = vcmp.lt.s32.totalorder %v16855_v40, %v9345_v42  ;;  %v4491_v15 = vsel %vm16857_vm15, %v16833_v55, -inf  ;;  %v3450_v23 = vmul.f32 %v2929_v7, %v2929_v7  ;;  %v16874_v7 = vld [vmem:[#allocation339_spill] sm:$0xff] }
 0x654   : > { %v3976_v3 = vsel %vm16856_vm14, %v16854_v53, inf  ;;  %v3703_v17 = vadd.f32 %v3702_v43, %v3448_v10  ;;  %v4226_v20 = vmin.f32 %v3975_v2, %v4225_v52  ;;  %v4741_v1 = vmax.f32 %v4490_v27, %v4740_v45  ;;  %vm16872_vm4 = vmmov %vm16856_vm14  ;;  %v16882_v45 = vld [vmem:[#allocation160_spill] sm:$0xff] }
 0x655   : > { %v2932_v19 = vsel %vm16858_vm9, %v16842_v57, 0.0  ;;  %v3186_v9 = vadd.f32 %v3185_v29, %v2930_v62  ;;  %vm16861_vm7 = vcmp.lt.s32.totalorder %v16860_v24, %v9345_v42  ;;  %v4492_v55 = vsel %vm16862_vm8, %v16838_v44, -inf  ;;  %vm16880_vm14 = vmmov %vm16872_vm4 }
 0x656   : > { %v3977_v30 = vsel %vm16861_vm7, %v16859_v11, inf  ;;  %v3451_v12 = vmul.f32 %v2930_v62, %v2930_v62  ;;  %v3704_v34 = vadd.f32 %v3703_v17, %v3449_v58  ;;  %v4227_v25 = vmin.f32 %v3976_v3, %v4226_v20  ;;  %vm16876_vm3 = vmmov %vm16861_vm7  ;;  %v16878_v62 = vld [vmem:[#allocation340_spill] sm:$0xff] }
 0x657   : > { %v4742_v31 = vmax.f32 %v4491_v15, %v4741_v1  ;;  %v2933_v39 = vsel %vm16863_vm6, %v16846_v37, 0.0  ;;  %v3187_v49 = vadd.f32 %v3186_v9, %v2931_v8  ;;  %vm16866_vm11 = vcmp.lt.s32.totalorder %v16865_v0, %v9345_v42  ;;  %vm16885_vm7 = vmmov %vm16876_vm3  ;;  %v16887_v1 = vld [vmem:[#allocation161_spill] sm:$0xff] }
 0x658   : > { %v3978_v21 = vsel %vm16866_vm11, %v16864_v51, inf  ;;  %v4493_v44 = vsel %vm16867_vm13, %v16842_v57, -inf  ;;  %v3452_v5 = vmul.f32 %v2931_v8, %v2931_v8  ;;  %v3705_v32 = vadd.f32 %v3704_v34, %v3450_v23  ;;  %vm16881_vm15 = vmmov %vm16866_vm11  ;;  %v16883_v8 = vld [vmem:[#allocation341_spill] sm:$0xff] }
 0x659   : > { %v4228_v63 = vmin.f32 %v3977_v30, %v4227_v25  ;;  %v4743_v4 = vmax.f32 %v4492_v55, %v4742_v31  ;;  %v2934_v38 = vsel %vm16868_vm5, %v16850_v60, 0.0  ;;  %v3188_v16 = vadd.f32 %v3187_v49, %v2932_v19  ;;  %v16891_v31 = vld [vmem:[#allocation162_spill] sm:$0xff] }
 0x65a   : > { %vm16871_vm10 = vcmp.lt.s32.totalorder %v16870_v54, %v9345_v42  ;;  %v4494_v57 = vsel %vm16848_vm0, %v16846_v37, -inf  ;;  %v3453_v46 = vmul.f32 %v2932_v19, %v2932_v19  ;;  %v3706_v50 = vadd.f32 %v3705_v32, %v3451_v12  ;;  %v16888_v19 = vld [vmem:[#allocation342_spill] sm:$0xff] }
 0x65b   : > { %v3979_v18 = vsel %vm16871_vm10, %v16869_v35, inf  ;;  %v4229_v56 = vmin.f32 %v3978_v21, %v4228_v63  ;;  %v4744_v36 = vmax.f32 %v4493_v44, %v4743_v4  ;;  %v2935_v6 = vsel %vm16872_vm4, %v16854_v53, 0.0  ;;  %vm16886_vm8 = vmmov %vm16871_vm10  ;;  %v16896_v4 = vld [vmem:[#allocation163_spill] sm:$0xff] }
 0x65c   : > { %v3189_v22 = vadd.f32 %v3188_v16, %v2933_v39  ;;  %vm16875_vm12 = vcmp.lt.s32.totalorder %v16874_v7, %v9345_v42  ;;  %v4495_v37 = vsel %vm16852_vm1, %v16850_v60, -inf  ;;  %v3454_v41 = vmul.f32 %v2933_v39, %v2933_v39  ;;  %v16892_v39 = vld [vmem:[#allocation343_spill] sm:$0xff]  ;;  %vm16894_vm10 = vmmov %vm16886_vm8 }
 0x65d   : > { %v3980_v59 = vsel %vm16875_vm12, %v16873_v14, inf  ;;  %v3707_v26 = vadd.f32 %v3706_v50, %v3452_v5  ;;  %v4230_v48 = vmin.f32 %v3979_v18, %v4229_v56  ;;  %v4745_v10 = vmax.f32 %v4494_v57, %v4744_v36  ;;  %vm16890_vm13 = vmmov %vm16875_vm12  ;;  %v16900_v36 = vld [vmem:[#allocation164_spill] sm:$0xff] }
 0x65e   : > { %v2936_v47 = vsel %vm16876_vm3, %v16859_v11, 0.0  ;;  %v3190_v28 = vadd.f32 %v3189_v22, %v2934_v38  ;;  %vm16879_vm2 = vcmp.lt.s32.totalorder %v16878_v62, %v9345_v42  ;;  %v4496_v60 = vsel %vm16880_vm14, %v16854_v53, -inf }
 0x65f   : > { %v3981_v61 = vsel %vm16879_vm2, %v16877_v33, inf  ;;  %v3455_v13 = vmul.f32 %v2934_v38, %v2934_v38  ;;  %v3708_v2 = vadd.f32 %v3707_v26, %v3453_v46  ;;  %v4231_v27 = vmin.f32 %v3980_v59, %v4230_v48  ;;  %vm16895_vm0 = vmmov %vm16879_vm2  ;;  %v16897_v38 = vld [vmem:[#allocation344_spill] sm:$0xff] }
 0x660   : > { %v4746_v58 = vmax.f32 %v4495_v37, %v4745_v10  ;;  %v2937_v43 = vsel %vm16881_vm15, %v16864_v51, 0.0  ;;  %v3191_v52 = vadd.f32 %v3190_v28, %v2935_v6  ;;  %vm16884_vm9 = vcmp.lt.s32.totalorder %v16883_v8, %v9345_v42  ;;  %vm16903_vm2 = vmmov %vm16895_vm0  ;;  %v16905_v10 = vld [vmem:[#allocation165_spill] sm:$0xff] }
 0x661   : > { %v3982_v29 = vsel %vm16884_vm9, %v16882_v45, inf  ;;  %v4497_v53 = vsel %vm16885_vm7, %v16859_v11, -inf  ;;  %v3456_v40 = vmul.f32 %v2935_v6, %v2935_v6  ;;  %v3709_v3 = vadd.f32 %v3708_v2, %v3454_v41  ;;  %vm16899_vm1 = vmmov %vm16884_vm9  ;;  %v16901_v6 = vld [vmem:[#allocation345_spill] sm:$0xff] }
 0x662   : > { %v4232_v15 = vmin.f32 %v3981_v61, %v4231_v27  ;;  %v4747_v23 = vmax.f32 %v4496_v60, %v4746_v58  ;;  %v2938_v17 = vsel %vm16886_vm8, %v16869_v35, 0.0  ;;  %v3192_v20 = vadd.f32 %v3191_v52, %v2936_v47  ;;  %vm16908_vm9 = vmmov %vm16899_vm1  ;;  %v16910_v58 = vld [vmem:[#allocation166_spill] sm:$0xff] }
 0x663   : > { %vm16889_vm6 = vcmp.lt.s32.totalorder %v16888_v19, %v9345_v42  ;;  %v4498_v11 = vsel %vm16866_vm11, %v16864_v51, -inf  ;;  %v3457_v24 = vmul.f32 %v2936_v47, %v2936_v47  ;;  %v3710_v30 = vadd.f32 %v3709_v3, %v3455_v13  ;;  %v16906_v47 = vld [vmem:[#allocation346_spill] sm:$0xff] }
 0x664   : > { %v3983_v9 = vsel %vm16889_vm6, %v16887_v1, inf  ;;  %v4233_v55 = vmin.f32 %v3982_v29, %v4232_v15  ;;  %v4748_v12 = vmax.f32 %v4497_v53, %v4747_v23  ;;  %v2939_v34 = vsel %vm16890_vm13, %v16873_v14, 0.0  ;;  %vm16904_vm14 = vmmov %vm16889_vm6  ;;  %v16914_v23 = vld [vmem:[#allocation167_spill] sm:$0xff] }
 0x665   : > { %v3193_v25 = vadd.f32 %v3192_v20, %v2937_v43  ;;  %vm16893_vm5 = vcmp.lt.s32.totalorder %v16892_v39, %v9345_v42  ;;  %v4499_v51 = vsel %vm16894_vm10, %v16869_v35, -inf  ;;  %v3458_v0 = vmul.f32 %v2937_v43, %v2937_v43  ;;  %v16911_v43 = vld [vmem:[#allocation347_spill] sm:$0xff] }
 0x666   : > { %v3984_v49 = vsel %vm16893_vm5, %v16891_v31, inf  ;;  %v3711_v21 = vadd.f32 %v3710_v30, %v3456_v40  ;;  %v4234_v44 = vmin.f32 %v3983_v9, %v4233_v55  ;;  %v4749_v5 = vmax.f32 %v4498_v11, %v4748_v12  ;;  %vm16909_vm7 = vmmov %vm16893_vm5  ;;  %v16918_v12 = vld [vmem:[#allocation168_spill] sm:$0xff] }
 0x667   : > { %v2940_v32 = vsel %vm16895_vm0, %v16877_v33, 0.0  ;;  %v3194_v63 = vadd.f32 %v3193_v25, %v2938_v17  ;;  %vm16898_vm4 = vcmp.lt.s32.totalorder %v16897_v38, %v9345_v42  ;;  %v4500_v35 = vsel %vm16875_vm12, %v16873_v14, -inf }
 0x668   : > { %v3985_v16 = vsel %vm16898_vm4, %v16896_v4, inf  ;;  %v3459_v54 = vmul.f32 %v2938_v17, %v2938_v17  ;;  %v3712_v18 = vadd.f32 %v3711_v21, %v3457_v24  ;;  %v4235_v57 = vmin.f32 %v3984_v49, %v4234_v44  ;;  %vm16913_vm11 = vmmov %vm16898_vm4  ;;  %v16915_v17 = vld [vmem:[#allocation348_spill] sm:$0xff] }
 0x669   : > { %v4750_v46 = vmax.f32 %v4499_v51, %v4749_v5  ;;  %v2941_v50 = vsel %vm16899_vm1, %v16882_v45, 0.0  ;;  %v3195_v56 = vadd.f32 %v3194_v63, %v2939_v34  ;;  %vm16902_vm3 = vcmp.lt.s32.totalorder %v16901_v6, %v9345_v42  ;;  %v16922_v5 = vld [vmem:[#allocation169_spill] sm:$0xff] }
 0x66a   : > { %v3986_v22 = vsel %vm16902_vm3, %v16900_v36, inf  ;;  %v4501_v14 = vsel %vm16903_vm2, %v16877_v33, -inf  ;;  %v3460_v7 = vmul.f32 %v2939_v34, %v2939_v34  ;;  %v3713_v59 = vadd.f32 %v3712_v18, %v3458_v0  ;;  %vm16917_vm10 = vmmov %vm16902_vm3  ;;  %v16919_v34 = vld [vmem:[#allocation349_spill] sm:$0xff] }
 0x66b   : > { %v4236_v37 = vmin.f32 %v3985_v16, %v4235_v57  ;;  %v4751_v41 = vmax.f32 %v4500_v35, %v4750_v46  ;;  %v2942_v26 = vsel %vm16904_vm14, %v16887_v1, 0.0  ;;  %v3196_v48 = vadd.f32 %v3195_v56, %v2940_v32  ;;  %v16926_v46 = vld [vmem:[#allocation170_spill] sm:$0xff] }
 0x66c   : > { %vm16907_vm15 = vcmp.lt.s32.totalorder %v16906_v47, %v9345_v42  ;;  %v4502_v33 = vsel %vm16908_vm9, %v16882_v45, -inf  ;;  %v3461_v62 = vmul.f32 %v2940_v32, %v2940_v32  ;;  %v3714_v61 = vadd.f32 %v3713_v59, %v3459_v54  ;;  %v16923_v32 = vld [vmem:[#allocation350_spill] sm:$0xff] }
 0x66d   : > { %v3987_v28 = vsel %vm16907_vm15, %v16905_v10, inf  ;;  %v4237_v60 = vmin.f32 %v3986_v22, %v4236_v37  ;;  %v4752_v13 = vmax.f32 %v4501_v14, %v4751_v41  ;;  %v2943_v2 = vsel %vm16909_vm7, %v16891_v31, 0.0  ;;  %vm16921_vm12 = vmmov %vm16907_vm15  ;;  %v16931_v41 = vld [vmem:[#allocation171_spill] sm:$0xff] }
 0x66e   : > { %v3197_v27 = vadd.f32 %v3196_v48, %v2941_v50  ;;  %vm16912_vm8 = vcmp.lt.s32.totalorder %v16911_v43, %v9345_v42  ;;  %v4503_v45 = vsel %vm16889_vm6, %v16887_v1, -inf  ;;  %v3462_v8 = vmul.f32 %v2941_v50, %v2941_v50  ;;  %v16927_v50 = vld [vmem:[#allocation351_spill] sm:$0xff]  ;;  %vm16929_vm15 = vmmov %vm16921_vm12 }
 0x66f   : > { %v3988_v52 = vsel %vm16912_vm8, %v16910_v58, inf  ;;  %v3715_v29 = vadd.f32 %v3714_v61, %v3460_v7  ;;  %v4238_v53 = vmin.f32 %v3987_v28, %v4237_v60  ;;  %v4753_v40 = vmax.f32 %v4502_v33, %v4752_v13  ;;  %vm16925_vm2 = vmmov %vm16912_vm8  ;;  %v16936_v13 = vld [vmem:[#allocation172_spill] sm:$0xff] }
 0x670   : > { %v2944_v3 = vsel %vm16913_vm11, %v16896_v4, 0.0  ;;  %v3198_v15 = vadd.f32 %v3197_v27, %v2942_v26  ;;  %vm16916_vm13 = vcmp.lt.s32.totalorder %v16915_v17, %v9345_v42  ;;  %v4504_v1 = vsel %vm16893_vm5, %v16891_v31, -inf  ;;  %vm16934_vm8 = vmmov %vm16925_vm2 }
 0x671   : > { %v3989_v20 = vsel %vm16916_vm13, %v16914_v23, inf  ;;  %v3463_v19 = vmul.f32 %v2942_v26, %v2942_v26  ;;  %v3716_v9 = vadd.f32 %v3715_v29, %v3461_v62  ;;  %v4239_v11 = vmin.f32 %v3988_v52, %v4238_v53  ;;  %vm16930_vm9 = vmmov %vm16916_vm13  ;;  %v16932_v26 = vld [vmem:[#allocation352_spill] sm:$0xff] }
 0x672   : > { %v4754_v24 = vmax.f32 %v4503_v45, %v4753_v40  ;;  %v2945_v30 = vsel %vm16917_vm10, %v16900_v36, 0.0  ;;  %v3199_v55 = vadd.f32 %v3198_v15, %v2943_v2  ;;  %vm16920_vm0 = vcmp.lt.s32.totalorder %v16919_v34, %v9345_v42  ;;  %vm16939_vm13 = vmmov %vm16930_vm9  ;;  %v16941_v40 = vld [vmem:[#allocation173_spill] sm:$0xff] }
 0x673   : > { %v3990_v25 = vsel %vm16920_vm0, %v16918_v12, inf  ;;  %v4505_v31 = vsel %vm16898_vm4, %v16896_v4, -inf  ;;  %v3464_v39 = vmul.f32 %v2943_v2, %v2943_v2  ;;  %v3717_v49 = vadd.f32 %v3716_v9, %v3462_v8  ;;  %vm16935_vm6 = vmmov %vm16920_vm0  ;;  %v16937_v2 = vld [vmem:[#allocation353_spill] sm:$0xff] }
 0x674   : > { %v4240_v51 = vmin.f32 %v3989_v20, %v4239_v11  ;;  %v4755_v0 = vmax.f32 %v4504_v1, %v4754_v24  ;;  %v2946_v21 = vsel %vm16921_vm12, %v16905_v10, 0.0  ;;  %v3200_v44 = vadd.f32 %v3199_v55, %v2944_v3  ;;  %v16945_v24 = vld [vmem:[#allocation174_spill] sm:$0xff] }
 0x675   : > { %vm16924_vm1 = vcmp.lt.s32.totalorder %v16923_v32, %v9345_v42  ;;  %v4506_v4 = vsel %vm16902_vm3, %v16900_v36, -inf  ;;  %v3465_v38 = vmul.f32 %v2944_v3, %v2944_v3  ;;  %v3718_v16 = vadd.f32 %v3717_v49, %v3463_v19  ;;  %v16942_v3 = vld [vmem:[#allocation354_spill] sm:$0xff] }
 0x676   : > { %v3991_v63 = vsel %vm16924_vm1, %v16922_v5, inf  ;;  %v4241_v35 = vmin.f32 %v3990_v25, %v4240_v51  ;;  %v4756_v54 = vmax.f32 %v4505_v31, %v4755_v0  ;;  %v2947_v18 = vsel %vm16925_vm2, %v16910_v58, 0.0  ;;  %vm16940_vm5 = vmmov %vm16924_vm1  ;;  %v16949_v0 = vld [vmem:[#allocation175_spill] sm:$0xff] }
 0x677   : > { %v3201_v57 = vadd.f32 %v3200_v44, %v2945_v30  ;;  %vm16928_vm14 = vcmp.lt.s32.totalorder %v16927_v50, %v9345_v42  ;;  %v4507_v36 = vsel %vm16929_vm15, %v16905_v10, -inf  ;;  %v3466_v6 = vmul.f32 %v2945_v30, %v2945_v30  ;;  %v16946_v30 = vld [vmem:[#allocation355_spill] sm:$0xff] }
 0x678   : > { %v3992_v56 = vsel %vm16928_vm14, %v16926_v46, inf  ;;  %v3719_v22 = vadd.f32 %v3718_v16, %v3464_v39  ;;  %v4242_v14 = vmin.f32 %v3991_v63, %v4241_v35  ;;  %v4757_v7 = vmax.f32 %v4506_v4, %v4756_v54  ;;  %vm16944_vm4 = vmmov %vm16928_vm14  ;;  %v16954_v54 = vld [vmem:[#allocation176_spill] sm:$0xff] }
 0x679   : > { %v2948_v59 = vsel %vm16930_vm9, %v16914_v23, 0.0  ;;  %v3202_v37 = vadd.f32 %v3201_v57, %v2946_v21  ;;  %vm16933_vm7 = vcmp.lt.s32.totalorder %v16932_v26, %v9345_v42  ;;  %v4508_v10 = vsel %vm16934_vm8, %v16910_v58, -inf  ;;  %vm16952_vm14 = vmmov %vm16944_vm4 }
 0x67a   : > { %v3993_v48 = vsel %vm16933_vm7, %v16931_v41, inf  ;;  %v3467_v47 = vmul.f32 %v2946_v21, %v2946_v21  ;;  %v3720_v28 = vadd.f32 %v3719_v22, %v3465_v38  ;;  %v4243_v33 = vmin.f32 %v3992_v56, %v4242_v14  ;;  %vm16948_vm3 = vmmov %vm16933_vm7  ;;  %v16950_v21 = vld [vmem:[#allocation356_spill] sm:$0xff] }
 0x67b   : > { %v4758_v62 = vmax.f32 %v4507_v36, %v4757_v7  ;;  %v2949_v61 = vsel %vm16935_vm6, %v16918_v12, 0.0  ;;  %v3203_v60 = vadd.f32 %v3202_v37, %v2947_v18  ;;  %vm16938_vm11 = vcmp.lt.s32.totalorder %v16937_v2, %v9345_v42  ;;  %vm16957_vm7 = vmmov %vm16948_vm3  ;;  %v16959_v7 = vld [vmem:[#allocation177_spill] sm:$0xff] }
 0x67c   : > { %v3994_v27 = vsel %vm16938_vm11, %v16936_v13, inf  ;;  %v4509_v58 = vsel %vm16939_vm13, %v16914_v23, -inf  ;;  %v3468_v43 = vmul.f32 %v2947_v18, %v2947_v18  ;;  %v3721_v52 = vadd.f32 %v3720_v28, %v3466_v6  ;;  %vm16953_vm15 = vmmov %vm16938_vm11  ;;  %v16955_v18 = vld [vmem:[#allocation357_spill] sm:$0xff] }
 0x67d   : > { %v4244_v45 = vmin.f32 %v3993_v48, %v4243_v33  ;;  %v4759_v8 = vmax.f32 %v4508_v10, %v4758_v62  ;;  %v2950_v29 = vsel %vm16940_vm5, %v16922_v5, 0.0  ;;  %v3204_v53 = vadd.f32 %v3203_v60, %v2948_v59  ;;  %v16963_v62 = vld [vmem:[#allocation178_spill] sm:$0xff] }
 0x67e   : > { %vm16943_vm10 = vcmp.lt.s32.totalorder %v16942_v3, %v9345_v42  ;;  %v4510_v23 = vsel %vm16920_vm0, %v16918_v12, -inf  ;;  %v3469_v17 = vmul.f32 %v2948_v59, %v2948_v59  ;;  %v3722_v20 = vadd.f32 %v3721_v52, %v3467_v47  ;;  %v16960_v59 = vld [vmem:[#allocation358_spill] sm:$0xff] }
 0x67f   : > { %v3995_v15 = vsel %vm16943_vm10, %v16941_v40, inf  ;;  %v4245_v1 = vmin.f32 %v3994_v27, %v4244_v45  ;;  %v4760_v19 = vmax.f32 %v4509_v58, %v4759_v8  ;;  %v2951_v9 = vsel %vm16944_vm4, %v16926_v46, 0.0  ;;  %vm16958_vm8 = vmmov %vm16943_vm10  ;;  %v16968_v8 = vld [vmem:[#allocation179_spill] sm:$0xff] }
 0x680   : > { %v3205_v11 = vadd.f32 %v3204_v53, %v2949_v61  ;;  %vm16947_vm12 = vcmp.lt.s32.totalorder %v16946_v30, %v9345_v42  ;;  %v4511_v12 = vsel %vm16924_vm1, %v16922_v5, -inf  ;;  %v3470_v34 = vmul.f32 %v2949_v61, %v2949_v61  ;;  %v16964_v61 = vld [vmem:[#allocation359_spill] sm:$0xff]  ;;  %vm16966_vm10 = vmmov %vm16958_vm8 }
 0x681   : > { %v3996_v55 = vsel %vm16947_vm12, %v16945_v24, inf  ;;  %v3723_v25 = vadd.f32 %v3722_v20, %v3468_v43  ;;  %v4246_v31 = vmin.f32 %v3995_v15, %v4245_v1  ;;  %v4761_v39 = vmax.f32 %v4510_v23, %v4760_v19  ;;  %vm16962_vm13 = vmmov %vm16947_vm12  ;;  %v16972_v19 = vld [vmem:[#allocation180_spill] sm:$0xff] }
 0x682   : > { %v2952_v49 = vsel %vm16948_vm3, %v16931_v41, 0.0  ;;  %v3206_v51 = vadd.f32 %v3205_v11, %v2950_v29  ;;  %vm16951_vm2 = vcmp.lt.s32.totalorder %v16950_v21, %v9345_v42  ;;  %v4512_v5 = vsel %vm16952_vm14, %v16926_v46, -inf }
 0x683   : > { %v3997_v44 = vsel %vm16951_vm2, %v16949_v0, inf  ;;  %v3471_v32 = vmul.f32 %v2950_v29, %v2950_v29  ;;  %v3724_v63 = vadd.f32 %v3723_v25, %v3469_v17  ;;  %v4247_v4 = vmin.f32 %v3996_v55, %v4246_v31  ;;  %vm16967_vm0 = vmmov %vm16951_vm2  ;;  %v16969_v29 = vld [vmem:[#allocation360_spill] sm:$0xff] }
 0x684   : > { %v4762_v38 = vmax.f32 %v4511_v12, %v4761_v39  ;;  %v2953_v16 = vsel %vm16953_vm15, %v16936_v13, 0.0  ;;  %v3207_v35 = vadd.f32 %v3206_v51, %v2951_v9  ;;  %vm16956_vm9 = vcmp.lt.s32.totalorder %v16955_v18, %v9345_v42  ;;  %vm16975_vm2 = vmmov %vm16967_vm0  ;;  %v16977_v39 = vld [vmem:[#allocation181_spill] sm:$0xff] }
 0x685   : > { %v3998_v57 = vsel %vm16956_vm9, %v16954_v54, inf  ;;  %v4513_v46 = vsel %vm16957_vm7, %v16931_v41, -inf  ;;  %v3472_v50 = vmul.f32 %v2951_v9, %v2951_v9  ;;  %v3725_v56 = vadd.f32 %v3724_v63, %v3470_v34  ;;  %vm16971_vm1 = vmmov %vm16956_vm9  ;;  %v16973_v9 = vld [vmem:[#allocation361_spill] sm:$0xff] }
 0x686   : > { %v4248_v36 = vmin.f32 %v3997_v44, %v4247_v4  ;;  %v4763_v6 = vmax.f32 %v4512_v5, %v4762_v38  ;;  %v2954_v22 = vsel %vm16958_vm8, %v16941_v40, 0.0  ;;  %v3208_v14 = vadd.f32 %v3207_v35, %v2952_v49  ;;  %vm16980_vm9 = vmmov %vm16971_vm1  ;;  %v16982_v38 = vld [vmem:[#allocation182_spill] sm:$0xff] }
 0x687   : > { %vm16961_vm6 = vcmp.lt.s32.totalorder %v16960_v59, %v9345_v42  ;;  %v4514_v41 = vsel %vm16938_vm11, %v16936_v13, -inf  ;;  %v3473_v26 = vmul.f32 %v2952_v49, %v2952_v49  ;;  %v3726_v48 = vadd.f32 %v3725_v56, %v3471_v32  ;;  %v16978_v49 = vld [vmem:[#allocation362_spill] sm:$0xff] }
 0x688   : > { %v3999_v37 = vsel %vm16961_vm6, %v16959_v7, inf  ;;  %v4249_v10 = vmin.f32 %v3998_v57, %v4248_v36  ;;  %v4764_v47 = vmax.f32 %v4513_v46, %v4763_v6  ;;  %v2955_v28 = vsel %vm16962_vm13, %v16945_v24, 0.0  ;;  %vm16976_vm14 = vmmov %vm16961_vm6  ;;  %v16986_v6 = vld [vmem:[#allocation183_spill] sm:$0xff] }
 0x689   : > { %v3209_v33 = vadd.f32 %v3208_v14, %v2953_v16  ;;  %vm16965_vm5 = vcmp.lt.s32.totalorder %v16964_v61, %v9345_v42  ;;  %v4515_v13 = vsel %vm16966_vm10, %v16941_v40, -inf  ;;  %v3474_v2 = vmul.f32 %v2953_v16, %v2953_v16  ;;  %v16983_v16 = vld [vmem:[#allocation363_spill] sm:$0xff] }
 0x68a   : > { %v4000_v60 = vsel %vm16965_vm5, %v16963_v62, inf  ;;  %v3727_v27 = vadd.f32 %v3726_v48, %v3472_v50  ;;  %v4250_v58 = vmin.f32 %v3999_v37, %v4249_v10  ;;  %v4765_v43 = vmax.f32 %v4514_v41, %v4764_v47  ;;  %vm16981_vm7 = vmmov %vm16965_vm5  ;;  %v16990_v47 = vld [vmem:[#allocation184_spill] sm:$0xff] }
 0x68b   : > { %v2956_v52 = vsel %vm16967_vm0, %v16949_v0, 0.0  ;;  %v3210_v45 = vadd.f32 %v3209_v33, %v2954_v22  ;;  %vm16970_vm4 = vcmp.lt.s32.totalorder %v16969_v29, %v9345_v42  ;;  %v4516_v40 = vsel %vm16947_vm12, %v16945_v24, -inf }
 0x68c   : > { %v4001_v53 = vsel %vm16970_vm4, %v16968_v8, inf  ;;  %v3475_v3 = vmul.f32 %v2954_v22, %v2954_v22  ;;  %v3728_v15 = vadd.f32 %v3727_v27, %v3473_v26  ;;  %v4251_v23 = vmin.f32 %v4000_v60, %v4250_v58  ;;  %vm16985_vm11 = vmmov %vm16970_vm4  ;;  %v16987_v22 = vld [vmem:[#allocation364_spill] sm:$0xff] }
 0x68d   : > { %v4766_v17 = vmax.f32 %v4515_v13, %v4765_v43  ;;  %v2957_v20 = vsel %vm16971_vm1, %v16954_v54, 0.0  ;;  %v3211_v1 = vadd.f32 %v3210_v45, %v2955_v28  ;;  %vm16974_vm3 = vcmp.lt.s32.totalorder %v16973_v9, %v9345_v42  ;;  %v16994_v43 = vld [vmem:[#allocation185_spill] sm:$0xff] }
 0x68e   : > { %v4002_v11 = vsel %vm16974_vm3, %v16972_v19, inf  ;;  %v4517_v24 = vsel %vm16975_vm2, %v16949_v0, -inf  ;;  %v3476_v30 = vmul.f32 %v2955_v28, %v2955_v28  ;;  %v3729_v55 = vadd.f32 %v3728_v15, %v3474_v2  ;;  %vm16989_vm10 = vmmov %vm16974_vm3  ;;  %v16991_v28 = vld [vmem:[#allocation365_spill] sm:$0xff] }
 0x68f   : > { %v4252_v12 = vmin.f32 %v4001_v53, %v4251_v23  ;;  %v4767_v34 = vmax.f32 %v4516_v40, %v4766_v17  ;;  %v2958_v25 = vsel %vm16976_vm14, %v16959_v7, 0.0  ;;  %v3212_v31 = vadd.f32 %v3211_v1, %v2956_v52  ;;  %v16998_v17 = vld [vmem:[#allocation186_spill] sm:$0xff] }
 0x690   : > { %vm16979_vm15 = vcmp.lt.s32.totalorder %v16978_v49, %v9345_v42  ;;  %v4518_v0 = vsel %vm16980_vm9, %v16954_v54, -inf  ;;  %v3477_v21 = vmul.f32 %v2956_v52, %v2956_v52  ;;  %v3730_v44 = vadd.f32 %v3729_v55, %v3475_v3  ;;  %v16995_v52 = vld [vmem:[#allocation366_spill] sm:$0xff] }
 0x691   : > { %v4003_v51 = vsel %vm16979_vm15, %v16977_v39, inf  ;;  %v4253_v5 = vmin.f32 %v4002_v11, %v4252_v12  ;;  %v4768_v32 = vmax.f32 %v4517_v24, %v4767_v34  ;;  %v2959_v63 = vsel %vm16981_vm7, %v16963_v62, 0.0  ;;  %vm16993_vm12 = vmmov %vm16979_vm15  ;;  %v17003_v34 = vld [vmem:[#allocation187_spill] sm:$0xff] }
 0x692   : > { %v3213_v4 = vadd.f32 %v3212_v31, %v2957_v20  ;;  %vm16984_vm8 = vcmp.lt.s32.totalorder %v16983_v16, %v9345_v42  ;;  %v4519_v54 = vsel %vm16961_vm6, %v16959_v7, -inf  ;;  %v3478_v18 = vmul.f32 %v2957_v20, %v2957_v20  ;;  %v16999_v20 = vld [vmem:[#allocation367_spill] sm:$0xff]  ;;  %vm17001_vm15 = vmmov %vm16993_vm12 }
 0x693   : > { %v4004_v35 = vsel %vm16984_vm8, %v16982_v38, inf  ;;  %v3731_v57 = vadd.f32 %v3730_v44, %v3476_v30  ;;  %v4254_v46 = vmin.f32 %v4003_v51, %v4253_v5  ;;  %v4769_v50 = vmax.f32 %v4518_v0, %v4768_v32  ;;  %vm16997_vm2 = vmmov %vm16984_vm8  ;;  %v17008_v32 = vld [vmem:[#allocation188_spill] sm:$0xff] }
 0x694   : > { %v2960_v56 = vsel %vm16985_vm11, %v16968_v8, 0.0  ;;  %v3214_v36 = vadd.f32 %v3213_v4, %v2958_v25  ;;  %vm16988_vm13 = vcmp.lt.s32.totalorder %v16987_v22, %v9345_v42  ;;  %v4520_v7 = vsel %vm16965_vm5, %v16963_v62, -inf  ;;  %vm17006_vm8 = vmmov %vm16997_vm2 }
 0x695   : > { %v4005_v14 = vsel %vm16988_vm13, %v16986_v6, inf  ;;  %v3479_v59 = vmul.f32 %v2958_v25, %v2958_v25  ;;  %v3732_v37 = vadd.f32 %v3731_v57, %v3477_v21  ;;  %v4255_v41 = vmin.f32 %v4004_v35, %v4254_v46  ;;  %vm17002_vm9 = vmmov %vm16988_vm13  ;;  %v17004_v25 = vld [vmem:[#allocation368_spill] sm:$0xff] }
 0x696   : > { %v4770_v26 = vmax.f32 %v4519_v54, %v4769_v50  ;;  %v2961_v48 = vsel %vm16989_vm10, %v16972_v19, 0.0  ;;  %v3215_v10 = vadd.f32 %v3214_v36, %v2959_v63  ;;  %vm16992_vm0 = vcmp.lt.s32.totalorder %v16991_v28, %v9345_v42  ;;  %vm17011_vm13 = vmmov %vm17002_vm9  ;;  %v17013_v50 = vld [vmem:[#allocation189_spill] sm:$0xff] }
 0x697   : > { %v4006_v33 = vsel %vm16992_vm0, %v16990_v47, inf  ;;  %v4521_v62 = vsel %vm16970_vm4, %v16968_v8, -inf  ;;  %v3480_v61 = vmul.f32 %v2959_v63, %v2959_v63  ;;  %v3733_v60 = vadd.f32 %v3732_v37, %v3478_v18  ;;  %vm17007_vm6 = vmmov %vm16992_vm0  ;;  %v17009_v63 = vld [vmem:[#allocation369_spill] sm:$0xff] }
 0x698   : > { %v4256_v13 = vmin.f32 %v4005_v14, %v4255_v41  ;;  %v4771_v2 = vmax.f32 %v4520_v7, %v4770_v26  ;;  %v2962_v27 = vsel %vm16993_vm12, %v16977_v39, 0.0  ;;  %v3216_v58 = vadd.f32 %v3215_v10, %v2960_v56  ;;  %v17017_v26 = vld [vmem:[#allocation190_spill] sm:$0xff] }
 0x699   : > { %vm16996_vm1 = vcmp.lt.s32.totalorder %v16995_v52, %v9345_v42  ;;  %v4522_v8 = vsel %vm16974_vm3, %v16972_v19, -inf  ;;  %v3481_v29 = vmul.f32 %v2960_v56, %v2960_v56  ;;  %v3734_v53 = vadd.f32 %v3733_v60, %v3479_v59  ;;  %v17014_v56 = vld [vmem:[#allocation370_spill] sm:$0xff] }
 0x69a   : > { %v4007_v45 = vsel %vm16996_vm1, %v16994_v43, inf  ;;  %v4257_v40 = vmin.f32 %v4006_v33, %v4256_v13  ;;  %v4772_v3 = vmax.f32 %v4521_v62, %v4771_v2  ;;  %v2963_v15 = vsel %vm16997_vm2, %v16982_v38, 0.0  ;;  %vm17012_vm5 = vmmov %vm16996_vm1  ;;  %v17021_v2 = vld [vmem:[#allocation191_spill] sm:$0xff] }
 0x69b   : > { %v3217_v23 = vadd.f32 %v3216_v58, %v2961_v48  ;;  %vm17000_vm14 = vcmp.lt.s32.totalorder %v16999_v20, %v9345_v42  ;;  %v4523_v19 = vsel %vm17001_vm15, %v16977_v39, -inf  ;;  %v3482_v9 = vmul.f32 %v2961_v48, %v2961_v48  ;;  %v17018_v48 = vld [vmem:[#allocation371_spill] sm:$0xff] }
 0x69c   : > { %v4008_v1 = vsel %vm17000_vm14, %v16998_v17, inf  ;;  %v3735_v11 = vadd.f32 %v3734_v53, %v3480_v61  ;;  %v4258_v24 = vmin.f32 %v4007_v45, %v4257_v40  ;;  %v4773_v30 = vmax.f32 %v4522_v8, %v4772_v3  ;;  %vm17016_vm4 = vmmov %vm17000_vm14  ;;  %v17026_v3 = vld [vmem:[#allocation192_spill] sm:$0xff] }
 0x69d   : > { %v2964_v55 = vsel %vm17002_vm9, %v16986_v6, 0.0  ;;  %v3218_v12 = vadd.f32 %v3217_v23, %v2962_v27  ;;  %vm17005_vm7 = vcmp.lt.s32.totalorder %v17004_v25, %v9345_v42  ;;  %v4524_v39 = vsel %vm17006_vm8, %v16982_v38, -inf  ;;  %vm17024_vm14 = vmmov %vm17016_vm4 }
 0x69e   : > { %v4009_v31 = vsel %vm17005_vm7, %v17003_v34, inf  ;;  %v3483_v49 = vmul.f32 %v2962_v27, %v2962_v27  ;;  %v3736_v51 = vadd.f32 %v3735_v11, %v3481_v29  ;;  %v4259_v0 = vmin.f32 %v4008_v1, %v4258_v24  ;;  %vm17020_vm3 = vmmov %vm17005_vm7  ;;  %v17022_v27 = vld [vmem:[#allocation372_spill] sm:$0xff] }
 0x69f   : > { %v4774_v21 = vmax.f32 %v4523_v19, %v4773_v30  ;;  %v2965_v44 = vsel %vm17007_vm6, %v16990_v47, 0.0  ;;  %v3219_v5 = vadd.f32 %v3218_v12, %v2963_v15  ;;  %vm17010_vm11 = vcmp.lt.s32.totalorder %v17009_v63, %v9345_v42  ;;  %vm17029_vm7 = vmmov %vm17020_vm3  ;;  %v17031_v30 = vld [vmem:[#allocation193_spill] sm:$0xff] }
 0x6a0   : > { %v4010_v4 = vsel %vm17010_vm11, %v17008_v32, inf  ;;  %v4525_v38 = vsel %vm17011_vm13, %v16986_v6, -inf  ;;  %v3484_v16 = vmul.f32 %v2963_v15, %v2963_v15  ;;  %v3737_v35 = vadd.f32 %v3736_v51, %v3482_v9  ;;  %vm17025_vm15 = vmmov %vm17010_vm11  ;;  %v17027_v15 = vld [vmem:[#allocation373_spill] sm:$0xff] }
 0x6a1   : > { %v4260_v54 = vmin.f32 %v4009_v31, %v4259_v0  ;;  %v4775_v18 = vmax.f32 %v4524_v39, %v4774_v21  ;;  %v2966_v57 = vsel %vm17012_vm5, %v16994_v43, 0.0  ;;  %v3220_v46 = vadd.f32 %v3219_v5, %v2964_v55  ;;  %v17035_v21 = vld [vmem:[#allocation194_spill] sm:$0xff] }
 0x6a2   : > { %vm17015_vm10 = vcmp.lt.s32.totalorder %v17014_v56, %v9345_v42  ;;  %v4526_v6 = vsel %vm16992_vm0, %v16990_v47, -inf  ;;  %v3485_v22 = vmul.f32 %v2964_v55, %v2964_v55  ;;  %v3738_v14 = vadd.f32 %v3737_v35, %v3483_v49  ;;  %v17032_v55 = vld [vmem:[#allocation374_spill] sm:$0xff] }
 0x6a3   : > { %v4011_v36 = vsel %vm17015_vm10, %v17013_v50, inf  ;;  %v4261_v7 = vmin.f32 %v4010_v4, %v4260_v54  ;;  %v4776_v59 = vmax.f32 %v4525_v38, %v4775_v18  ;;  %v2967_v37 = vsel %vm17016_vm4, %v16998_v17, 0.0  ;;  %vm17030_vm8 = vmmov %vm17015_vm10  ;;  %v17040_v18 = vld [vmem:[#allocation195_spill] sm:$0xff] }
 0x6a4   : > { %v3221_v41 = vadd.f32 %v3220_v46, %v2965_v44  ;;  %vm17019_vm12 = vcmp.lt.s32.totalorder %v17018_v48, %v9345_v42  ;;  %v4527_v47 = vsel %vm16996_vm1, %v16994_v43, -inf  ;;  %v3486_v28 = vmul.f32 %v2965_v44, %v2965_v44  ;;  %v17036_v44 = vld [vmem:[#allocation375_spill] sm:$0xff]  ;;  %vm17038_vm10 = vmmov %vm17030_vm8 }
 0x6a5   : > { %v4012_v10 = vsel %vm17019_vm12, %v17017_v26, inf  ;;  %v3739_v33 = vadd.f32 %v3738_v14, %v3484_v16  ;;  %v4262_v62 = vmin.f32 %v4011_v36, %v4261_v7  ;;  %v4777_v61 = vmax.f32 %v4526_v6, %v4776_v59  ;;  %vm17034_vm13 = vmmov %vm17019_vm12  ;;  %v17044_v59 = vld [vmem:[#allocation196_spill] sm:$0xff] }
 0x6a6   : > { %v2968_v60 = vsel %vm17020_vm3, %v17003_v34, 0.0  ;;  %v3222_v13 = vadd.f32 %v3221_v41, %v2966_v57  ;;  %vm17023_vm2 = vcmp.lt.s32.totalorder %v17022_v27, %v9345_v42  ;;  %v4528_v43 = vsel %vm17024_vm14, %v16998_v17, -inf }
 0x6a7   : > { %v4013_v58 = vsel %vm17023_vm2, %v17021_v2, inf  ;;  %v3487_v52 = vmul.f32 %v2966_v57, %v2966_v57  ;;  %v3740_v45 = vadd.f32 %v3739_v33, %v3485_v22  ;;  %v4263_v8 = vmin.f32 %v4012_v10, %v4262_v62  ;;  %vm17039_vm0 = vmmov %vm17023_vm2  ;;  %v17041_v57 = vld [vmem:[#allocation376_spill] sm:$0xff] }
 0x6a8   : > { %v4778_v29 = vmax.f32 %v4527_v47, %v4777_v61  ;;  %v2969_v53 = vsel %vm17025_vm15, %v17008_v32, 0.0  ;;  %v3223_v40 = vadd.f32 %v3222_v13, %v2967_v37  ;;  %vm17028_vm9 = vcmp.lt.s32.totalorder %v17027_v15, %v9345_v42  ;;  %vm17047_vm2 = vmmov %vm17039_vm0  ;;  %v17049_v61 = vld [vmem:[#allocation197_spill] sm:$0xff] }
 0x6a9   : > { %v4014_v23 = vsel %vm17028_vm9, %v17026_v3, inf  ;;  %v4529_v17 = vsel %vm17029_vm7, %v17003_v34, -inf  ;;  %v3488_v20 = vmul.f32 %v2967_v37, %v2967_v37  ;;  %v3741_v1 = vadd.f32 %v3740_v45, %v3486_v28  ;;  %vm17043_vm1 = vmmov %vm17028_vm9  ;;  %v17045_v37 = vld [vmem:[#allocation377_spill] sm:$0xff] }
 0x6aa   : > { %v4264_v19 = vmin.f32 %v4013_v58, %v4263_v8  ;;  %v4779_v9 = vmax.f32 %v4528_v43, %v4778_v29  ;;  %v2970_v11 = vsel %vm17030_vm8, %v17013_v50, 0.0  ;;  %v3224_v24 = vadd.f32 %v3223_v40, %v2968_v60  ;;  %vm17052_vm9 = vmmov %vm17043_vm1  ;;  %v17054_v29 = vld [vmem:[#allocation198_spill] sm:$0xff] }
 0x6ab   : > { %vm17033_vm6 = vcmp.lt.s32.totalorder %v17032_v55, %v9345_v42  ;;  %v4530_v34 = vsel %vm17010_vm11, %v17008_v32, -inf  ;;  %v3489_v25 = vmul.f32 %v2968_v60, %v2968_v60  ;;  %v3742_v31 = vadd.f32 %v3741_v1, %v3487_v52  ;;  %v17050_v60 = vld [vmem:[#allocation378_spill] sm:$0xff] }
 0x6ac   : > { %v4015_v12 = vsel %vm17033_vm6, %v17031_v30, inf  ;;  %v4265_v39 = vmin.f32 %v4014_v23, %v4264_v19  ;;  %v4780_v49 = vmax.f32 %v4529_v17, %v4779_v9  ;;  %v2971_v51 = vsel %vm17034_vm13, %v17017_v26, 0.0  ;;  %vm17048_vm14 = vmmov %vm17033_vm6  ;;  %v17058_v9 = vld [vmem:[#allocation199_spill] sm:$0xff] }
 0x6ad   : > { %v3225_v0 = vadd.f32 %v3224_v24, %v2969_v53  ;;  %vm17037_vm5 = vcmp.lt.s32.totalorder %v17036_v44, %v9345_v42  ;;  %v4531_v32 = vsel %vm17038_vm10, %v17013_v50, -inf  ;;  %v3490_v63 = vmul.f32 %v2969_v53, %v2969_v53  ;;  %v17055_v53 = vld [vmem:[#allocation379_spill] sm:$0xff] }
 0x6ae   : > { %v4016_v5 = vsel %vm17037_vm5, %v17035_v21, inf  ;;  %v3743_v4 = vadd.f32 %v3742_v31, %v3488_v20  ;;  %v4266_v38 = vmin.f32 %v4015_v12, %v4265_v39  ;;  %v4781_v16 = vmax.f32 %v4530_v34, %v4780_v49  ;;  %vm17053_vm7 = vmmov %vm17037_vm5  ;;  %v17062_v49 = vld [vmem:[#allocation200_spill] sm:$0xff] }
 0x6af   : > { %v2972_v35 = vsel %vm17039_vm0, %v17021_v2, 0.0  ;;  %v3226_v54 = vadd.f32 %v3225_v0, %v2970_v11  ;;  %vm17042_vm4 = vcmp.lt.s32.totalorder %v17041_v57, %v9345_v42  ;;  %v4532_v50 = vsel %vm17019_vm12, %v17017_v26, -inf }
 0x6b0   : > { %v4017_v46 = vsel %vm17042_vm4, %v17040_v18, inf  ;;  %v3491_v56 = vmul.f32 %v2970_v11, %v2970_v11  ;;  %v3744_v36 = vadd.f32 %v3743_v4, %v3489_v25  ;;  %v4267_v6 = vmin.f32 %v4016_v5, %v4266_v38  ;;  %vm17057_vm11 = vmmov %vm17042_vm4  ;;  %v17059_v11 = vld [vmem:[#allocation380_spill] sm:$0xff] }
 0x6b1   : > { %v4782_v22 = vmax.f32 %v4531_v32, %v4781_v16  ;;  %v2973_v14 = vsel %vm17043_vm1, %v17026_v3, 0.0  ;;  %v3227_v7 = vadd.f32 %v3226_v54, %v2971_v51  ;;  %vm17046_vm3 = vcmp.lt.s32.totalorder %v17045_v37, %v9345_v42  ;;  %v17066_v16 = vld [vmem:[#allocation201_spill] sm:$0xff] }
 0x6b2   : > { %v4018_v41 = vsel %vm17046_vm3, %v17044_v59, inf  ;;  %v4533_v26 = vsel %vm17047_vm2, %v17021_v2, -inf  ;;  %v3492_v48 = vmul.f32 %v2971_v51, %v2971_v51  ;;  %v3745_v10 = vadd.f32 %v3744_v36, %v3490_v63  ;;  %vm17061_vm10 = vmmov %vm17046_vm3  ;;  %v17063_v51 = vld [vmem:[#allocation381_spill] sm:$0xff] }
 0x6b3   : > { %v4268_v47 = vmin.f32 %v4017_v46, %v4267_v6  ;;  %v4783_v28 = vmax.f32 %v4532_v50, %v4782_v22  ;;  %v2974_v33 = vsel %vm17048_vm14, %v17031_v30, 0.0  ;;  %v3228_v62 = vadd.f32 %v3227_v7, %v2972_v35  ;;  %v17070_v22 = vld [vmem:[#allocation202_spill] sm:$0xff] }
 0x6b4   : > { %vm17051_vm15 = vcmp.lt.s32.totalorder %v17050_v60, %v9345_v42  ;;  %v4534_v2 = vsel %vm17052_vm9, %v17026_v3, -inf  ;;  %v3493_v27 = vmul.f32 %v2972_v35, %v2972_v35  ;;  %v3746_v58 = vadd.f32 %v3745_v10, %v3491_v56  ;;  %v17067_v35 = vld [vmem:[#allocation382_spill] sm:$0xff] }
 0x6b5   : > { %v4019_v13 = vsel %vm17051_vm15, %v17049_v61, inf  ;;  %v4269_v43 = vmin.f32 %v4018_v41, %v4268_v47  ;;  %v4784_v52 = vmax.f32 %v4533_v26, %v4783_v28  ;;  %v2975_v45 = vsel %vm17053_vm7, %v17035_v21, 0.0  ;;  %vm17065_vm12 = vmmov %vm17051_vm15  ;;  %v17075_v28 = vld [vmem:[#allocation203_spill] sm:$0xff] }
 0x6b6   : > { %v3229_v8 = vadd.f32 %v3228_v62, %v2973_v14  ;;  %vm17056_vm8 = vcmp.lt.s32.totalorder %v17055_v53, %v9345_v42  ;;  %v4535_v3 = vsel %vm17033_vm6, %v17031_v30, -inf  ;;  %v3494_v15 = vmul.f32 %v2973_v14, %v2973_v14  ;;  %v17071_v14 = vld [vmem:[#allocation383_spill] sm:$0xff]  ;;  %vm17073_vm15 = vmmov %vm17065_vm12 }
 0x6b7   : > { %v4020_v40 = vsel %vm17056_vm8, %v17054_v29, inf  ;;  %v3747_v23 = vadd.f32 %v3746_v58, %v3492_v48  ;;  %v4270_v17 = vmin.f32 %v4019_v13, %v4269_v43  ;;  %v4785_v20 = vmax.f32 %v4534_v2, %v4784_v52  ;;  %vm17069_vm2 = vmmov %vm17056_vm8  ;;  %v17080_v52 = vld [vmem:[#allocation204_spill] sm:$0xff] }
 0x6b8   : > { %v2976_v1 = vsel %vm17057_vm11, %v17040_v18, 0.0  ;;  %v3230_v19 = vadd.f32 %v3229_v8, %v2974_v33  ;;  %vm17060_vm13 = vcmp.lt.s32.totalorder %v17059_v11, %v9345_v42  ;;  %v4536_v30 = vsel %vm17037_vm5, %v17035_v21, -inf  ;;  %vm17078_vm8 = vmmov %vm17069_vm2 }
 0x6b9   : > { %v4021_v24 = vsel %vm17060_vm13, %v17058_v9, inf  ;;  %v3495_v55 = vmul.f32 %v2974_v33, %v2974_v33  ;;  %v3748_v12 = vadd.f32 %v3747_v23, %v3493_v27  ;;  %v4271_v34 = vmin.f32 %v4020_v40, %v4270_v17  ;;  %vm17074_vm9 = vmmov %vm17060_vm13  ;;  %v17076_v33 = vld [vmem:[#allocation384_spill] sm:$0xff] }
 0x6ba   : > { %v4786_v25 = vmax.f32 %v4535_v3, %v4785_v20  ;;  %v2977_v31 = vsel %vm17061_vm10, %v17044_v59, 0.0  ;;  %v3231_v39 = vadd.f32 %v3230_v19, %v2975_v45  ;;  %vm17064_vm0 = vcmp.lt.s32.totalorder %v17063_v51, %v9345_v42  ;;  %vm17083_vm13 = vmmov %vm17074_vm9  ;;  %v17085_v20 = vld [vmem:[#allocation205_spill] sm:$0xff] }
 0x6bb   : > { %v4022_v0 = vsel %vm17064_vm0, %v17062_v49, inf  ;;  %v4537_v21 = vsel %vm17042_vm4, %v17040_v18, -inf  ;;  %v3496_v44 = vmul.f32 %v2975_v45, %v2975_v45  ;;  %v3749_v5 = vadd.f32 %v3748_v12, %v3494_v15  ;;  %vm17079_vm6 = vmmov %vm17064_vm0  ;;  %v17081_v45 = vld [vmem:[#allocation385_spill] sm:$0xff] }
 0x6bc   : > { %v4272_v32 = vmin.f32 %v4021_v24, %v4271_v34  ;;  %v4787_v63 = vmax.f32 %v4536_v30, %v4786_v25  ;;  %v2978_v4 = vsel %vm17065_vm12, %v17049_v61, 0.0  ;;  %v3232_v38 = vadd.f32 %v3231_v39, %v2976_v1  ;;  %v17089_v25 = vld [vmem:[#allocation206_spill] sm:$0xff] }
 0x6bd   : > { %vm17068_vm1 = vcmp.lt.s32.totalorder %v17067_v35, %v9345_v42  ;;  %v4538_v18 = vsel %vm17046_vm3, %v17044_v59, -inf  ;;  %v3497_v57 = vmul.f32 %v2976_v1, %v2976_v1  ;;  %v3750_v46 = vadd.f32 %v3749_v5, %v3495_v55  ;;  %v17086_v1 = vld [vmem:[#allocation386_spill] sm:$0xff] }
 0x6be   : > { %v4023_v54 = vsel %vm17068_vm1, %v17066_v16, inf  ;;  %v4273_v50 = vmin.f32 %v4022_v0, %v4272_v32  ;;  %v4788_v56 = vmax.f32 %v4537_v21, %v4787_v63  ;;  %v2979_v36 = vsel %vm17069_vm2, %v17054_v29, 0.0  ;;  %vm17084_vm5 = vmmov %vm17068_vm1  ;;  %v17093_v63 = vld [vmem:[#allocation207_spill] sm:$0xff] }
 0x6bf   : > { %v3233_v6 = vadd.f32 %v3232_v38, %v2977_v31  ;;  %vm17072_vm14 = vcmp.lt.s32.totalorder %v17071_v14, %v9345_v42  ;;  %v4539_v59 = vsel %vm17073_vm15, %v17049_v61, -inf  ;;  %v3498_v37 = vmul.f32 %v2977_v31, %v2977_v31  ;;  %v17090_v31 = vld [vmem:[#allocation387_spill] sm:$0xff] }
 0x6c0   : > { %v4024_v7 = vsel %vm17072_vm14, %v17070_v22, inf  ;;  %v3751_v41 = vadd.f32 %v3750_v46, %v3496_v44  ;;  %v4274_v26 = vmin.f32 %v4023_v54, %v4273_v50  ;;  %v4789_v48 = vmax.f32 %v4538_v18, %v4788_v56  ;;  %vm17088_vm4 = vmmov %vm17072_vm14  ;;  %v17098_v56 = vld [vmem:[#allocation208_spill] sm:$0xff] }
 0x6c1   : > { %v2980_v10 = vsel %vm17074_vm9, %v17058_v9, 0.0  ;;  %v3234_v47 = vadd.f32 %v3233_v6, %v2978_v4  ;;  %vm17077_vm7 = vcmp.lt.s32.totalorder %v17076_v33, %v9345_v42  ;;  %v4540_v61 = vsel %vm17078_vm8, %v17054_v29, -inf  ;;  %vm17096_vm14 = vmmov %vm17088_vm4 }
 0x6c2   : > { %v4025_v62 = vsel %vm17077_vm7, %v17075_v28, inf  ;;  %v3499_v60 = vmul.f32 %v2978_v4, %v2978_v4  ;;  %v3752_v13 = vadd.f32 %v3751_v41, %v3497_v57  ;;  %v4275_v2 = vmin.f32 %v4024_v7, %v4274_v26  ;;  %vm17092_vm3 = vmmov %vm17077_vm7  ;;  %v17094_v4 = vld [vmem:[#allocation388_spill] sm:$0xff] }
 0x6c3   : > { %v4790_v27 = vmax.f32 %v4539_v59, %v4789_v48  ;;  %v2981_v58 = vsel %vm17079_vm6, %v17062_v49, 0.0  ;;  %v3235_v43 = vadd.f32 %v3234_v47, %v2979_v36  ;;  %vm17082_vm11 = vcmp.lt.s32.totalorder %v17081_v45, %v9345_v42  ;;  %vm17101_vm7 = vmmov %vm17092_vm3  ;;  %v17103_v48 = vld [vmem:[#allocation209_spill] sm:$0xff] }
 0x6c4   : > { %v4026_v8 = vsel %vm17082_vm11, %v17080_v52, inf  ;;  %v4541_v29 = vsel %vm17083_vm13, %v17058_v9, -inf  ;;  %v3500_v53 = vmul.f32 %v2979_v36, %v2979_v36  ;;  %v3753_v40 = vadd.f32 %v3752_v13, %v3498_v37  ;;  %vm17097_vm15 = vmmov %vm17082_vm11  ;;  %v17099_v36 = vld [vmem:[#allocation389_spill] sm:$0xff] }
 0x6c5   : > { %v4276_v3 = vmin.f32 %v4025_v62, %v4275_v2  ;;  %v4791_v15 = vmax.f32 %v4540_v61, %v4790_v27  ;;  %v2982_v23 = vsel %vm17084_vm5, %v17066_v16, 0.0  ;;  %v3236_v17 = vadd.f32 %v3235_v43, %v2980_v10  ;;  %v17107_v27 = vld [vmem:[#allocation210_spill] sm:$0xff] }
 0x6c6   : > { %vm17087_vm10 = vcmp.lt.s32.totalorder %v17086_v1, %v9345_v42  ;;  %v4542_v9 = vsel %vm17064_vm0, %v17062_v49, -inf  ;;  %v3501_v11 = vmul.f32 %v2980_v10, %v2980_v10  ;;  %v3754_v24 = vadd.f32 %v3753_v40, %v3499_v60  ;;  %v17104_v10 = vld [vmem:[#allocation390_spill] sm:$0xff] }
 0x6c7   : > { %v4027_v19 = vsel %vm17087_vm10, %v17085_v20, inf  ;;  %v4277_v30 = vmin.f32 %v4026_v8, %v4276_v3  ;;  %v4792_v55 = vmax.f32 %v4541_v29, %v4791_v15  ;;  %v2983_v12 = vsel %vm17088_vm4, %v17070_v22, 0.0  ;;  %vm17102_vm8 = vmmov %vm17087_vm10  ;;  %v17112_v15 = vld [vmem:[#allocation211_spill] sm:$0xff] }
 0x6c8   : > { %v3237_v34 = vadd.f32 %v3236_v17, %v2981_v58  ;;  %vm17091_vm12 = vcmp.lt.s32.totalorder %v17090_v31, %v9345_v42  ;;  %v4543_v49 = vsel %vm17068_vm1, %v17066_v16, -inf  ;;  %v3502_v51 = vmul.f32 %v2981_v58, %v2981_v58  ;;  %v17108_v58 = vld [vmem:[#allocation391_spill] sm:$0xff]  ;;  %vm17110_vm10 = vmmov %vm17102_vm8 }
 0x6c9   : > { %v4028_v39 = vsel %vm17091_vm12, %v17089_v25, inf  ;;  %v3755_v0 = vadd.f32 %v3754_v24, %v3500_v53  ;;  %v4278_v21 = vmin.f32 %v4027_v19, %v4277_v30  ;;  %v4793_v44 = vmax.f32 %v4542_v9, %v4792_v55  ;;  %vm17106_vm13 = vmmov %vm17091_vm12  ;;  %v17116_v55 = vld [vmem:[#allocation212_spill] sm:$0xff] }
 0x6ca   : > { %v2984_v5 = vsel %vm17092_vm3, %v17075_v28, 0.0  ;;  %v3238_v32 = vadd.f32 %v3237_v34, %v2982_v23  ;;  %vm17095_vm2 = vcmp.lt.s32.totalorder %v17094_v4, %v9345_v42  ;;  %v4544_v16 = vsel %vm17096_vm14, %v17070_v22, -inf }
 0x6cb   : > { %v4029_v38 = vsel %vm17095_vm2, %v17093_v63, inf  ;;  %v3503_v35 = vmul.f32 %v2982_v23, %v2982_v23  ;;  %v3756_v54 = vadd.f32 %v3755_v0, %v3501_v11  ;;  %v4279_v18 = vmin.f32 %v4028_v39, %v4278_v21  ;;  %vm17111_vm0 = vmmov %vm17095_vm2  ;;  %v17113_v23 = vld [vmem:[#allocation392_spill] sm:$0xff] }
 0x6cc   : > { %v4794_v57 = vmax.f32 %v4543_v49, %v4793_v44  ;;  %v2985_v46 = vsel %vm17097_vm15, %v17080_v52, 0.0  ;;  %v3239_v50 = vadd.f32 %v3238_v32, %v2983_v12  ;;  %vm17100_vm9 = vcmp.lt.s32.totalorder %v17099_v36, %v9345_v42  ;;  %vm17119_vm2 = vmmov %vm17111_vm0  ;;  %v17121_v44 = vld [vmem:[#allocation213_spill] sm:$0xff] }
 0x6cd   : > { %v4030_v6 = vsel %vm17100_vm9, %v17098_v56, inf  ;;  %v4545_v22 = vsel %vm17101_vm7, %v17075_v28, -inf  ;;  %v3504_v14 = vmul.f32 %v2983_v12, %v2983_v12  ;;  %v3757_v7 = vadd.f32 %v3756_v54, %v3502_v51  ;;  %vm17115_vm1 = vmmov %vm17100_vm9  ;;  %v17117_v12 = vld [vmem:[#allocation393_spill] sm:$0xff] }
 0x6ce   : > { %v4280_v59 = vmin.f32 %v4029_v38, %v4279_v18  ;;  %v4795_v37 = vmax.f32 %v4544_v16, %v4794_v57  ;;  %v2986_v41 = vsel %vm17102_vm8, %v17085_v20, 0.0  ;;  %v3240_v26 = vadd.f32 %v3239_v50, %v2984_v5  ;;  %vm17124_vm9 = vmmov %vm17115_vm1  ;;  %v17126_v57 = vld [vmem:[#allocation214_spill] sm:$0xff] }
 0x6cf   : > { %vm17105_vm6 = vcmp.lt.s32.totalorder %v17104_v10, %v9345_v42  ;;  %v4546_v28 = vsel %vm17082_vm11, %v17080_v52, -inf  ;;  %v3505_v33 = vmul.f32 %v2984_v5, %v2984_v5  ;;  %v3758_v62 = vadd.f32 %v3757_v7, %v3503_v35  ;;  %v17122_v5 = vld [vmem:[#allocation394_spill] sm:$0xff] }
 0x6d0   : > { %v4031_v47 = vsel %vm17105_vm6, %v17103_v48, inf  ;;  %v4281_v61 = vmin.f32 %v4030_v6, %v4280_v59  ;;  %v4796_v60 = vmax.f32 %v4545_v22, %v4795_v37  ;;  %v2987_v13 = vsel %vm17106_vm13, %v17089_v25, 0.0  ;;  %vm17120_vm14 = vmmov %vm17105_vm6  ;;  %v17130_v37 = vld [vmem:[#allocation215_spill] sm:$0xff] }
 0x6d1   : > { %v3241_v2 = vadd.f32 %v3240_v26, %v2985_v46  ;;  %vm17109_vm5 = vcmp.lt.s32.totalorder %v17108_v58, %v9345_v42  ;;  %v4547_v52 = vsel %vm17110_vm10, %v17085_v20, -inf  ;;  %v3506_v45 = vmul.f32 %v2985_v46, %v2985_v46  ;;  %v17127_v46 = vld [vmem:[#allocation395_spill] sm:$0xff] }
 0x6d2   : > { %v4032_v43 = vsel %vm17109_vm5, %v17107_v27, inf  ;;  %v3759_v8 = vadd.f32 %v3758_v62, %v3504_v14  ;;  %v4282_v29 = vmin.f32 %v4031_v47, %v4281_v61  ;;  %v4797_v53 = vmax.f32 %v4546_v28, %v4796_v60  ;;  %vm17125_vm7 = vmmov %vm17109_vm5  ;;  %v17134_v60 = vld [vmem:[#allocation216_spill] sm:$0xff] }
 0x6d3   : > { %v2988_v40 = vsel %vm17111_vm0, %v17093_v63, 0.0  ;;  %v3242_v3 = vadd.f32 %v3241_v2, %v2986_v41  ;;  %vm17114_vm4 = vcmp.lt.s32.totalorder %v17113_v23, %v9345_v42  ;;  %v4548_v20 = vsel %vm17091_vm12, %v17089_v25, -inf }
 0x6d4   : > { %v4033_v17 = vsel %vm17114_vm4, %v17112_v15, inf  ;;  %v3507_v1 = vmul.f32 %v2986_v41, %v2986_v41  ;;  %v3760_v19 = vadd.f32 %v3759_v8, %v3505_v33  ;;  %v4283_v9 = vmin.f32 %v4032_v43, %v4282_v29  ;;  %vm17129_vm11 = vmmov %vm17114_vm4  ;;  %v17131_v41 = vld [vmem:[#allocation396_spill] sm:$0xff] }
 0x6d5   : > { %v4798_v11 = vmax.f32 %v4547_v52, %v4797_v53  ;;  %v2989_v24 = vsel %vm17115_vm1, %v17098_v56, 0.0  ;;  %v3243_v30 = vadd.f32 %v3242_v3, %v2987_v13  ;;  %vm17118_vm3 = vcmp.lt.s32.totalorder %v17117_v12, %v9345_v42  ;;  %v17138_v53 = vld [vmem:[#allocation217_spill] sm:$0xff] }
 0x6d6   : > { %v4034_v34 = vsel %vm17118_vm3, %v17116_v55, inf  ;;  %v4549_v25 = vsel %vm17119_vm2, %v17093_v63, -inf  ;;  %v3508_v31 = vmul.f32 %v2987_v13, %v2987_v13  ;;  %v3761_v39 = vadd.f32 %v3760_v19, %v3506_v45  ;;  %vm17133_vm10 = vmmov %vm17118_vm3  ;;  %v17135_v13 = vld [vmem:[#allocation397_spill] sm:$0xff] }
 0x6d7   : > { %v4284_v49 = vmin.f32 %v4033_v17, %v4283_v9  ;;  %v4799_v51 = vmax.f32 %v4548_v20, %v4798_v11  ;;  %v2990_v0 = vsel %vm17120_vm14, %v17103_v48, 0.0  ;;  %v3244_v21 = vadd.f32 %v3243_v30, %v2988_v40  ;;  %v17142_v11 = vld [vmem:[#allocation218_spill] sm:$0xff] }
 0x6d8   : > { %vm17123_vm15 = vcmp.lt.s32.totalorder %v17122_v5, %v9345_v42  ;;  %v4550_v63 = vsel %vm17124_vm9, %v17098_v56, -inf  ;;  %v3509_v4 = vmul.f32 %v2988_v40, %v2988_v40  ;;  %v3762_v38 = vadd.f32 %v3761_v39, %v3507_v1  ;;  %v17139_v40 = vld [vmem:[#allocation398_spill] sm:$0xff] }
 0x6d9   : > { %v4035_v32 = vsel %vm17123_vm15, %v17121_v44, inf  ;;  %v4285_v16 = vmin.f32 %v4034_v34, %v4284_v49  ;;  %v4800_v35 = vmax.f32 %v4549_v25, %v4799_v51  ;;  %v2991_v54 = vsel %vm17125_vm7, %v17107_v27, 0.0  ;;  %vm17137_vm12 = vmmov %vm17123_vm15  ;;  %v17147_v51 = vld [vmem:[#allocation219_spill] sm:$0xff] }
 0x6da   : > { %v3245_v18 = vadd.f32 %v3244_v21, %v2989_v24  ;;  %vm17128_vm8 = vcmp.lt.s32.totalorder %v17127_v46, %v9345_v42  ;;  %v4551_v56 = vsel %vm17105_vm6, %v17103_v48, -inf  ;;  %v3510_v36 = vmul.f32 %v2989_v24, %v2989_v24  ;;  %v17143_v24 = vld [vmem:[#allocation399_spill] sm:$0xff]  ;;  %vm17145_vm15 = vmmov %vm17137_vm12 }
 0x6db   : > { %v4036_v50 = vsel %vm17128_vm8, %v17126_v57, inf  ;;  %v3763_v6 = vadd.f32 %v3762_v38, %v3508_v31  ;;  %v4286_v22 = vmin.f32 %v4035_v32, %v4285_v16  ;;  %v4801_v14 = vmax.f32 %v4550_v63, %v4800_v35  ;;  %vm17141_vm2 = vmmov %vm17128_vm8  ;;  %v17152_v35 = vld [vmem:[#allocation220_spill] sm:$0xff] }
 0x6dc   : > { %v2992_v7 = vsel %vm17129_vm11, %v17112_v15, 0.0  ;;  %v3246_v59 = vadd.f32 %v3245_v18, %v2990_v0  ;;  %vm17132_vm13 = vcmp.lt.s32.totalorder %v17131_v41, %v9345_v42  ;;  %v4552_v48 = vsel %vm17109_vm5, %v17107_v27, -inf  ;;  %vm17150_vm8 = vmmov %vm17141_vm2 }
 0x6dd   : > { %v4037_v26 = vsel %vm17132_vm13, %v17130_v37, inf  ;;  %v3511_v10 = vmul.f32 %v2990_v0, %v2990_v0  ;;  %v3764_v47 = vadd.f32 %v3763_v6, %v3509_v4  ;;  %v4287_v28 = vmin.f32 %v4036_v50, %v4286_v22  ;;  %vm17146_vm9 = vmmov %vm17132_vm13  ;;  %v17148_v0 = vld [vmem:[#allocation400_spill] sm:$0xff] }
 0x6de   : > { %v4802_v33 = vmax.f32 %v4551_v56, %v4801_v14  ;;  %v2993_v62 = vsel %vm17133_vm10, %v17116_v55, 0.0  ;;  %v3247_v61 = vadd.f32 %v3246_v59, %v2991_v54  ;;  %vm17136_vm0 = vcmp.lt.s32.totalorder %v17135_v13, %v9345_v42  ;;  %vm17155_vm13 = vmmov %vm17146_vm9  ;;  %v17157_v14 = vld [vmem:[#allocation221_spill] sm:$0xff] }
 0x6df   : > { %v4038_v2 = vsel %vm17136_vm0, %v17134_v60, inf  ;;  %v4553_v27 = vsel %vm17114_vm4, %v17112_v15, -inf  ;;  %v3512_v58 = vmul.f32 %v2991_v54, %v2991_v54  ;;  %v3765_v43 = vadd.f32 %v3764_v47, %v3510_v36  ;;  %vm17151_vm6 = vmmov %vm17136_vm0  ;;  %v17153_v54 = vld [vmem:[#allocation401_spill] sm:$0xff] }
 0x6e0   : > { %v4288_v52 = vmin.f32 %v4037_v26, %v4287_v28  ;;  %v4803_v45 = vmax.f32 %v4552_v48, %v4802_v33  ;;  %v2994_v8 = vsel %vm17137_vm12, %v17121_v44, 0.0  ;;  %v3248_v29 = vadd.f32 %v3247_v61, %v2992_v7  ;;  %v17161_v33 = vld [vmem:[#allocation222_spill] sm:$0xff] }
 0x6e1   : > { %vm17140_vm1 = vcmp.lt.s32.totalorder %v17139_v40, %v9345_v42  ;;  %v4554_v15 = vsel %vm17118_vm3, %v17116_v55, -inf  ;;  %v3513_v23 = vmul.f32 %v2992_v7, %v2992_v7  ;;  %v3766_v17 = vadd.f32 %v3765_v43, %v3511_v10  ;;  %v17158_v7 = vld [vmem:[#allocation402_spill] sm:$0xff] }
 0x6e2   : > { %v4039_v3 = vsel %vm17140_vm1, %v17138_v53, inf  ;;  %v4289_v20 = vmin.f32 %v4038_v2, %v4288_v52  ;;  %v4804_v1 = vmax.f32 %v4553_v27, %v4803_v45  ;;  %v2995_v19 = vsel %vm17141_vm2, %v17126_v57, 0.0  ;;  %vm17156_vm5 = vmmov %vm17140_vm1  ;;  %v17165_v45 = vld [vmem:[#allocation223_spill] sm:$0xff] }
 0x6e3   : > { %v3249_v9 = vadd.f32 %v3248_v29, %v2993_v62  ;;  %vm17144_vm14 = vcmp.lt.s32.totalorder %v17143_v24, %v9345_v42  ;;  %v4555_v55 = vsel %vm17145_vm15, %v17121_v44, -inf  ;;  %v3514_v12 = vmul.f32 %v2993_v62, %v2993_v62  ;;  %v17162_v62 = vld [vmem:[#allocation403_spill] sm:$0xff] }
 0x6e4   : > { %v4040_v30 = vsel %vm17144_vm14, %v17142_v11, inf  ;;  %v3767_v34 = vadd.f32 %v3766_v17, %v3512_v58  ;;  %v4290_v25 = vmin.f32 %v4039_v3, %v4289_v20  ;;  %v4805_v31 = vmax.f32 %v4554_v15, %v4804_v1  ;;  %vm17160_vm4 = vmmov %vm17144_vm14  ;;  %v17170_v1 = vld [vmem:[#allocation224_spill] sm:$0xff] }
 0x6e5   : > { %v2996_v39 = vsel %vm17146_vm9, %v17130_v37, 0.0  ;;  %v3250_v49 = vadd.f32 %v3249_v9, %v2994_v8  ;;  %vm17149_vm7 = vcmp.lt.s32.totalorder %v17148_v0, %v9345_v42  ;;  %v4556_v44 = vsel %vm17150_vm8, %v17126_v57, -inf  ;;  %vm17168_vm14 = vmmov %vm17160_vm4 }
 0x6e6   : > { %v4041_v21 = vsel %vm17149_vm7, %v17147_v51, inf  ;;  %v3515_v5 = vmul.f32 %v2994_v8, %v2994_v8  ;;  %v3768_v32 = vadd.f32 %v3767_v34, %v3513_v23  ;;  %v4291_v63 = vmin.f32 %v4040_v30, %v4290_v25  ;;  %vm17164_vm3 = vmmov %vm17149_vm7  ;;  %v17166_v8 = vld [vmem:[#allocation404_spill] sm:$0xff] }
 0x6e7   : > { %v4806_v4 = vmax.f32 %v4555_v55, %v4805_v31  ;;  %v2997_v38 = vsel %vm17151_vm6, %v17134_v60, 0.0  ;;  %v3251_v16 = vadd.f32 %v3250_v49, %v2995_v19  ;;  %vm17154_vm11 = vcmp.lt.s32.totalorder %v17153_v54, %v9345_v42  ;;  %vm17173_vm7 = vmmov %vm17164_vm3  ;;  %v17175_v31 = vld [vmem:[#allocation225_spill] sm:$0xff] }
 0x6e8   : > { %v4042_v18 = vsel %vm17154_vm11, %v17152_v35, inf  ;;  %v4557_v57 = vsel %vm17155_vm13, %v17130_v37, -inf  ;;  %v3516_v46 = vmul.f32 %v2995_v19, %v2995_v19  ;;  %v3769_v50 = vadd.f32 %v3768_v32, %v3514_v12  ;;  %vm17169_vm15 = vmmov %vm17154_vm11  ;;  %v17171_v19 = vld [vmem:[#allocation405_spill] sm:$0xff] }
 0x6e9   : > { %v4292_v56 = vmin.f32 %v4041_v21, %v4291_v63  ;;  %v4807_v36 = vmax.f32 %v4556_v44, %v4806_v4  ;;  %v2998_v6 = vsel %vm17156_vm5, %v17138_v53, 0.0  ;;  %v3252_v22 = vadd.f32 %v3251_v16, %v2996_v39  ;;  %v17179_v4 = vld [vmem:[#allocation226_spill] sm:$0xff] }
 0x6ea   : > { %vm17159_vm10 = vcmp.lt.s32.totalorder %v17158_v7, %v9345_v42  ;;  %v4558_v37 = vsel %vm17136_vm0, %v17134_v60, -inf  ;;  %v3517_v41 = vmul.f32 %v2996_v39, %v2996_v39  ;;  %v3770_v26 = vadd.f32 %v3769_v50, %v3515_v5  ;;  %v17176_v39 = vld [vmem:[#allocation406_spill] sm:$0xff] }
 0x6eb   : > { %v4043_v59 = vsel %vm17159_vm10, %v17157_v14, inf  ;;  %v4293_v48 = vmin.f32 %v4042_v18, %v4292_v56  ;;  %v4808_v10 = vmax.f32 %v4557_v57, %v4807_v36  ;;  %v2999_v47 = vsel %vm17160_vm4, %v17142_v11, 0.0  ;;  %vm17174_vm8 = vmmov %vm17159_vm10  ;;  %v17184_v36 = vld [vmem:[#allocation227_spill] sm:$0xff] }
 0x6ec   : > { %v3253_v28 = vadd.f32 %v3252_v22, %v2997_v38  ;;  %vm17163_vm12 = vcmp.lt.s32.totalorder %v17162_v62, %v9345_v42  ;;  %v4559_v60 = vsel %vm17140_vm1, %v17138_v53, -inf  ;;  %v3518_v13 = vmul.f32 %v2997_v38, %v2997_v38  ;;  %v17180_v38 = vld [vmem:[#allocation407_spill] sm:$0xff]  ;;  %vm17182_vm10 = vmmov %vm17174_vm8 }
 0x6ed   : > { %v4044_v61 = vsel %vm17163_vm12, %v17161_v33, inf  ;;  %v3771_v2 = vadd.f32 %v3770_v26, %v3516_v46  ;;  %v4294_v27 = vmin.f32 %v4043_v59, %v4293_v48  ;;  %v4809_v58 = vmax.f32 %v4558_v37, %v4808_v10  ;;  %vm17178_vm13 = vmmov %vm17163_vm12  ;;  %v17188_v10 = vld [vmem:[#allocation228_spill] sm:$0xff] }
 0x6ee   : > { %v3000_v43 = vsel %vm17164_vm3, %v17147_v51, 0.0  ;;  %v3254_v52 = vadd.f32 %v3253_v28, %v2998_v6  ;;  %vm17167_vm2 = vcmp.lt.s32.totalorder %v17166_v8, %v9345_v42  ;;  %v4560_v53 = vsel %vm17168_vm14, %v17142_v11, -inf }
 0x6ef   : > { %v4045_v29 = vsel %vm17167_vm2, %v17165_v45, inf  ;;  %v3519_v40 = vmul.f32 %v2998_v6, %v2998_v6  ;;  %v3772_v3 = vadd.f32 %v3771_v2, %v3517_v41  ;;  %v4295_v15 = vmin.f32 %v4044_v61, %v4294_v27  ;;  %vm17183_vm0 = vmmov %vm17167_vm2  ;;  %v17185_v6 = vld [vmem:[#allocation408_spill] sm:$0xff] }
 0x6f0   : > { %v4810_v23 = vmax.f32 %v4559_v60, %v4809_v58  ;;  %v3001_v17 = vsel %vm17169_vm15, %v17152_v35, 0.0  ;;  %v3255_v20 = vadd.f32 %v3254_v52, %v2999_v47  ;;  %vm17172_vm9 = vcmp.lt.s32.totalorder %v17171_v19, %v9345_v42  ;;  %vm17191_vm2 = vmmov %vm17183_vm0  ;;  %v17193_v58 = vld [vmem:[#allocation229_spill] sm:$0xff] }
 0x6f1   : > { %v4046_v9 = vsel %vm17172_vm9, %v17170_v1, inf  ;;  %v4561_v11 = vsel %vm17173_vm7, %v17147_v51, -inf  ;;  %v3520_v24 = vmul.f32 %v2999_v47, %v2999_v47  ;;  %v3773_v30 = vadd.f32 %v3772_v3, %v3518_v13  ;;  %vm17187_vm1 = vmmov %vm17172_vm9  ;;  %v17189_v47 = vld [vmem:[#allocation409_spill] sm:$0xff] }
 0x6f2   : > { %v4296_v55 = vmin.f32 %v4045_v29, %v4295_v15  ;;  %v4811_v12 = vmax.f32 %v4560_v53, %v4810_v23  ;;  %v3002_v34 = vsel %vm17174_vm8, %v17157_v14, 0.0  ;;  %v3256_v25 = vadd.f32 %v3255_v20, %v3000_v43  ;;  %vm17196_vm9 = vmmov %vm17187_vm1  ;;  %v17198_v23 = vld [vmem:[#allocation230_spill] sm:$0xff] }
 0x6f3   : > { %vm17177_vm6 = vcmp.lt.s32.totalorder %v17176_v39, %v9345_v42  ;;  %v4562_v51 = vsel %vm17154_vm11, %v17152_v35, -inf  ;;  %v3521_v0 = vmul.f32 %v3000_v43, %v3000_v43  ;;  %v3774_v21 = vadd.f32 %v3773_v30, %v3519_v40  ;;  %v17194_v43 = vld [vmem:[#allocation410_spill] sm:$0xff] }
 0x6f4   : > { %v4047_v49 = vsel %vm17177_vm6, %v17175_v31, inf  ;;  %v4297_v44 = vmin.f32 %v4046_v9, %v4296_v55  ;;  %v4812_v5 = vmax.f32 %v4561_v11, %v4811_v12  ;;  %v3003_v32 = vsel %vm17178_vm13, %v17161_v33, 0.0  ;;  %vm17192_vm14 = vmmov %vm17177_vm6  ;;  %v17202_v12 = vld [vmem:[#allocation231_spill] sm:$0xff] }
 0x6f5   : > { %v3257_v63 = vadd.f32 %v3256_v25, %v3001_v17  ;;  %vm17181_vm5 = vcmp.lt.s32.totalorder %v17180_v38, %v9345_v42  ;;  %v4563_v35 = vsel %vm17182_vm10, %v17157_v14, -inf  ;;  %v3522_v54 = vmul.f32 %v3001_v17, %v3001_v17  ;;  %v17199_v17 = vld [vmem:[#allocation411_spill] sm:$0xff] }
 0x6f6   : > { %v4048_v16 = vsel %vm17181_vm5, %v17179_v4, inf  ;;  %v3775_v18 = vadd.f32 %v3774_v21, %v3520_v24  ;;  %v4298_v57 = vmin.f32 %v4047_v49, %v4297_v44  ;;  %v4813_v46 = vmax.f32 %v4562_v51, %v4812_v5  ;;  %vm17197_vm7 = vmmov %vm17181_vm5  ;;  %v17206_v5 = vld [vmem:[#allocation232_spill] sm:$0xff] }
 0x6f7   : > { %v3004_v50 = vsel %vm17183_vm0, %v17165_v45, 0.0  ;;  %v3258_v56 = vadd.f32 %v3257_v63, %v3002_v34  ;;  %vm17186_vm4 = vcmp.lt.s32.totalorder %v17185_v6, %v9345_v42  ;;  %v4564_v14 = vsel %vm17163_vm12, %v17161_v33, -inf }
 0x6f8   : > { %v4049_v22 = vsel %vm17186_vm4, %v17184_v36, inf  ;;  %v3523_v7 = vmul.f32 %v3002_v34, %v3002_v34  ;;  %v3776_v59 = vadd.f32 %v3775_v18, %v3521_v0  ;;  %v4299_v37 = vmin.f32 %v4048_v16, %v4298_v57  ;;  %vm17201_vm11 = vmmov %vm17186_vm4  ;;  %v17203_v34 = vld [vmem:[#allocation412_spill] sm:$0xff] }
 0x6f9   : > { %v4814_v41 = vmax.f32 %v4563_v35, %v4813_v46  ;;  %v3005_v26 = vsel %vm17187_vm1, %v17170_v1, 0.0  ;;  %v3259_v48 = vadd.f32 %v3258_v56, %v3003_v32  ;;  %vm17190_vm3 = vcmp.lt.s32.totalorder %v17189_v47, %v9345_v42  ;;  %v17210_v46 = vld [vmem:[#allocation233_spill] sm:$0xff] }
 0x6fa   : > { %v4050_v28 = vsel %vm17190_vm3, %v17188_v10, inf  ;;  %v4565_v33 = vsel %vm17191_vm2, %v17165_v45, -inf  ;;  %v3524_v62 = vmul.f32 %v3003_v32, %v3003_v32  ;;  %v3777_v61 = vadd.f32 %v3776_v59, %v3522_v54  ;;  %vm17205_vm10 = vmmov %vm17190_vm3  ;;  %v17207_v32 = vld [vmem:[#allocation413_spill] sm:$0xff] }
 0x6fb   : > { %v4300_v60 = vmin.f32 %v4049_v22, %v4299_v37  ;;  %v4815_v13 = vmax.f32 %v4564_v14, %v4814_v41  ;;  %v3006_v2 = vsel %vm17192_vm14, %v17175_v31, 0.0  ;;  %v3260_v27 = vadd.f32 %v3259_v48, %v3004_v50  ;;  %v17214_v41 = vld [vmem:[#allocation234_spill] sm:$0xff] }
 0x6fc   : > { %vm17195_vm15 = vcmp.lt.s32.totalorder %v17194_v43, %v9345_v42  ;;  %v4566_v45 = vsel %vm17196_vm9, %v17170_v1, -inf  ;;  %v3525_v8 = vmul.f32 %v3004_v50, %v3004_v50  ;;  %v3778_v29 = vadd.f32 %v3777_v61, %v3523_v7  ;;  %v17211_v50 = vld [vmem:[#allocation414_spill] sm:$0xff] }
 0x6fd   : > { %v4051_v52 = vsel %vm17195_vm15, %v17193_v58, inf  ;;  %v4301_v53 = vmin.f32 %v4050_v28, %v4300_v60  ;;  %v4816_v40 = vmax.f32 %v4565_v33, %v4815_v13  ;;  %v3007_v3 = vsel %vm17197_vm7, %v17179_v4, 0.0  ;;  %vm17209_vm12 = vmmov %vm17195_vm15  ;;  %v17219_v13 = vld [vmem:[#allocation235_spill] sm:$0xff] }
 0x6fe   : > { %v3261_v15 = vadd.f32 %v3260_v27, %v3005_v26  ;;  %vm17200_vm8 = vcmp.lt.s32.totalorder %v17199_v17, %v9345_v42  ;;  %v4567_v1 = vsel %vm17177_vm6, %v17175_v31, -inf  ;;  %v3526_v19 = vmul.f32 %v3005_v26, %v3005_v26  ;;  %v17215_v26 = vld [vmem:[#allocation415_spill] sm:$0xff]  ;;  %vm17217_vm15 = vmmov %vm17209_vm12 }
 0x6ff   : > { %v4052_v20 = vsel %vm17200_vm8, %v17198_v23, inf  ;;  %v3779_v9 = vadd.f32 %v3778_v29, %v3524_v62  ;;  %v4302_v11 = vmin.f32 %v4051_v52, %v4301_v53  ;;  %v4817_v24 = vmax.f32 %v4566_v45, %v4816_v40  ;;  %vm17213_vm2 = vmmov %vm17200_vm8  ;;  %v17224_v40 = vld [vmem:[#allocation236_spill] sm:$0xff] }
 0x700   : > { %v3008_v30 = vsel %vm17201_vm11, %v17184_v36, 0.0  ;;  %v3262_v55 = vadd.f32 %v3261_v15, %v3006_v2  ;;  %vm17204_vm13 = vcmp.lt.s32.totalorder %v17203_v34, %v9345_v42  ;;  %v4568_v31 = vsel %vm17181_vm5, %v17179_v4, -inf  ;;  %vm17222_vm8 = vmmov %vm17213_vm2 }
 0x701   : > { %v4053_v25 = vsel %vm17204_vm13, %v17202_v12, inf  ;;  %v3527_v39 = vmul.f32 %v3006_v2, %v3006_v2  ;;  %v3780_v49 = vadd.f32 %v3779_v9, %v3525_v8  ;;  %v4303_v51 = vmin.f32 %v4052_v20, %v4302_v11  ;;  %vm17218_vm9 = vmmov %vm17204_vm13  ;;  %v17220_v2 = vld [vmem:[#allocation416_spill] sm:$0xff] }
 0x702   : > { %v4818_v0 = vmax.f32 %v4567_v1, %v4817_v24  ;;  %v3009_v21 = vsel %vm17205_vm10, %v17188_v10, 0.0  ;;  %v3263_v44 = vadd.f32 %v3262_v55, %v3007_v3  ;;  %vm17208_vm0 = vcmp.lt.s32.totalorder %v17207_v32, %v9345_v42  ;;  %vm17227_vm13 = vmmov %vm17218_vm9  ;;  %v17229_v24 = vld [vmem:[#allocation237_spill] sm:$0xff] }
 0x703   : > { %v4054_v63 = vsel %vm17208_vm0, %v17206_v5, inf  ;;  %v4569_v4 = vsel %vm17186_vm4, %v17184_v36, -inf  ;;  %v3528_v38 = vmul.f32 %v3007_v3, %v3007_v3  ;;  %v3781_v16 = vadd.f32 %v3780_v49, %v3526_v19  ;;  %vm17223_vm6 = vmmov %vm17208_vm0  ;;  %v17225_v3 = vld [vmem:[#allocation417_spill] sm:$0xff] }
 0x704   : > { %v4304_v35 = vmin.f32 %v4053_v25, %v4303_v51  ;;  %v4819_v54 = vmax.f32 %v4568_v31, %v4818_v0  ;;  %v3010_v18 = vsel %vm17209_vm12, %v17193_v58, 0.0  ;;  %v3264_v57 = vadd.f32 %v3263_v44, %v3008_v30  ;;  %v17233_v0 = vld [vmem:[#allocation238_spill] sm:$0xff] }
 0x705   : > { %vm17212_vm1 = vcmp.lt.s32.totalorder %v17211_v50, %v9345_v42  ;;  %v4570_v36 = vsel %vm17190_vm3, %v17188_v10, -inf  ;;  %v3529_v6 = vmul.f32 %v3008_v30, %v3008_v30  ;;  %v3782_v22 = vadd.f32 %v3781_v16, %v3527_v39  ;;  %v17230_v30 = vld [vmem:[#allocation418_spill] sm:$0xff] }
 0x706   : > { %v4055_v56 = vsel %vm17212_vm1, %v17210_v46, inf  ;;  %v4305_v14 = vmin.f32 %v4054_v63, %v4304_v35  ;;  %v4820_v7 = vmax.f32 %v4569_v4, %v4819_v54  ;;  %v3011_v59 = vsel %vm17213_vm2, %v17198_v23, 0.0  ;;  %vm17228_vm5 = vmmov %vm17212_vm1  ;;  %v17237_v54 = vld [vmem:[#allocation239_spill] sm:$0xff] }
 0x707   : > { %v3265_v37 = vadd.f32 %v3264_v57, %v3009_v21  ;;  %vm17216_vm14 = vcmp.lt.s32.totalorder %v17215_v26, %v9345_v42  ;;  %v4571_v10 = vsel %vm17217_vm15, %v17193_v58, -inf  ;;  %v3530_v47 = vmul.f32 %v3009_v21, %v3009_v21  ;;  %v17234_v21 = vld [vmem:[#allocation419_spill] sm:$0xff] }
 0x708   : > { %v4056_v48 = vsel %vm17216_vm14, %v17214_v41, inf  ;;  %v3783_v28 = vadd.f32 %v3782_v22, %v3528_v38  ;;  %v4306_v33 = vmin.f32 %v4055_v56, %v4305_v14  ;;  %v4821_v62 = vmax.f32 %v4570_v36, %v4820_v7  ;;  %vm17232_vm4 = vmmov %vm17216_vm14  ;;  %v17242_v7 = vld [vmem:[#allocation240_spill] sm:$0xff] }
 0x709   : > { %v3012_v61 = vsel %vm17218_vm9, %v17202_v12, 0.0  ;;  %v3266_v60 = vadd.f32 %v3265_v37, %v3010_v18  ;;  %vm17221_vm7 = vcmp.lt.s32.totalorder %v17220_v2, %v9345_v42  ;;  %v4572_v58 = vsel %vm17222_vm8, %v17198_v23, -inf  ;;  %vm17240_vm14 = vmmov %vm17232_vm4 }
 0x70a   : > { %v4057_v27 = vsel %vm17221_vm7, %v17219_v13, inf  ;;  %v3531_v43 = vmul.f32 %v3010_v18, %v3010_v18  ;;  %v3784_v52 = vadd.f32 %v3783_v28, %v3529_v6  ;;  %v4307_v45 = vmin.f32 %v4056_v48, %v4306_v33  ;;  %vm17236_vm3 = vmmov %vm17221_vm7  ;;  %v17238_v18 = vld [vmem:[#allocation420_spill] sm:$0xff] }
 0x70b   : > { %v4822_v8 = vmax.f32 %v4571_v10, %v4821_v62  ;;  %v3013_v29 = vsel %vm17223_vm6, %v17206_v5, 0.0  ;;  %v3267_v53 = vadd.f32 %v3266_v60, %v3011_v59  ;;  %vm17226_vm11 = vcmp.lt.s32.totalorder %v17225_v3, %v9345_v42  ;;  %vm17245_vm7 = vmmov %vm17236_vm3  ;;  %v17247_v62 = vld [vmem:[#allocation241_spill] sm:$0xff] }
 0x70c   : > { %v4058_v15 = vsel %vm17226_vm11, %v17224_v40, inf  ;;  %v4573_v23 = vsel %vm17227_vm13, %v17202_v12, -inf  ;;  %v3532_v17 = vmul.f32 %v3011_v59, %v3011_v59  ;;  %v3785_v20 = vadd.f32 %v3784_v52, %v3530_v47  ;;  %vm17241_vm15 = vmmov %vm17226_vm11  ;;  %v17243_v59 = vld [vmem:[#allocation421_spill] sm:$0xff] }
 0x70d   : > { %v4308_v1 = vmin.f32 %v4057_v27, %v4307_v45  ;;  %v4823_v19 = vmax.f32 %v4572_v58, %v4822_v8  ;;  %v3014_v9 = vsel %vm17228_vm5, %v17210_v46, 0.0  ;;  %v3268_v11 = vadd.f32 %v3267_v53, %v3012_v61  ;;  %v17251_v8 = vld [vmem:[#allocation242_spill] sm:$0xff] }
 0x70e   : > { %vm17231_vm10 = vcmp.lt.s32.totalorder %v17230_v30, %v9345_v42  ;;  %v4574_v12 = vsel %vm17208_vm0, %v17206_v5, -inf  ;;  %v3533_v34 = vmul.f32 %v3012_v61, %v3012_v61  ;;  %v3786_v25 = vadd.f32 %v3785_v20, %v3531_v43  ;;  %v17248_v61 = vld [vmem:[#allocation422_spill] sm:$0xff] }
 0x70f   : > { %v4059_v55 = vsel %vm17231_vm10, %v17229_v24, inf  ;;  %v4309_v31 = vmin.f32 %v4058_v15, %v4308_v1  ;;  %v4824_v39 = vmax.f32 %v4573_v23, %v4823_v19  ;;  %v3015_v49 = vsel %vm17232_vm4, %v17214_v41, 0.0  ;;  %vm17246_vm8 = vmmov %vm17231_vm10  ;;  %v17256_v19 = vld [vmem:[#allocation243_spill] sm:$0xff] }
 0x710   : > { %v3269_v51 = vadd.f32 %v3268_v11, %v3013_v29  ;;  %vm17235_vm12 = vcmp.lt.s32.totalorder %v17234_v21, %v9345_v42  ;;  %v4575_v5 = vsel %vm17212_vm1, %v17210_v46, -inf  ;;  %v3534_v32 = vmul.f32 %v3013_v29, %v3013_v29  ;;  %v17252_v29 = vld [vmem:[#allocation423_spill] sm:$0xff]  ;;  %vm17254_vm10 = vmmov %vm17246_vm8 }
 0x711   : > { %v4060_v44 = vsel %vm17235_vm12, %v17233_v0, inf  ;;  %v3787_v63 = vadd.f32 %v3786_v25, %v3532_v17  ;;  %v4310_v4 = vmin.f32 %v4059_v55, %v4309_v31  ;;  %v4825_v38 = vmax.f32 %v4574_v12, %v4824_v39  ;;  %vm17250_vm13 = vmmov %vm17235_vm12  ;;  %v17260_v39 = vld [vmem:[#allocation244_spill] sm:$0xff] }
 0x712   : > { %v3016_v16 = vsel %vm17236_vm3, %v17219_v13, 0.0  ;;  %v3270_v35 = vadd.f32 %v3269_v51, %v3014_v9  ;;  %vm17239_vm2 = vcmp.lt.s32.totalorder %v17238_v18, %v9345_v42  ;;  %v4576_v46 = vsel %vm17240_vm14, %v17214_v41, -inf }
 0x713   : > { %v4061_v57 = vsel %vm17239_vm2, %v17237_v54, inf  ;;  %v3535_v50 = vmul.f32 %v3014_v9, %v3014_v9  ;;  %v3788_v56 = vadd.f32 %v3787_v63, %v3533_v34  ;;  %v4311_v36 = vmin.f32 %v4060_v44, %v4310_v4  ;;  %vm17255_vm0 = vmmov %vm17239_vm2  ;;  %v17257_v9 = vld [vmem:[#allocation424_spill] sm:$0xff] }
 0x714   : > { %v4826_v6 = vmax.f32 %v4575_v5, %v4825_v38  ;;  %v3017_v22 = vsel %vm17241_vm15, %v17224_v40, 0.0  ;;  %v3271_v14 = vadd.f32 %v3270_v35, %v3015_v49  ;;  %vm17244_vm9 = vcmp.lt.s32.totalorder %v17243_v59, %v9345_v42  ;;  %vm17263_vm2 = vmmov %vm17255_vm0  ;;  %v17265_v38 = vld [vmem:[#allocation245_spill] sm:$0xff] }
 0x715   : > { %v4062_v37 = vsel %vm17244_vm9, %v17242_v7, inf  ;;  %v4577_v41 = vsel %vm17245_vm7, %v17219_v13, -inf  ;;  %v3536_v26 = vmul.f32 %v3015_v49, %v3015_v49  ;;  %v3789_v48 = vadd.f32 %v3788_v56, %v3534_v32  ;;  %vm17259_vm1 = vmmov %vm17244_vm9  ;;  %v17261_v49 = vld [vmem:[#allocation425_spill] sm:$0xff] }
 0x716   : > { %v4312_v10 = vmin.f32 %v4061_v57, %v4311_v36  ;;  %v4827_v47 = vmax.f32 %v4576_v46, %v4826_v6  ;;  %v3018_v28 = vsel %vm17246_vm8, %v17229_v24, 0.0  ;;  %v3272_v33 = vadd.f32 %v3271_v14, %v3016_v16  ;;  %vm17268_vm9 = vmmov %vm17259_vm1  ;;  %v17270_v6 = vld [vmem:[#allocation246_spill] sm:$0xff] }
 0x717   : > { %vm17249_vm6 = vcmp.lt.s32.totalorder %v17248_v61, %v9345_v42  ;;  %v4578_v13 = vsel %vm17226_vm11, %v17224_v40, -inf  ;;  %v3537_v2 = vmul.f32 %v3016_v16, %v3016_v16  ;;  %v3790_v27 = vadd.f32 %v3789_v48, %v3535_v50  ;;  %v17266_v16 = vld [vmem:[#allocation426_spill] sm:$0xff] }
 0x718   : > { %v4063_v60 = vsel %vm17249_vm6, %v17247_v62, inf  ;;  %v4313_v58 = vmin.f32 %v4062_v37, %v4312_v10  ;;  %v4828_v43 = vmax.f32 %v4577_v41, %v4827_v47  ;;  %v3019_v52 = vsel %vm17250_vm13, %v17233_v0, 0.0  ;;  %vm17264_vm14 = vmmov %vm17249_vm6  ;;  %v17274_v47 = vld [vmem:[#allocation247_spill] sm:$0xff] }
 0x719   : > { %v3273_v45 = vadd.f32 %v3272_v33, %v3017_v22  ;;  %vm17253_vm5 = vcmp.lt.s32.totalorder %v17252_v29, %v9345_v42  ;;  %v4579_v40 = vsel %vm17254_vm10, %v17229_v24, -inf  ;;  %v3538_v3 = vmul.f32 %v3017_v22, %v3017_v22  ;;  %v17271_v22 = vld [vmem:[#allocation427_spill] sm:$0xff] }
 0x71a   : > { %v4064_v53 = vsel %vm17253_vm5, %v17251_v8, inf  ;;  %v3791_v15 = vadd.f32 %v3790_v27, %v3536_v26  ;;  %v4314_v23 = vmin.f32 %v4063_v60, %v4313_v58  ;;  %v4829_v17 = vmax.f32 %v4578_v13, %v4828_v43  ;;  %vm17269_vm7 = vmmov %vm17253_vm5 }
 0x71b   : > { %v3020_v20 = vsel %vm17255_vm0, %v17237_v54, 0.0  ;;  %v3274_v1 = vadd.f32 %v3273_v45, %v3018_v28  ;;  %vm17258_vm4 = vcmp.lt.s32.totalorder %v17257_v9, %v9345_v42  ;;  %v4580_v24 = vsel %vm17235_vm12, %v17233_v0, -inf  ;;  %v17280_v45 = vld [vmem:[#allocation429_spill] sm:$0xff] }
 0x71c   : > { %v4065_v11 = vsel %vm17258_vm4, %v17256_v19, inf  ;;  %v3539_v30 = vmul.f32 %v3018_v28, %v3018_v28  ;;  %v3792_v55 = vadd.f32 %v3791_v15, %v3537_v2  ;;  %v4315_v12 = vmin.f32 %v4064_v53, %v4314_v23  ;;  %vm17273_vm11 = vmmov %vm17258_vm4  ;;  %v17275_v28 = vld [vmem:[#allocation428_spill] sm:$0xff] }
 0x71d   : > { %v4830_v34 = vmax.f32 %v4579_v40, %v4829_v17  ;;  %v3021_v25 = vsel %vm17259_vm1, %v17242_v7, 0.0  ;;  %v3275_v31 = vadd.f32 %v3274_v1, %v3019_v52  ;;  %vm17262_vm3 = vcmp.lt.s32.totalorder %v17261_v49, %v9345_v42  ;;  %v17285_v1 = vld [vmem:[#allocation430_spill] sm:$0xff] }
 0x71e   : > { %v4066_v51 = vsel %vm17262_vm3, %v17260_v39, inf  ;;  %v4581_v0 = vsel %vm17263_vm2, %v17237_v54, -inf  ;;  %v3540_v21 = vmul.f32 %v3019_v52, %v3019_v52  ;;  %v3793_v44 = vadd.f32 %v3792_v55, %v3538_v3  ;;  %vm17277_vm10 = vmmov %vm17262_vm3  ;;  %v17279_v52 = vld [vmem:[#allocation248_spill] sm:$0xff] }
 0x71f   : > { %v4316_v5 = vmin.f32 %v4065_v11, %v4315_v12  ;;  %v4831_v32 = vmax.f32 %v4580_v24, %v4830_v34  ;;  %v3022_v63 = vsel %vm17264_vm14, %v17247_v62, 0.0  ;;  %v3276_v4 = vadd.f32 %v3275_v31, %v3020_v20  ;;  %v17290_v31 = vld [vmem:[#allocation466_spill] sm:$0xff] }
 0x720   : > { %vm17267_vm15 = vcmp.lt.s32.totalorder %v17266_v16, %v9345_v42  ;;  %v4582_v54 = vsel %vm17268_vm9, %v17242_v7, -inf  ;;  %v3541_v18 = vmul.f32 %v3020_v20, %v3020_v20  ;;  %v3794_v57 = vadd.f32 %v3793_v44, %v3539_v30  ;;  %v17284_v20 = vld [vmem:[#allocation249_spill] sm:$0xff]  ;;  %v17293_v44 = vld [vmem:[#allocation251_spill] sm:$0xff] }
 0x721   : > { %v4067_v35 = vsel %vm17267_vm15, %v17265_v38, inf  ;;  %v4317_v46 = vmin.f32 %v4066_v51, %v4316_v5  ;;  %v4832_v50 = vmax.f32 %v4581_v0, %v4831_v32  ;;  %v3023_v56 = vsel %vm17269_vm7, %v17251_v8, 0.0  ;;  %vm17278_vm0 = vmmov %vm17267_vm15  ;;  %v17294_v5 = vld [vmem:[#allocation432_spill] sm:$0xff] }
 0x722   : > { %v3277_v36 = vadd.f32 %v3276_v4, %v3021_v25  ;;  %vm17272_vm8 = vcmp.lt.s32.totalorder %v17271_v22, %v9345_v42  ;;  %v4583_v7 = vsel %vm17249_vm6, %v17247_v62, -inf  ;;  %v3542_v59 = vmul.f32 %v3021_v25, %v3021_v25  ;;  %v17289_v25 = vld [vmem:[#allocation250_spill] sm:$0xff] }
 0x723   : > { %v4068_v14 = vsel %vm17272_vm8, %v17270_v6, inf  ;;  %v3795_v37 = vadd.f32 %v3794_v57, %v3540_v21  ;;  %v4318_v41 = vmin.f32 %v4067_v35, %v4317_v46  ;;  %v4833_v26 = vmax.f32 %v4582_v54, %v4832_v50  ;;  %vm17282_vm12 = vmmov %vm17272_vm8  ;;  %v17296_v54 = vld [vmem:[#allocation252_spill] sm:$0xff]  ;;  %v17299_v46 = vld [vmem:[#allocation253_spill] sm:$0xff] }
 0x724   : > { %v3024_v48 = vsel %vm17273_vm11, %v17256_v19, 0.0  ;;  %v3278_v10 = vadd.f32 %v3277_v36, %v3022_v63  ;;  %vm17276_vm13 = vcmp.lt.s32.totalorder %v17275_v28, %v9345_v42  ;;  %v4584_v62 = vsel %vm17253_vm5, %v17251_v8, -inf  ;;  %v17300_v50 = vld [vmem:[#allocation468_spill] sm:$0xff] }
 0x725   : > { %v4069_v33 = vsel %vm17276_vm13, %v17274_v47, inf  ;;  %v3543_v61 = vmul.f32 %v3022_v63, %v3022_v63  ;;  %v3796_v60 = vadd.f32 %v3795_v37, %v3541_v18  ;;  %v4319_v13 = vmin.f32 %v4068_v14, %v4318_v41  ;;  %vm17283_vm1 = vmmov %vm17276_vm13  ;;  %v17297_v18 = vld [vmem:[#allocation467_spill] sm:$0xff] }
 0x726   : > { %v4834_v2 = vmax.f32 %v4583_v7, %v4833_v26  ;;  %v3025_v27 = vsel %vm17277_vm10, %v17260_v39, 0.0  ;;  %v3026_v58 = vsel %vm17278_vm0, %v17265_v38, 0.0  ;;  %v3279_v43 = vadd.f32 %v3278_v10, %v3023_v56  ;;  %v17303_v7 = vld [vmem:[#allocation254_spill] sm:$0xff]  ;;  %v17306_v10 = vld [vmem:[#allocation255_spill] sm:$0xff] }
 0x727   : > { %vm17281_vm4 = vcmp.lt.s32.totalorder %v17280_v45, %v9345_v42  ;;  %v3544_v29 = vmul.f32 %v3023_v56, %v3023_v56  ;;  %v3797_v53 = vadd.f32 %v3796_v60, %v3542_v59  ;;  %v4320_v40 = vmin.f32 %v4069_v33, %v4319_v13  ;;  %v17304_v59 = vld [vmem:[#allocation469_spill] sm:$0xff]  ;;  %v17307_v33 = vld [vmem:[#allocation470_spill] sm:$0xff] }
 0x728   : > { %v4070_v8 = vsel %vm17281_vm4, %v17279_v52, inf  ;;  %v4835_v3 = vmax.f32 %v4584_v62, %v4834_v2  ;;  %v3027_v15 = vsel %vm17282_vm12, %v17270_v6, 0.0  ;;  %v3028_v23 = vsel %vm17283_vm1, %v17274_v47, 0.0  ;;  %vm17287_vm2 = vmmov %vm17281_vm4  ;;  %v17311_v2 = vld [vmem:[#allocation256_spill] sm:$0xff] }
 0x729   : > { %v3280_v17 = vadd.f32 %v3279_v43, %v3024_v48  ;;  %vm17286_vm3 = vcmp.lt.s32.totalorder %v17285_v1, %v9345_v42  ;;  %v3029_v24 = vsel %vm17287_vm2, %v17279_v52, 0.0  ;;  %v3545_v30 = vmul.f32 %v3024_v48, %v3024_v48 }
 0x72a   : > { %v4071_v11 = vsel %vm17286_vm3, %v17284_v20, inf  ;;  %v3798_v55 = vadd.f32 %v3797_v53, %v3543_v61  ;;  %v4321_v12 = vmin.f32 %v4070_v8, %v4320_v40  ;;  %vm17288_vm14 = vmmov %vm17286_vm3  ;;  %vm17291_vm15 = vcmp.lt.s32.totalorder %v17290_v31, %v9345_v42  ;;  %v17314_v53 = vld [vmem:[#allocation257_spill] sm:$0xff]  ;;  %v17315_v40 = vld [vmem:[#allocation472_spill] sm:$0xff] }
 0x72b   : > { %v3030_v34 = vsel %vm17288_vm14, %v17284_v20, 0.0  ;;  %v3031_v51 = vsel %vm17291_vm15, %v17289_v25, 0.0  ;;  %v3281_v0 = vadd.f32 %v3280_v17, %v3025_v27  ;;  %vm17292_vm9 = vmmov %vm17291_vm15  ;;  %vm17295_vm7 = vcmp.lt.s32.totalorder %v17294_v5, %v9345_v42 }
 0x72c   : > { %v4072_v21 = vsel %vm17292_vm9, %v17289_v25, inf  ;;  %v3032_v32 = vsel %vm17295_vm7, %v17293_v44, 0.0  ;;  %v3546_v63 = vmul.f32 %v3025_v27, %v3025_v27  ;;  %v3799_v4 = vadd.f32 %v3798_v55, %v3544_v29  ;;  %vm17302_vm11 = vmmov %vm17295_vm7  ;;  %v17312_v27 = vld [vmem:[#allocation471_spill] sm:$0xff] }
 0x72d   : > { %v4322_v35 = vmin.f32 %v4071_v11, %v4321_v12  ;;  %vm17298_vm8 = vcmp.lt.s32.totalorder %v17297_v18, %v9345_v42  ;;  %vm17301_vm6 = vcmp.lt.s32.totalorder %v17300_v50, %v9345_v42  ;;  %v3282_v36 = vadd.f32 %v3281_v0, %v3026_v58  ;;  %v17319_v0 = vld [vmem:[#allocation258_spill] sm:$0xff] }
 0x72e   : > { %v3033_v57 = vsel %vm17298_vm8, %v17296_v54, 0.0  ;;  %v12971_v56 = vsel %vm17301_vm6, %v17299_v46, 0.0  ;;  %v4073_v14 = vsel %vm17302_vm11, %v17293_v44, inf  ;;  %vm17305_vm13 = vcmp.lt.s32.totalorder %v17304_v59, %v9345_v42  ;;  %vm17309_vm10 = vmmov %vm17298_vm8 }
 0x72f   : > { %v12981_v37 = vsel %vm17305_vm13, %v17303_v7, 0.0  ;;  %v3547_v41 = vmul.f32 %v3026_v58, %v3026_v58  ;;  %v3800_v26 = vadd.f32 %v3799_v4, %v3545_v30  ;;  %v4323_v48 = vmin.f32 %v4072_v21, %v4322_v35  ;;  %vm17317_vm1 = vmmov %vm17301_vm6  ;;  %v17320_v21 = vld [vmem:[#allocation473_spill] sm:$0xff] }
 0x730   : > { %vm17308_vm5 = vcmp.lt.s32.totalorder %v17307_v33, %v9345_v42  ;;  %v3283_v61 = vadd.f32 %v3282_v36, %v3027_v15  ;;  %v4074_v60 = vsel %vm17309_vm10, %v17296_v54, inf  ;;  %vm17310_vm0 = vcmp.lt.s32.totalorder %v17257_v9, %v9345_v42  ;;  %vm17322_vm14 = vmmov %vm17305_vm13 }
 0x731   : > { %v12987_v62 = vsel %vm17308_vm5, %v17306_v10, 0.0  ;;  %v4585_v13 = vsel %vm17310_vm0, %v17256_v19, -inf  ;;  %vm17313_vm4 = vcmp.lt.s32.totalorder %v17312_v27, %v9345_v42  ;;  %v3548_v43 = vmul.f32 %v3027_v15, %v3027_v15  ;;  %vm17324_vm9 = vmmov %vm17308_vm5 }
 0x732   : > { %v13001_v58 = vsel %vm17313_vm4, %v17311_v2, 0.0  ;;  %v3801_v8 = vadd.f32 %v3800_v26, %v3546_v63  ;;  %v4324_v29 = vmin.f32 %v4073_v14, %v4323_v48  ;;  %vm17316_vm12 = vcmp.lt.s32.totalorder %v17315_v40, %v9345_v42  ;;  %vm17326_vm8 = vmmov %vm17313_vm4 }
 0x733   : > { %v13007_v17 = vsel %vm17316_vm12, %v17314_v53, 0.0  ;;  %v3284_v11 = vadd.f32 %v3283_v61, %v3028_v23  ;;  %v4075_v19 = vsel %vm17317_vm1, %v17299_v46, inf  ;;  %vm17318_vm3 = vcmp.lt.s32.totalorder %v17261_v49, %v9345_v42  ;;  %vm17328_vm11 = vmmov %vm17316_vm12 }
 0x734   : > { %v4586_v9 = vsel %vm17318_vm3, %v17260_v39, -inf  ;;  %v3549_v15 = vmul.f32 %v3028_v23, %v3028_v23  ;;  %v3802_v30 = vadd.f32 %v3801_v8, %v3547_v41  ;;  %v4325_v55 = vmin.f32 %v4074_v60, %v4324_v29 }
 0x735   : > { %v4836_v12 = vmax.f32 %v4585_v13, %v4835_v3  ;;  %vm17321_vm2 = vcmp.lt.s32.totalorder %v17320_v21, %v9345_v42  ;;  %v3285_v4 = vadd.f32 %v3284_v11, %v3029_v24  ;;  %v4076_v35 = vsel %vm17322_vm14, %v17303_v7, inf }
 0x736   : > { %v13021_v63 = vsel %vm17321_vm2, %v17319_v0, 0.0  ;;  %vm17323_vm15 = vcmp.lt.s32.totalorder %v17266_v16, %v9345_v42  ;;  %v3550_v49 = vmul.f32 %v3029_v24, %v3029_v24  ;;  %v3803_v23 = vadd.f32 %v3802_v30, %v3548_v43  ;;  %vm17331_vm10 = vmmov %vm17321_vm2 }
 0x737   : > { %v4587_v39 = vsel %vm17323_vm15, %v17265_v38, -inf  ;;  %v4326_v3 = vmin.f32 %v4075_v19, %v4325_v55  ;;  %v4837_v36 = vmax.f32 %v4586_v9, %v4836_v12  ;;  %v3286_v14 = vadd.f32 %v3285_v4, %v3030_v34 }
 0x738   : > { %v3551_v41 = vmul.f32 %v3030_v34, %v3030_v34  ;;  %v4077_v26 = vsel %vm17324_vm9, %v17306_v10, inf  ;;  %vm17325_vm7 = vcmp.lt.s32.totalorder %v17271_v22, %v9345_v42  ;;  %v3552_v61 = vmul.f32 %v3031_v51, %v3031_v51 }
 0x739   : > { %v4588_v48 = vsel %vm17325_vm7, %v17270_v6, -inf  ;;  %v3804_v60 = vadd.f32 %v3803_v23, %v3549_v15  ;;  %v4327_v16 = vmin.f32 %v4076_v35, %v4326_v3  ;;  %v4838_v38 = vmax.f32 %v4587_v39, %v4837_v36  ;;  %v17333_v39 = vld [vmem:[#allocation259_spill] sm:$0xff] }
 0x73a   : > { %v3287_v24 = vadd.f32 %v3286_v14, %v3031_v51  ;;  %v3553_v13 = vmul.f32 %v3032_v32, %v3032_v32  ;;  %v4078_v34 = vsel %vm17326_vm8, %v17311_v2, inf  ;;  %vm17327_vm6 = vcmp.lt.s32.totalorder %v17275_v28, %v9345_v42 }
 0x73b   : > { %v4589_v43 = vsel %vm17327_vm6, %v17274_v47, -inf  ;;  %v3554_v8 = vmul.f32 %v3033_v57, %v3033_v57  ;;  %v3805_v29 = vadd.f32 %v3804_v60, %v3550_v49  ;;  %v4328_v22 = vmin.f32 %v4077_v26, %v4327_v16  ;;  %v17334_v49 = vld [vmem:[#allocation474_spill] sm:$0xff]  ;;  %v17339_v26 = vld [vmem:[#allocation264_spill] sm:$0xff]  ;;  %v17345_v16 = vld [vmem:[#allocation475_spill] sm:$0xff] }
 0x73c   : > { %v4839_v6 = vmax.f32 %v4588_v48, %v4838_v38  ;;  %v3288_v11 = vadd.f32 %v3287_v24, %v3032_v32  ;;  %v3555_v19 = vmul.f32 %v12971_v56, %v12971_v56  ;;  %v4079_v51 = vsel %vm17328_vm11, %v17314_v53, inf  ;;  %v17342_v60 = vld [vmem:[#allocation480_spill] sm:$0xff] }
 0x73d   : > { %vm17329_vm13 = vcmp.lt.s32.totalorder %v17280_v45, %v9345_v42  ;;  %v3806_v28 = vadd.f32 %v3805_v29, %v3551_v41  ;;  %v4329_v47 = vmin.f32 %v4078_v34, %v4328_v22  ;;  %vm17330_vm5 = vcmp.lt.s32.totalorder %v17285_v1, %v9345_v42  ;;  %v17338_v41 = vld [vmem:[#allocation6_spill] sm:$0xff]  ;;  %v17347_v34 = vld [vmem:[#allocation7_spill] sm:$0xff] }
 0x73e   : > { %v4590_v9 = vsel %vm17329_vm13, %v17279_v52, -inf  ;;  %v4840_v15 = vmax.f32 %v4589_v43, %v4839_v6  ;;  %v4591_v32 = vsel %vm17330_vm5, %v17284_v20, -inf  ;;  %v3289_v30 = vadd.f32 %v3288_v11, %v3033_v57  ;;  %v17348_v43 = vld [vmem:[#allocation477_spill] sm:$0xff] }
 0x73f   : > { %v3556_v55 = vmul.f32 %v12981_v37, %v12981_v37  ;;  %v4080_v12 = vsel %vm17331_vm10, %v17319_v0, inf  ;;  %vm17332_vm0 = vcmp.lt.s32.totalorder %v17290_v31, %v9345_v42  ;;  %v3557_v45 = vmul.f32 %v12987_v62, %v12987_v62  ;;  %v17350_v22 = vld [vmem:[#allocation11_spill] sm:$0xff] }
 0x740   : > { %v4592_v52 = vsel %vm17332_vm0, %v17289_v25, -inf  ;;  %v3807_v4 = vadd.f32 %v3806_v28, %v3552_v61  ;;  %v4330_v1 = vmin.f32 %v4079_v51, %v4329_v47  ;;  %v4841_v20 = vmax.f32 %v4590_v9, %v4840_v15  ;;  %v17341_v61 = vld [vmem:[#allocation10_spill] sm:$0xff]  ;;  %v17351_v6 = vld [vmem:[#allocation481_spill] sm:$0xff]  ;;  %v17353_v51 = vld [vmem:[#allocation261_spill] sm:$0xff] }
 0x741   : > { %v3290_v57 = vadd.f32 %v3289_v30, %v12971_v56  ;;  %v3558_v35 = vmul.f32 %v13001_v58, %v13001_v58  ;;  %vm17335_vm4 = vcmp.lt.s32.totalorder %v17334_v49, %v9345_v42  ;;  %vm17336_vm12 = vcmp.lt.s32.totalorder %v17294_v5, %v9345_v42  ;;  %v17344_v5 = vld [vmem:[#allocation260_spill] sm:$0xff]  ;;  %v17354_v9 = vld [vmem:[#allocation476_spill] sm:$0xff] }
 0x742   : > { %v4081_v23 = vsel %vm17335_vm4, %v17333_v39, inf  ;;  %v4593_v25 = vsel %vm17336_vm12, %v17293_v44, -inf  ;;  %v3808_v31 = vadd.f32 %v3807_v4, %v3553_v13  ;;  %v4331_v3 = vmin.f32 %v4080_v12, %v4330_v1  ;;  %v17356_v30 = vld [vmem:[#allocation8_spill] sm:$0xff]  ;;  %vm17370_vm0 = vmmov %vm17335_vm4 }
 0x743   : > { %v4842_v36 = vmax.f32 %v4591_v32, %v4841_v20  ;;  %vm17337_vm1 = vcmp.lt.s32.totalorder %v17297_v18, %v9345_v42  ;;  %v3291_v14 = vadd.f32 %v3290_v57, %v12981_v37  ;;  %vm17340_vm3 = vcmp.lt.s32.totalorder %v17339_v26, %v9345_v42  ;;  %v17357_v12 = vld [vmem:[#allocation478_spill] sm:$0xff] }
 0x744   : > { %v4594_v56 = vsel %vm17337_vm1, %v17296_v54, -inf  ;;  %v3828_v48 = vsel %vm17340_vm3, %v17338_v41, inf  ;;  %vm17343_vm2 = vcmp.lt.s32.totalorder %v17342_v60, %v9345_v42  ;;  %vm17346_vm14 = vcmp.lt.s32.totalorder %v17345_v16, %v9345_v42  ;;  %v17359_v4 = vld [vmem:[#allocation12_spill] sm:$0xff] }
 0x745   : > { %v3832_v44 = vsel %vm17343_vm2, %v17341_v61, inf  ;;  %v4082_v38 = vsel %vm17346_vm14, %v17344_v5, inf  ;;  %v3559_v54 = vmul.f32 %v13007_v17, %v13007_v17  ;;  %v3809_v18 = vadd.f32 %v3808_v31, %v3554_v8  ;;  %v17360_v1 = vld [vmem:[#allocation482_spill] sm:$0xff]  ;;  %vm17372_vm12 = vmmov %vm17346_vm14 }
 0x746   : > { %v4332_v37 = vmin.f32 %v4081_v23, %v4331_v3  ;;  %v4843_v24 = vmax.f32 %v4592_v52, %v4842_v36  ;;  %v3292_v13 = vadd.f32 %v3291_v14, %v12987_v62  ;;  %vm17349_vm15 = vcmp.lt.s32.totalorder %v17348_v43, %v9345_v42  ;;  %v17363_v3 = vld [vmem:[#allocation9_spill] sm:$0xff] }
 0x747   : > { %v3829_v29 = vsel %vm17349_vm15, %v17347_v34, inf  ;;  %vm17352_vm9 = vcmp.lt.s32.totalorder %v17351_v6, %v9345_v42  ;;  %vm17355_vm7 = vcmp.lt.s32.totalorder %v17354_v9, %v9345_v42  ;;  %v3810_v8 = vadd.f32 %v3809_v18, %v3555_v19  ;;  %v17364_v36 = vld [vmem:[#allocation479_spill] sm:$0xff]  ;;  %vm17377_vm15 = vmmov %vm17370_vm0 }
 0x748   : > { %v3833_v11 = vsel %vm17352_vm9, %v17350_v22, inf  ;;  %v4083_v28 = vsel %vm17355_vm7, %v17353_v51, inf  ;;  %v4333_v47 = vmin.f32 %v4082_v38, %v4332_v37  ;;  %v4084_v15 = vmin.f32 %v3828_v48, %v3832_v44  ;;  %v17366_v48 = vld [vmem:[#allocation13_spill] sm:$0xff]  ;;  %vm17374_vm3 = vmmov %vm17355_vm7 }
 0x749   : > { %v4844_v32 = vmax.f32 %v4593_v25, %v4843_v24  ;;  %v3293_v62 = vadd.f32 %v3292_v13, %v13001_v58  ;;  %vm17358_vm8 = vcmp.lt.s32.totalorder %v17357_v12, %v9345_v42  ;;  %vm17361_vm6 = vcmp.lt.s32.totalorder %v17360_v1, %v9345_v42  ;;  %v17367_v44 = vld [vmem:[#allocation483_spill] sm:$0xff] }
 0x74a   : > { %v3830_v52 = vsel %vm17358_vm8, %v17356_v30, inf  ;;  %v3834_v20 = vsel %vm17361_vm6, %v17359_v4, inf  ;;  %vm17362_vm11 = vcmp.lt.s32.totalorder %v17300_v50, %v9345_v42  ;;  %v3811_v57 = vadd.f32 %v3810_v8, %v3556_v55  ;;  %vm17380_vm8 = vmmov %vm17372_vm12 }
 0x74b   : > { %v4595_v19 = vsel %vm17362_vm11, %v17299_v46, -inf  ;;  %v4334_v23 = vmin.f32 %v4083_v28, %v4333_v47  ;;  %v4085_v25 = vmin.f32 %v3829_v29, %v3833_v11  ;;  %v4845_v31 = vmax.f32 %v4594_v56, %v4844_v32 }
 0x74c   : > { %v3294_v58 = vadd.f32 %v3293_v62, %v13007_v17  ;;  %vm17365_vm13 = vcmp.lt.s32.totalorder %v17364_v36, %v9345_v42  ;;  %vm17368_vm5 = vcmp.lt.s32.totalorder %v17367_v44, %v9345_v42  ;;  %vm17369_vm10 = vcmp.lt.s32.totalorder %v17304_v59, %v9345_v42 }
 0x74d   : > { %v3831_v14 = vsel %vm17365_vm13, %v17363_v3, inf  ;;  %v3835_v38 = vsel %vm17368_vm5, %v17366_v48, inf  ;;  %v4596_v46 = vsel %vm17369_vm10, %v17303_v7, -inf  ;;  %v3812_v50 = vadd.f32 %v3811_v57, %v3557_v45  ;;  %vm17383_vm13 = vmmov %vm17374_vm3 }
 0x74e   : > { %v4335_v55 = vmin.f32 %v4084_v15, %v4334_v23  ;;  %v4086_v56 = vmin.f32 %v3830_v52, %v3834_v20  ;;  %v4846_v18 = vmax.f32 %v4595_v19, %v4845_v31  ;;  %v3040_v17 = vsel %vm17370_vm0, %v17333_v39, 0.0 }
 0x74f   : > { %v3295_v37 = vadd.f32 %v3294_v58, %v13021_v63  ;;  %v3560_v24 = vmul.f32 %v13021_v63, %v13021_v63  ;;  %vm17371_vm4 = vcmp.lt.s32.totalorder %v17307_v33, %v9345_v42  ;;  %v3813_v7 = vadd.f32 %v3812_v50, %v3558_v35 }
 0x750   : > { %v4597_v59 = vsel %vm17371_vm4, %v17306_v10, -inf  ;;  %v4336_v45 = vmin.f32 %v4085_v25, %v4335_v55  ;;  %v4087_v13 = vmin.f32 %v3831_v14, %v3835_v38  ;;  %v4847_v29 = vmax.f32 %v4596_v46, %v4846_v18 }
 0x751   : > { %v3041_v11 = vsel %vm17372_vm12, %v17344_v5, 0.0  ;;  %v3296_v28 = vadd.f32 %v3295_v37, %v3040_v17  ;;  %vm17373_vm1 = vcmp.lt.s32.totalorder %v17312_v27, %v9345_v42  ;;  %v3561_v8 = vmul.f32 %v3040_v17, %v3040_v17  ;;  %v3827_v37 = vld [vmem:[#allocation4] sm:$0x1] }
 0x752   : > { %v4598_v63 = vsel %vm17373_vm1, %v17311_v2, -inf  ;;  %v3814_v47 = vadd.f32 %v3813_v7, %v3559_v54  ;;  %v4337_v15 = vmin.f32 %v4086_v56, %v4336_v45  ;;  %v4848_v33 = vmax.f32 %v4597_v59, %v4847_v29 }
 0x753   : > { %v3042_v10 = vsel %vm17374_vm3, %v17353_v51, 0.0  ;;  %v3297_v35 = vadd.f32 %v3296_v28, %v3041_v11  ;;  %vm17375_vm2 = vcmp.lt.s32.totalorder %v17315_v40, %v9345_v42  ;;  %v3562_v62 = vmul.f32 %v3041_v11, %v3041_v11 }
 0x754   : > { %v4599_v32 = vsel %vm17375_vm2, %v17314_v53, -inf  ;;  %v3815_v52 = vadd.f32 %v3814_v47, %v3560_v24  ;;  %v4338_v20 = vmin.f32 %v4087_v13, %v4337_v15  ;;  %v4849_v27 = vmax.f32 %v4598_v63, %v4848_v33 }
 0x755   : > { %v3298_v2 = vadd.f32 %v3297_v35, %v3042_v10  ;;  %vm17376_vm14 = vcmp.lt.s32.totalorder %v17320_v21, %v9345_v42  ;;  %v3563_v19 = vmul.f32 %v3042_v10, %v3042_v10  ;;  %v4601_v53 = vsel %vm17377_vm15, %v17333_v39, -inf }
 0x756   : > { %v4600_v54 = vsel %vm17376_vm14, %v17319_v0, -inf  ;;  %v3816_v57 = vadd.f32 %v3815_v52, %v3561_v8  ;;  %v4339_v23 = vrot.slane %v4338_v20, 4  ;;  %v4850_v25 = vmax.f32 %v4599_v32, %v4849_v27  ;;  %v4347_v32 = vld [vmem:[#allocation5] sm:$0x1] }
 0x757   : > { %v3299_v31 = vrot.slane %v3298_v2, 4  ;;  %vm17378_vm9 = vcmp.lt.s32.totalorder %v17339_v26, %v9345_v42  ;;  %vm17379_vm7 = vcmp.lt.s32.totalorder %v17342_v60, %v9345_v42  ;;  %v4602_v49 = vsel %vm17380_vm8, %v17344_v5, -inf }
 0x758   : > { %v3817_v40 = vadd.f32 %v3816_v57, %v3562_v62  ;;  %v4340_v58 = vmin.f32 %v4338_v20, %v4339_v23  ;;  %v4851_v14 = vmax.f32 %v4600_v54, %v4850_v25  ;;  %v4348_v21 = vsel %vm17378_vm9, %v17338_v41, -inf }
 0x759   : > { %v3300_v38 = vadd.f32 %v3299_v31, %v3298_v2  ;;  %v4352_v0 = vsel %vm17379_vm7, %v17341_v61, -inf  ;;  %vm17381_vm6 = vcmp.lt.s32.totalorder %v17348_v43, %v9345_v42  ;;  %vm17382_vm11 = vcmp.lt.s32.totalorder %v17351_v6, %v9345_v42 }
 0x75a   : > { %v3818_v39 = vadd.f32 %v3817_v40, %v3563_v19  ;;  %v4341_v46 = vrot.slane %v4340_v58, 2  ;;  %v4852_v50 = vmax.f32 %v4601_v53, %v4851_v14  ;;  %v4349_v26 = vsel %vm17381_vm6, %v17347_v34, -inf }
 0x75b   : > { %v3301_v55 = vrot.slane %v3300_v38, 2  ;;  %v4353_v41 = vsel %vm17382_vm11, %v17350_v22, -inf  ;;  %v4603_v61 = vsel %vm17383_vm13, %v17353_v51, -inf  ;;  %v4604_v56 = vmax.f32 %v4348_v21, %v4352_v0 }
 0x75c   : > { %v3819_v60 = vrot.slane %v3818_v39, 4  ;;  %v4342_v5 = vmin.f32 %v4340_v58, %v4341_v46  ;;  %v4853_v16 = vmax.f32 %v4602_v49, %v4852_v50  ;;  %vm17384_vm5 = vcmp.lt.s32.totalorder %v17357_v12, %v9345_v42  ;;  %v3043_v12 = vld [vmem:[#allocation2] sm:$0x1] }
 0x75d   : > { %v3302_v18 = vadd.f32 %v3301_v55, %v3300_v38  ;;  %v4350_v34 = vsel %vm17384_vm5, %v17356_v30, -inf  ;;  %vm17385_vm10 = vcmp.lt.s32.totalorder %v17360_v1, %v9345_v42  ;;  %v4605_v9 = vmax.f32 %v4349_v26, %v4353_v41 }
 0x75e   : > { %v4354_v43 = vsel %vm17385_vm10, %v17359_v4, -inf  ;;  %v3820_v22 = vadd.f32 %v3819_v60, %v3818_v39  ;;  %v4343_v6 = vrot.slane %v4342_v5, 1  ;;  %v4854_v17 = vmax.f32 %v4603_v61, %v4853_v16 }
 0x75f   : > { %v3303_v51 = vrot.slane %v3302_v18, 1  ;;  %vm17386_vm0 = vcmp.lt.s32.totalorder %v17364_v36, %v9345_v42  ;;  %vm17387_vm4 = vcmp.lt.s32.totalorder %v17367_v44, %v9345_v42  ;;  %v4606_v7 = vmax.f32 %v4350_v34, %v4354_v43 }
 0x760   : > { %v4351_v24 = vsel %vm17386_vm0, %v17363_v3, -inf  ;;  %v4355_v30 = vsel %vm17387_vm4, %v17366_v48, -inf  ;;  %v3821_v59 = vrot.slane %v3820_v22, 2  ;;  %v4344_v1 = vmin.f32 %v4342_v5, %v4343_v6  ;;  %v3307_v3 = vld [vmem:[#allocation3] sm:$0x1] }
 0x761   : > { %v4855_v4 = vmax.f32 %v4604_v56, %v4854_v17  ;;  %v3304_v45 = vadd.f32 %v3303_v51, %v3302_v18  ;;  %v4607_v28 = vmax.f32 %v4351_v24, %v4355_v30 }
 0x762   : > { %v3822_v13 = vadd.f32 %v3821_v59, %v3820_v22  ;;  %v4345_v29 = vmin.f32 %v3827_v37, %v4344_v1 }
 0x763   : > { %v4856_v11 = vmax.f32 %v4605_v9, %v4855_v4  ;;  %v3305_v63 = vadd.f32 %v3304_v45, %v3043_v12 }
 0x764   : > { %v3823_v8 = vrot.slane %v3822_v13, 1  ;;  %4346 = vst [vmem:[#allocation4] sm:$0x1] %v4345_v29 }
 0x765   : > { %v4857_v36 = vmax.f32 %v4606_v7, %v4856_v11  ;;  %3306 = vst [vmem:[#allocation2] sm:$0x1] %v3305_v63 }
 0x766   : > { %v3824_v47 = vadd.f32 %v3823_v8, %v3822_v13 }
 0x767   : > { %v4858_v15 = vmax.f32 %v4607_v28, %v4857_v36 }
 0x768   : > { %v3825_v42 = vadd.f32 %v3824_v47, %v3307_v3 }
 0x769   : > { %v4859_v48 = vrot.slane %v4858_v15, 4 }
 0x76a   : > { %3826 = vst [vmem:[#allocation3] sm:$0x1] %v3825_v42 }
 0x76b   : > { %v4860_v44 = vmax.f32 %v4858_v15, %v4859_v48 }
 0x76d   : > { %v4861_v33 = vrot.slane %v4860_v44, 2 }
 0x76f   : > { %v4862_v10 = vmax.f32 %v4860_v44, %v4861_v33 }
 0x771   : > { %v4863_v35 = vrot.slane %v4862_v10, 1 }
 0x773   : > { %v4864_v62 = vmax.f32 %v4862_v10, %v4863_v35 }
 0x775   : > { %v4865_v52 = vmax.f32 %v4347_v32, %v4864_v62 }
 0x777   : > { %4866 = vst [vmem:[#allocation5] sm:$0x1] %v4865_v52 }
 0x778 PF: > { %vm4874_vm12 = vcmask 1040384   ;;  %v4898_v20 = vld [vmem:[#allocation4] sm:$0x1]  ;;  %v4873_v27 = vld [vmem:[#allocation2] sm:$0x1]  ;;  %v4870_v37 = vlaneseq }
 0x779   : > { %v4899_v2 = vsel %vm4874_vm12, %v4898_v20, inf  ;;  %v4875_v54 = vsel %vm4874_vm12, %v4873_v27, 0.0  ;;  %v4886_v57 = vld [vmem:[#allocation3] sm:$0x1] }
 0x77a   : > { %4900 = vmin.xlane.f32.xlu1 %v4899_v2  ;;  %4876 = vadd.xlane.f32.xlu0 %v4875_v54  ;;  %v4887_v25 = vsel %vm4874_vm12, %v4886_v57, 0.0  ;;  %v4871_v24 = vand.u32 127, %v4870_v37 }
 0x77c   : > { %vm4909_vm1 = vcmp.eq.s32.totalorder %v4871_v24, 3  ;;  %vm4897_vm3 = vcmp.eq.s32.totalorder %v4871_v24, 2  ;;  %vm4885_vm2 = vcmp.eq.s32.totalorder %v4871_v24, 1  ;;  %vm4872_vm14 = vcmp.eq.s32.totalorder %v4871_v24, 0 }
 0x77e   : > { %v4910_v19 = vld [vmem:[#allocation5] sm:$0x1] }
 0x77f   : > { %v4911_v23 = vsel %vm4874_vm12, %v4910_v19, -inf }
 0x782   : > { %4912 = vmax.xlane.f32.xlu1 %v4911_v23  ;;  %4888 = vadd.xlane.f32.xlu0 %v4887_v25 }
 0x7ed   : > { %v4901_v31 = vpop.xlane.xlu1 %4900  ;;  %v4877_v53 = vpop.xlane.xlu0 %4876 }
 0x7ee   : > { %v4902_v40 = vrot.slane %v4901_v31, 4  ;;  %v4878_v58 = vrot.slane %v4877_v53, 4 }
 0x7f0   : > { %v4879_v14 = vadd.f32 %v4878_v58, %v4877_v53  ;;  %v4903_v38 = vmin.f32 %v4901_v31, %v4902_v40 }
 0x7f2   : > { %v4880_v21 = vrot.slane %v4879_v14, 2  ;;  %v4904_v49 = vrot.slane %v4903_v38, 2 }
 0x7f4   : > { %v4881_v0 = vadd.f32 %v4880_v21, %v4879_v14  ;;  %v4905_v5 = vmin.f32 %v4903_v38, %v4904_v49 }
 0x7f5   : > { %v4913_v39 = vpop.xlane.xlu1 %4912  ;;  %v4889_v46 = vpop.xlane.xlu0 %4888 }
 0x7f6   : > { %v4914_v50 = vrot.slane %v4913_v39, 4  ;;  %v4890_v55 = vrot.slane %v4889_v46, 4  ;;  %v4882_v26 = vrot.slane %v4881_v0, 1  ;;  %v4906_v43 = vrot.slane %v4905_v5, 1 }
 0x7f8   : > { %v4915_v41 = vmax.f32 %v4913_v39, %v4914_v50  ;;  %v4891_v61 = vadd.f32 %v4890_v55, %v4889_v46  ;;  %v4883_v60 = vadd.f32 %v4882_v26, %v4881_v0  ;;  %v4907_v51 = vmin.f32 %v4905_v5, %v4906_v43 }
 0x7fa   : > { %v4916_v16 = vrot.slane %v4915_v41, 2  ;;  %v4892_v56 = vrot.slane %v4891_v61, 2  ;;  %5003 = vpush %v4883_v60 }
 0x7fc   : > { %v4917_v18 = vmax.f32 %v4915_v41, %v4916_v16  ;;  %v4893_v34 = vadd.f32 %v4892_v56, %v4891_v61 }
 0x7fe   : > { %v4894_v22 = vrot.slane %v4893_v34, 1  ;;  %v4918_v6 = vrot.slane %v4917_v18, 1 }
 0x800   : > { %v4895_v17 = vadd.f32 %v4894_v22, %v4893_v34  ;;  %v4919_v9 = vmax.f32 %v4917_v18, %v4918_v6 }
 0x802   : > { %5005 = vpush %v4895_v17 }
 0x803   : > { %5007 = vpush %v4907_v51 }
 0x804   : > { %5009 = vpush %v4919_v9 }
 0x82b   : > { %s5004_s21 = spop %5003 }
 0x82c   : > { %v4927_v7 = vstv %s5004_s21 }
 0x833   : > { %s5006_s22 = spop %5005 }
 0x834   : > { %s5008_s23 = spop %5007  ;;  %v4925_v1 = vstv %s5006_s22 }
 0x835   : > { %v4923_v30 = vstv %s5008_s23  ;;  %s5010_s24 = spop %5009 }
 0x836   : > { %v4921_v12 = vstv %s5010_s24 }
 0x837   : > { %v4922_v59 = vsel %vm4909_vm1, %v4921_v12, 0.0 }
 0x838   : > { %v4924_v4 = vsel %vm4897_vm3, %v4923_v30, %v4922_v59 }
 0x839   : > { %v4926_v45 = vsel %vm4885_vm2, %v4925_v1, %v4924_v4 }
 0x83a   : > { %v4928_v13 = vsel %vm4872_vm14, %v4927_v7, %v4926_v45 }
 0x83b   : > { %4929 = vst [vmem:[%s5098_s16] sm:$0xff] %v4928_v13 }
 0x83c PF: > { %s11_s8 = sadd.s32 1, %s5060_s8   ;;  %s17388_s6 = smov %s5056_s7 }
 0x83d   : > { %p8_p9 = scmp.ge.s32.totalorder %s11_s8, 4   ;;  %s17389_s7 = smov %s17391_s9 }
 0x83f   :  { %10 = sbr.rel (!%p8_p9) target bundleno = 2 (0x2), region = 70 }

</bundles_post_ra>
